<compile_context>
chip_gen: v7x
topology: tpu7x:2x2x1
jax: 0.10.0
libtpu: 0.0.40
codegen_flags: <defaults>
</compile_context>

<pallas_src>
import jax
import jax.numpy as jnp
from jax.experimental import pallas as pl
from jax.experimental.pallas import tpu as pltpu

IN_DIM = 2048
HID_DIM = 1024
OUT_DIM = 2
OUT_PAD = 128      # lane-dense output slab; real logits live in columns [0, OUT_DIM)
BN_EPS = 1e-5


def _discriminator_kernel(x_ref, w1_ref, b1_ref, w2_ref, b2_ref, o_ref):
    # ReverseLayerF: identity on the forward path (alpha only scales gradients).
    # Linear(2048 -> 1024) with eval-mode BN pre-folded into w1/b1 (wrapper).
    # bf16 operands, f32 accumulation on the MXU.
    h = jnp.dot(x_ref[...], w1_ref[...], preferred_element_type=jnp.float32)
    h = jnp.maximum(h + b1_ref[...], 0.0)          # bias + ReLU epilogue in f32
    # Dropout(0.5): identity in eval mode.
    # Linear(1024 -> 2), padded to 128 output lanes for a clean full-lane store.
    logits = jnp.dot(h.astype(jnp.bfloat16), w2_ref[...],
                     preferred_element_type=jnp.float32)
    o_ref[...] = jax.nn.sigmoid(logits + b2_ref[...])


def _prepare_params(params):
    """Fold eval-mode BatchNorm1d into the first Linear, pad the second Linear
    to 128 output lanes, and cast the streamed weights to bf16."""
    scale = params["bn_gamma"] * jax.lax.rsqrt(params["bn_var"] + BN_EPS)     # [1, H]
    w1 = (params["w1"] * scale).astype(jnp.bfloat16)                          # [IN, H] bf16
    b1 = (params["b1"] - params["bn_mean"]) * scale + params["bn_beta"]       # [1, H] f32
    w2 = jnp.zeros((HID_DIM, OUT_PAD), jnp.float32).at[:, :OUT_DIM].set(params["w2"])
    w2 = w2.astype(jnp.bfloat16)                                              # [H, 128] bf16
    b2 = jnp.zeros((1, OUT_PAD), jnp.float32).at[:, :OUT_DIM].set(params["b2"])
    return w1, b1, w2, b2


def discriminator_forward(x, params, alpha=1.0, *, tile_b=256):
    """Pallas forward pass. `alpha` only affects the backward pass of the
    gradient-reversal layer, so it is accepted but unused here."""
    del alpha
    B = x.shape[0]
    w1, b1, w2, b2 = _prepare_params(params)

    # Pad the batch up to a multiple of the tile so the MXU M-dimension is full.
    pad_b = pl.cdiv(B, tile_b) * tile_b
    xb = x.astype(jnp.bfloat16)
    if pad_b != B:
        xb = jnp.pad(xb, ((0, pad_b - B), (0, 0)))

    out = pl.pallas_call(
        _discriminator_kernel,
        out_shape=jax.ShapeDtypeStruct((pad_b, OUT_PAD), jnp.float32),
        grid=(pad_b // tile_b,),
        in_specs=[
            # x tile: streamed / double-buffered per grid step.
            pl.BlockSpec((tile_b, IN_DIM), lambda i: (i, 0)),
            # Weights / biases: constant index_map -> DMA'd once, VMEM-resident.
            pl.BlockSpec((IN_DIM, HID_DIM), lambda i: (0, 0)),
            pl.BlockSpec((1, HID_DIM), lambda i: (0, 0)),
            pl.BlockSpec((HID_DIM, OUT_PAD), lambda i: (0, 0)),
            pl.BlockSpec((1, OUT_PAD), lambda i: (0, 0)),
        ],
        out_specs=pl.BlockSpec((tile_b, OUT_PAD), lambda i: (i, 0)),
        compiler_params=pltpu.CompilerParams(
            dimension_semantics=("parallel",),
            vmem_limit_bytes=32 << 20,
        ),
    )(xb, w1, b1, w2, b2)

    # Keep the external [B, 2] contract: drop padded rows and padded lanes.
    return out[:B, :OUT_DIM]


def init_params(key):
    """Deterministic synthetic parameters matching the PyTorch module shapes."""
    k1, k2, k3, k4, k5, k6, k7, k8 = jax.random.split(key, 8)
    s1 = 1.0 / jnp.sqrt(IN_DIM)
    s2 = 1.0 / jnp.sqrt(HID_DIM)
    return {
        # Linear(2048, 1024): PyTorch weight is [1024, 2048]; stored transposed.
        "w1": jax.random.uniform(k1, (IN_DIM, HID_DIM), jnp.float32, -s1, s1),
        "b1": jax.random.uniform(k2, (1, HID_DIM), jnp.float32, -s1, s1),
        # BatchNorm1d(1024) affine params + running stats (synthetic, non-trivial).
        "bn_gamma": 1.0 + 0.1 * jax.random.normal(k3, (1, HID_DIM), jnp.float32),
        "bn_beta": 0.1 * jax.random.normal(k4, (1, HID_DIM), jnp.float32),
        "bn_mean": 0.05 * jax.random.normal(k5, (1, HID_DIM), jnp.float32),
        "bn_var": jnp.abs(1.0 + 0.1 * jax.random.normal(k6, (1, HID_DIM), jnp.float32)),
        # Linear(1024, 2) — independent keys (fixes harness key-reuse noted in review).
        "w2": jax.random.uniform(k7, (HID_DIM, OUT_DIM), jnp.float32, -s2, s2),
        "b2": jax.random.uniform(k8, (1, OUT_DIM), jnp.float32, -s2, s2),
    }


def _reference_forward_matched(x, params):
    """Pure-JAX reference using the exact same folded/bf16-cast parameters the
    kernel consumes (tight tolerance check)."""
    w1, b1, w2, b2 = _prepare_params(params)
    xb = x.astype(jnp.bfloat16)
    h = jnp.maximum(jnp.dot(xb, w1, preferred_element_type=jnp.float32) + b1, 0.0)
    logits = jnp.dot(h.astype(jnp.bfloat16), w2, preferred_element_type=jnp.float32) + b2
    return jax.nn.sigmoid(logits)[:, :OUT_DIM]


def _reference_forward_f32(x, params):
    """Full-precision reference of the original (unfolded) eval-mode math."""
    h = x @ params["w1"] + params["b1"]
    h = (h - params["bn_mean"]) * jax.lax.rsqrt(params["bn_var"] + BN_EPS)
    h = h * params["bn_gamma"] + params["bn_beta"]
    h = jnp.maximum(h, 0.0)
    logits = h @ params["w2"] + params["b2"]
    return jax.nn.sigmoid(logits)


if __name__ == "__main__":
    key = jax.random.PRNGKey(0)
    kx, kp = jax.random.split(key)

    B = 8  # small batch (padded to one 256-row tile internally)
    x = jax.random.normal(kx, (B, IN_DIM), jnp.float32)
    params = init_params(kp)
    alpha = 0.7  # only used by the backward pass of ReverseLayerF

    out = discriminator_forward(x, params, alpha)
    out = jax.block_until_ready(out)
    assert out.shape == (B, OUT_DIM), out.shape

    # Tight check vs. a reference that uses identical (folded, bf16) parameters.
    ref_matched = _reference_forward_matched(x, params)
    assert jnp.allclose(out, ref_matched, atol=1e-4, rtol=1e-4), "mismatch vs matched reference"

    # Loose check vs. the original full-precision eval-mode math (bf16 weight error only).
    ref_f32 = _reference_forward_f32(x, params)
    assert jnp.allclose(out, ref_f32, atol=5e-3, rtol=5e-3), "mismatch vs f32 reference"

    print("KERNEL_OK")
</pallas_src>

<mosaic_0001>
module attributes {stable_mosaic.version = 11 : i64} {
  func.func @_discriminator_kernel(%arg0: i32, %arg1: memref<256x2048xbf16, #tpu.memory_space<vmem>>, %arg2: memref<2048x1024xbf16, #tpu.memory_space<vmem>>, %arg3: memref<1x1024xf32, #tpu.memory_space<vmem>>, %arg4: memref<1024x128xbf16, #tpu.memory_space<vmem>>, %arg5: memref<1x128xf32, #tpu.memory_space<vmem>>, %arg6: memref<256x128xf32, #tpu.memory_space<vmem>>) attributes {dimension_semantics = [#tpu.dimension_semantics<parallel>], iteration_bounds = array<i64: 1>, scalar_prefetch = 0 : i64, scratch_operands = 0 : i64, tpu.core_type = #tpu.core_type<tc>, window_params = [{transform_indices = @transform_0, window_bounds = array<i64: 256, 2048>}, {pipeline_mode = #tpu.pipeline_mode<synchronous>, transform_indices = @transform_1, window_bounds = array<i64: 2048, 1024>}, {pipeline_mode = #tpu.pipeline_mode<synchronous>, transform_indices = @transform_2, window_bounds = array<i64: 1, 1024>}, {pipeline_mode = #tpu.pipeline_mode<synchronous>, transform_indices = @transform_3, window_bounds = array<i64: 1024, 128>}, {pipeline_mode = #tpu.pipeline_mode<synchronous>, transform_indices = @transform_4, window_bounds = array<i64: 1, 128>}, {transform_indices = @transform_5, window_bounds = array<i64: 256, 128>}]} {
    %c0 = arith.constant 0 : index
    %c0_0 = arith.constant 0 : index
    %0 = vector.load %arg1[%c0, %c0_0] : memref<256x2048xbf16, #tpu.memory_space<vmem>>, vector<256x2048xbf16>
    %c0_1 = arith.constant 0 : index
    %c0_2 = arith.constant 0 : index
    %1 = vector.load %arg2[%c0_1, %c0_2] : memref<2048x1024xbf16, #tpu.memory_space<vmem>>, vector<2048x1024xbf16>
    %cst = arith.constant dense<0.000000e+00> : vector<256x1024xf32>
    %2 = tpu.matmul %0, %1, %cst {dimension_numbers = #tpu.dot_dimension_numbers<[1], [0], [0], [1], [0, 0, 1, 1], [], []>} : vector<256x2048xbf16>, vector<2048x1024xbf16>, vector<256x1024xf32> -> vector<256x1024xf32>
    %c0_3 = arith.constant 0 : index
    %c0_4 = arith.constant 0 : index
    %3 = vector.load %arg3[%c0_3, %c0_4] : memref<1x1024xf32, #tpu.memory_space<vmem>>, vector<1x1024xf32>
    %4 = vector.broadcast %3 : vector<1x1024xf32> to vector<256x1024xf32>
    %5 = arith.addf %2, %4 : vector<256x1024xf32>
    %cst_5 = arith.constant 0.000000e+00 : f32
    %6 = vector.broadcast %cst_5 : f32 to vector<256x1024xf32>
    %7 = arith.maximumf %5, %6 : vector<256x1024xf32>
    %8 = arith.truncf %7 : vector<256x1024xf32> to vector<256x1024xbf16>
    %c0_6 = arith.constant 0 : index
    %c0_7 = arith.constant 0 : index
    %9 = vector.load %arg4[%c0_6, %c0_7] : memref<1024x128xbf16, #tpu.memory_space<vmem>>, vector<1024x128xbf16>
    %cst_8 = arith.constant dense<0.000000e+00> : vector<256x128xf32>
    %10 = tpu.matmul %8, %9, %cst_8 {dimension_numbers = #tpu.dot_dimension_numbers<[1], [0], [0], [1], [0, 0, 1, 1], [], []>} : vector<256x1024xbf16>, vector<1024x128xbf16>, vector<256x128xf32> -> vector<256x128xf32>
    %c0_9 = arith.constant 0 : index
    %c0_10 = arith.constant 0 : index
    %11 = vector.load %arg5[%c0_9, %c0_10] : memref<1x128xf32, #tpu.memory_space<vmem>>, vector<1x128xf32>
    %12 = vector.broadcast %11 : vector<1x128xf32> to vector<256x128xf32>
    %13 = arith.addf %10, %12 : vector<256x128xf32>
    %14 = arith.negf %13 : vector<256x128xf32>
    %15 = math.exp %14 : vector<256x128xf32>
    %cst_11 = arith.constant 1.000000e+00 : f32
    %16 = vector.broadcast %cst_11 : f32 to vector<256x128xf32>
    %17 = arith.addf %16, %15 : vector<256x128xf32>
    %18 = arith.divf %16, %17 : vector<256x128xf32>
    %c0_12 = arith.constant 0 : index
    %c0_13 = arith.constant 0 : index
    %19 = vector.load %arg6[%c0_12, %c0_13] : memref<256x128xf32, #tpu.memory_space<vmem>>, vector<256x128xf32>
    tpu.vector_store %arg6[%c0_12, %c0_13], %18 {strides = array<i32>} : memref<256x128xf32, #tpu.memory_space<vmem>>, vector<256x128xf32>,
    return
  }
  func.func @transform_0(%arg0: i32) -> (i32, i32) {
    %c0_i32 = arith.constant 0 : i32
    %c0_i32_0 = arith.constant 0 : i32
    return %arg0, %c0_i32 : i32, i32
  }
  func.func @transform_1(%arg0: i32) -> (i32, i32) {
    %c0_i32 = arith.constant 0 : i32
    %c0_i32_0 = arith.constant 0 : i32
    %c0_i32_1 = arith.constant 0 : i32
    return %c0_i32, %c0_i32_0 : i32, i32
  }
  func.func @transform_2(%arg0: i32) -> (i32, i32) {
    %c0_i32 = arith.constant 0 : i32
    %c0_i32_0 = arith.constant 0 : i32
    %c0_i32_1 = arith.constant 0 : i32
    return %c0_i32, %c0_i32_0 : i32, i32
  }
  func.func @transform_3(%arg0: i32) -> (i32, i32) {
    %c0_i32 = arith.constant 0 : i32
    %c0_i32_0 = arith.constant 0 : i32
    %c0_i32_1 = arith.constant 0 : i32
    return %c0_i32, %c0_i32_0 : i32, i32
  }
  func.func @transform_4(%arg0: i32) -> (i32, i32) {
    %c0_i32 = arith.constant 0 : i32
    %c0_i32_0 = arith.constant 0 : i32
    %c0_i32_1 = arith.constant 0 : i32
    return %c0_i32, %c0_i32_0 : i32, i32
  }
  func.func @transform_5(%arg0: i32) -> (i32, i32) {
    %c0_i32 = arith.constant 0 : i32
    %c0_i32_0 = arith.constant 0 : i32
    return %arg0, %c0_i32 : i32, i32
  }
}

</mosaic_0001>

<bundles_post_ra>
// kernel: tpu_custom_call.1
= control target key start
LH: loop header
LB: loop body
LE: loop exit
PB: predicated region body
PF: predicated region fallthrough
CT: control target
= control target key end

     0   :  { %10 = vsyncpa [#allocation3], 0  ;;  %s22984_s0 = inlined_call_operand.hbm [shape: bf16[256,2048], index: 0, kind: input, shape index: {}]   ;;  %s22985_s1 = inlined_call_operand.hbm [shape: bf16[2048,1024], index: 1, kind: input, shape index: {}]   ;;  %s22986_s2 = inlined_call_operand.hbm [shape: f32[1,1024], index: 2, kind: input, shape index: {}]   ;;  %s22987_s3 = inlined_call_operand.hbm [shape: bf16[1024,128], index: 3, kind: input, shape index: {}]   ;;  %s22988_s4 = inlined_call_operand.hbm [shape: f32[1,128], index: 4, kind: input, shape index: {}]   ;;  %s22989_s5 = inlined_call_operand.hbm [shape: f32[256,128], index: 5, kind: output, shape index: {}]  }
   0x1   :  { %11 = vsyncpa [#allocation6], 0 }
   0x2   :  { %12 = vsyncpa [#allocation9], 0 }
   0x3   :  { %13 = vsyncpa [#allocation4], 0  ;;  %s19993_s18 = smov [#allocation5]   ;;  %s19853_s22 = scalar_lea.hbm %s22985_s1, 131072 }
   0x4   :  { %s31_s19 = sshll.u32 %s19993_s18, 4  ;;  %p19854_p0 = scmp.ne.s32.totalorder %s22985_s1, %s19853_s22  ;;  %s32_s19 = int_to_ptr.vmem [resolvable:$true] %s31_s19 }
   0x5   :  { %p19857_p1 = scmp.lt.u32.totalorder %s19853_s22, %s22985_s1 }
   0x7   :  { %p19859_p2 = pnand %p19857_p1, %p19854_p0 }
   0x9   :  { %19862 = shalt.err (!%p19859_p2)
}
   0xa   :  { %s19863_s27 = scalar_lea.vmem %s32_s19, 131072  ;;  %p19868_p4 = scmp.lt.s32.totalorder %s32_s19, %s32_s19 }
   0xb   :  { %p19864_p3 = scmp.ne.s32.totalorder %s32_s19, %s19863_s27  ;;  %p19869_p5 = scmp.lt.s32.totalorder %s19863_s27, %s19863_s27 }
   0xd   :  { %p19870_p6 = por %p19869_p5, %p19868_p4 }
   0xf   :  { %p19871_p7 = pnand %p19870_p6, %p19864_p3 }
  0x11   :  { %19874 = shalt.err (!%p19871_p7)
}
  0x12   :  { %s19994_s28 = smov 512   ;;  %s19995_s29 = smov 32  }
  0x13   :  { %37 = dma.hbm_to_vmem [thread:$0]  %s22985_s1, 131072, %s32_s19, [#allocation6], %s19994_s28, %s19994_s28, %s19995_s29  }
  0x14   :  { %s19996_s7 = smov [#allocation8]   ;;  %s19997_s9 = smov [#allocation2]  }
  0x15   :  { %s53_s8 = sshll.u32 %s19996_s7, 4  ;;  %s19_s10 = sshll.u32 %s19997_s9, 4  ;;  %s54_s8 = int_to_ptr.vmem [resolvable:$true] %s53_s8  ;;  %s20_s10 = int_to_ptr.vmem [resolvable:$true] %s19_s10 }
  0x16   :  { %s19875_s13 = scalar_lea.hbm %s22987_s3, 8192 }
  0x17   :  { %p19876_p8 = scmp.ne.s32.totalorder %s22987_s3, %s19875_s13  ;;  %p19879_p9 = scmp.lt.u32.totalorder %s19875_s13, %s22987_s3 }
  0x19   :  { %p19881_p10 = pnand %p19879_p9, %p19876_p8 }
  0x1b   :  { %19884 = shalt.err (!%p19881_p10)
}
  0x1c   :  { %s19885_s1 = scalar_lea.vmem %s54_s8, 8192  ;;  %p19890_p12 = scmp.lt.s32.totalorder %s54_s8, %s54_s8 }
  0x1d   :  { %p19886_p11 = scmp.ne.s32.totalorder %s54_s8, %s19885_s1  ;;  %p19891_p13 = scmp.lt.s32.totalorder %s19885_s1, %s19885_s1 }
  0x1f   :  { %p19892_p0 = por %p19891_p13, %p19890_p12 }
  0x21   :  { %p19893_p1 = pnand %p19892_p0, %p19886_p11 }
  0x23   :  { %19896 = shalt.err (!%p19893_p1)
}
  0x24   :  { %s19998_s18 = smov 64   ;;  %s19999_s19 = smov 4  }
  0x25   :  { %59 = dma.hbm_to_vmem [thread:$0]  %s22987_s3, 8192, %s54_s8, [#allocation9], %s19998_s18, %s19998_s18, %s19999_s19  }
  0x26   :  { %s19897_s24 = scalar_lea.hbm %s22984_s0, 32768 }
  0x27   :  { %p19898_p2 = scmp.ne.s32.totalorder %s22984_s0, %s19897_s24  ;;  %p19901_p3 = scmp.lt.u32.totalorder %s19897_s24, %s22984_s0 }
  0x29   :  { %p19903_p4 = pnand %p19901_p3, %p19898_p2 }
  0x2b   :  { %19906 = shalt.err (!%p19903_p4)
}
  0x2c   :  { %s19907_s29 = scalar_lea.vmem %s20_s10, 32768  ;;  %p19912_p6 = scmp.lt.s32.totalorder %s20_s10, %s20_s10 }
  0x2d   :  { %p19908_p5 = scmp.ne.s32.totalorder %s20_s10, %s19907_s29  ;;  %p19913_p7 = scmp.lt.s32.totalorder %s19907_s29, %s19907_s29 }
  0x2f   :  { %p19914_p8 = por %p19913_p7, %p19912_p6 }
  0x31   :  { %p19915_p9 = pnand %p19914_p8, %p19908_p5 }
  0x33   :  { %19918 = shalt.err (!%p19915_p9)
}
  0x34   :  { %s20000_s3 = smov 1024   ;;  %s20001_s7 = smov [#allocation7]  }
  0x35   :  { %25 = dma.hbm_to_vmem [thread:$0]  %s22984_s0, 32768, %s20_s10, [#allocation3], %s20000_s3, %s20000_s3, %s19998_s18  }
  0x36   :  { %s44_s8 = sshll.u32 %s20001_s7, 4  ;;  %s20002_s9 = smov [#allocation10]   ;;  %s45_s8 = int_to_ptr.vmem [resolvable:$true] %s44_s8 }
  0x37   :  { %s66_s11 = sshll.u32 %s20002_s9, 4  ;;  %s19919_s14 = scalar_lea.hbm %s22986_s2, 128  ;;  %s67_s11 = int_to_ptr.vmem [resolvable:$true] %s66_s11 }
  0x38   :  { %p19920_p10 = scmp.ne.s32.totalorder %s22986_s2, %s19919_s14  ;;  %p19923_p11 = scmp.lt.u32.totalorder %s19919_s14, %s22986_s2 }
  0x3a   :  { %p19925_p12 = pnand %p19923_p11, %p19920_p10 }
  0x3c   :  { %19928 = shalt.err (!%p19925_p12)
}
  0x3d   :  { %s19929_s0 = scalar_lea.vmem %s45_s8, 128  ;;  %p19934_p0 = scmp.lt.s32.totalorder %s45_s8, %s45_s8 }
  0x3e   :  { %p19930_p13 = scmp.ne.s32.totalorder %s45_s8, %s19929_s0  ;;  %p19935_p1 = scmp.lt.s32.totalorder %s19929_s0, %s19929_s0 }
  0x40   :  { %p19936_p2 = por %p19935_p1, %p19934_p0 }
  0x42   :  { %p19937_p3 = pnand %p19936_p2, %p19930_p13 }
  0x44   :  { %19940 = shalt.err (!%p19937_p3)
}
  0x45   :  { %47 = dma.hbm_to_vmem [thread:$0]  %s22986_s2, 128, %s45_s8, [#allocation6]  }
  0x46   :  { %s19941_s21 = scalar_lea.hbm %s22988_s4, 16 }
  0x47   :  { %p19942_p4 = scmp.ne.s32.totalorder %s22988_s4, %s19941_s21  ;;  %p19945_p5 = scmp.lt.u32.totalorder %s19941_s21, %s22988_s4 }
  0x49   :  { %p19947_p6 = pnand %p19945_p5, %p19942_p4 }
  0x4b   :  { %19950 = shalt.err (!%p19947_p6)
}
  0x4c   :  { %s19951_s26 = scalar_lea.vmem %s67_s11, 16  ;;  %s19955_s27 = scalar_lea.vmem %s67_s11, 32 }
  0x4d   :  { %p19952_p7 = scmp.ne.s32.totalorder %s67_s11, %s19951_s26  ;;  %p19956_p8 = scmp.lt.s32.totalorder %s67_s11, %s67_s11 }
  0x4e   :  { %p19957_p9 = scmp.lt.s32.totalorder %s19955_s27, %s19951_s26 }
  0x50   :  { %p19958_p10 = por %p19957_p9, %p19956_p8 }
  0x52   :  { %p19959_p11 = pnand %p19958_p10, %p19952_p7 }
  0x54   :  { %19962 = shalt.err (!%p19959_p11)
}
  0x55   :  { %69 = dma.hbm_to_vmem [thread:$0]  %s22988_s4, 16, %s67_s11, [#allocation9]  }
  0x56   :  { %19985 = dma.done.wait [#allocation3], 32768  }
  0x57   :  { %19986 = vsyncadd [#allocation3], 4294934528 }
  0x58   :  { %19987 = dma.done.wait [#allocation6], 131200  }
  0x59   :  { %19988 = vsyncadd [#allocation6], 4294836096 }
  0x5a   :  { %19989 = dma.done.wait [#allocation9], 8208  }
  0x5b   :  { %19990 = vsyncadd [#allocation9], 4294959088  ;;  %v342_v0 = vld [vmem:[#allocation5] sm:$0xff]  ;;  %v343_v2 = vld [vmem:[#allocation5 + $0x8] sm:$0xff]  ;;  %s20003_s4 = smov [#allocation11]  }
  0x5c   :  { %v346_v1 = vld [vmem:[#allocation5 + $0x20] sm:$0xff]  ;;  %v347_v4 = vld [vmem:[#allocation5 + $0x28] sm:$0xff]  ;;  %s15760_s29 = sshll.u32 %s20003_s4, 4  ;;  %s15761_s29 = int_to_ptr.vmem [resolvable:$true] %s15760_s29 }
  0x5d   :  { %v16031_v3 = vcombine.high %v342_v0, %v346_v1  ;;  %v16030_v5 = vcombine.low %v342_v0, %v346_v1  ;;  %v350_v6 = vld [vmem:[#allocation5 + $0x40] sm:$0xff]  ;;  %v16033_v8 = vcombine.high %v343_v2, %v347_v4  ;;  %v16032_v9 = vcombine.low %v343_v2, %v347_v4  ;;  %v351_v11 = vld [vmem:[#allocation5 + $0x48] sm:$0xff]  ;;  %s19963_s3 = scalar_lea.vmem %s15761_s29, 4096  ;;  %p19968_p13 = scmp.lt.s32.totalorder %s15761_s29, %s15761_s29 }
  0x5e   :  { %v354_v7 = vld [vmem:[#allocation5 + $0x60] sm:$0xff]  ;;  %v355_v12 = vld [vmem:[#allocation5 + $0x68] sm:$0xff]  ;;  %p19964_p12 = scmp.ne.s32.totalorder %s15761_s29, %s19963_s3  ;;  %p19969_p0 = scmp.lt.s32.totalorder %s19963_s3, %s19963_s3 }
  0x5f   :  { %v16039_v10 = vcombine.high %v350_v6, %v354_v7  ;;  %v358_v13 = vld [vmem:[#allocation5 + $0x80] sm:$0xff]  ;;  %7808 = vmatprep.subr.bf16.mxu0 %v16031_v3  ;;  %v16041_v14 = vcombine.high %v351_v11, %v355_v12  ;;  %v359_v16 = vld [vmem:[#allocation5 + $0x88] sm:$0xff]  ;;  %9352 = vmatprep.subr.bf16.mxu1 %v16033_v8  ;;  %v16038_v18 = vcombine.low %v350_v6, %v354_v7 }
  0x60   :  { %v362_v15 = vld [vmem:[#allocation5 + $0xa0] sm:$0xff]  ;;  %v363_v17 = vld [vmem:[#allocation5 + $0xa8] sm:$0xff]  ;;  %7809 = vmatpush1.bf16.msra.mxu0 %v16030_v5  ;;  %9353 = vmatpush1.bf16.msra.mxu1 %v16032_v9  ;;  %v16040_v19 = vcombine.low %v351_v11, %v355_v12  ;;  %p19970_p1 = por %p19969_p0, %p19968_p13 }
  0x61   :  { %7810 = vmatprep.subr.bf16.mxu0 %v16039_v10  ;;  %v16047_v20 = vcombine.high %v358_v13, %v362_v15  ;;  %9354 = vmatprep.subr.bf16.mxu1 %v16041_v14  ;;  %v16049_v21 = vcombine.high %v359_v16, %v363_v17  ;;  %v366_v22 = vld [vmem:[#allocation5 + $0xc0] sm:$0xff]  ;;  %v367_v24 = vld [vmem:[#allocation5 + $0xc8] sm:$0xff]  ;;  %v16046_v26 = vcombine.low %v358_v13, %v362_v15 }
  0x62   :  { %v370_v23 = vld [vmem:[#allocation5 + $0xe0] sm:$0xff]  ;;  %v371_v25 = vld [vmem:[#allocation5 + $0xe8] sm:$0xff]  ;;  %v16048_v27 = vcombine.low %v359_v16, %v363_v17  ;;  %p19971_p2 = pnand %p19970_p1, %p19964_p12 }
  0x63   :  { %v16055_v28 = vcombine.high %v366_v22, %v370_v23  ;;  %v16057_v29 = vcombine.high %v367_v24, %v371_v25  ;;  %v374_v30 = vld [vmem:[#allocation5 + $0x100] sm:$0xff]  ;;  %v375_v32 = vld [vmem:[#allocation5 + $0x108] sm:$0xff]  ;;  %v16054_v34 = vcombine.low %v366_v22, %v370_v23  ;;  %v16056_v35 = vcombine.low %v367_v24, %v371_v25 }
  0x64   :  { %7811 = vmatpush1.bf16.msra.mxu0 %v16038_v18  ;;  %9355 = vmatpush1.bf16.msra.mxu1 %v16040_v19  ;;  %v378_v31 = vld [vmem:[#allocation5 + $0x120] sm:$0xff]  ;;  %v379_v33 = vld [vmem:[#allocation5 + $0x128] sm:$0xff] }
  0x65   :  { %7812 = vmatprep.subr.bf16.mxu0 %v16047_v20  ;;  %9356 = vmatprep.subr.bf16.mxu1 %v16049_v21  ;;  %v16063_v36 = vcombine.high %v374_v30, %v378_v31  ;;  %v16065_v37 = vcombine.high %v375_v32, %v379_v33  ;;  %v382_v38 = vld [vmem:[#allocation5 + $0x140] sm:$0xff]  ;;  %v383_v40 = vld [vmem:[#allocation5 + $0x148] sm:$0xff]  ;;  %v16062_v42 = vcombine.low %v374_v30, %v378_v31 }
  0x66   :  { %v386_v39 = vld [vmem:[#allocation5 + $0x160] sm:$0xff]  ;;  %v387_v41 = vld [vmem:[#allocation5 + $0x168] sm:$0xff]  ;;  %v16064_v43 = vcombine.low %v375_v32, %v379_v33 }
  0x67   :  { %v16071_v44 = vcombine.high %v382_v38, %v386_v39  ;;  %v16073_v45 = vcombine.high %v383_v40, %v387_v41  ;;  %v390_v46 = vld [vmem:[#allocation5 + $0x180] sm:$0xff]  ;;  %v391_v48 = vld [vmem:[#allocation5 + $0x188] sm:$0xff]  ;;  %v16070_v50 = vcombine.low %v382_v38, %v386_v39  ;;  %v16072_v51 = vcombine.low %v383_v40, %v387_v41 }
  0x68   :  { %7813 = vmatpush1.bf16.msra.mxu0 %v16046_v26  ;;  %9357 = vmatpush1.bf16.msra.mxu1 %v16048_v27  ;;  %v394_v47 = vld [vmem:[#allocation5 + $0x1a0] sm:$0xff]  ;;  %v395_v49 = vld [vmem:[#allocation5 + $0x1a8] sm:$0xff] }
  0x69   :  { %7814 = vmatprep.subr.bf16.mxu0 %v16055_v28  ;;  %9358 = vmatprep.subr.bf16.mxu1 %v16057_v29  ;;  %v16079_v52 = vcombine.high %v390_v46, %v394_v47  ;;  %v20096_v53 = vld [vmem:[#allocation2] sm:$0xff]  ;;  %v16081_v55 = vcombine.high %v391_v48, %v395_v49  ;;  %v399_v59 = vld [vmem:[#allocation5 + $0x1c8] sm:$0xff]  ;;  %v16078_v61 = vcombine.low %v390_v46, %v394_v47 }
  0x6a   :  { %v20098_v54 = vld [vmem:[#allocation2 + $0x40] sm:$0xff]  ;;  %v403_v60 = vld [vmem:[#allocation5 + $0x1e8] sm:$0xff]  ;;  %v16080_v62 = vcombine.low %v391_v48, %v395_v49 }
  0x6b   :  { %v398_v56 = vld [vmem:[#allocation5 + $0x1c0] sm:$0xff]  ;;  %v20102_v58 = vcombine.high %v20096_v53, %v20098_v54  ;;  %v16089_v0 = vcombine.high %v399_v59, %v403_v60  ;;  %v407_v3 = vld [vmem:[#allocation5 + $0x208] sm:$0xff]  ;;  %v16088_v6 = vcombine.low %v399_v59, %v403_v60 }
  0x6c   :  { %7815 = vmatpush1.bf16.msra.mxu0 %v16054_v34  ;;  %9359 = vmatpush1.bf16.msra.mxu1 %v16056_v35  ;;  %v402_v57 = vld [vmem:[#allocation5 + $0x1e0] sm:$0xff]  ;;  %v411_v4 = vld [vmem:[#allocation5 + $0x228] sm:$0xff] }
  0x6d   :  { %7816 = vmatprep.subr.bf16.mxu0 %v16063_v36  ;;  %9360 = vmatprep.subr.bf16.mxu1 %v16065_v37  ;;  %v16087_v63 = vcombine.high %v398_v56, %v402_v57  ;;  %v406_v1 = vld [vmem:[#allocation5 + $0x200] sm:$0xff]  ;;  %v16086_v5 = vcombine.low %v398_v56, %v402_v57  ;;  %v16097_v8 = vcombine.high %v407_v3, %v411_v4  ;;  %v415_v11 = vld [vmem:[#allocation5 + $0x248] sm:$0xff] }
  0x6e   :  { %7840 = vmatprep.mubr.bf16.mxu0 %v20102_v58  ;;  %v410_v2 = vld [vmem:[#allocation5 + $0x220] sm:$0xff]  ;;  %9384 = vmatprep.mubr.bf16.mxu1 %v20102_v58  ;;  %v419_v12 = vld [vmem:[#allocation5 + $0x268] sm:$0xff]  ;;  %v16096_v14 = vcombine.low %v407_v3, %v411_v4 }
  0x6f   :  { %v16095_v7 = vcombine.high %v406_v1, %v410_v2  ;;  %v414_v9 = vld [vmem:[#allocation5 + $0x240] sm:$0xff]  ;;  %v16094_v13 = vcombine.low %v406_v1, %v410_v2  ;;  %v16105_v16 = vcombine.high %v415_v11, %v419_v12  ;;  %v423_v19 = vld [vmem:[#allocation5 + $0x288] sm:$0xff]  ;;  %v16104_v22 = vcombine.low %v415_v11, %v419_v12 }
  0x70   :  { %7817 = vmatpush1.bf16.msra.mxu0 %v16062_v42  ;;  %9361 = vmatpush1.bf16.msra.mxu1 %v16064_v43  ;;  %v418_v10 = vld [vmem:[#allocation5 + $0x260] sm:$0xff]  ;;  %v427_v20 = vld [vmem:[#allocation5 + $0x2a8] sm:$0xff] }
  0x71   :  { %7818 = vmatprep.subr.bf16.mxu0 %v16071_v44  ;;  %9362 = vmatprep.subr.bf16.mxu1 %v16073_v45  ;;  %v16103_v15 = vcombine.high %v414_v9, %v418_v10  ;;  %v422_v17 = vld [vmem:[#allocation5 + $0x280] sm:$0xff]  ;;  %v16102_v21 = vcombine.low %v414_v9, %v418_v10  ;;  %v16113_v24 = vcombine.high %v423_v19, %v427_v20  ;;  %v431_v27 = vld [vmem:[#allocation5 + $0x2c8] sm:$0xff] }
  0x72   :  { %v426_v18 = vld [vmem:[#allocation5 + $0x2a0] sm:$0xff]  ;;  %v435_v28 = vld [vmem:[#allocation5 + $0x2e8] sm:$0xff]  ;;  %v16112_v30 = vcombine.low %v423_v19, %v427_v20 }
  0x73   :  { %v16111_v23 = vcombine.high %v422_v17, %v426_v18  ;;  %v430_v25 = vld [vmem:[#allocation5 + $0x2c0] sm:$0xff]  ;;  %v16110_v29 = vcombine.low %v422_v17, %v426_v18  ;;  %v16121_v32 = vcombine.high %v431_v27, %v435_v28  ;;  %v439_v35 = vld [vmem:[#allocation5 + $0x308] sm:$0xff]  ;;  %v16120_v38 = vcombine.low %v431_v27, %v435_v28 }
  0x74   :  { %7819 = vmatpush1.bf16.msra.mxu0 %v16070_v50  ;;  %9363 = vmatpush1.bf16.msra.mxu1 %v16072_v51  ;;  %v434_v26 = vld [vmem:[#allocation5 + $0x2e0] sm:$0xff]  ;;  %v443_v36 = vld [vmem:[#allocation5 + $0x328] sm:$0xff]  ;;  %v20108_v18 = vcombine.low %v20096_v53, %v20098_v54 }
  0x75   :  { %7820 = vmatprep.subr.bf16.mxu0 %v16079_v52  ;;  %9364 = vmatprep.subr.bf16.mxu1 %v16081_v55  ;;  %v16119_v31 = vcombine.high %v430_v25, %v434_v26  ;;  %v438_v33 = vld [vmem:[#allocation5 + $0x300] sm:$0xff]  ;;  %v16118_v37 = vcombine.low %v430_v25, %v434_v26  ;;  %v16129_v40 = vcombine.high %v439_v35, %v443_v36  ;;  %v447_v43 = vld [vmem:[#allocation5 + $0x348] sm:$0xff] }
  0x76   :  { %v442_v34 = vld [vmem:[#allocation5 + $0x320] sm:$0xff]  ;;  %v451_v44 = vld [vmem:[#allocation5 + $0x368] sm:$0xff]  ;;  %v16128_v46 = vcombine.low %v439_v35, %v443_v36 }
  0x77   :  { %v16127_v39 = vcombine.high %v438_v33, %v442_v34  ;;  %v446_v41 = vld [vmem:[#allocation5 + $0x340] sm:$0xff]  ;;  %v16126_v45 = vcombine.low %v438_v33, %v442_v34  ;;  %v16137_v50 = vcombine.high %v447_v43, %v451_v44  ;;  %v455_v51 = vld [vmem:[#allocation5 + $0x388] sm:$0xff]  ;;  %v16136_v59 = vcombine.low %v447_v43, %v451_v44 }
  0x78   :  { %7821 = vmatpush1.bf16.msra.mxu0 %v16078_v61  ;;  %9365 = vmatpush1.bf16.msra.mxu1 %v16080_v62  ;;  %v450_v42 = vld [vmem:[#allocation5 + $0x360] sm:$0xff]  ;;  %v459_v52 = vld [vmem:[#allocation5 + $0x3a8] sm:$0xff] }
  0x79   :  { %7822 = vmatprep.subr.bf16.mxu0 %v16087_v63  ;;  %9366 = vmatprep.subr.bf16.mxu1 %v16089_v0  ;;  %v16135_v47 = vcombine.high %v446_v41, %v450_v42  ;;  %v454_v48 = vld [vmem:[#allocation5 + $0x380] sm:$0xff]  ;;  %v16134_v55 = vcombine.low %v446_v41, %v450_v42  ;;  %v463_v61 = vld [vmem:[#allocation5 + $0x3c8] sm:$0xff]  ;;  %v16145_v63 = vcombine.high %v455_v51, %v459_v52 }
  0x7a   :  { %v458_v49 = vld [vmem:[#allocation5 + $0x3a0] sm:$0xff]  ;;  %v467_v62 = vld [vmem:[#allocation5 + $0x3e8] sm:$0xff]  ;;  %v16144_v3 = vcombine.low %v455_v51, %v459_v52 }
  0x7b   :  { %v462_v56 = vld [vmem:[#allocation5 + $0x3c0] sm:$0xff]  ;;  %v16143_v60 = vcombine.high %v454_v48, %v458_v49  ;;  %v16142_v0 = vcombine.low %v454_v48, %v458_v49  ;;  %v16152_v11 = vcombine.low %v463_v61, %v467_v62  ;;  %v483_v17 = vld [vmem:[#allocation5 + $0x468] sm:$0xff] }
  0x7c   :  { %7823 = vmatpush1.bf16.msra.mxu0 %v16086_v5  ;;  %9367 = vmatpush1.bf16.msra.mxu1 %v16088_v6  ;;  %v466_v57 = vld [vmem:[#allocation5 + $0x3e0] sm:$0xff]  ;;  %v16153_v5 = vcombine.high %v463_v61, %v467_v62  ;;  %v471_v6 = vld [vmem:[#allocation5 + $0x408] sm:$0xff] }
  0x7d   :  { %7824 = vmatprep.subr.bf16.mxu0 %v16095_v7  ;;  %9368 = vmatprep.subr.bf16.mxu1 %v16097_v8  ;;  %v470_v1 = vld [vmem:[#allocation5 + $0x400] sm:$0xff]  ;;  %v16151_v4 = vcombine.high %v462_v56, %v466_v57  ;;  %v475_v7 = vld [vmem:[#allocation5 + $0x428] sm:$0xff]  ;;  %v16150_v8 = vcombine.low %v462_v56, %v466_v57 }
  0x7e   :  { %v474_v2 = vld [vmem:[#allocation5 + $0x420] sm:$0xff]  ;;  %v491_v25 = vld [vmem:[#allocation5 + $0x4a8] sm:$0xff] }
  0x7f   :  { %v102_v9 = vld [vmem:[#allocation2 + $0x80] sm:$0xff]  ;;  %v16159_v12 = vcombine.high %v470_v1, %v474_v2  ;;  %v16158_v19 = vcombine.low %v470_v1, %v474_v2  ;;  %v20122_v33 = vld [vmem:[#allocation5 + $0x828] sm:$0xff] }
  0x80   :  { %7825 = vmatpush1.bf16.msra.mxu0 %v16094_v13  ;;  %9369 = vmatpush1.bf16.msra.mxu1 %v16096_v14  ;;  %v110_v10 = vld [vmem:[#allocation2 + $0xc0] sm:$0xff]  ;;  %v499_v41 = vld [vmem:[#allocation5 + $0x4e8] sm:$0xff] }
  0x81   :  { %7826 = vmatprep.subr.bf16.mxu0 %v16103_v15  ;;  %9370 = vmatprep.subr.bf16.mxu1 %v16105_v16  ;;  %v478_v13 = vld [vmem:[#allocation5 + $0x440] sm:$0xff]  ;;  %v16161_v15 = vcombine.high %v471_v6, %v475_v7  ;;  %v479_v16 = vld [vmem:[#allocation5 + $0x448] sm:$0xff]  ;;  %v20128_v42 = vcombine.low %v102_v9, %v110_v10 }
  0x82   :  { %v482_v14 = vld [vmem:[#allocation5 + $0x460] sm:$0xff]  ;;  %v16169_v27 = vcombine.high %v479_v16, %v483_v17  ;;  %v16168_v34 = vcombine.low %v479_v16, %v483_v17  ;;  %v503_v52 = vld [vmem:[#allocation5 + $0x508] sm:$0xff] }
  0x83   :  { %v486_v20 = vld [vmem:[#allocation5 + $0x480] sm:$0xff]  ;;  %v16167_v26 = vcombine.high %v478_v13, %v482_v14  ;;  %v511_v62 = vld [vmem:[#allocation5 + $0x548] sm:$0xff] }
  0x84   :  { %7827 = vmatpush1.bf16.msra.mxu0 %v16102_v21  ;;  %9371 = vmatpush1.bf16.msra.mxu1 %v16104_v22  ;;  %v490_v21 = vld [vmem:[#allocation5 + $0x4a0] sm:$0xff]  ;;  %v16160_v22 = vcombine.low %v471_v6, %v475_v7 }
  0x85   :  { %7828 = vmatprep.subr.bf16.mxu0 %v16111_v23  ;;  %9372 = vmatprep.subr.bf16.mxu1 %v16113_v24  ;;  %v20110_v23 = vcombine.high %v102_v9, %v110_v10  ;;  %v487_v24 = vld [vmem:[#allocation5 + $0x488] sm:$0xff]  ;;  %v118_v28 = vld [vmem:[#allocation2 + $0x100] sm:$0xff]  ;;  %v16175_v35 = vcombine.high %v486_v20, %v490_v21  ;;  %v16174_v44 = vcombine.low %v486_v20, %v490_v21 }
  0x86   :  { %v20113_v53 = vld [vmem:[#allocation5 + $0x800] sm:$0xff]  ;;  %v531_v20 = vld [vmem:[#allocation5 + $0x5e8] sm:$0xff] }
  0x87   :  { %v20115_v54 = vld [vmem:[#allocation5 + $0x820] sm:$0xff] }
  0x88   :  { %7829 = vmatpush1.bf16.msra.mxu0 %v16110_v29  ;;  %9373 = vmatpush1.bf16.msra.mxu1 %v16112_v30  ;;  %v126_v29 = vld [vmem:[#allocation2 + $0x140] sm:$0xff]  ;;  %v16166_v30 = vcombine.low %v478_v13, %v482_v14 }
  0x89   :  { %7830 = vmatprep.subr.bf16.mxu0 %v16119_v31  ;;  %9374 = vmatprep.subr.bf16.mxu1 %v16121_v32  ;;  %v16286_v31 = vcombine.low %v20113_v53, %v20115_v54  ;;  %v20120_v32 = vld [vmem:[#allocation5 + $0x808] sm:$0xff]  ;;  %v494_v36 = vld [vmem:[#allocation5 + $0x4c0] sm:$0xff]  ;;  %v20130_v43 = vcombine.high %v118_v28, %v126_v29 }
  0x8a   :  { %v502_v49 = vld [vmem:[#allocation5 + $0x500] sm:$0xff] }
  0x8b   :  { %v142_v51 = vld [vmem:[#allocation2 + $0x1c0] sm:$0xff] }
  0x8c   :  { %7831 = vmatpush1.bf16.msra.mxu0 %v16118_v37  ;;  %9375 = vmatpush1.bf16.msra.mxu1 %v16120_v38  ;;  %v498_v37 = vld [vmem:[#allocation5 + $0x4e0] sm:$0xff]  ;;  %v16288_v38 = vcombine.low %v20120_v32, %v20122_v33 }
  0x8d   :  { %7832 = vmatprep.subr.bf16.mxu0 %v16127_v39  ;;  %9376 = vmatprep.subr.bf16.mxu1 %v16129_v40  ;;  %v16177_v39 = vcombine.high %v487_v24, %v491_v25  ;;  %v495_v40 = vld [vmem:[#allocation5 + $0x4c8] sm:$0xff]  ;;  %v16182_v56 = vcombine.low %v494_v36, %v498_v37  ;;  %v510_v57 = vld [vmem:[#allocation5 + $0x540] sm:$0xff] }
  0x8e   :  { %v16185_v48 = vcombine.high %v495_v40, %v499_v41  ;;  %v150_v6 = vld [vmem:[#allocation2 + $0x200] sm:$0xff] }
  0x8f   :  { %v522_v9 = vld [vmem:[#allocation5 + $0x5a0] sm:$0xff] }
  0x90   :  { %7833 = vmatpush1.bf16.msra.mxu0 %v16126_v45  ;;  %9377 = vmatpush1.bf16.msra.mxu1 %v16128_v46  ;;  %v16176_v45 = vcombine.low %v487_v24, %v491_v25  ;;  %v16183_v46 = vcombine.high %v494_v36, %v498_v37  ;;  %v158_v10 = vld [vmem:[#allocation2 + $0x240] sm:$0xff]  ;;  %v535_v36 = vld [vmem:[#allocation5 + $0x608] sm:$0xff] }
  0x91   :  { %7834 = vmatprep.subr.bf16.mxu0 %v16135_v47  ;;  %9378 = vmatprep.subr.bf16.mxu1 %v16137_v50  ;;  %v134_v47 = vld [vmem:[#allocation2 + $0x180] sm:$0xff]  ;;  %v20146_v24 = vcombine.high %v150_v6, %v158_v10  ;;  %v539_v37 = vld [vmem:[#allocation5 + $0x628] sm:$0xff] }
  0x92   :  { %v506_v50 = vld [vmem:[#allocation5 + $0x520] sm:$0xff]  ;;  %v20138_v2 = vcombine.high %v134_v47, %v142_v51  ;;  %v20144_v21 = vcombine.low %v134_v47, %v142_v51  ;;  %v547_v47 = vld [vmem:[#allocation5 + $0x668] sm:$0xff] }
  0x93   :  { %v16191_v61 = vcombine.high %v502_v49, %v506_v50  ;;  %v526_v14 = vld [vmem:[#allocation5 + $0x5c0] sm:$0xff] }
  0x94   :  { %7835 = vmatpush1.bf16.msra.mxu0 %v16134_v55  ;;  %9379 = vmatpush1.bf16.msra.mxu1 %v16136_v59  ;;  %v507_v55 = vld [vmem:[#allocation5 + $0x528] sm:$0xff]  ;;  %v514_v59 = vld [vmem:[#allocation5 + $0x560] sm:$0xff] }
  0x95   :  { %7836 = vmatprep.subr.bf16.mxu0 %v16143_v60  ;;  %9380 = vmatprep.subr.bf16.mxu1 %v16145_v63  ;;  %v16184_v60 = vcombine.low %v495_v40, %v499_v41  ;;  %v515_v63 = vld [vmem:[#allocation5 + $0x568] sm:$0xff]  ;;  %v16193_v1 = vcombine.high %v503_v52, %v507_v55  ;;  %v16198_v13 = vcombine.low %v510_v57, %v514_v59  ;;  %v542_v40 = vld [vmem:[#allocation5 + $0x640] sm:$0xff] }
  0x96   :  { %v16201_v7 = vcombine.high %v511_v62, %v515_v63  ;;  %v16200_v16 = vcombine.low %v511_v62, %v515_v63  ;;  %v546_v41 = vld [vmem:[#allocation5 + $0x660] sm:$0xff]  ;;  %v551_v62 = vld [vmem:[#allocation5 + $0x688] sm:$0xff] }
  0x97   :  { %v555_v63 = vld [vmem:[#allocation5 + $0x6a8] sm:$0xff] }
  0x98   :  { %7837 = vmatpush1.bf16.msra.mxu0 %v16142_v0  ;;  %9381 = vmatpush1.bf16.msra.mxu1 %v16144_v3  ;;  %v20136_v0 = vcombine.low %v118_v28, %v126_v29  ;;  %v16190_v3 = vcombine.low %v502_v49, %v506_v50  ;;  %v166_v28 = vld [vmem:[#allocation2 + $0x280] sm:$0xff]  ;;  %v16225_v49 = vcombine.high %v535_v36, %v539_v37 }
  0x99   :  { %7838 = vmatprep.subr.bf16.mxu0 %v16151_v4  ;;  %9382 = vmatprep.subr.bf16.mxu1 %v16153_v5  ;;  %v16192_v4 = vcombine.low %v503_v52, %v507_v55  ;;  %v16199_v5 = vcombine.high %v510_v57, %v514_v59  ;;  %v16224_v52 = vcombine.low %v535_v36, %v539_v37  ;;  %v550_v59 = vld [vmem:[#allocation5 + $0x680] sm:$0xff]  ;;  %v575_v37 = vld [vmem:[#allocation5 + $0x748] sm:$0xff] }
  0x9a   :  { %v16231_v55 = vcombine.high %v542_v40, %v546_v41 }
  0x9c   :  { %7839 = vmatpush1.bf16.msra.mxu0 %v16150_v8  ;;  %9383 = vmatpush1.bf16.msra.mxu1 %v16152_v11  ;;  %v518_v8 = vld [vmem:[#allocation5 + $0x580] sm:$0xff]  ;;  %v519_v11 = vld [vmem:[#allocation5 + $0x588] sm:$0xff] }
  0x9d   :  { %8001 = vmatprep.subr.bf16.mxu0 %v16159_v12  ;;  %9545 = vmatprep.subr.bf16.mxu1 %v16161_v15  ;;  %v523_v12 = vld [vmem:[#allocation5 + $0x5a8] sm:$0xff]  ;;  %v530_v15 = vld [vmem:[#allocation5 + $0x5e0] sm:$0xff]  ;;  %v16207_v17 = vcombine.high %v518_v8, %v522_v9  ;;  %v16206_v25 = vcombine.low %v518_v8, %v522_v9 }
  0x9e   :  { %v563_v8 = vld [vmem:[#allocation5 + $0x6e8] sm:$0xff] }
  0x9f   :  { %7841 = vmatmul.mubr.bf16.vlgmr.msra.gmra.mrb[0].mxu0 %v20108_v18  ;;  %9385 = vmatmul.mubr.bf16.vlgmr.msra.gmra.mrb[0].mxu1 %v20108_v18 }
  0xa0   :  { %8002 = vmatpush1.bf16.msra.mxu0 %v16158_v19  ;;  %9546 = vmatpush1.bf16.msra.mxu1 %v16160_v22  ;;  %v527_v19 = vld [vmem:[#allocation5 + $0x5c8] sm:$0xff]  ;;  %v16209_v22 = vcombine.high %v519_v11, %v523_v12 }
  0xa1   :  { %7850 = vmatprep.mubr.bf16.mxu0 %v20110_v23  ;;  %9394 = vmatprep.mubr.bf16.mxu1 %v20110_v23  ;;  %v16217_v29 = vcombine.high %v527_v19, %v531_v20 }
  0xa2   :  { %8003 = vmatprep.subr.bf16.mxu0 %v16167_v26  ;;  %9547 = vmatprep.subr.bf16.mxu1 %v16169_v27  ;;  %v16208_v26 = vcombine.low %v519_v11, %v523_v12  ;;  %v16215_v27 = vcombine.high %v526_v14, %v530_v15 }
  0xa4   :  { %8004 = vmatpush1.bf16.msra.mxu0 %v16166_v30  ;;  %9548 = vmatpush1.bf16.msra.mxu1 %v16168_v34  ;;  %v534_v30 = vld [vmem:[#allocation5 + $0x600] sm:$0xff] }
  0xa5   :  { %8005 = vmatprep.subr.bf16.mxu0 %v16175_v35  ;;  %9549 = vmatprep.subr.bf16.mxu1 %v16177_v39  ;;  %v538_v34 = vld [vmem:[#allocation5 + $0x620] sm:$0xff]  ;;  %v16214_v39 = vcombine.low %v526_v14, %v530_v15 }
  0xa6   :  { %v174_v35 = vld [vmem:[#allocation2 + $0x2c0] sm:$0xff]  ;;  %v16222_v51 = vcombine.low %v534_v30, %v538_v34 }
  0xa7   :  { %7851 = vmatmul.mubr.bf16.gmra.mrb[4].mxu0 %v20128_v42  ;;  %9395 = vmatmul.mubr.bf16.gmra.mrb[4].mxu1 %v20128_v42  ;;  %v20154_v50 = vcombine.high %v166_v28, %v174_v35  ;;  %v20160_v9 = vcombine.low %v166_v28, %v174_v35  ;;  %v578_v35 = vld [vmem:[#allocation5 + $0x760] sm:$0xff] }
  0xa8   :  { %7860 = vmatprep.mubr.bf16.mxu0 %v20130_v43  ;;  %9404 = vmatprep.mubr.bf16.mxu1 %v20130_v43 }
  0xa9   :  { %8006 = vmatpush1.bf16.msra.mxu0 %v16174_v44  ;;  %9550 = vmatpush1.bf16.msra.mxu1 %v16176_v45  ;;  %v16216_v44 = vcombine.low %v527_v19, %v531_v20  ;;  %v16223_v45 = vcombine.high %v534_v30, %v538_v34  ;;  %v567_v19 = vld [vmem:[#allocation5 + $0x708] sm:$0xff]  ;;  %v574_v34 = vld [vmem:[#allocation5 + $0x740] sm:$0xff] }
  0xaa   :  { %8007 = vmatprep.subr.bf16.mxu0 %v16183_v46  ;;  %9551 = vmatprep.subr.bf16.mxu1 %v16185_v48  ;;  %v543_v46 = vld [vmem:[#allocation5 + $0x648] sm:$0xff]  ;;  %v20152_v48 = vcombine.low %v150_v6, %v158_v10  ;;  %v16241_v10 = vcombine.high %v551_v62, %v555_v63 }
  0xab   :  { %v16233_v57 = vcombine.high %v543_v46, %v547_v47  ;;  %v571_v20 = vld [vmem:[#allocation5 + $0x728] sm:$0xff] }
  0xac   :  { %v16257_v30 = vcombine.high %v567_v19, %v571_v20 }
  0xad   :  { %8008 = vmatpush1.bf16.msra.mxu0 %v16182_v56  ;;  %9552 = vmatpush1.bf16.msra.mxu1 %v16184_v60  ;;  %v182_v56 = vld [vmem:[#allocation2 + $0x300] sm:$0xff] }
  0xae   :  { %8009 = vmatprep.subr.bf16.mxu0 %v16191_v61  ;;  %9553 = vmatprep.subr.bf16.mxu1 %v16193_v1  ;;  %v554_v60 = vld [vmem:[#allocation5 + $0x6a0] sm:$0xff]  ;;  %v16230_v1 = vcombine.low %v542_v40, %v546_v41  ;;  %v16256_v41 = vcombine.low %v567_v19, %v571_v20 }
  0xaf   :  { %7861 = vmatmul.mubr.bf16.gmra.mrb[8].mxu0 %v20136_v0  ;;  %9405 = vmatmul.mubr.bf16.gmra.mrb[8].mxu1 %v20136_v0  ;;  %v190_v61 = vld [vmem:[#allocation2 + $0x340] sm:$0xff]  ;;  %v16239_v6 = vcombine.high %v550_v59, %v554_v60  ;;  %v16238_v12 = vcombine.low %v550_v59, %v554_v60 }
  0xb0   :  { %7870 = vmatprep.mubr.bf16.mxu0 %v20138_v2  ;;  %9414 = vmatprep.mubr.bf16.mxu1 %v20138_v2  ;;  %v20162_v11 = vcombine.high %v182_v56, %v190_v61  ;;  %v246_v20 = vld [vmem:[#allocation2 + $0x500] sm:$0xff] }
  0xb1   :  { %8010 = vmatpush1.bf16.msra.mxu0 %v16190_v3  ;;  %9554 = vmatpush1.bf16.msra.mxu1 %v16192_v4  ;;  %v558_v3 = vld [vmem:[#allocation5 + $0x6c0] sm:$0xff] }
  0xb2   :  { %8011 = vmatprep.subr.bf16.mxu0 %v16199_v5  ;;  %9555 = vmatprep.subr.bf16.mxu1 %v16201_v7  ;;  %v562_v4 = vld [vmem:[#allocation5 + $0x6e0] sm:$0xff]  ;;  %v16232_v5 = vcombine.low %v543_v46, %v547_v47  ;;  %v559_v7 = vld [vmem:[#allocation5 + $0x6c8] sm:$0xff] }
  0xb3   :  { %v16247_v14 = vcombine.high %v558_v3, %v562_v4  ;;  %v16249_v15 = vcombine.high %v559_v7, %v563_v8  ;;  %v582_v46 = vld [vmem:[#allocation5 + $0x780] sm:$0xff] }
  0xb4   :  { %v586_v47 = vld [vmem:[#allocation5 + $0x7a0] sm:$0xff] }
  0xb5   :  { %8012 = vmatpush1.bf16.msra.mxu0 %v16198_v13  ;;  %9556 = vmatpush1.bf16.msra.mxu1 %v16200_v16  ;;  %v16240_v13 = vcombine.low %v551_v62, %v555_v63  ;;  %v566_v16 = vld [vmem:[#allocation5 + $0x700] sm:$0xff]  ;;  %v16271_v59 = vcombine.high %v582_v46, %v586_v47 }
  0xb6   :  { %8013 = vmatprep.subr.bf16.mxu0 %v16207_v17  ;;  %9557 = vmatprep.subr.bf16.mxu1 %v16209_v22  ;;  %v570_v17 = vld [vmem:[#allocation5 + $0x720] sm:$0xff] }
  0xb7   :  { %7871 = vmatmul.mubr.bf16.gmra.mrb[12].mxu0 %v20144_v21  ;;  %9415 = vmatmul.mubr.bf16.gmra.mrb[12].mxu1 %v20144_v21  ;;  %v198_v22 = vld [vmem:[#allocation2 + $0x380] sm:$0xff]  ;;  %v16255_v28 = vcombine.high %v566_v16, %v570_v17  ;;  %v16254_v40 = vcombine.low %v566_v16, %v570_v17  ;;  %v16289_v17 = vcombine.high %v20120_v32, %v20122_v33  ;;  %v623_v33 = vld [vmem:[#allocation5 + $0x8c8] sm:$0xff] }
  0xb8   :  { %7880 = vmatprep.mubr.bf16.mxu0 %v20146_v24  ;;  %9424 = vmatprep.mubr.bf16.mxu1 %v20146_v24  ;;  %v590_v62 = vld [vmem:[#allocation5 + $0x7c0] sm:$0xff] }
  0xb9   :  { %8014 = vmatpush1.bf16.msra.mxu0 %v16206_v25  ;;  %9558 = vmatpush1.bf16.msra.mxu1 %v16208_v26  ;;  %v206_v25 = vld [vmem:[#allocation2 + $0x3c0] sm:$0xff]  ;;  %v16246_v26 = vcombine.low %v558_v3, %v562_v4  ;;  %v591_v3 = vld [vmem:[#allocation5 + $0x7c8] sm:$0xff] }
  0xba   :  { %8015 = vmatprep.subr.bf16.mxu0 %v16215_v27  ;;  %9559 = vmatprep.subr.bf16.mxu1 %v16217_v29  ;;  %v16248_v27 = vcombine.low %v559_v7, %v563_v8  ;;  %v20168_v29 = vcombine.low %v182_v56, %v190_v61  ;;  %v20170_v36 = vcombine.high %v198_v22, %v206_v25  ;;  %v594_v63 = vld [vmem:[#allocation5 + $0x7e0] sm:$0xff]  ;;  %v595_v4 = vld [vmem:[#allocation5 + $0x7e8] sm:$0xff] }
  0xbb   :  { %v16262_v56 = vcombine.low %v574_v34, %v578_v35  ;;  %v20176_v60 = vcombine.low %v198_v22, %v206_v25  ;;  %v16279_v7 = vcombine.high %v590_v62, %v594_v63  ;;  %v16281_v8 = vcombine.high %v591_v3, %v595_v4  ;;  %v254_v22 = vld [vmem:[#allocation2 + $0x540] sm:$0xff] }
  0xbd   :  { %8016 = vmatpush1.bf16.msra.mxu0 %v16214_v39  ;;  %9560 = vmatpush1.bf16.msra.mxu1 %v16216_v44  ;;  %v579_v39 = vld [vmem:[#allocation5 + $0x768] sm:$0xff]  ;;  %v16263_v44 = vcombine.high %v574_v34, %v578_v35  ;;  %v278_v35 = vld [vmem:[#allocation2 + $0x600] sm:$0xff] }
  0xbe   :  { %8017 = vmatprep.subr.bf16.mxu0 %v16223_v45  ;;  %9561 = vmatprep.subr.bf16.mxu1 %v16225_v49  ;;  %v16265_v45 = vcombine.high %v575_v37, %v579_v39  ;;  %v583_v49 = vld [vmem:[#allocation5 + $0x788] sm:$0xff] }
  0xbf   :  { %7881 = vmatmul.mubr.bf16.gmra.mrb[16].mxu0 %v20152_v48  ;;  %9425 = vmatmul.mubr.bf16.gmra.mrb[16].mxu1 %v20152_v48 }
  0xc0   :  { %7890 = vmatprep.mubr.bf16.mxu0 %v20154_v50  ;;  %9434 = vmatprep.mubr.bf16.mxu1 %v20154_v50 }
  0xc1   :  { %8018 = vmatpush1.bf16.msra.mxu0 %v16222_v51  ;;  %9562 = vmatpush1.bf16.msra.mxu1 %v16224_v52  ;;  %v587_v51 = vld [vmem:[#allocation5 + $0x7a8] sm:$0xff]  ;;  %v214_v52 = vld [vmem:[#allocation2 + $0x400] sm:$0xff] }
  0xc2   :  { %8019 = vmatprep.subr.bf16.mxu0 %v16231_v55  ;;  %9563 = vmatprep.subr.bf16.mxu1 %v16233_v57  ;;  %v222_v55 = vld [vmem:[#allocation2 + $0x440] sm:$0xff]  ;;  %v16264_v57 = vcombine.low %v575_v37, %v579_v39  ;;  %v16273_v61 = vcombine.high %v583_v49, %v587_v51 }
  0xc3   :  { %v20186_v16 = vcombine.low %v214_v52, %v222_v55  ;;  %v286_v37 = vld [vmem:[#allocation2 + $0x640] sm:$0xff] }
  0xc5   :  { %8020 = vmatpush1.bf16.msra.mxu0 %v16230_v1  ;;  %9564 = vmatpush1.bf16.msra.mxu1 %v16232_v5  ;;  %v20178_v1 = vcombine.high %v214_v52, %v222_v55  ;;  %v16270_v5 = vcombine.low %v582_v46, %v586_v47  ;;  %v310_v47 = vld [vmem:[#allocation2 + $0x700] sm:$0xff] }
  0xc6   :  { %8021 = vmatprep.subr.bf16.mxu0 %v16239_v6  ;;  %9565 = vmatprep.subr.bf16.mxu1 %v16241_v10  ;;  %v16272_v6 = vcombine.low %v583_v49, %v587_v51  ;;  %v230_v10 = vld [vmem:[#allocation2 + $0x480] sm:$0xff] }
  0xc7   :  { %7891 = vmatmul.mubr.bf16.gmra.mrb[20].mxu0 %v20160_v9  ;;  %9435 = vmatmul.mubr.bf16.gmra.mrb[20].mxu1 %v20160_v9  ;;  %v318_v49 = vld [vmem:[#allocation2 + $0x740] sm:$0xff] }
  0xc8   :  { %7900 = vmatprep.mubr.bf16.mxu0 %v20162_v11  ;;  %9444 = vmatprep.mubr.bf16.mxu1 %v20162_v11  ;;  %v20230_v52 = vcombine.high %v310_v47, %v318_v49  ;;  %v326_v55 = vld [vmem:[#allocation2 + $0x780] sm:$0xff] }
  0xc9   :  { %8022 = vmatpush1.bf16.msra.mxu0 %v16238_v12  ;;  %9566 = vmatpush1.bf16.msra.mxu1 %v16240_v13  ;;  %v238_v12 = vld [vmem:[#allocation2 + $0x4c0] sm:$0xff]  ;;  %v16278_v13 = vcombine.low %v590_v62, %v594_v63  ;;  %v95_v62 = vld [vmem:[#allocation2 + $0x48] sm:$0xff] }
  0xca   :  { %8023 = vmatprep.subr.bf16.mxu0 %v16247_v14  ;;  %9567 = vmatprep.subr.bf16.mxu1 %v16249_v15  ;;  %v16280_v14 = vcombine.low %v591_v3, %v595_v4  ;;  %v16287_v15 = vcombine.high %v20113_v53, %v20115_v54  ;;  %v20190_v19 = vcombine.high %v230_v10, %v238_v12  ;;  %v103_v4 = vld [vmem:[#allocation2 + $0x88] sm:$0xff]  ;;  %v630_v53 = vld [vmem:[#allocation5 + $0x900] sm:$0xff] }
  0xcb   :  { %v20196_v25 = vcombine.low %v230_v10, %v238_v12  ;;  %v607_v10 = vld [vmem:[#allocation5 + $0x848] sm:$0xff] }
  0xcc   :  { %v611_v12 = vld [vmem:[#allocation5 + $0x868] sm:$0xff] }
  0xcd   :  { %8024 = vmatpush1.bf16.msra.mxu0 %v16246_v26  ;;  %9568 = vmatpush1.bf16.msra.mxu1 %v16248_v27  ;;  %v20198_v26 = vcombine.high %v246_v20, %v254_v22  ;;  %v262_v27 = vld [vmem:[#allocation2 + $0x580] sm:$0xff] }
  0xce   :  { %8025 = vmatprep.subr.bf16.mxu0 %v16255_v28  ;;  %9569 = vmatprep.subr.bf16.mxu1 %v16257_v30  ;;  %v270_v28 = vld [vmem:[#allocation2 + $0x5c0] sm:$0xff]  ;;  %v20204_v30 = vcombine.low %v246_v20, %v254_v22  ;;  %v615_v20 = vld [vmem:[#allocation5 + $0x888] sm:$0xff]  ;;  %v16297_v22 = vcombine.high %v607_v10, %v611_v12 }
  0xcf   :  { %7901 = vmatmul.mubr.bf16.gmra.mrb[24].mxu0 %v20168_v29  ;;  %9445 = vmatmul.mubr.bf16.gmra.mrb[24].mxu1 %v20168_v29  ;;  %v20206_v34 = vcombine.high %v262_v27, %v270_v28  ;;  %v20212_v39 = vcombine.low %v262_v27, %v270_v28  ;;  %v619_v27 = vld [vmem:[#allocation5 + $0x8a8] sm:$0xff]  ;;  %v20257_v28 = vld [vmem:[#allocation5 + $0xc00] sm:$0xff] }
  0xd0   :  { %7910 = vmatprep.mubr.bf16.mxu0 %v20170_v36  ;;  %9454 = vmatprep.mubr.bf16.mxu1 %v20170_v36  ;;  %v16305_v54 = vcombine.high %v615_v20, %v619_v27 }
  0xd1   :  { %8026 = vmatpush1.bf16.msra.mxu0 %v16254_v40  ;;  %9570 = vmatpush1.bf16.msra.mxu1 %v16256_v41  ;;  %v20214_v40 = vcombine.high %v278_v35, %v286_v37  ;;  %v294_v41 = vld [vmem:[#allocation2 + $0x680] sm:$0xff] }
  0xd2   :  { %8027 = vmatprep.subr.bf16.mxu0 %v16263_v44  ;;  %9571 = vmatprep.subr.bf16.mxu1 %v16265_v45  ;;  %v302_v44 = vld [vmem:[#allocation2 + $0x6c0] sm:$0xff]  ;;  %v20220_v45 = vcombine.low %v278_v35, %v286_v37 }
  0xd3   :  { %v20222_v46 = vcombine.high %v294_v41, %v302_v44  ;;  %v20228_v51 = vcombine.low %v294_v41, %v302_v44  ;;  %v20259_v35 = vld [vmem:[#allocation5 + $0xc20] sm:$0xff]  ;;  %v20267_v44 = vld [vmem:[#allocation5 + $0xc08] sm:$0xff] }
  0xd4   :  { %v642_v41 = vld [vmem:[#allocation5 + $0x960] sm:$0xff] }
  0xd5   :  { %8028 = vmatpush1.bf16.msra.mxu0 %v16262_v56  ;;  %9572 = vmatpush1.bf16.msra.mxu1 %v16264_v57  ;;  %v334_v56 = vld [vmem:[#allocation2 + $0x7c0] sm:$0xff]  ;;  %v20236_v57 = vcombine.low %v310_v47, %v318_v49  ;;  %v20269_v47 = vld [vmem:[#allocation5 + $0xc28] sm:$0xff]  ;;  %v16296_v49 = vcombine.low %v607_v10, %v611_v12  ;;  %v16304_v10 = vcombine.low %v615_v20, %v619_v27 }
  0xd6   :  { %8029 = vmatprep.subr.bf16.mxu0 %v16271_v59  ;;  %9573 = vmatprep.subr.bf16.mxu1 %v16273_v61  ;;  %v20238_v59 = vcombine.high %v326_v55, %v334_v56  ;;  %v87_v61 = vld [vmem:[#allocation2 + $0x8] sm:$0xff]  ;;  %v20244_v63 = vcombine.low %v326_v55, %v334_v56 }
  0xd7   :  { %7911 = vmatmul.mubr.bf16.gmra.mrb[28].mxu0 %v20176_v60  ;;  %9455 = vmatmul.mubr.bf16.gmra.mrb[28].mxu1 %v20176_v60  ;;  %v20246_v3 = vcombine.high %v87_v61, %v95_v62  ;;  %v119_v55 = vld [vmem:[#allocation2 + $0x108] sm:$0xff] }
  0xd8   :  { %7920 = vmatprep.mubr.bf16.mxu0 %v20178_v1  ;;  %9464 = vmatprep.mubr.bf16.mxu1 %v20178_v1  ;;  %v127_v56 = vld [vmem:[#allocation2 + $0x148] sm:$0xff] }
  0xd9   :  { %8030 = vmatpush1.bf16.msra.mxu0 %v16270_v5  ;;  %9574 = vmatpush1.bf16.msra.mxu1 %v16272_v6  ;;  %v111_v5 = vld [vmem:[#allocation2 + $0xc8] sm:$0xff]  ;;  %v20252_v6 = vcombine.low %v87_v61, %v95_v62  ;;  %v622_v62 = vld [vmem:[#allocation5 + $0x8c0] sm:$0xff]  ;;  %v20280_v32 = vcombine.high %v119_v55, %v127_v56 }
  0xda   :  { %8031 = vmatprep.subr.bf16.mxu0 %v16279_v7  ;;  %9575 = vmatprep.subr.bf16.mxu1 %v16281_v8  ;;  %v606_v7 = vld [vmem:[#allocation5 + $0x840] sm:$0xff] }
  0xdb   :  { %23422 = vst [vmem:[#allocation16_spill] sm:$0xff] %v20252_v6  ;;  %v610_v8 = vld [vmem:[#allocation5 + $0x860] sm:$0xff]  ;;  %23425 = vst [vmem:[#allocation19_spill] sm:$0xff] %v20280_v32 }
  0xdc   :  { %v16294_v37 = vcombine.low %v606_v7, %v610_v8 }
  0xdd   :  { %8032 = vmatpush1.bf16.msra.mxu0 %v16278_v13  ;;  %9576 = vmatpush1.bf16.msra.mxu1 %v16280_v14  ;;  %v20254_v13 = vcombine.high %v103_v4, %v111_v5  ;;  %v16295_v14 = vcombine.high %v606_v7, %v610_v8  ;;  %v626_v7 = vld [vmem:[#allocation5 + $0x8e0] sm:$0xff] }
  0xde   :  { %8194 = vmatprep.subr.bf16.mxu0 %v16287_v15  ;;  %9738 = vmatprep.subr.bf16.mxu1 %v16289_v17  ;;  %v614_v15 = vld [vmem:[#allocation5 + $0x880] sm:$0xff]  ;;  %v16311_v12 = vcombine.high %v622_v62, %v626_v7 }
  0xdf   :  { %7921 = vmatmul.mubr.bf16.gmra.mrb[32].mxu0 %v20186_v16  ;;  %9465 = vmatmul.mubr.bf16.gmra.mrb[32].mxu1 %v20186_v16  ;;  %23423 = vst [vmem:[#allocation17_spill] sm:$0xff] %v20254_v13  ;;  %v618_v17 = vld [vmem:[#allocation5 + $0x8a0] sm:$0xff] }
  0xe0   :  { %7930 = vmatprep.mubr.bf16.mxu0 %v20190_v19  ;;  %9474 = vmatprep.mubr.bf16.mxu1 %v20190_v19  ;;  %v16303_v61 = vcombine.high %v614_v15, %v618_v17  ;;  %v16302_v8 = vcombine.low %v614_v15, %v618_v17  ;;  %v143_v15 = vld [vmem:[#allocation2 + $0x1c8] sm:$0xff]  ;;  %v16310_v17 = vcombine.low %v622_v62, %v626_v7 }
  0xe7   :  { %7931 = vmatmul.mubr.bf16.gmra.mrb[36].mxu0 %v20196_v25  ;;  %9475 = vmatmul.mubr.bf16.gmra.mrb[36].mxu1 %v20196_v25 }
  0xe8   :  { %7940 = vmatprep.mubr.bf16.mxu0 %v20198_v26  ;;  %9484 = vmatprep.mubr.bf16.mxu1 %v20198_v26 }
  0xef   :  { %7941 = vmatmul.mubr.bf16.gmra.mrb[40].mxu0 %v20204_v30  ;;  %9485 = vmatmul.mubr.bf16.gmra.mrb[40].mxu1 %v20204_v30 }
  0xf0   :  { %7950 = vmatprep.mubr.bf16.mxu0 %v20206_v34  ;;  %9494 = vmatprep.mubr.bf16.mxu1 %v20206_v34 }
  0xf7   :  { %7951 = vmatmul.mubr.bf16.gmra.mrb[44].mxu0 %v20212_v39  ;;  %9495 = vmatmul.mubr.bf16.gmra.mrb[44].mxu1 %v20212_v39 }
  0xf8   :  { %7960 = vmatprep.mubr.bf16.mxu0 %v20214_v40  ;;  %9504 = vmatprep.mubr.bf16.mxu1 %v20214_v40 }
  0xff   :  { %7961 = vmatmul.mubr.bf16.gmra.mrb[48].mxu0 %v20220_v45  ;;  %9505 = vmatmul.mubr.bf16.gmra.mrb[48].mxu1 %v20220_v45 }
 0x100   :  { %7970 = vmatprep.mubr.bf16.mxu0 %v20222_v46  ;;  %9514 = vmatprep.mubr.bf16.mxu1 %v20222_v46 }
 0x107   :  { %7971 = vmatmul.mubr.bf16.gmra.mrb[52].mxu0 %v20228_v51  ;;  %9515 = vmatmul.mubr.bf16.gmra.mrb[52].mxu1 %v20228_v51 }
 0x108   :  { %7980 = vmatprep.mubr.bf16.mxu0 %v20230_v52  ;;  %9524 = vmatprep.mubr.bf16.mxu1 %v20230_v52 }
 0x10f   :  { %7981 = vmatmul.mubr.bf16.gmra.mrb[56].mxu0 %v20236_v57  ;;  %9525 = vmatmul.mubr.bf16.gmra.mrb[56].mxu1 %v20236_v57 }
 0x110   :  { %7990 = vmatprep.mubr.bf16.mxu0 %v20238_v59  ;;  %9534 = vmatprep.mubr.bf16.mxu1 %v20238_v59 }
 0x117   :  { %7991 = vmatmul.mubr.bf16.gmra.mrb[60].mxu0 %v20244_v63  ;;  %9535 = vmatmul.mubr.bf16.gmra.mrb[60].mxu1 %v20244_v63 }
 0x118   :  { %8033 = vmatprep.mubr.bf16.mxu0 %v20246_v3  ;;  %9577 = vmatprep.mubr.bf16.mxu1 %v20246_v3 }
 0x11f   :  { %8034 = vmatmul.mubr.bf16.vlgmr.msra.gmra.mrb[0].mxu0 %v20252_v6  ;;  %9578 = vmatmul.mubr.bf16.vlgmr.msra.gmra.mrb[0].mxu1 %v20252_v6  ;;  %v643_v6 = vld [vmem:[#allocation5 + $0x968] sm:$0xff] }
 0x120   :  { %8195 = vmatpush1.bf16.msra.mxu0 %v16286_v31  ;;  %9739 = vmatpush1.bf16.msra.mxu1 %v16288_v38  ;;  %v20278_v31 = vcombine.low %v103_v4, %v111_v5  ;;  %v627_v38 = vld [vmem:[#allocation5 + $0x8e8] sm:$0xff]  ;;  %v634_v4 = vld [vmem:[#allocation5 + $0x920] sm:$0xff] }
 0x121   :  { %8043 = vmatprep.mubr.bf16.mxu0 %v20254_v13  ;;  %9587 = vmatprep.mubr.bf16.mxu1 %v20254_v13  ;;  %v631_v5 = vld [vmem:[#allocation5 + $0x908] sm:$0xff]  ;;  %v16312_v20 = vcombine.low %v623_v33, %v627_v38  ;;  %v16319_v27 = vcombine.high %v630_v53, %v634_v4 }
 0x122   :  { %8196 = vmatprep.subr.bf16.mxu0 %v16295_v14  ;;  %23424 = vst [vmem:[#allocation18_spill] sm:$0xff] %v20278_v31  ;;  %9740 = vmatprep.subr.bf16.mxu1 %v16297_v22  ;;  %v16313_v14 = vcombine.high %v623_v33, %v627_v38  ;;  %v635_v22 = vld [vmem:[#allocation5 + $0x928] sm:$0xff] }
 0x123   :  { %v639_v13 = vld [vmem:[#allocation5 + $0x948] sm:$0xff] }
 0x124   :  { %8197 = vmatpush1.bf16.msra.mxu0 %v16294_v37  ;;  %9741 = vmatpush1.bf16.msra.mxu1 %v16296_v49  ;;  %v135_v37 = vld [vmem:[#allocation2 + $0x188] sm:$0xff]  ;;  %v20286_v49 = vcombine.low %v119_v55, %v127_v56  ;;  %v16329_v7 = vcombine.high %v639_v13, %v643_v6  ;;  %v646_v55 = vld [vmem:[#allocation5 + $0x980] sm:$0xff] }
 0x125   :  { %8198 = vmatprep.subr.bf16.mxu0 %v16303_v61  ;;  %9742 = vmatprep.subr.bf16.mxu1 %v16305_v54  ;;  %v16321_v61 = vcombine.high %v631_v5, %v635_v22  ;;  %v638_v54 = vld [vmem:[#allocation5 + $0x940] sm:$0xff]  ;;  %v647_v33 = vld [vmem:[#allocation5 + $0x988] sm:$0xff] }
 0x126   :  { %23426 = vst [vmem:[#allocation20_spill] sm:$0xff] %v20286_v49  ;;  %v16327_v62 = vcombine.high %v638_v54, %v642_v41  ;;  %v650_v56 = vld [vmem:[#allocation5 + $0x9a0] sm:$0xff]  ;;  %v651_v38 = vld [vmem:[#allocation5 + $0x9a8] sm:$0xff] }
 0x127   :  { %8044 = vmatmul.mubr.bf16.gmra.mrb[4].mxu0 %v20278_v31  ;;  %9588 = vmatmul.mubr.bf16.gmra.mrb[4].mxu1 %v20278_v31  ;;  %v20288_v31 = vcombine.high %v135_v37, %v143_v15 }
 0x128   :  { %8053 = vmatprep.mubr.bf16.mxu0 %v20280_v32  ;;  %9597 = vmatprep.mubr.bf16.mxu1 %v20280_v32  ;;  %v16318_v32 = vcombine.low %v630_v53, %v634_v4  ;;  %v159_v53 = vld [vmem:[#allocation2 + $0x248] sm:$0xff]  ;;  %v16335_v4 = vcombine.high %v646_v55, %v650_v56 }
 0x129   :  { %8199 = vmatpush1.bf16.msra.mxu0 %v16302_v8  ;;  %9743 = vmatpush1.bf16.msra.mxu1 %v16304_v10  ;;  %23427 = vst [vmem:[#allocation21_spill] sm:$0xff] %v20288_v31  ;;  %v16320_v8 = vcombine.low %v631_v5, %v635_v22  ;;  %v151_v10 = vld [vmem:[#allocation2 + $0x208] sm:$0xff]  ;;  %v20294_v5 = vcombine.low %v135_v37, %v143_v15  ;;  %v666_v37 = vld [vmem:[#allocation5 + $0xa20] sm:$0xff] }
 0x12a   :  { %8200 = vmatprep.subr.bf16.mxu0 %v16311_v12  ;;  %9744 = vmatprep.subr.bf16.mxu1 %v16313_v14  ;;  %v16326_v12 = vcombine.low %v638_v54, %v642_v41  ;;  %v16328_v14 = vcombine.low %v639_v13, %v643_v6  ;;  %v16337_v22 = vcombine.high %v647_v33, %v651_v38  ;;  %v662_v13 = vld [vmem:[#allocation5 + $0xa00] sm:$0xff]  ;;  %v663_v15 = vld [vmem:[#allocation5 + $0xa08] sm:$0xff] }
 0x12b   :  { %23428 = vst [vmem:[#allocation22_spill] sm:$0xff] %v20294_v5  ;;  %v667_v54 = vld [vmem:[#allocation5 + $0xa28] sm:$0xff] }
 0x12d   :  { %8201 = vmatpush1.bf16.msra.mxu0 %v16310_v17  ;;  %9745 = vmatpush1.bf16.msra.mxu1 %v16312_v20  ;;  %v654_v17 = vld [vmem:[#allocation5 + $0x9c0] sm:$0xff] }
 0x12e   :  { %8202 = vmatprep.subr.bf16.mxu0 %v16319_v27  ;;  %9746 = vmatprep.subr.bf16.mxu1 %v16321_v61  ;;  %v658_v20 = vld [vmem:[#allocation5 + $0x9e0] sm:$0xff]  ;;  %v20296_v27 = vcombine.high %v151_v10, %v159_v53  ;;  %v655_v61 = vld [vmem:[#allocation5 + $0x9c8] sm:$0xff] }
 0x12f   :  { %8054 = vmatmul.mubr.bf16.gmra.mrb[8].mxu0 %v20286_v49  ;;  %9598 = vmatmul.mubr.bf16.gmra.mrb[8].mxu1 %v20286_v49  ;;  %v659_v49 = vld [vmem:[#allocation5 + $0x9e8] sm:$0xff]  ;;  %v16343_v41 = vcombine.high %v654_v17, %v658_v20 }
 0x130   :  { %8063 = vmatprep.mubr.bf16.mxu0 %v20288_v31  ;;  %9607 = vmatprep.mubr.bf16.mxu1 %v20288_v31  ;;  %23429 = vst [vmem:[#allocation23_spill] sm:$0xff] %v20296_v27  ;;  %v16334_v31 = vcombine.low %v646_v55, %v650_v56  ;;  %v16345_v6 = vcombine.high %v655_v61, %v659_v49 }
 0x131   :  { %8203 = vmatpush1.bf16.msra.mxu0 %v16318_v32  ;;  %9747 = vmatpush1.bf16.msra.mxu1 %v16320_v8  ;;  %v16336_v32 = vcombine.low %v647_v33, %v651_v38  ;;  %v167_v8 = vld [vmem:[#allocation2 + $0x288] sm:$0xff]  ;;  %v16344_v55 = vcombine.low %v655_v61, %v659_v49  ;;  %v16351_v56 = vcombine.high %v662_v13, %v666_v37 }
 0x132   :  { %8204 = vmatprep.subr.bf16.mxu0 %v16327_v62  ;;  %9748 = vmatprep.subr.bf16.mxu1 %v16329_v7  ;;  %v175_v62 = vld [vmem:[#allocation2 + $0x2c8] sm:$0xff]  ;;  %v16342_v7 = vcombine.low %v654_v17, %v658_v20  ;;  %v20302_v33 = vcombine.low %v151_v10, %v159_v53  ;;  %v16353_v38 = vcombine.high %v663_v15, %v667_v54  ;;  %v678_v10 = vld [vmem:[#allocation5 + $0xa80] sm:$0xff] }
 0x133   :  { %v682_v53 = vld [vmem:[#allocation5 + $0xaa0] sm:$0xff]  ;;  %v679_v20 = vld [vmem:[#allocation5 + $0xa88] sm:$0xff] }
 0x134   :  { %23430 = vst [vmem:[#allocation24_spill] sm:$0xff] %v20302_v33  ;;  %v683_v61 = vld [vmem:[#allocation5 + $0xaa8] sm:$0xff] }
 0x135   :  { %8205 = vmatpush1.bf16.msra.mxu0 %v16326_v12  ;;  %9749 = vmatpush1.bf16.msra.mxu1 %v16328_v14  ;;  %v670_v12 = vld [vmem:[#allocation5 + $0xa40] sm:$0xff] }
 0x136   :  { %8206 = vmatprep.subr.bf16.mxu0 %v16335_v4  ;;  %9750 = vmatprep.subr.bf16.mxu1 %v16337_v22  ;;  %v674_v14 = vld [vmem:[#allocation5 + $0xa60] sm:$0xff]  ;;  %v20304_v4 = vcombine.high %v167_v8, %v175_v62  ;;  %v671_v22 = vld [vmem:[#allocation5 + $0xa48] sm:$0xff] }
 0x137   :  { %8064 = vmatmul.mubr.bf16.gmra.mrb[12].mxu0 %v20294_v5  ;;  %9608 = vmatmul.mubr.bf16.gmra.mrb[12].mxu1 %v20294_v5  ;;  %v675_v5 = vld [vmem:[#allocation5 + $0xa68] sm:$0xff]  ;;  %v16359_v17 = vcombine.high %v670_v12, %v674_v14 }
 0x138   :  { %8073 = vmatprep.mubr.bf16.mxu0 %v20296_v27  ;;  %9617 = vmatprep.mubr.bf16.mxu1 %v20296_v27  ;;  %23431 = vst [vmem:[#allocation25_spill] sm:$0xff] %v20304_v4  ;;  %v16350_v27 = vcombine.low %v662_v13, %v666_v37  ;;  %v16361_v49 = vcombine.high %v671_v22, %v675_v5 }
 0x139   :  { %8207 = vmatpush1.bf16.msra.mxu0 %v16334_v31  ;;  %9751 = vmatpush1.bf16.msra.mxu1 %v16336_v32  ;;  %v16352_v31 = vcombine.low %v663_v15, %v667_v54  ;;  %v183_v32 = vld [vmem:[#allocation2 + $0x308] sm:$0xff]  ;;  %v16360_v13 = vcombine.low %v671_v22, %v675_v5  ;;  %v16367_v37 = vcombine.high %v678_v10, %v682_v53 }
 0x13a   :  { %8208 = vmatprep.subr.bf16.mxu0 %v16343_v41  ;;  %9752 = vmatprep.subr.bf16.mxu1 %v16345_v6  ;;  %v191_v41 = vld [vmem:[#allocation2 + $0x348] sm:$0xff]  ;;  %v16358_v6 = vcombine.low %v670_v12, %v674_v14  ;;  %v20310_v15 = vcombine.low %v167_v8, %v175_v62  ;;  %v16369_v54 = vcombine.high %v679_v20, %v683_v61  ;;  %v694_v8 = vld [vmem:[#allocation5 + $0xb00] sm:$0xff] }
 0x13b   :  { %v698_v62 = vld [vmem:[#allocation5 + $0xb20] sm:$0xff]  ;;  %v695_v14 = vld [vmem:[#allocation5 + $0xb08] sm:$0xff] }
 0x13c   :  { %23432 = vst [vmem:[#allocation26_spill] sm:$0xff] %v20310_v15  ;;  %v699_v22 = vld [vmem:[#allocation5 + $0xb28] sm:$0xff] }
 0x13d   :  { %8209 = vmatpush1.bf16.msra.mxu0 %v16342_v7  ;;  %9753 = vmatpush1.bf16.msra.mxu1 %v16344_v55  ;;  %v686_v7 = vld [vmem:[#allocation5 + $0xac0] sm:$0xff] }
 0x13e   :  { %8210 = vmatprep.subr.bf16.mxu0 %v16351_v56  ;;  %9754 = vmatprep.subr.bf16.mxu1 %v16353_v38  ;;  %v690_v55 = vld [vmem:[#allocation5 + $0xae0] sm:$0xff]  ;;  %v20312_v56 = vcombine.high %v183_v32, %v191_v41  ;;  %v687_v38 = vld [vmem:[#allocation5 + $0xac8] sm:$0xff] }
 0x13f   :  { %8074 = vmatmul.mubr.bf16.gmra.mrb[16].mxu0 %v20302_v33  ;;  %9618 = vmatmul.mubr.bf16.gmra.mrb[16].mxu1 %v20302_v33  ;;  %v691_v33 = vld [vmem:[#allocation5 + $0xae8] sm:$0xff]  ;;  %v16375_v12 = vcombine.high %v686_v7, %v690_v55 }
 0x140   :  { %8083 = vmatprep.mubr.bf16.mxu0 %v20304_v4  ;;  %9627 = vmatprep.mubr.bf16.mxu1 %v20304_v4  ;;  %23433 = vst [vmem:[#allocation27_spill] sm:$0xff] %v20312_v56  ;;  %v16366_v4 = vcombine.low %v678_v10, %v682_v53  ;;  %v16377_v5 = vcombine.high %v687_v38, %v691_v33 }
 0x141   :  { %8211 = vmatpush1.bf16.msra.mxu0 %v16350_v27  ;;  %9755 = vmatpush1.bf16.msra.mxu1 %v16352_v31  ;;  %v16368_v27 = vcombine.low %v679_v20, %v683_v61  ;;  %v199_v31 = vld [vmem:[#allocation2 + $0x388] sm:$0xff]  ;;  %v16376_v10 = vcombine.low %v687_v38, %v691_v33  ;;  %v16383_v53 = vcombine.high %v694_v8, %v698_v62 }
 0x142   :  { %8212 = vmatprep.subr.bf16.mxu0 %v16359_v17  ;;  %9756 = vmatprep.subr.bf16.mxu1 %v16361_v49  ;;  %v207_v17 = vld [vmem:[#allocation2 + $0x3c8] sm:$0xff]  ;;  %v16374_v49 = vcombine.low %v686_v7, %v690_v55  ;;  %v20318_v20 = vcombine.low %v183_v32, %v191_v41  ;;  %v16385_v61 = vcombine.high %v695_v14, %v699_v22  ;;  %v710_v32 = vld [vmem:[#allocation5 + $0xb80] sm:$0xff] }
 0x143   :  { %v714_v41 = vld [vmem:[#allocation5 + $0xba0] sm:$0xff]  ;;  %v711_v55 = vld [vmem:[#allocation5 + $0xb88] sm:$0xff] }
 0x144   :  { %23434 = vst [vmem:[#allocation28_spill] sm:$0xff] %v20318_v20  ;;  %v715_v38 = vld [vmem:[#allocation5 + $0xba8] sm:$0xff] }
 0x145   :  { %8213 = vmatpush1.bf16.msra.mxu0 %v16358_v6  ;;  %9757 = vmatpush1.bf16.msra.mxu1 %v16360_v13  ;;  %v702_v6 = vld [vmem:[#allocation5 + $0xb40] sm:$0xff] }
 0x146   :  { %8214 = vmatprep.subr.bf16.mxu0 %v16367_v37  ;;  %9758 = vmatprep.subr.bf16.mxu1 %v16369_v54  ;;  %v706_v13 = vld [vmem:[#allocation5 + $0xb60] sm:$0xff]  ;;  %v20320_v37 = vcombine.high %v199_v31, %v207_v17  ;;  %v703_v54 = vld [vmem:[#allocation5 + $0xb48] sm:$0xff] }
 0x147   :  { %8084 = vmatmul.mubr.bf16.gmra.mrb[20].mxu0 %v20310_v15  ;;  %9628 = vmatmul.mubr.bf16.gmra.mrb[20].mxu1 %v20310_v15  ;;  %v707_v15 = vld [vmem:[#allocation5 + $0xb68] sm:$0xff]  ;;  %v16391_v7 = vcombine.high %v702_v6, %v706_v13 }
 0x148   :  { %8093 = vmatprep.mubr.bf16.mxu0 %v20312_v56  ;;  %9637 = vmatprep.mubr.bf16.mxu1 %v20312_v56  ;;  %23435 = vst [vmem:[#allocation29_spill] sm:$0xff] %v20320_v37  ;;  %v16382_v56 = vcombine.low %v694_v8, %v698_v62  ;;  %v16393_v33 = vcombine.high %v703_v54, %v707_v15 }
 0x149   :  { %8215 = vmatpush1.bf16.msra.mxu0 %v16366_v4  ;;  %9759 = vmatpush1.bf16.msra.mxu1 %v16368_v27  ;;  %v16384_v4 = vcombine.low %v695_v14, %v699_v22  ;;  %v215_v27 = vld [vmem:[#allocation2 + $0x408] sm:$0xff]  ;;  %v16392_v8 = vcombine.low %v703_v54, %v707_v15  ;;  %v16399_v62 = vcombine.high %v710_v32, %v714_v41 }
 0x14a   :  { %8216 = vmatprep.subr.bf16.mxu0 %v16375_v12  ;;  %9760 = vmatprep.subr.bf16.mxu1 %v16377_v5  ;;  %v223_v12 = vld [vmem:[#allocation2 + $0x448] sm:$0xff]  ;;  %v16390_v5 = vcombine.low %v702_v6, %v706_v13  ;;  %v20326_v14 = vcombine.low %v199_v31, %v207_v17  ;;  %v16401_v22 = vcombine.high %v711_v55, %v715_v38 }
 0x14b   :  { %v231_v31 = vld [vmem:[#allocation2 + $0x488] sm:$0xff] }
 0x14c   :  { %23436 = vst [vmem:[#allocation30_spill] sm:$0xff] %v20326_v14  ;;  %v239_v17 = vld [vmem:[#allocation2 + $0x4c8] sm:$0xff] }
 0x14d   :  { %8217 = vmatpush1.bf16.msra.mxu0 %v16374_v49  ;;  %9761 = vmatpush1.bf16.msra.mxu1 %v16376_v10  ;;  %v718_v49 = vld [vmem:[#allocation5 + $0xbc0] sm:$0xff] }
 0x14e   :  { %8218 = vmatprep.subr.bf16.mxu0 %v16383_v53  ;;  %9762 = vmatprep.subr.bf16.mxu1 %v16385_v61  ;;  %v722_v10 = vld [vmem:[#allocation5 + $0xbe0] sm:$0xff]  ;;  %v20328_v53 = vcombine.high %v215_v27, %v223_v12  ;;  %v719_v61 = vld [vmem:[#allocation5 + $0xbc8] sm:$0xff] }
 0x14f   :  { %8094 = vmatmul.mubr.bf16.gmra.mrb[24].mxu0 %v20318_v20  ;;  %9638 = vmatmul.mubr.bf16.gmra.mrb[24].mxu1 %v20318_v20  ;;  %v723_v20 = vld [vmem:[#allocation5 + $0xbe8] sm:$0xff]  ;;  %v16407_v6 = vcombine.high %v718_v49, %v722_v10  ;;  %v16406_v13 = vcombine.low %v718_v49, %v722_v10 }
 0x150   :  { %8103 = vmatprep.mubr.bf16.mxu0 %v20320_v37  ;;  %9647 = vmatprep.mubr.bf16.mxu1 %v20320_v37  ;;  %23437 = vst [vmem:[#allocation31_spill] sm:$0xff] %v20328_v53  ;;  %v16398_v37 = vcombine.low %v710_v32, %v714_v41  ;;  %v16409_v15 = vcombine.high %v719_v61, %v723_v20  ;;  %v295_v10 = vld [vmem:[#allocation2 + $0x688] sm:$0xff] }
 0x151   :  { %8219 = vmatpush1.bf16.msra.mxu0 %v16382_v56  ;;  %9763 = vmatpush1.bf16.msra.mxu1 %v16384_v4  ;;  %v16400_v56 = vcombine.low %v711_v55, %v715_v38  ;;  %v16408_v54 = vcombine.low %v719_v61, %v723_v20  ;;  %v16415_v4 = vcombine.high %v20257_v28, %v20259_v35  ;;  %v247_v20 = vld [vmem:[#allocation2 + $0x508] sm:$0xff] }
 0x152   :  { %8220 = vmatprep.subr.bf16.mxu0 %v16391_v7  ;;  %9764 = vmatprep.subr.bf16.mxu1 %v16393_v33  ;;  %v20336_v7 = vcombine.low %v215_v27, %v223_v12  ;;  %v16417_v33 = vcombine.high %v20267_v44, %v20269_v47  ;;  %v20340_v32 = vcombine.high %v231_v31, %v239_v17  ;;  %v263_v38 = vld [vmem:[#allocation2 + $0x588] sm:$0xff] }
 0x153   :  { %v20346_v41 = vcombine.low %v231_v31, %v239_v17  ;;  %v271_v27 = vld [vmem:[#allocation2 + $0x5c8] sm:$0xff] }
 0x154   :  { %23438 = vst [vmem:[#allocation32_spill] sm:$0xff] %v20336_v7  ;;  %23439 = vst [vmem:[#allocation33_spill] sm:$0xff] %v20340_v32  ;;  %v303_v61 = vld [vmem:[#allocation2 + $0x6c8] sm:$0xff] }
 0x155   :  { %8221 = vmatpush1.bf16.msra.mxu0 %v16390_v5  ;;  %9765 = vmatpush1.bf16.msra.mxu1 %v16392_v8  ;;  %23440 = vst [vmem:[#allocation34_spill] sm:$0xff] %v20346_v41  ;;  %v20356_v5 = vcombine.high %v263_v38, %v271_v27  ;;  %v279_v8 = vld [vmem:[#allocation2 + $0x608] sm:$0xff]  ;;  %v20378_v17 = vcombine.low %v295_v10, %v303_v61 }
 0x156   :  { %8222 = vmatprep.subr.bf16.mxu0 %v16399_v62  ;;  %9766 = vmatprep.subr.bf16.mxu1 %v16401_v22  ;;  %v287_v62 = vld [vmem:[#allocation2 + $0x648] sm:$0xff]  ;;  %v20362_v22 = vcombine.low %v263_v38, %v271_v27  ;;  %v96_v38 = vld [vmem:[#allocation2 + $0x50] sm:$0xff] }
 0x157   :  { %8104 = vmatmul.mubr.bf16.gmra.mrb[28].mxu0 %v20326_v14  ;;  %9648 = vmatmul.mubr.bf16.gmra.mrb[28].mxu1 %v20326_v14  ;;  %23443 = vst [vmem:[#allocation37_spill] sm:$0xff] %v20356_v5  ;;  %v20364_v49 = vcombine.high %v279_v8, %v287_v62  ;;  %v319_v31 = vld [vmem:[#allocation2 + $0x748] sm:$0xff]  ;;  %23448 = vst [vmem:[#allocation42_spill] sm:$0xff] %v20378_v17 }
 0x158   :  { %8113 = vmatprep.mubr.bf16.mxu0 %v20328_v53  ;;  %9657 = vmatprep.mubr.bf16.mxu1 %v20328_v53  ;;  %23444 = vst [vmem:[#allocation38_spill] sm:$0xff] %v20362_v22  ;;  %v767_v53 = vld [vmem:[#allocation5 + $0xd48] sm:$0xff] }
 0x159   :  { %8223 = vmatpush1.bf16.msra.mxu0 %v16398_v37  ;;  %9767 = vmatpush1.bf16.msra.mxu1 %v16400_v56  ;;  %v255_v37 = vld [vmem:[#allocation2 + $0x548] sm:$0xff]  ;;  %23445 = vst [vmem:[#allocation39_spill] sm:$0xff] %v20364_v49  ;;  %v20370_v56 = vcombine.low %v279_v8, %v287_v62  ;;  %v104_v62 = vld [vmem:[#allocation2 + $0x90] sm:$0xff] }
 0x15a   :  { %8224 = vmatprep.subr.bf16.mxu0 %v16407_v6  ;;  %9768 = vmatprep.subr.bf16.mxu1 %v16409_v15  ;;  %v20348_v55 = vcombine.high %v247_v20, %v255_v37  ;;  %v20354_v12 = vcombine.low %v247_v20, %v255_v37  ;;  %v20372_v6 = vcombine.high %v295_v10, %v303_v61  ;;  %v311_v15 = vld [vmem:[#allocation2 + $0x708] sm:$0xff]  ;;  %v88_v37 = vld [vmem:[#allocation2 + $0x10] sm:$0xff] }
 0x15b   :  { %23446 = vst [vmem:[#allocation40_spill] sm:$0xff] %v20370_v56  ;;  %v20396_v8 = vcombine.high %v88_v37, %v96_v38  ;;  %v112_v10 = vld [vmem:[#allocation2 + $0xd0] sm:$0xff]  ;;  %v20402_v61 = vcombine.low %v88_v37, %v96_v38  ;;  %v23456_v37 = vcombine.low %v20257_v28, %v20259_v35  ;;  %v771_v14 = vld [vmem:[#allocation5 + $0xd68] sm:$0xff] }
 0x15c   :  { %23441 = vst [vmem:[#allocation35_spill] sm:$0xff] %v20348_v55  ;;  %23442 = vst [vmem:[#allocation36_spill] sm:$0xff] %v20354_v12 }
 0x15d   :  { %8225 = vmatpush1.bf16.msra.mxu0 %v16406_v13  ;;  %9769 = vmatpush1.bf16.msra.mxu1 %v16408_v54  ;;  %23447 = vst [vmem:[#allocation41_spill] sm:$0xff] %v20372_v6  ;;  %v20380_v13 = vcombine.high %v311_v15, %v319_v31  ;;  %v327_v54 = vld [vmem:[#allocation2 + $0x788] sm:$0xff]  ;;  %23453 = vst [vmem:[#allocation47_spill] sm:$0xff] %v20396_v8 }
 0x15e   :  { %8387 = vmatprep.subr.bf16.mxu0 %v16415_v4  ;;  %9931 = vmatprep.subr.bf16.mxu1 %v16417_v33  ;;  %v335_v4 = vld [vmem:[#allocation2 + $0x7c8] sm:$0xff]  ;;  %v20386_v33 = vcombine.low %v311_v15, %v319_v31  ;;  %23454 = vst [vmem:[#allocation48_spill] sm:$0xff] %v20402_v61  ;;  %v734_v15 = vld [vmem:[#allocation5 + $0xc40] sm:$0xff] }
 0x15f   :  { %8114 = vmatmul.mubr.bf16.gmra.mrb[32].mxu0 %v20336_v7  ;;  %9658 = vmatmul.mubr.bf16.gmra.mrb[32].mxu1 %v20336_v7  ;;  %23449 = vst [vmem:[#allocation43_spill] sm:$0xff] %v20380_v13  ;;  %v20388_v20 = vcombine.high %v327_v54, %v335_v4  ;;  %v20394_v27 = vcombine.low %v327_v54, %v335_v4  ;;  %v738_v31 = vld [vmem:[#allocation5 + $0xc60] sm:$0xff] }
 0x160   :  { %8123 = vmatprep.mubr.bf16.mxu0 %v20340_v32  ;;  %9667 = vmatprep.mubr.bf16.mxu1 %v20340_v32  ;;  %23450 = vst [vmem:[#allocation44_spill] sm:$0xff] %v20386_v33  ;;  %v20404_v54 = vcombine.high %v104_v62, %v112_v10  ;;  %v16423_v4 = vcombine.high %v734_v15, %v738_v31  ;;  %v128_v32 = vld [vmem:[#allocation2 + $0x150] sm:$0xff] }
 0x161   :  { %23451 = vst [vmem:[#allocation45_spill] sm:$0xff] %v20388_v20  ;;  %23452 = vst [vmem:[#allocation46_spill] sm:$0xff] %v20394_v27  ;;  %v16422_v38 = vcombine.low %v734_v15, %v738_v31  ;;  %v20428_v15 = vcombine.low %v104_v62, %v112_v10  ;;  %v750_v31 = vld [vmem:[#allocation5 + $0xcc0] sm:$0xff]  ;;  %v763_v10 = vld [vmem:[#allocation5 + $0xd28] sm:$0xff] }
 0x162   :  { %23455 = vst [vmem:[#allocation49_spill] sm:$0xff] %v20404_v54  ;;  %v762_v62 = vld [vmem:[#allocation5 + $0xd20] sm:$0xff] }
 0x163   :  { %23458 = vst [vmem:[#allocation50_spill] sm:$0xff] %v20428_v15 }
 0x167   :  { %8124 = vmatmul.mubr.bf16.gmra.mrb[36].mxu0 %v20346_v41  ;;  %9668 = vmatmul.mubr.bf16.gmra.mrb[36].mxu1 %v20346_v41 }
 0x168   :  { %8133 = vmatprep.mubr.bf16.mxu0 %v20348_v55  ;;  %9677 = vmatprep.mubr.bf16.mxu1 %v20348_v55  ;;  %v23457_v55 = vcombine.low %v20267_v44, %v20269_v47  ;;  %v751_v47 = vld [vmem:[#allocation5 + $0xcc8] sm:$0xff] }
 0x16f   :  { %8134 = vmatmul.mubr.bf16.gmra.mrb[40].mxu0 %v20354_v12  ;;  %9678 = vmatmul.mubr.bf16.gmra.mrb[40].mxu1 %v20354_v12  ;;  %v20419_v12 = vld [vmem:[#allocation5 + $0x1028] sm:$0xff] }
 0x170   :  { %8143 = vmatprep.mubr.bf16.mxu0 %v20356_v5  ;;  %9687 = vmatprep.mubr.bf16.mxu1 %v20356_v5  ;;  %v20417_v5 = vld [vmem:[#allocation5 + $0x1008] sm:$0xff] }
 0x177   :  { %8144 = vmatmul.mubr.bf16.gmra.mrb[44].mxu0 %v20362_v22  ;;  %9688 = vmatmul.mubr.bf16.gmra.mrb[44].mxu1 %v20362_v22  ;;  %v758_v22 = vld [vmem:[#allocation5 + $0xd00] sm:$0xff] }
 0x178   :  { %8153 = vmatprep.mubr.bf16.mxu0 %v20364_v49  ;;  %9697 = vmatprep.mubr.bf16.mxu1 %v20364_v49  ;;  %v20407_v49 = vld [vmem:[#allocation5 + $0x1000] sm:$0xff] }
 0x17f   :  { %8154 = vmatmul.mubr.bf16.gmra.mrb[48].mxu0 %v20370_v56  ;;  %9698 = vmatmul.mubr.bf16.gmra.mrb[48].mxu1 %v20370_v56  ;;  %v747_v56 = vld [vmem:[#allocation5 + $0xca8] sm:$0xff] }
 0x180   :  { %8163 = vmatprep.mubr.bf16.mxu0 %v20372_v6  ;;  %9707 = vmatprep.mubr.bf16.mxu1 %v20372_v6  ;;  %v743_v6 = vld [vmem:[#allocation5 + $0xc88] sm:$0xff] }
 0x181   :  { %v16433_v35 = vcombine.high %v743_v6, %v747_v56 }
 0x187   :  { %8164 = vmatmul.mubr.bf16.gmra.mrb[52].mxu0 %v20378_v17  ;;  %9708 = vmatmul.mubr.bf16.gmra.mrb[52].mxu1 %v20378_v17  ;;  %v746_v17 = vld [vmem:[#allocation5 + $0xca0] sm:$0xff] }
 0x188   :  { %8173 = vmatprep.mubr.bf16.mxu0 %v20380_v13  ;;  %9717 = vmatprep.mubr.bf16.mxu1 %v20380_v13  ;;  %v742_v13 = vld [vmem:[#allocation5 + $0xc80] sm:$0xff] }
 0x189   :  { %v16431_v7 = vcombine.high %v742_v13, %v746_v17 }
 0x18f   :  { %8174 = vmatmul.mubr.bf16.gmra.mrb[56].mxu0 %v20386_v33  ;;  %9718 = vmatmul.mubr.bf16.gmra.mrb[56].mxu1 %v20386_v33  ;;  %v739_v33 = vld [vmem:[#allocation5 + $0xc68] sm:$0xff] }
 0x190   :  { %8183 = vmatprep.mubr.bf16.mxu0 %v20388_v20  ;;  %9727 = vmatprep.mubr.bf16.mxu1 %v20388_v20  ;;  %v735_v20 = vld [vmem:[#allocation5 + $0xc48] sm:$0xff] }
 0x191   :  { %v16424_v41 = vcombine.low %v735_v20, %v739_v33 }
 0x197   :  { %8184 = vmatmul.mubr.bf16.gmra.mrb[60].mxu0 %v20394_v27  ;;  %9728 = vmatmul.mubr.bf16.gmra.mrb[60].mxu1 %v20394_v27  ;;  %v16425_v27 = vcombine.high %v735_v20, %v739_v33  ;;  %v16430_v33 = vcombine.low %v742_v13, %v746_v17  ;;  %v16432_v20 = vcombine.low %v743_v6, %v747_v56  ;;  %v144_v17 = vld [vmem:[#allocation2 + $0x1d0] sm:$0xff] }
 0x198   :  { %8226 = vmatprep.mubr.bf16.mxu0 %v20396_v8  ;;  %9770 = vmatprep.mubr.bf16.mxu1 %v20396_v8  ;;  %v20409_v8 = vld [vmem:[#allocation5 + $0x1020] sm:$0xff]  ;;  %v16447_v6 = vcombine.high %v758_v22, %v762_v62 }
 0x19f   :  { %8227 = vmatmul.mubr.bf16.vlgmr.msra.gmra.mrb[0].mxu0 %v20402_v61  ;;  %9771 = vmatmul.mubr.bf16.vlgmr.msra.gmra.mrb[0].mxu1 %v20402_v61  ;;  %v120_v61 = vld [vmem:[#allocation2 + $0x110] sm:$0xff] }
 0x1a0   :  { %8388 = vmatpush1.bf16.msra.mxu0 %v23456_v37  ;;  %9932 = vmatpush1.bf16.msra.mxu1 %v23457_v55  ;;  %v754_v37 = vld [vmem:[#allocation5 + $0xce0] sm:$0xff]  ;;  %v20430_v44 = vcombine.high %v120_v61, %v128_v32  ;;  %v755_v55 = vld [vmem:[#allocation5 + $0xce8] sm:$0xff]  ;;  %v20436_v13 = vcombine.low %v120_v61, %v128_v32 }
 0x1a1   :  { %8236 = vmatprep.mubr.bf16.mxu0 %v20404_v54  ;;  %9780 = vmatprep.mubr.bf16.mxu1 %v20404_v54  ;;  %v16439_v28 = vcombine.high %v750_v31, %v754_v37  ;;  %v16440_v56 = vcombine.low %v751_v47, %v755_v55  ;;  %v774_v32 = vld [vmem:[#allocation5 + $0xd80] sm:$0xff] }
 0x1a2   :  { %8389 = vmatprep.subr.bf16.mxu0 %v16423_v4  ;;  %9933 = vmatprep.subr.bf16.mxu1 %v16425_v27  ;;  %23459 = vst [vmem:[#allocation51_spill] sm:$0xff] %v20430_v44  ;;  %v16441_v4 = vcombine.high %v751_v47, %v755_v55  ;;  %v759_v27 = vld [vmem:[#allocation5 + $0xd08] sm:$0xff]  ;;  %23460 = vst [vmem:[#allocation52_spill] sm:$0xff] %v20436_v13  ;;  %v778_v61 = vld [vmem:[#allocation5 + $0xda0] sm:$0xff] }
 0x1a3   :  { %v779_v47 = vld [vmem:[#allocation5 + $0xda8] sm:$0xff]  ;;  %v152_v55 = vld [vmem:[#allocation2 + $0x210] sm:$0xff] }
 0x1a4   :  { %8390 = vmatpush1.bf16.msra.mxu0 %v16422_v38  ;;  %9934 = vmatpush1.bf16.msra.mxu1 %v16424_v41  ;;  %v136_v41 = vld [vmem:[#allocation2 + $0x190] sm:$0xff]  ;;  %v16449_v38 = vcombine.high %v759_v27, %v763_v10 }
 0x1a5   :  { %8391 = vmatprep.subr.bf16.mxu0 %v16431_v7  ;;  %9935 = vmatprep.subr.bf16.mxu1 %v16433_v35  ;;  %v16438_v7 = vcombine.low %v750_v31, %v754_v37  ;;  %v766_v35 = vld [vmem:[#allocation5 + $0xd40] sm:$0xff]  ;;  %v20438_v54 = vcombine.high %v136_v41, %v144_v17  ;;  %v775_v37 = vld [vmem:[#allocation5 + $0xd88] sm:$0xff] }
 0x1a7   :  { %8237 = vmatmul.mubr.bf16.gmra.mrb[4].mxu0 %v20428_v15  ;;  %9781 = vmatmul.mubr.bf16.gmra.mrb[4].mxu1 %v20428_v15  ;;  %v770_v15 = vld [vmem:[#allocation5 + $0xd60] sm:$0xff]  ;;  %23461 = vst [vmem:[#allocation53_spill] sm:$0xff] %v20438_v54 }
 0x1a8   :  { %8246 = vmatprep.mubr.bf16.mxu0 %v20430_v44  ;;  %9790 = vmatprep.mubr.bf16.mxu1 %v20430_v44  ;;  %v16446_v44 = vcombine.low %v758_v22, %v762_v62  ;;  %v16455_v31 = vcombine.high %v766_v35, %v770_v15  ;;  %v160_v22 = vld [vmem:[#allocation2 + $0x250] sm:$0xff]  ;;  %v16463_v62 = vcombine.high %v774_v32, %v778_v61 }
 0x1a9   :  { %8392 = vmatpush1.bf16.msra.mxu0 %v16430_v33  ;;  %9936 = vmatpush1.bf16.msra.mxu1 %v16432_v20  ;;  %v16448_v33 = vcombine.low %v759_v27, %v763_v10  ;;  %v16454_v20 = vcombine.low %v766_v35, %v770_v15  ;;  %v20444_v27 = vcombine.low %v136_v41, %v144_v17  ;;  %v794_v41 = vld [vmem:[#allocation5 + $0xe20] sm:$0xff]  ;;  %v791_v17 = vld [vmem:[#allocation5 + $0xe08] sm:$0xff] }
 0x1aa   :  { %8393 = vmatprep.subr.bf16.mxu0 %v16439_v28  ;;  %9937 = vmatprep.subr.bf16.mxu1 %v16441_v4  ;;  %v16457_v28 = vcombine.high %v767_v53, %v771_v14  ;;  %v16456_v4 = vcombine.low %v767_v53, %v771_v14  ;;  %v16465_v10 = vcombine.high %v775_v37, %v779_v47  ;;  %v790_v53 = vld [vmem:[#allocation5 + $0xe00] sm:$0xff]  ;;  %v795_v35 = vld [vmem:[#allocation5 + $0xe28] sm:$0xff] }
 0x1ab   :  { %23462 = vst [vmem:[#allocation54_spill] sm:$0xff] %v20444_v27 }
 0x1ad   :  { %8394 = vmatpush1.bf16.msra.mxu0 %v16438_v7  ;;  %9938 = vmatpush1.bf16.msra.mxu1 %v16440_v56  ;;  %v782_v7 = vld [vmem:[#allocation5 + $0xdc0] sm:$0xff] }
 0x1ae   :  { %8395 = vmatprep.subr.bf16.mxu0 %v16447_v6  ;;  %9939 = vmatprep.subr.bf16.mxu1 %v16449_v38  ;;  %v786_v56 = vld [vmem:[#allocation5 + $0xde0] sm:$0xff]  ;;  %v20446_v6 = vcombine.high %v152_v55, %v160_v22  ;;  %v783_v38 = vld [vmem:[#allocation5 + $0xdc8] sm:$0xff] }
 0x1af   :  { %8247 = vmatmul.mubr.bf16.gmra.mrb[8].mxu0 %v20436_v13  ;;  %9791 = vmatmul.mubr.bf16.gmra.mrb[8].mxu1 %v20436_v13  ;;  %v787_v13 = vld [vmem:[#allocation5 + $0xde8] sm:$0xff]  ;;  %v16471_v15 = vcombine.high %v782_v7, %v786_v56 }
 0x1b0   :  { %8256 = vmatprep.mubr.bf16.mxu0 %v20438_v54  ;;  %9800 = vmatprep.mubr.bf16.mxu1 %v20438_v54  ;;  %23463 = vst [vmem:[#allocation55_spill] sm:$0xff] %v20446_v6  ;;  %v16462_v54 = vcombine.low %v774_v32, %v778_v61  ;;  %v16473_v14 = vcombine.high %v783_v38, %v787_v13 }
 0x1b1   :  { %8396 = vmatpush1.bf16.msra.mxu0 %v16446_v44  ;;  %9940 = vmatpush1.bf16.msra.mxu1 %v16448_v33  ;;  %v16464_v44 = vcombine.low %v775_v37, %v779_v47  ;;  %v168_v33 = vld [vmem:[#allocation2 + $0x290] sm:$0xff]  ;;  %v16472_v32 = vcombine.low %v783_v38, %v787_v13  ;;  %v16479_v61 = vcombine.high %v790_v53, %v794_v41  ;;  %v811_v38 = vld [vmem:[#allocation5 + $0xea8] sm:$0xff] }
 0x1b2   :  { %8397 = vmatprep.subr.bf16.mxu0 %v16455_v31  ;;  %9941 = vmatprep.subr.bf16.mxu1 %v16457_v28  ;;  %v176_v31 = vld [vmem:[#allocation2 + $0x2d0] sm:$0xff]  ;;  %v16470_v28 = vcombine.low %v782_v7, %v786_v56  ;;  %v20452_v37 = vcombine.low %v152_v55, %v160_v22  ;;  %v16481_v47 = vcombine.high %v791_v17, %v795_v35  ;;  %v806_v55 = vld [vmem:[#allocation5 + $0xe80] sm:$0xff]  ;;  %v807_v56 = vld [vmem:[#allocation5 + $0xe88] sm:$0xff] }
 0x1b3   :  { %v810_v22 = vld [vmem:[#allocation5 + $0xea0] sm:$0xff] }
 0x1b4   :  { %23464 = vst [vmem:[#allocation56_spill] sm:$0xff] %v20452_v37 }
 0x1b5   :  { %8398 = vmatpush1.bf16.msra.mxu0 %v16454_v20  ;;  %9942 = vmatpush1.bf16.msra.mxu1 %v16456_v4  ;;  %v798_v20 = vld [vmem:[#allocation5 + $0xe40] sm:$0xff] }
 0x1b6   :  { %8399 = vmatprep.subr.bf16.mxu0 %v16463_v62  ;;  %9943 = vmatprep.subr.bf16.mxu1 %v16465_v10  ;;  %v802_v4 = vld [vmem:[#allocation5 + $0xe60] sm:$0xff]  ;;  %v20454_v62 = vcombine.high %v168_v33, %v176_v31  ;;  %v799_v10 = vld [vmem:[#allocation5 + $0xe48] sm:$0xff] }
 0x1b7   :  { %8257 = vmatmul.mubr.bf16.gmra.mrb[12].mxu0 %v20444_v27  ;;  %9801 = vmatmul.mubr.bf16.gmra.mrb[12].mxu1 %v20444_v27  ;;  %v803_v27 = vld [vmem:[#allocation5 + $0xe68] sm:$0xff]  ;;  %v16487_v7 = vcombine.high %v798_v20, %v802_v4 }
 0x1b8   :  { %8266 = vmatprep.mubr.bf16.mxu0 %v20446_v6  ;;  %9810 = vmatprep.mubr.bf16.mxu1 %v20446_v6  ;;  %23465 = vst [vmem:[#allocation57_spill] sm:$0xff] %v20454_v62  ;;  %v16478_v6 = vcombine.low %v790_v53, %v794_v41  ;;  %v16489_v13 = vcombine.high %v799_v10, %v803_v27 }
 0x1b9   :  { %8400 = vmatpush1.bf16.msra.mxu0 %v16462_v54  ;;  %9944 = vmatpush1.bf16.msra.mxu1 %v16464_v44  ;;  %v16480_v54 = vcombine.low %v791_v17, %v795_v35  ;;  %v184_v44 = vld [vmem:[#allocation2 + $0x310] sm:$0xff]  ;;  %v16488_v53 = vcombine.low %v799_v10, %v803_v27  ;;  %v16495_v41 = vcombine.high %v806_v55, %v810_v22  ;;  %v827_v10 = vld [vmem:[#allocation5 + $0xf28] sm:$0xff] }
 0x1ba   :  { %8401 = vmatprep.subr.bf16.mxu0 %v16471_v15  ;;  %9945 = vmatprep.subr.bf16.mxu1 %v16473_v14  ;;  %v192_v15 = vld [vmem:[#allocation2 + $0x350] sm:$0xff]  ;;  %v16486_v14 = vcombine.low %v798_v20, %v802_v4  ;;  %v20460_v17 = vcombine.low %v168_v33, %v176_v31  ;;  %v16497_v35 = vcombine.high %v807_v56, %v811_v38  ;;  %v822_v33 = vld [vmem:[#allocation5 + $0xf00] sm:$0xff]  ;;  %v823_v4 = vld [vmem:[#allocation5 + $0xf08] sm:$0xff] }
 0x1bb   :  { %v826_v31 = vld [vmem:[#allocation5 + $0xf20] sm:$0xff] }
 0x1bc   :  { %23466 = vst [vmem:[#allocation58_spill] sm:$0xff] %v20460_v17 }
 0x1bd   :  { %8402 = vmatpush1.bf16.msra.mxu0 %v16470_v28  ;;  %9946 = vmatpush1.bf16.msra.mxu1 %v16472_v32  ;;  %v814_v28 = vld [vmem:[#allocation5 + $0xec0] sm:$0xff] }
 0x1be   :  { %8403 = vmatprep.subr.bf16.mxu0 %v16479_v61  ;;  %9947 = vmatprep.subr.bf16.mxu1 %v16481_v47  ;;  %v818_v32 = vld [vmem:[#allocation5 + $0xee0] sm:$0xff]  ;;  %v20462_v61 = vcombine.high %v184_v44, %v192_v15  ;;  %v815_v47 = vld [vmem:[#allocation5 + $0xec8] sm:$0xff] }
 0x1bf   :  { %8267 = vmatmul.mubr.bf16.gmra.mrb[16].mxu0 %v20452_v37  ;;  %9811 = vmatmul.mubr.bf16.gmra.mrb[16].mxu1 %v20452_v37  ;;  %v819_v37 = vld [vmem:[#allocation5 + $0xee8] sm:$0xff]  ;;  %v16503_v20 = vcombine.high %v814_v28, %v818_v32 }
 0x1c0   :  { %8276 = vmatprep.mubr.bf16.mxu0 %v20454_v62  ;;  %9820 = vmatprep.mubr.bf16.mxu1 %v20454_v62  ;;  %23467 = vst [vmem:[#allocation59_spill] sm:$0xff] %v20462_v61  ;;  %v16494_v62 = vcombine.low %v806_v55, %v810_v22  ;;  %v16505_v27 = vcombine.high %v815_v47, %v819_v37 }
 0x1c1   :  { %8404 = vmatpush1.bf16.msra.mxu0 %v16478_v6  ;;  %9948 = vmatpush1.bf16.msra.mxu1 %v16480_v54  ;;  %v16496_v6 = vcombine.low %v807_v56, %v811_v38  ;;  %v200_v54 = vld [vmem:[#allocation2 + $0x390] sm:$0xff]  ;;  %v16504_v55 = vcombine.low %v815_v47, %v819_v37  ;;  %v16511_v22 = vcombine.high %v822_v33, %v826_v31  ;;  %v843_v47 = vld [vmem:[#allocation5 + $0xfa8] sm:$0xff] }
 0x1c2   :  { %8405 = vmatprep.subr.bf16.mxu0 %v16487_v7  ;;  %9949 = vmatprep.subr.bf16.mxu1 %v16489_v13  ;;  %v208_v7 = vld [vmem:[#allocation2 + $0x3d0] sm:$0xff]  ;;  %v16502_v13 = vcombine.low %v814_v28, %v818_v32  ;;  %v20468_v56 = vcombine.low %v184_v44, %v192_v15  ;;  %v16513_v38 = vcombine.high %v823_v4, %v827_v10  ;;  %v838_v44 = vld [vmem:[#allocation5 + $0xf80] sm:$0xff]  ;;  %v839_v32 = vld [vmem:[#allocation5 + $0xf88] sm:$0xff] }
 0x1c3   :  { %v842_v15 = vld [vmem:[#allocation5 + $0xfa0] sm:$0xff] }
 0x1c4   :  { %23468 = vst [vmem:[#allocation60_spill] sm:$0xff] %v20468_v56 }
 0x1c5   :  { %8406 = vmatpush1.bf16.msra.mxu0 %v16486_v14  ;;  %9950 = vmatpush1.bf16.msra.mxu1 %v16488_v53  ;;  %v830_v14 = vld [vmem:[#allocation5 + $0xf40] sm:$0xff] }
 0x1c6   :  { %8407 = vmatprep.subr.bf16.mxu0 %v16495_v41  ;;  %9951 = vmatprep.subr.bf16.mxu1 %v16497_v35  ;;  %v834_v53 = vld [vmem:[#allocation5 + $0xf60] sm:$0xff]  ;;  %v20470_v41 = vcombine.high %v200_v54, %v208_v7  ;;  %v831_v35 = vld [vmem:[#allocation5 + $0xf48] sm:$0xff] }
 0x1c7   :  { %8277 = vmatmul.mubr.bf16.gmra.mrb[20].mxu0 %v20460_v17  ;;  %9821 = vmatmul.mubr.bf16.gmra.mrb[20].mxu1 %v20460_v17  ;;  %v835_v17 = vld [vmem:[#allocation5 + $0xf68] sm:$0xff]  ;;  %v16519_v28 = vcombine.high %v830_v14, %v834_v53 }
 0x1c8   :  { %8286 = vmatprep.mubr.bf16.mxu0 %v20462_v61  ;;  %9830 = vmatprep.mubr.bf16.mxu1 %v20462_v61  ;;  %23469 = vst [vmem:[#allocation61_spill] sm:$0xff] %v20470_v41  ;;  %v16510_v61 = vcombine.low %v822_v33, %v826_v31  ;;  %v16521_v37 = vcombine.high %v831_v35, %v835_v17 }
 0x1c9   :  { %8408 = vmatpush1.bf16.msra.mxu0 %v16494_v62  ;;  %9952 = vmatpush1.bf16.msra.mxu1 %v16496_v6  ;;  %v16512_v62 = vcombine.low %v823_v4, %v827_v10  ;;  %v216_v6 = vld [vmem:[#allocation2 + $0x410] sm:$0xff]  ;;  %v16520_v33 = vcombine.low %v831_v35, %v835_v17  ;;  %v16527_v31 = vcombine.high %v838_v44, %v842_v15 }
 0x1ca   :  { %8409 = vmatprep.subr.bf16.mxu0 %v16503_v20  ;;  %9953 = vmatprep.subr.bf16.mxu1 %v16505_v27  ;;  %v224_v20 = vld [vmem:[#allocation2 + $0x450] sm:$0xff]  ;;  %v16518_v27 = vcombine.low %v830_v14, %v834_v53  ;;  %v20476_v4 = vcombine.low %v200_v54, %v208_v7  ;;  %v16529_v10 = vcombine.high %v839_v32, %v843_v47 }
 0x1cb   :  { %v232_v54 = vld [vmem:[#allocation2 + $0x490] sm:$0xff] }
 0x1cc   :  { %23470 = vst [vmem:[#allocation62_spill] sm:$0xff] %v20476_v4  ;;  %v240_v7 = vld [vmem:[#allocation2 + $0x4d0] sm:$0xff] }
 0x1cd   :  { %8410 = vmatpush1.bf16.msra.mxu0 %v16502_v13  ;;  %9954 = vmatpush1.bf16.msra.mxu1 %v16504_v55  ;;  %v846_v13 = vld [vmem:[#allocation5 + $0xfc0] sm:$0xff] }
 0x1ce   :  { %8411 = vmatprep.subr.bf16.mxu0 %v16511_v22  ;;  %9955 = vmatprep.subr.bf16.mxu1 %v16513_v38  ;;  %v850_v55 = vld [vmem:[#allocation5 + $0xfe0] sm:$0xff]  ;;  %v20478_v22 = vcombine.high %v216_v6, %v224_v20  ;;  %v847_v38 = vld [vmem:[#allocation5 + $0xfc8] sm:$0xff] }
 0x1cf   :  { %8287 = vmatmul.mubr.bf16.gmra.mrb[24].mxu0 %v20468_v56  ;;  %9831 = vmatmul.mubr.bf16.gmra.mrb[24].mxu1 %v20468_v56  ;;  %v851_v56 = vld [vmem:[#allocation5 + $0xfe8] sm:$0xff]  ;;  %v16535_v14 = vcombine.high %v846_v13, %v850_v55  ;;  %v16534_v53 = vcombine.low %v846_v13, %v850_v55  ;;  %v296_v55 = vld [vmem:[#allocation2 + $0x690] sm:$0xff] }
 0x1d0   :  { %8296 = vmatprep.mubr.bf16.mxu0 %v20470_v41  ;;  %9840 = vmatprep.mubr.bf16.mxu1 %v20470_v41  ;;  %23471 = vst [vmem:[#allocation63_spill] sm:$0xff] %v20478_v22  ;;  %v16526_v41 = vcombine.low %v838_v44, %v842_v15  ;;  %v16537_v17 = vcombine.high %v847_v38, %v851_v56 }
 0x1d1   :  { %8412 = vmatpush1.bf16.msra.mxu0 %v16510_v61  ;;  %9956 = vmatpush1.bf16.msra.mxu1 %v16512_v62  ;;  %v16528_v61 = vcombine.low %v839_v32, %v843_v47  ;;  %v16536_v35 = vcombine.low %v847_v38, %v851_v56  ;;  %v16543_v62 = vcombine.high %v20407_v49, %v20409_v8  ;;  %v248_v56 = vld [vmem:[#allocation2 + $0x510] sm:$0xff] }
 0x1d2   :  { %8413 = vmatprep.subr.bf16.mxu0 %v16519_v28  ;;  %9957 = vmatprep.subr.bf16.mxu1 %v16521_v37  ;;  %v20486_v28 = vcombine.low %v216_v6, %v224_v20  ;;  %v16545_v37 = vcombine.high %v20417_v5, %v20419_v12  ;;  %v20490_v44 = vcombine.high %v232_v54, %v240_v7  ;;  %v264_v47 = vld [vmem:[#allocation2 + $0x590] sm:$0xff] }
 0x1d3   :  { %v20496_v15 = vcombine.low %v232_v54, %v240_v7  ;;  %v272_v6 = vld [vmem:[#allocation2 + $0x5d0] sm:$0xff] }
 0x1d4   :  { %23472 = vst [vmem:[#allocation64_spill] sm:$0xff] %v20486_v28  ;;  %23473 = vst [vmem:[#allocation65_spill] sm:$0xff] %v20490_v44  ;;  %v304_v38 = vld [vmem:[#allocation2 + $0x6d0] sm:$0xff] }
 0x1d5   :  { %8414 = vmatpush1.bf16.msra.mxu0 %v16518_v27  ;;  %9958 = vmatpush1.bf16.msra.mxu1 %v16520_v33  ;;  %23474 = vst [vmem:[#allocation66_spill] sm:$0xff] %v20496_v15  ;;  %v20506_v27 = vcombine.high %v264_v47, %v272_v6  ;;  %v280_v33 = vld [vmem:[#allocation2 + $0x610] sm:$0xff]  ;;  %v20528_v7 = vcombine.low %v296_v55, %v304_v38 }
 0x1d6   :  { %8415 = vmatprep.subr.bf16.mxu0 %v16527_v31  ;;  %9959 = vmatprep.subr.bf16.mxu1 %v16529_v10  ;;  %v288_v31 = vld [vmem:[#allocation2 + $0x650] sm:$0xff]  ;;  %v20512_v10 = vcombine.low %v264_v47, %v272_v6  ;;  %v97_v47 = vld [vmem:[#allocation2 + $0x58] sm:$0xff] }
 0x1d7   :  { %8297 = vmatmul.mubr.bf16.gmra.mrb[28].mxu0 %v20476_v4  ;;  %9841 = vmatmul.mubr.bf16.gmra.mrb[28].mxu1 %v20476_v4  ;;  %23477 = vst [vmem:[#allocation69_spill] sm:$0xff] %v20506_v27  ;;  %v20514_v13 = vcombine.high %v280_v33, %v288_v31  ;;  %v320_v54 = vld [vmem:[#allocation2 + $0x750] sm:$0xff]  ;;  %23482 = vst [vmem:[#allocation74_spill] sm:$0xff] %v20528_v7  ;;  %v899_v4 = vld [vmem:[#allocation5 + $0x1168] sm:$0xff] }
 0x1d8   :  { %8306 = vmatprep.mubr.bf16.mxu0 %v20478_v22  ;;  %9850 = vmatprep.mubr.bf16.mxu1 %v20478_v22  ;;  %23478 = vst [vmem:[#allocation70_spill] sm:$0xff] %v20512_v10  ;;  %v895_v22 = vld [vmem:[#allocation5 + $0x1148] sm:$0xff] }
 0x1d9   :  { %8416 = vmatpush1.bf16.msra.mxu0 %v16526_v41  ;;  %9960 = vmatpush1.bf16.msra.mxu1 %v16528_v61  ;;  %v256_v41 = vld [vmem:[#allocation2 + $0x550] sm:$0xff]  ;;  %23479 = vst [vmem:[#allocation71_spill] sm:$0xff] %v20514_v13  ;;  %v20520_v61 = vcombine.low %v280_v33, %v288_v31  ;;  %v105_v31 = vld [vmem:[#allocation2 + $0x98] sm:$0xff] }
 0x1da   :  { %8417 = vmatprep.subr.bf16.mxu0 %v16535_v14  ;;  %9961 = vmatprep.subr.bf16.mxu1 %v16537_v17  ;;  %v20498_v32 = vcombine.high %v248_v56, %v256_v41  ;;  %v20504_v20 = vcombine.low %v248_v56, %v256_v41  ;;  %v20522_v14 = vcombine.high %v296_v55, %v304_v38  ;;  %v312_v17 = vld [vmem:[#allocation2 + $0x710] sm:$0xff]  ;;  %v89_v41 = vld [vmem:[#allocation2 + $0x18] sm:$0xff] }
 0x1db   :  { %23480 = vst [vmem:[#allocation72_spill] sm:$0xff] %v20520_v61  ;;  %v20546_v33 = vcombine.high %v89_v41, %v97_v47  ;;  %v113_v55 = vld [vmem:[#allocation2 + $0xd8] sm:$0xff]  ;;  %v20552_v38 = vcombine.low %v89_v41, %v97_v47  ;;  %v23490_v41 = vcombine.low %v20407_v49, %v20409_v8 }
 0x1dc   :  { %23475 = vst [vmem:[#allocation67_spill] sm:$0xff] %v20498_v32  ;;  %23476 = vst [vmem:[#allocation68_spill] sm:$0xff] %v20504_v20 }
 0x1dd   :  { %8418 = vmatpush1.bf16.msra.mxu0 %v16534_v53  ;;  %9962 = vmatpush1.bf16.msra.mxu1 %v16536_v35  ;;  %23481 = vst [vmem:[#allocation73_spill] sm:$0xff] %v20522_v14  ;;  %v20530_v53 = vcombine.high %v312_v17, %v320_v54  ;;  %v328_v35 = vld [vmem:[#allocation2 + $0x790] sm:$0xff]  ;;  %23487 = vst [vmem:[#allocation79_spill] sm:$0xff] %v20546_v33 }
 0x1de   :  { %8580 = vmatprep.subr.bf16.mxu0 %v16543_v62  ;;  %10124 = vmatprep.subr.bf16.mxu1 %v16545_v37  ;;  %v336_v62 = vld [vmem:[#allocation2 + $0x7d0] sm:$0xff]  ;;  %v20536_v37 = vcombine.low %v312_v17, %v320_v54  ;;  %23488 = vst [vmem:[#allocation80_spill] sm:$0xff] %v20552_v38  ;;  %v862_v17 = vld [vmem:[#allocation5 + $0x1040] sm:$0xff] }
 0x1df   :  { %8307 = vmatmul.mubr.bf16.gmra.mrb[32].mxu0 %v20486_v28  ;;  %9851 = vmatmul.mubr.bf16.gmra.mrb[32].mxu1 %v20486_v28  ;;  %23483 = vst [vmem:[#allocation75_spill] sm:$0xff] %v20530_v53  ;;  %v20538_v56 = vcombine.high %v328_v35, %v336_v62  ;;  %v20544_v6 = vcombine.low %v328_v35, %v336_v62  ;;  %v866_v54 = vld [vmem:[#allocation5 + $0x1060] sm:$0xff] }
 0x1e0   :  { %8316 = vmatprep.mubr.bf16.mxu0 %v20490_v44  ;;  %9860 = vmatprep.mubr.bf16.mxu1 %v20490_v44  ;;  %23484 = vst [vmem:[#allocation76_spill] sm:$0xff] %v20536_v37  ;;  %v20554_v35 = vcombine.high %v105_v31, %v113_v55  ;;  %v16551_v62 = vcombine.high %v862_v17, %v866_v54  ;;  %v129_v44 = vld [vmem:[#allocation2 + $0x158] sm:$0xff] }
 0x1e1   :  { %23485 = vst [vmem:[#allocation77_spill] sm:$0xff] %v20538_v56  ;;  %23486 = vst [vmem:[#allocation78_spill] sm:$0xff] %v20544_v6  ;;  %v16550_v47 = vcombine.low %v862_v17, %v866_v54  ;;  %v20578_v17 = vcombine.low %v105_v31, %v113_v55  ;;  %v878_v54 = vld [vmem:[#allocation5 + $0x10c0] sm:$0xff]  ;;  %v891_v55 = vld [vmem:[#allocation5 + $0x1128] sm:$0xff] }
 0x1e2   :  { %23489 = vst [vmem:[#allocation81_spill] sm:$0xff] %v20554_v35  ;;  %v890_v31 = vld [vmem:[#allocation5 + $0x1120] sm:$0xff] }
 0x1e3   :  { %23492 = vst [vmem:[#allocation82_spill] sm:$0xff] %v20578_v17 }
 0x1e7   :  { %8317 = vmatmul.mubr.bf16.gmra.mrb[36].mxu0 %v20496_v15  ;;  %9861 = vmatmul.mubr.bf16.gmra.mrb[36].mxu1 %v20496_v15 }
 0x1e8   :  { %8326 = vmatprep.mubr.bf16.mxu0 %v20498_v32  ;;  %9870 = vmatprep.mubr.bf16.mxu1 %v20498_v32  ;;  %v23491_v32 = vcombine.low %v20417_v5, %v20419_v12  ;;  %v879_v5 = vld [vmem:[#allocation5 + $0x10c8] sm:$0xff] }
 0x1ef   :  { %8327 = vmatmul.mubr.bf16.gmra.mrb[40].mxu0 %v20504_v20  ;;  %9871 = vmatmul.mubr.bf16.gmra.mrb[40].mxu1 %v20504_v20  ;;  %v20569_v20 = vld [vmem:[#allocation5 + $0x1428] sm:$0xff] }
 0x1f0   :  { %8336 = vmatprep.mubr.bf16.mxu0 %v20506_v27  ;;  %9880 = vmatprep.mubr.bf16.mxu1 %v20506_v27  ;;  %v20567_v27 = vld [vmem:[#allocation5 + $0x1408] sm:$0xff] }
 0x1f7   :  { %8337 = vmatmul.mubr.bf16.gmra.mrb[44].mxu0 %v20512_v10  ;;  %9881 = vmatmul.mubr.bf16.gmra.mrb[44].mxu1 %v20512_v10  ;;  %v886_v10 = vld [vmem:[#allocation5 + $0x1100] sm:$0xff] }
 0x1f8   :  { %8346 = vmatprep.mubr.bf16.mxu0 %v20514_v13  ;;  %9890 = vmatprep.mubr.bf16.mxu1 %v20514_v13  ;;  %v20557_v13 = vld [vmem:[#allocation5 + $0x1400] sm:$0xff] }
 0x1ff   :  { %8347 = vmatmul.mubr.bf16.gmra.mrb[48].mxu0 %v20520_v61  ;;  %9891 = vmatmul.mubr.bf16.gmra.mrb[48].mxu1 %v20520_v61  ;;  %v875_v61 = vld [vmem:[#allocation5 + $0x10a8] sm:$0xff] }
 0x200   :  { %8356 = vmatprep.mubr.bf16.mxu0 %v20522_v14  ;;  %9900 = vmatprep.mubr.bf16.mxu1 %v20522_v14  ;;  %v871_v14 = vld [vmem:[#allocation5 + $0x1088] sm:$0xff] }
 0x201   :  { %v16561_v8 = vcombine.high %v871_v14, %v875_v61 }
 0x207   :  { %8357 = vmatmul.mubr.bf16.gmra.mrb[52].mxu0 %v20528_v7  ;;  %9901 = vmatmul.mubr.bf16.gmra.mrb[52].mxu1 %v20528_v7  ;;  %v874_v7 = vld [vmem:[#allocation5 + $0x10a0] sm:$0xff] }
 0x208   :  { %8366 = vmatprep.mubr.bf16.mxu0 %v20530_v53  ;;  %9910 = vmatprep.mubr.bf16.mxu1 %v20530_v53  ;;  %v870_v53 = vld [vmem:[#allocation5 + $0x1080] sm:$0xff] }
 0x209   :  { %v16559_v28 = vcombine.high %v870_v53, %v874_v7 }
 0x20f   :  { %8367 = vmatmul.mubr.bf16.gmra.mrb[56].mxu0 %v20536_v37  ;;  %9911 = vmatmul.mubr.bf16.gmra.mrb[56].mxu1 %v20536_v37  ;;  %v867_v37 = vld [vmem:[#allocation5 + $0x1068] sm:$0xff] }
 0x210   :  { %8376 = vmatprep.mubr.bf16.mxu0 %v20538_v56  ;;  %9920 = vmatprep.mubr.bf16.mxu1 %v20538_v56  ;;  %v863_v56 = vld [vmem:[#allocation5 + $0x1048] sm:$0xff] }
 0x211   :  { %v16552_v15 = vcombine.low %v863_v56, %v867_v37 }
 0x217   :  { %8377 = vmatmul.mubr.bf16.gmra.mrb[60].mxu0 %v20544_v6  ;;  %9921 = vmatmul.mubr.bf16.gmra.mrb[60].mxu1 %v20544_v6  ;;  %v16553_v6 = vcombine.high %v863_v56, %v867_v37  ;;  %v16558_v37 = vcombine.low %v870_v53, %v874_v7  ;;  %v16560_v56 = vcombine.low %v871_v14, %v875_v61  ;;  %v145_v7 = vld [vmem:[#allocation2 + $0x1d8] sm:$0xff] }
 0x218   :  { %8419 = vmatprep.mubr.bf16.mxu0 %v20546_v33  ;;  %9963 = vmatprep.mubr.bf16.mxu1 %v20546_v33  ;;  %v20559_v33 = vld [vmem:[#allocation5 + $0x1420] sm:$0xff]  ;;  %v16575_v14 = vcombine.high %v886_v10, %v890_v31 }
 0x21f   :  { %8420 = vmatmul.mubr.bf16.vlgmr.msra.gmra.mrb[0].mxu0 %v20552_v38  ;;  %9964 = vmatmul.mubr.bf16.vlgmr.msra.gmra.mrb[0].mxu1 %v20552_v38  ;;  %v121_v38 = vld [vmem:[#allocation2 + $0x118] sm:$0xff] }
 0x220   :  { %8581 = vmatpush1.bf16.msra.mxu0 %v23490_v41  ;;  %10125 = vmatpush1.bf16.msra.mxu1 %v23491_v32  ;;  %v882_v41 = vld [vmem:[#allocation5 + $0x10e0] sm:$0xff]  ;;  %v20580_v12 = vcombine.high %v121_v38, %v129_v44  ;;  %v883_v32 = vld [vmem:[#allocation5 + $0x10e8] sm:$0xff]  ;;  %v20586_v53 = vcombine.low %v121_v38, %v129_v44 }
 0x221   :  { %8429 = vmatprep.mubr.bf16.mxu0 %v20554_v35  ;;  %9973 = vmatprep.mubr.bf16.mxu1 %v20554_v35  ;;  %v16567_v49 = vcombine.high %v878_v54, %v882_v41  ;;  %v16568_v61 = vcombine.low %v879_v5, %v883_v32  ;;  %v902_v44 = vld [vmem:[#allocation5 + $0x1180] sm:$0xff] }
 0x222   :  { %8582 = vmatprep.subr.bf16.mxu0 %v16551_v62  ;;  %10126 = vmatprep.subr.bf16.mxu1 %v16553_v6  ;;  %23493 = vst [vmem:[#allocation83_spill] sm:$0xff] %v20580_v12  ;;  %v16569_v62 = vcombine.high %v879_v5, %v883_v32  ;;  %v887_v6 = vld [vmem:[#allocation5 + $0x1108] sm:$0xff]  ;;  %23494 = vst [vmem:[#allocation84_spill] sm:$0xff] %v20586_v53  ;;  %v906_v38 = vld [vmem:[#allocation5 + $0x11a0] sm:$0xff] }
 0x223   :  { %v907_v5 = vld [vmem:[#allocation5 + $0x11a8] sm:$0xff]  ;;  %v153_v32 = vld [vmem:[#allocation2 + $0x218] sm:$0xff] }
 0x224   :  { %8583 = vmatpush1.bf16.msra.mxu0 %v16550_v47  ;;  %10127 = vmatpush1.bf16.msra.mxu1 %v16552_v15  ;;  %v137_v15 = vld [vmem:[#allocation2 + $0x198] sm:$0xff]  ;;  %v16577_v47 = vcombine.high %v887_v6, %v891_v55 }
 0x225   :  { %8584 = vmatprep.subr.bf16.mxu0 %v16559_v28  ;;  %10128 = vmatprep.subr.bf16.mxu1 %v16561_v8  ;;  %v16566_v28 = vcombine.low %v878_v54, %v882_v41  ;;  %v894_v8 = vld [vmem:[#allocation5 + $0x1140] sm:$0xff]  ;;  %v20588_v35 = vcombine.high %v137_v15, %v145_v7  ;;  %v903_v41 = vld [vmem:[#allocation5 + $0x1188] sm:$0xff] }
 0x227   :  { %8430 = vmatmul.mubr.bf16.gmra.mrb[4].mxu0 %v20578_v17  ;;  %9974 = vmatmul.mubr.bf16.gmra.mrb[4].mxu1 %v20578_v17  ;;  %v898_v17 = vld [vmem:[#allocation5 + $0x1160] sm:$0xff]  ;;  %23495 = vst [vmem:[#allocation85_spill] sm:$0xff] %v20588_v35 }
 0x228   :  { %8439 = vmatprep.mubr.bf16.mxu0 %v20580_v12  ;;  %9983 = vmatprep.mubr.bf16.mxu1 %v20580_v12  ;;  %v16574_v12 = vcombine.low %v886_v10, %v890_v31  ;;  %v16583_v54 = vcombine.high %v894_v8, %v898_v17  ;;  %v161_v10 = vld [vmem:[#allocation2 + $0x258] sm:$0xff]  ;;  %v16591_v31 = vcombine.high %v902_v44, %v906_v38 }
 0x229   :  { %8585 = vmatpush1.bf16.msra.mxu0 %v16558_v37  ;;  %10129 = vmatpush1.bf16.msra.mxu1 %v16560_v56  ;;  %v16576_v37 = vcombine.low %v887_v6, %v891_v55  ;;  %v16582_v56 = vcombine.low %v894_v8, %v898_v17  ;;  %v20594_v6 = vcombine.low %v137_v15, %v145_v7  ;;  %v922_v15 = vld [vmem:[#allocation5 + $0x1220] sm:$0xff]  ;;  %v919_v7 = vld [vmem:[#allocation5 + $0x1208] sm:$0xff] }
 0x22a   :  { %8586 = vmatprep.subr.bf16.mxu0 %v16567_v49  ;;  %10130 = vmatprep.subr.bf16.mxu1 %v16569_v62  ;;  %v16585_v49 = vcombine.high %v895_v22, %v899_v4  ;;  %v16584_v62 = vcombine.low %v895_v22, %v899_v4  ;;  %v16593_v55 = vcombine.high %v903_v41, %v907_v5  ;;  %v918_v22 = vld [vmem:[#allocation5 + $0x1200] sm:$0xff]  ;;  %v923_v8 = vld [vmem:[#allocation5 + $0x1228] sm:$0xff] }
 0x22b   :  { %23496 = vst [vmem:[#allocation86_spill] sm:$0xff] %v20594_v6 }
 0x22d   :  { %8587 = vmatpush1.bf16.msra.mxu0 %v16566_v28  ;;  %10131 = vmatpush1.bf16.msra.mxu1 %v16568_v61  ;;  %v910_v28 = vld [vmem:[#allocation5 + $0x11c0] sm:$0xff] }
 0x22e   :  { %8588 = vmatprep.subr.bf16.mxu0 %v16575_v14  ;;  %10132 = vmatprep.subr.bf16.mxu1 %v16577_v47  ;;  %v914_v61 = vld [vmem:[#allocation5 + $0x11e0] sm:$0xff]  ;;  %v20596_v14 = vcombine.high %v153_v32, %v161_v10  ;;  %v911_v47 = vld [vmem:[#allocation5 + $0x11c8] sm:$0xff] }
 0x22f   :  { %8440 = vmatmul.mubr.bf16.gmra.mrb[8].mxu0 %v20586_v53  ;;  %9984 = vmatmul.mubr.bf16.gmra.mrb[8].mxu1 %v20586_v53  ;;  %v915_v53 = vld [vmem:[#allocation5 + $0x11e8] sm:$0xff]  ;;  %v16599_v17 = vcombine.high %v910_v28, %v914_v61 }
 0x230   :  { %8449 = vmatprep.mubr.bf16.mxu0 %v20588_v35  ;;  %9993 = vmatprep.mubr.bf16.mxu1 %v20588_v35  ;;  %23497 = vst [vmem:[#allocation87_spill] sm:$0xff] %v20596_v14  ;;  %v16590_v35 = vcombine.low %v902_v44, %v906_v38  ;;  %v16601_v4 = vcombine.high %v911_v47, %v915_v53 }
 0x231   :  { %8589 = vmatpush1.bf16.msra.mxu0 %v16574_v12  ;;  %10133 = vmatpush1.bf16.msra.mxu1 %v16576_v37  ;;  %v16592_v12 = vcombine.low %v903_v41, %v907_v5  ;;  %v169_v37 = vld [vmem:[#allocation2 + $0x298] sm:$0xff]  ;;  %v16600_v44 = vcombine.low %v911_v47, %v915_v53  ;;  %v16607_v38 = vcombine.high %v918_v22, %v922_v15  ;;  %v939_v47 = vld [vmem:[#allocation5 + $0x12a8] sm:$0xff] }
 0x232   :  { %8590 = vmatprep.subr.bf16.mxu0 %v16583_v54  ;;  %10134 = vmatprep.subr.bf16.mxu1 %v16585_v49  ;;  %v177_v54 = vld [vmem:[#allocation2 + $0x2d8] sm:$0xff]  ;;  %v16598_v49 = vcombine.low %v910_v28, %v914_v61  ;;  %v20602_v41 = vcombine.low %v153_v32, %v161_v10  ;;  %v16609_v5 = vcombine.high %v919_v7, %v923_v8  ;;  %v934_v32 = vld [vmem:[#allocation5 + $0x1280] sm:$0xff]  ;;  %v935_v61 = vld [vmem:[#allocation5 + $0x1288] sm:$0xff] }
 0x233   :  { %v938_v10 = vld [vmem:[#allocation5 + $0x12a0] sm:$0xff] }
 0x234   :  { %23498 = vst [vmem:[#allocation88_spill] sm:$0xff] %v20602_v41 }
 0x235   :  { %8591 = vmatpush1.bf16.msra.mxu0 %v16582_v56  ;;  %10135 = vmatpush1.bf16.msra.mxu1 %v16584_v62  ;;  %v926_v56 = vld [vmem:[#allocation5 + $0x1240] sm:$0xff] }
 0x236   :  { %8592 = vmatprep.subr.bf16.mxu0 %v16591_v31  ;;  %10136 = vmatprep.subr.bf16.mxu1 %v16593_v55  ;;  %v930_v62 = vld [vmem:[#allocation5 + $0x1260] sm:$0xff]  ;;  %v20604_v31 = vcombine.high %v169_v37, %v177_v54  ;;  %v927_v55 = vld [vmem:[#allocation5 + $0x1248] sm:$0xff] }
 0x237   :  { %8450 = vmatmul.mubr.bf16.gmra.mrb[12].mxu0 %v20594_v6  ;;  %9994 = vmatmul.mubr.bf16.gmra.mrb[12].mxu1 %v20594_v6  ;;  %v931_v6 = vld [vmem:[#allocation5 + $0x1268] sm:$0xff]  ;;  %v16615_v28 = vcombine.high %v926_v56, %v930_v62 }
 0x238   :  { %8459 = vmatprep.mubr.bf16.mxu0 %v20596_v14  ;;  %10003 = vmatprep.mubr.bf16.mxu1 %v20596_v14  ;;  %23499 = vst [vmem:[#allocation89_spill] sm:$0xff] %v20604_v31  ;;  %v16606_v14 = vcombine.low %v918_v22, %v922_v15  ;;  %v16617_v53 = vcombine.high %v927_v55, %v931_v6 }
 0x239   :  { %8593 = vmatpush1.bf16.msra.mxu0 %v16590_v35  ;;  %10137 = vmatpush1.bf16.msra.mxu1 %v16592_v12  ;;  %v16608_v35 = vcombine.low %v919_v7, %v923_v8  ;;  %v185_v12 = vld [vmem:[#allocation2 + $0x318] sm:$0xff]  ;;  %v16616_v22 = vcombine.low %v927_v55, %v931_v6  ;;  %v16623_v15 = vcombine.high %v934_v32, %v938_v10  ;;  %v955_v55 = vld [vmem:[#allocation5 + $0x1328] sm:$0xff] }
 0x23a   :  { %8594 = vmatprep.subr.bf16.mxu0 %v16599_v17  ;;  %10138 = vmatprep.subr.bf16.mxu1 %v16601_v4  ;;  %v193_v17 = vld [vmem:[#allocation2 + $0x358] sm:$0xff]  ;;  %v16614_v4 = vcombine.low %v926_v56, %v930_v62  ;;  %v20610_v7 = vcombine.low %v169_v37, %v177_v54  ;;  %v16625_v8 = vcombine.high %v935_v61, %v939_v47  ;;  %v950_v37 = vld [vmem:[#allocation5 + $0x1300] sm:$0xff]  ;;  %v951_v62 = vld [vmem:[#allocation5 + $0x1308] sm:$0xff] }
 0x23b   :  { %v954_v54 = vld [vmem:[#allocation5 + $0x1320] sm:$0xff] }
 0x23c   :  { %23500 = vst [vmem:[#allocation90_spill] sm:$0xff] %v20610_v7 }
 0x23d   :  { %8595 = vmatpush1.bf16.msra.mxu0 %v16598_v49  ;;  %10139 = vmatpush1.bf16.msra.mxu1 %v16600_v44  ;;  %v942_v49 = vld [vmem:[#allocation5 + $0x12c0] sm:$0xff] }
 0x23e   :  { %8596 = vmatprep.subr.bf16.mxu0 %v16607_v38  ;;  %10140 = vmatprep.subr.bf16.mxu1 %v16609_v5  ;;  %v946_v44 = vld [vmem:[#allocation5 + $0x12e0] sm:$0xff]  ;;  %v20612_v38 = vcombine.high %v185_v12, %v193_v17  ;;  %v943_v5 = vld [vmem:[#allocation5 + $0x12c8] sm:$0xff] }
 0x23f   :  { %8460 = vmatmul.mubr.bf16.gmra.mrb[16].mxu0 %v20602_v41  ;;  %10004 = vmatmul.mubr.bf16.gmra.mrb[16].mxu1 %v20602_v41  ;;  %v947_v41 = vld [vmem:[#allocation5 + $0x12e8] sm:$0xff]  ;;  %v16631_v56 = vcombine.high %v942_v49, %v946_v44 }
 0x240   :  { %8469 = vmatprep.mubr.bf16.mxu0 %v20604_v31  ;;  %10013 = vmatprep.mubr.bf16.mxu1 %v20604_v31  ;;  %23501 = vst [vmem:[#allocation91_spill] sm:$0xff] %v20612_v38  ;;  %v16622_v31 = vcombine.low %v934_v32, %v938_v10  ;;  %v16633_v6 = vcombine.high %v943_v5, %v947_v41 }
 0x241   :  { %8597 = vmatpush1.bf16.msra.mxu0 %v16606_v14  ;;  %10141 = vmatpush1.bf16.msra.mxu1 %v16608_v35  ;;  %v16624_v14 = vcombine.low %v935_v61, %v939_v47  ;;  %v201_v35 = vld [vmem:[#allocation2 + $0x398] sm:$0xff]  ;;  %v16632_v32 = vcombine.low %v943_v5, %v947_v41  ;;  %v16639_v10 = vcombine.high %v950_v37, %v954_v54  ;;  %v971_v5 = vld [vmem:[#allocation5 + $0x13a8] sm:$0xff] }
 0x242   :  { %8598 = vmatprep.subr.bf16.mxu0 %v16615_v28  ;;  %10142 = vmatprep.subr.bf16.mxu1 %v16617_v53  ;;  %v209_v28 = vld [vmem:[#allocation2 + $0x3d8] sm:$0xff]  ;;  %v16630_v53 = vcombine.low %v942_v49, %v946_v44  ;;  %v20618_v61 = vcombine.low %v185_v12, %v193_v17  ;;  %v16641_v47 = vcombine.high %v951_v62, %v955_v55  ;;  %v966_v12 = vld [vmem:[#allocation5 + $0x1380] sm:$0xff]  ;;  %v967_v44 = vld [vmem:[#allocation5 + $0x1388] sm:$0xff] }
 0x243   :  { %v970_v17 = vld [vmem:[#allocation5 + $0x13a0] sm:$0xff] }
 0x244   :  { %23502 = vst [vmem:[#allocation92_spill] sm:$0xff] %v20618_v61 }
 0x245   :  { %8599 = vmatpush1.bf16.msra.mxu0 %v16614_v4  ;;  %10143 = vmatpush1.bf16.msra.mxu1 %v16616_v22  ;;  %v958_v4 = vld [vmem:[#allocation5 + $0x1340] sm:$0xff] }
 0x246   :  { %8600 = vmatprep.subr.bf16.mxu0 %v16623_v15  ;;  %10144 = vmatprep.subr.bf16.mxu1 %v16625_v8  ;;  %v962_v22 = vld [vmem:[#allocation5 + $0x1360] sm:$0xff]  ;;  %v20620_v15 = vcombine.high %v201_v35, %v209_v28  ;;  %v959_v8 = vld [vmem:[#allocation5 + $0x1348] sm:$0xff] }
 0x247   :  { %8470 = vmatmul.mubr.bf16.gmra.mrb[20].mxu0 %v20610_v7  ;;  %10014 = vmatmul.mubr.bf16.gmra.mrb[20].mxu1 %v20610_v7  ;;  %v963_v7 = vld [vmem:[#allocation5 + $0x1368] sm:$0xff]  ;;  %v16647_v49 = vcombine.high %v958_v4, %v962_v22 }
 0x248   :  { %8479 = vmatprep.mubr.bf16.mxu0 %v20612_v38  ;;  %10023 = vmatprep.mubr.bf16.mxu1 %v20612_v38  ;;  %23503 = vst [vmem:[#allocation93_spill] sm:$0xff] %v20620_v15  ;;  %v16638_v38 = vcombine.low %v950_v37, %v954_v54  ;;  %v16649_v41 = vcombine.high %v959_v8, %v963_v7 }
 0x249   :  { %8601 = vmatpush1.bf16.msra.mxu0 %v16622_v31  ;;  %10145 = vmatpush1.bf16.msra.mxu1 %v16624_v14  ;;  %v16640_v31 = vcombine.low %v951_v62, %v955_v55  ;;  %v217_v14 = vld [vmem:[#allocation2 + $0x418] sm:$0xff]  ;;  %v16648_v37 = vcombine.low %v959_v8, %v963_v7  ;;  %v16655_v54 = vcombine.high %v966_v12, %v970_v17 }
 0x24a   :  { %8602 = vmatprep.subr.bf16.mxu0 %v16631_v56  ;;  %10146 = vmatprep.subr.bf16.mxu1 %v16633_v6  ;;  %v225_v56 = vld [vmem:[#allocation2 + $0x458] sm:$0xff]  ;;  %v16646_v6 = vcombine.low %v958_v4, %v962_v22  ;;  %v20626_v62 = vcombine.low %v201_v35, %v209_v28  ;;  %v16657_v55 = vcombine.high %v967_v44, %v971_v5 }
 0x24b   :  { %v233_v35 = vld [vmem:[#allocation2 + $0x498] sm:$0xff] }
 0x24c   :  { %23504 = vst [vmem:[#allocation94_spill] sm:$0xff] %v20626_v62  ;;  %v241_v28 = vld [vmem:[#allocation2 + $0x4d8] sm:$0xff] }
 0x24d   :  { %8603 = vmatpush1.bf16.msra.mxu0 %v16630_v53  ;;  %10147 = vmatpush1.bf16.msra.mxu1 %v16632_v32  ;;  %v974_v53 = vld [vmem:[#allocation5 + $0x13c0] sm:$0xff] }
 0x24e   :  { %8604 = vmatprep.subr.bf16.mxu0 %v16639_v10  ;;  %10148 = vmatprep.subr.bf16.mxu1 %v16641_v47  ;;  %v978_v32 = vld [vmem:[#allocation5 + $0x13e0] sm:$0xff]  ;;  %v20628_v10 = vcombine.high %v217_v14, %v225_v56  ;;  %v975_v47 = vld [vmem:[#allocation5 + $0x13c8] sm:$0xff] }
 0x24f   :  { %8480 = vmatmul.mubr.bf16.gmra.mrb[24].mxu0 %v20618_v61  ;;  %10024 = vmatmul.mubr.bf16.gmra.mrb[24].mxu1 %v20618_v61  ;;  %v979_v61 = vld [vmem:[#allocation5 + $0x13e8] sm:$0xff]  ;;  %v16663_v4 = vcombine.high %v974_v53, %v978_v32  ;;  %v16662_v22 = vcombine.low %v974_v53, %v978_v32  ;;  %v297_v32 = vld [vmem:[#allocation2 + $0x698] sm:$0xff] }
 0x250   :  { %8489 = vmatprep.mubr.bf16.mxu0 %v20620_v15  ;;  %10033 = vmatprep.mubr.bf16.mxu1 %v20620_v15  ;;  %23505 = vst [vmem:[#allocation95_spill] sm:$0xff] %v20628_v10  ;;  %v16654_v15 = vcombine.low %v966_v12, %v970_v17  ;;  %v16665_v7 = vcombine.high %v975_v47, %v979_v61 }
 0x251   :  { %8605 = vmatpush1.bf16.msra.mxu0 %v16638_v38  ;;  %10149 = vmatpush1.bf16.msra.mxu1 %v16640_v31  ;;  %v16656_v38 = vcombine.low %v967_v44, %v971_v5  ;;  %v16664_v8 = vcombine.low %v975_v47, %v979_v61  ;;  %v16671_v31 = vcombine.high %v20557_v13, %v20559_v33  ;;  %v249_v61 = vld [vmem:[#allocation2 + $0x518] sm:$0xff] }
 0x252   :  { %8606 = vmatprep.subr.bf16.mxu0 %v16647_v49  ;;  %10150 = vmatprep.subr.bf16.mxu1 %v16649_v41  ;;  %v20636_v49 = vcombine.low %v217_v14, %v225_v56  ;;  %v16673_v41 = vcombine.high %v20567_v27, %v20569_v20  ;;  %v20640_v12 = vcombine.high %v233_v35, %v241_v28  ;;  %v265_v5 = vld [vmem:[#allocation2 + $0x598] sm:$0xff] }
 0x253   :  { %v20646_v17 = vcombine.low %v233_v35, %v241_v28  ;;  %v273_v14 = vld [vmem:[#allocation2 + $0x5d8] sm:$0xff] }
 0x254   :  { %23506 = vst [vmem:[#allocation96_spill] sm:$0xff] %v20636_v49  ;;  %23507 = vst [vmem:[#allocation97_spill] sm:$0xff] %v20640_v12  ;;  %v305_v47 = vld [vmem:[#allocation2 + $0x6d8] sm:$0xff] }
 0x255   :  { %8607 = vmatpush1.bf16.msra.mxu0 %v16646_v6  ;;  %10151 = vmatpush1.bf16.msra.mxu1 %v16648_v37  ;;  %23508 = vst [vmem:[#allocation98_spill] sm:$0xff] %v20646_v17  ;;  %v20656_v6 = vcombine.high %v265_v5, %v273_v14  ;;  %v281_v37 = vld [vmem:[#allocation2 + $0x618] sm:$0xff]  ;;  %v20678_v28 = vcombine.low %v297_v32, %v305_v47 }
 0x256   :  { %8608 = vmatprep.subr.bf16.mxu0 %v16655_v54  ;;  %10152 = vmatprep.subr.bf16.mxu1 %v16657_v55  ;;  %v289_v54 = vld [vmem:[#allocation2 + $0x658] sm:$0xff]  ;;  %v20662_v55 = vcombine.low %v265_v5, %v273_v14  ;;  %v98_v5 = vld [vmem:[#allocation2 + $0x60] sm:$0xff] }
 0x257   :  { %8490 = vmatmul.mubr.bf16.gmra.mrb[28].mxu0 %v20626_v62  ;;  %10034 = vmatmul.mubr.bf16.gmra.mrb[28].mxu1 %v20626_v62  ;;  %23511 = vst [vmem:[#allocation101_spill] sm:$0xff] %v20656_v6  ;;  %v20664_v53 = vcombine.high %v281_v37, %v289_v54  ;;  %v321_v35 = vld [vmem:[#allocation2 + $0x758] sm:$0xff]  ;;  %23516 = vst [vmem:[#allocation106_spill] sm:$0xff] %v20678_v28  ;;  %v1027_v62 = vld [vmem:[#allocation5 + $0x1568] sm:$0xff] }
 0x258   :  { %8499 = vmatprep.mubr.bf16.mxu0 %v20628_v10  ;;  %10043 = vmatprep.mubr.bf16.mxu1 %v20628_v10  ;;  %23512 = vst [vmem:[#allocation102_spill] sm:$0xff] %v20662_v55  ;;  %v1023_v10 = vld [vmem:[#allocation5 + $0x1548] sm:$0xff] }
 0x259   :  { %8609 = vmatpush1.bf16.msra.mxu0 %v16654_v15  ;;  %10153 = vmatpush1.bf16.msra.mxu1 %v16656_v38  ;;  %v257_v15 = vld [vmem:[#allocation2 + $0x558] sm:$0xff]  ;;  %23513 = vst [vmem:[#allocation103_spill] sm:$0xff] %v20664_v53  ;;  %v20670_v38 = vcombine.low %v281_v37, %v289_v54  ;;  %v106_v54 = vld [vmem:[#allocation2 + $0xa0] sm:$0xff] }
 0x25a   :  { %8610 = vmatprep.subr.bf16.mxu0 %v16663_v4  ;;  %10154 = vmatprep.subr.bf16.mxu1 %v16665_v7  ;;  %v20648_v44 = vcombine.high %v249_v61, %v257_v15  ;;  %v20654_v56 = vcombine.low %v249_v61, %v257_v15  ;;  %v20672_v4 = vcombine.high %v297_v32, %v305_v47  ;;  %v313_v7 = vld [vmem:[#allocation2 + $0x718] sm:$0xff]  ;;  %v90_v15 = vld [vmem:[#allocation2 + $0x20] sm:$0xff] }
 0x25b   :  { %23514 = vst [vmem:[#allocation104_spill] sm:$0xff] %v20670_v38  ;;  %v20696_v37 = vcombine.high %v90_v15, %v98_v5  ;;  %v114_v32 = vld [vmem:[#allocation2 + $0xe0] sm:$0xff]  ;;  %v20702_v47 = vcombine.low %v90_v15, %v98_v5  ;;  %v23524_v15 = vcombine.low %v20557_v13, %v20559_v33 }
 0x25c   :  { %23509 = vst [vmem:[#allocation99_spill] sm:$0xff] %v20648_v44  ;;  %23510 = vst [vmem:[#allocation100_spill] sm:$0xff] %v20654_v56 }
 0x25d   :  { %8611 = vmatpush1.bf16.msra.mxu0 %v16662_v22  ;;  %10155 = vmatpush1.bf16.msra.mxu1 %v16664_v8  ;;  %23515 = vst [vmem:[#allocation105_spill] sm:$0xff] %v20672_v4  ;;  %v20680_v22 = vcombine.high %v313_v7, %v321_v35  ;;  %v329_v8 = vld [vmem:[#allocation2 + $0x798] sm:$0xff]  ;;  %23521 = vst [vmem:[#allocation111_spill] sm:$0xff] %v20696_v37 }
 0x25e   :  { %8773 = vmatprep.subr.bf16.mxu0 %v16671_v31  ;;  %10317 = vmatprep.subr.bf16.mxu1 %v16673_v41  ;;  %v337_v31 = vld [vmem:[#allocation2 + $0x7d8] sm:$0xff]  ;;  %v20686_v41 = vcombine.low %v313_v7, %v321_v35  ;;  %23522 = vst [vmem:[#allocation112_spill] sm:$0xff] %v20702_v47  ;;  %v990_v7 = vld [vmem:[#allocation5 + $0x1440] sm:$0xff] }
 0x25f   :  { %8500 = vmatmul.mubr.bf16.gmra.mrb[32].mxu0 %v20636_v49  ;;  %10044 = vmatmul.mubr.bf16.gmra.mrb[32].mxu1 %v20636_v49  ;;  %23517 = vst [vmem:[#allocation107_spill] sm:$0xff] %v20680_v22  ;;  %v20688_v61 = vcombine.high %v329_v8, %v337_v31  ;;  %v20694_v14 = vcombine.low %v329_v8, %v337_v31  ;;  %v994_v35 = vld [vmem:[#allocation5 + $0x1460] sm:$0xff] }
 0x260   :  { %8509 = vmatprep.mubr.bf16.mxu0 %v20640_v12  ;;  %10053 = vmatprep.mubr.bf16.mxu1 %v20640_v12  ;;  %23518 = vst [vmem:[#allocation108_spill] sm:$0xff] %v20686_v41  ;;  %v20704_v8 = vcombine.high %v106_v54, %v114_v32  ;;  %v16679_v31 = vcombine.high %v990_v7, %v994_v35  ;;  %v130_v12 = vld [vmem:[#allocation2 + $0x160] sm:$0xff] }
 0x261   :  { %23519 = vst [vmem:[#allocation109_spill] sm:$0xff] %v20688_v61  ;;  %23520 = vst [vmem:[#allocation110_spill] sm:$0xff] %v20694_v14  ;;  %v16678_v5 = vcombine.low %v990_v7, %v994_v35  ;;  %v20728_v7 = vcombine.low %v106_v54, %v114_v32  ;;  %v1006_v35 = vld [vmem:[#allocation5 + $0x14c0] sm:$0xff]  ;;  %v1019_v32 = vld [vmem:[#allocation5 + $0x1528] sm:$0xff] }
 0x262   :  { %23523 = vst [vmem:[#allocation113_spill] sm:$0xff] %v20704_v8  ;;  %v1018_v54 = vld [vmem:[#allocation5 + $0x1520] sm:$0xff] }
 0x263   :  { %23526 = vst [vmem:[#allocation114_spill] sm:$0xff] %v20728_v7 }
 0x267   :  { %8510 = vmatmul.mubr.bf16.gmra.mrb[36].mxu0 %v20646_v17  ;;  %10054 = vmatmul.mubr.bf16.gmra.mrb[36].mxu1 %v20646_v17 }
 0x268   :  { %8519 = vmatprep.mubr.bf16.mxu0 %v20648_v44  ;;  %10063 = vmatprep.mubr.bf16.mxu1 %v20648_v44  ;;  %v23525_v44 = vcombine.low %v20567_v27, %v20569_v20  ;;  %v1007_v27 = vld [vmem:[#allocation5 + $0x14c8] sm:$0xff] }
 0x26f   :  { %8520 = vmatmul.mubr.bf16.gmra.mrb[40].mxu0 %v20654_v56  ;;  %10064 = vmatmul.mubr.bf16.gmra.mrb[40].mxu1 %v20654_v56  ;;  %v20719_v56 = vld [vmem:[#allocation5 + $0x1828] sm:$0xff] }
 0x270   :  { %8529 = vmatprep.mubr.bf16.mxu0 %v20656_v6  ;;  %10073 = vmatprep.mubr.bf16.mxu1 %v20656_v6  ;;  %v20717_v6 = vld [vmem:[#allocation5 + $0x1808] sm:$0xff] }
 0x277   :  { %8530 = vmatmul.mubr.bf16.gmra.mrb[44].mxu0 %v20662_v55  ;;  %10074 = vmatmul.mubr.bf16.gmra.mrb[44].mxu1 %v20662_v55  ;;  %v1014_v55 = vld [vmem:[#allocation5 + $0x1500] sm:$0xff] }
 0x278   :  { %8539 = vmatprep.mubr.bf16.mxu0 %v20664_v53  ;;  %10083 = vmatprep.mubr.bf16.mxu1 %v20664_v53  ;;  %v20707_v53 = vld [vmem:[#allocation5 + $0x1800] sm:$0xff] }
 0x27f   :  { %8540 = vmatmul.mubr.bf16.gmra.mrb[48].mxu0 %v20670_v38  ;;  %10084 = vmatmul.mubr.bf16.gmra.mrb[48].mxu1 %v20670_v38  ;;  %v1003_v38 = vld [vmem:[#allocation5 + $0x14a8] sm:$0xff] }
 0x280   :  { %8549 = vmatprep.mubr.bf16.mxu0 %v20672_v4  ;;  %10093 = vmatprep.mubr.bf16.mxu1 %v20672_v4  ;;  %v999_v4 = vld [vmem:[#allocation5 + $0x1488] sm:$0xff] }
 0x281   :  { %v16689_v33 = vcombine.high %v999_v4, %v1003_v38 }
 0x287   :  { %8550 = vmatmul.mubr.bf16.gmra.mrb[52].mxu0 %v20678_v28  ;;  %10094 = vmatmul.mubr.bf16.gmra.mrb[52].mxu1 %v20678_v28  ;;  %v1002_v28 = vld [vmem:[#allocation5 + $0x14a0] sm:$0xff] }
 0x288   :  { %8559 = vmatprep.mubr.bf16.mxu0 %v20680_v22  ;;  %10103 = vmatprep.mubr.bf16.mxu1 %v20680_v22  ;;  %v998_v22 = vld [vmem:[#allocation5 + $0x1480] sm:$0xff] }
 0x289   :  { %v16687_v49 = vcombine.high %v998_v22, %v1002_v28 }
 0x28f   :  { %8560 = vmatmul.mubr.bf16.gmra.mrb[56].mxu0 %v20686_v41  ;;  %10104 = vmatmul.mubr.bf16.gmra.mrb[56].mxu1 %v20686_v41  ;;  %v995_v41 = vld [vmem:[#allocation5 + $0x1468] sm:$0xff] }
 0x290   :  { %8569 = vmatprep.mubr.bf16.mxu0 %v20688_v61  ;;  %10113 = vmatprep.mubr.bf16.mxu1 %v20688_v61  ;;  %v991_v61 = vld [vmem:[#allocation5 + $0x1448] sm:$0xff] }
 0x291   :  { %v16680_v17 = vcombine.low %v991_v61, %v995_v41 }
 0x297   :  { %8570 = vmatmul.mubr.bf16.gmra.mrb[60].mxu0 %v20694_v14  ;;  %10114 = vmatmul.mubr.bf16.gmra.mrb[60].mxu1 %v20694_v14  ;;  %v16681_v14 = vcombine.high %v991_v61, %v995_v41  ;;  %v16686_v41 = vcombine.low %v998_v22, %v1002_v28  ;;  %v16688_v61 = vcombine.low %v999_v4, %v1003_v38  ;;  %v146_v28 = vld [vmem:[#allocation2 + $0x1e0] sm:$0xff] }
 0x298   :  { %8612 = vmatprep.mubr.bf16.mxu0 %v20696_v37  ;;  %10156 = vmatprep.mubr.bf16.mxu1 %v20696_v37  ;;  %v20709_v37 = vld [vmem:[#allocation5 + $0x1820] sm:$0xff]  ;;  %v16703_v4 = vcombine.high %v1014_v55, %v1018_v54 }
 0x29f   :  { %8613 = vmatmul.mubr.bf16.vlgmr.msra.gmra.mrb[0].mxu0 %v20702_v47  ;;  %10157 = vmatmul.mubr.bf16.vlgmr.msra.gmra.mrb[0].mxu1 %v20702_v47  ;;  %v122_v47 = vld [vmem:[#allocation2 + $0x120] sm:$0xff] }
 0x2a0   :  { %8774 = vmatpush1.bf16.msra.mxu0 %v23524_v15  ;;  %10318 = vmatpush1.bf16.msra.mxu1 %v23525_v44  ;;  %v1010_v15 = vld [vmem:[#allocation5 + $0x14e0] sm:$0xff]  ;;  %v20730_v20 = vcombine.high %v122_v47, %v130_v12  ;;  %v1011_v44 = vld [vmem:[#allocation5 + $0x14e8] sm:$0xff]  ;;  %v20736_v22 = vcombine.low %v122_v47, %v130_v12 }
 0x2a1   :  { %8622 = vmatprep.mubr.bf16.mxu0 %v20704_v8  ;;  %10166 = vmatprep.mubr.bf16.mxu1 %v20704_v8  ;;  %v16695_v13 = vcombine.high %v1006_v35, %v1010_v15  ;;  %v16696_v38 = vcombine.low %v1007_v27, %v1011_v44  ;;  %v1030_v12 = vld [vmem:[#allocation5 + $0x1580] sm:$0xff] }
 0x2a2   :  { %8775 = vmatprep.subr.bf16.mxu0 %v16679_v31  ;;  %10319 = vmatprep.subr.bf16.mxu1 %v16681_v14  ;;  %23527 = vst [vmem:[#allocation115_spill] sm:$0xff] %v20730_v20  ;;  %v16697_v31 = vcombine.high %v1007_v27, %v1011_v44  ;;  %v1015_v14 = vld [vmem:[#allocation5 + $0x1508] sm:$0xff]  ;;  %23528 = vst [vmem:[#allocation116_spill] sm:$0xff] %v20736_v22  ;;  %v1034_v47 = vld [vmem:[#allocation5 + $0x15a0] sm:$0xff] }
 0x2a3   :  { %v1035_v27 = vld [vmem:[#allocation5 + $0x15a8] sm:$0xff]  ;;  %v154_v44 = vld [vmem:[#allocation2 + $0x220] sm:$0xff] }
 0x2a4   :  { %8776 = vmatpush1.bf16.msra.mxu0 %v16678_v5  ;;  %10320 = vmatpush1.bf16.msra.mxu1 %v16680_v17  ;;  %v138_v17 = vld [vmem:[#allocation2 + $0x1a0] sm:$0xff]  ;;  %v16705_v5 = vcombine.high %v1015_v14, %v1019_v32 }
 0x2a5   :  { %8777 = vmatprep.subr.bf16.mxu0 %v16687_v49  ;;  %10321 = vmatprep.subr.bf16.mxu1 %v16689_v33  ;;  %v16694_v49 = vcombine.low %v1006_v35, %v1010_v15  ;;  %v1022_v33 = vld [vmem:[#allocation5 + $0x1540] sm:$0xff]  ;;  %v20738_v8 = vcombine.high %v138_v17, %v146_v28  ;;  %v1031_v15 = vld [vmem:[#allocation5 + $0x1588] sm:$0xff] }
 0x2a7   :  { %8623 = vmatmul.mubr.bf16.gmra.mrb[4].mxu0 %v20728_v7  ;;  %10167 = vmatmul.mubr.bf16.gmra.mrb[4].mxu1 %v20728_v7  ;;  %v1026_v7 = vld [vmem:[#allocation5 + $0x1560] sm:$0xff]  ;;  %23529 = vst [vmem:[#allocation117_spill] sm:$0xff] %v20738_v8 }
 0x2a8   :  { %8632 = vmatprep.mubr.bf16.mxu0 %v20730_v20  ;;  %10176 = vmatprep.mubr.bf16.mxu1 %v20730_v20  ;;  %v16702_v20 = vcombine.low %v1014_v55, %v1018_v54  ;;  %v16711_v35 = vcombine.high %v1022_v33, %v1026_v7  ;;  %v162_v55 = vld [vmem:[#allocation2 + $0x260] sm:$0xff]  ;;  %v16719_v54 = vcombine.high %v1030_v12, %v1034_v47 }
 0x2a9   :  { %8778 = vmatpush1.bf16.msra.mxu0 %v16686_v41  ;;  %10322 = vmatpush1.bf16.msra.mxu1 %v16688_v61  ;;  %v16704_v41 = vcombine.low %v1015_v14, %v1019_v32  ;;  %v16710_v61 = vcombine.low %v1022_v33, %v1026_v7  ;;  %v20744_v14 = vcombine.low %v138_v17, %v146_v28  ;;  %v1050_v17 = vld [vmem:[#allocation5 + $0x1620] sm:$0xff]  ;;  %v1047_v28 = vld [vmem:[#allocation5 + $0x1608] sm:$0xff] }
 0x2aa   :  { %8779 = vmatprep.subr.bf16.mxu0 %v16695_v13  ;;  %10323 = vmatprep.subr.bf16.mxu1 %v16697_v31  ;;  %v16713_v13 = vcombine.high %v1023_v10, %v1027_v62  ;;  %v16712_v31 = vcombine.low %v1023_v10, %v1027_v62  ;;  %v16721_v32 = vcombine.high %v1031_v15, %v1035_v27  ;;  %v1046_v10 = vld [vmem:[#allocation5 + $0x1600] sm:$0xff]  ;;  %v1051_v33 = vld [vmem:[#allocation5 + $0x1628] sm:$0xff] }
 0x2ab   :  { %23530 = vst [vmem:[#allocation118_spill] sm:$0xff] %v20744_v14 }
 0x2ad   :  { %8780 = vmatpush1.bf16.msra.mxu0 %v16694_v49  ;;  %10324 = vmatpush1.bf16.msra.mxu1 %v16696_v38  ;;  %v1038_v49 = vld [vmem:[#allocation5 + $0x15c0] sm:$0xff] }
 0x2ae   :  { %8781 = vmatprep.subr.bf16.mxu0 %v16703_v4  ;;  %10325 = vmatprep.subr.bf16.mxu1 %v16705_v5  ;;  %v1042_v38 = vld [vmem:[#allocation5 + $0x15e0] sm:$0xff]  ;;  %v20746_v4 = vcombine.high %v154_v44, %v162_v55  ;;  %v1039_v5 = vld [vmem:[#allocation5 + $0x15c8] sm:$0xff] }
 0x2af   :  { %8633 = vmatmul.mubr.bf16.gmra.mrb[8].mxu0 %v20736_v22  ;;  %10177 = vmatmul.mubr.bf16.gmra.mrb[8].mxu1 %v20736_v22  ;;  %v1043_v22 = vld [vmem:[#allocation5 + $0x15e8] sm:$0xff]  ;;  %v16727_v7 = vcombine.high %v1038_v49, %v1042_v38 }
 0x2b0   :  { %8642 = vmatprep.mubr.bf16.mxu0 %v20738_v8  ;;  %10186 = vmatprep.mubr.bf16.mxu1 %v20738_v8  ;;  %23531 = vst [vmem:[#allocation119_spill] sm:$0xff] %v20746_v4  ;;  %v16718_v8 = vcombine.low %v1030_v12, %v1034_v47  ;;  %v16729_v62 = vcombine.high %v1039_v5, %v1043_v22 }
 0x2b1   :  { %8782 = vmatpush1.bf16.msra.mxu0 %v16702_v20  ;;  %10326 = vmatpush1.bf16.msra.mxu1 %v16704_v41  ;;  %v16720_v20 = vcombine.low %v1031_v15, %v1035_v27  ;;  %v170_v41 = vld [vmem:[#allocation2 + $0x2a0] sm:$0xff]  ;;  %v16728_v12 = vcombine.low %v1039_v5, %v1043_v22  ;;  %v16735_v47 = vcombine.high %v1046_v10, %v1050_v17  ;;  %v1067_v5 = vld [vmem:[#allocation5 + $0x16a8] sm:$0xff] }
 0x2b2   :  { %8783 = vmatprep.subr.bf16.mxu0 %v16711_v35  ;;  %10327 = vmatprep.subr.bf16.mxu1 %v16713_v13  ;;  %v178_v35 = vld [vmem:[#allocation2 + $0x2e0] sm:$0xff]  ;;  %v16726_v13 = vcombine.low %v1038_v49, %v1042_v38  ;;  %v20752_v15 = vcombine.low %v154_v44, %v162_v55  ;;  %v16737_v27 = vcombine.high %v1047_v28, %v1051_v33  ;;  %v1063_v38 = vld [vmem:[#allocation5 + $0x1688] sm:$0xff] }
 0x2b3   :  { %v1062_v44 = vld [vmem:[#allocation5 + $0x1680] sm:$0xff] }
 0x2b4   :  { %23532 = vst [vmem:[#allocation120_spill] sm:$0xff] %v20752_v15  ;;  %v1066_v55 = vld [vmem:[#allocation5 + $0x16a0] sm:$0xff] }
 0x2b5   :  { %8784 = vmatpush1.bf16.msra.mxu0 %v16710_v61  ;;  %10328 = vmatpush1.bf16.msra.mxu1 %v16712_v31  ;;  %v1054_v61 = vld [vmem:[#allocation5 + $0x1640] sm:$0xff] }
 0x2b6   :  { %8785 = vmatprep.subr.bf16.mxu0 %v16719_v54  ;;  %10329 = vmatprep.subr.bf16.mxu1 %v16721_v32  ;;  %v1058_v31 = vld [vmem:[#allocation5 + $0x1660] sm:$0xff]  ;;  %v20754_v54 = vcombine.high %v170_v41, %v178_v35  ;;  %v1055_v32 = vld [vmem:[#allocation5 + $0x1648] sm:$0xff] }
 0x2b7   :  { %8643 = vmatmul.mubr.bf16.gmra.mrb[12].mxu0 %v20744_v14  ;;  %10187 = vmatmul.mubr.bf16.gmra.mrb[12].mxu1 %v20744_v14  ;;  %v1059_v14 = vld [vmem:[#allocation5 + $0x1668] sm:$0xff]  ;;  %v16743_v49 = vcombine.high %v1054_v61, %v1058_v31 }
 0x2b8   :  { %8652 = vmatprep.mubr.bf16.mxu0 %v20746_v4  ;;  %10196 = vmatprep.mubr.bf16.mxu1 %v20746_v4  ;;  %23533 = vst [vmem:[#allocation121_spill] sm:$0xff] %v20754_v54  ;;  %v16734_v4 = vcombine.low %v1046_v10, %v1050_v17  ;;  %v16745_v22 = vcombine.high %v1055_v32, %v1059_v14 }
 0x2b9   :  { %8786 = vmatpush1.bf16.msra.mxu0 %v16718_v8  ;;  %10330 = vmatpush1.bf16.msra.mxu1 %v16720_v20  ;;  %v16736_v8 = vcombine.low %v1047_v28, %v1051_v33  ;;  %v186_v20 = vld [vmem:[#allocation2 + $0x320] sm:$0xff]  ;;  %v16744_v10 = vcombine.low %v1055_v32, %v1059_v14  ;;  %v16751_v17 = vcombine.high %v1062_v44, %v1066_v55  ;;  %v1083_v32 = vld [vmem:[#allocation5 + $0x1728] sm:$0xff] }
 0x2ba   :  { %8787 = vmatprep.subr.bf16.mxu0 %v16727_v7  ;;  %10331 = vmatprep.subr.bf16.mxu1 %v16729_v62  ;;  %v194_v7 = vld [vmem:[#allocation2 + $0x360] sm:$0xff]  ;;  %v16742_v62 = vcombine.low %v1054_v61, %v1058_v31  ;;  %v20760_v28 = vcombine.low %v170_v41, %v178_v35  ;;  %v16753_v33 = vcombine.high %v1063_v38, %v1067_v5  ;;  %v1079_v31 = vld [vmem:[#allocation5 + $0x1708] sm:$0xff] }
 0x2bb   :  { %v1078_v41 = vld [vmem:[#allocation5 + $0x1700] sm:$0xff] }
 0x2bc   :  { %23534 = vst [vmem:[#allocation122_spill] sm:$0xff] %v20760_v28  ;;  %v1082_v35 = vld [vmem:[#allocation5 + $0x1720] sm:$0xff] }
 0x2bd   :  { %8788 = vmatpush1.bf16.msra.mxu0 %v16726_v13  ;;  %10332 = vmatpush1.bf16.msra.mxu1 %v16728_v12  ;;  %v1070_v13 = vld [vmem:[#allocation5 + $0x16c0] sm:$0xff] }
 0x2be   :  { %8789 = vmatprep.subr.bf16.mxu0 %v16735_v47  ;;  %10333 = vmatprep.subr.bf16.mxu1 %v16737_v27  ;;  %v1074_v12 = vld [vmem:[#allocation5 + $0x16e0] sm:$0xff]  ;;  %v20762_v47 = vcombine.high %v186_v20, %v194_v7  ;;  %v1071_v27 = vld [vmem:[#allocation5 + $0x16c8] sm:$0xff] }
 0x2bf   :  { %8653 = vmatmul.mubr.bf16.gmra.mrb[16].mxu0 %v20752_v15  ;;  %10197 = vmatmul.mubr.bf16.gmra.mrb[16].mxu1 %v20752_v15  ;;  %v1075_v15 = vld [vmem:[#allocation5 + $0x16e8] sm:$0xff]  ;;  %v16759_v61 = vcombine.high %v1070_v13, %v1074_v12 }
 0x2c0   :  { %8662 = vmatprep.mubr.bf16.mxu0 %v20754_v54  ;;  %10206 = vmatprep.mubr.bf16.mxu1 %v20754_v54  ;;  %23535 = vst [vmem:[#allocation123_spill] sm:$0xff] %v20762_v47  ;;  %v16750_v54 = vcombine.low %v1062_v44, %v1066_v55  ;;  %v16761_v14 = vcombine.high %v1071_v27, %v1075_v15 }
 0x2c1   :  { %8790 = vmatpush1.bf16.msra.mxu0 %v16734_v4  ;;  %10334 = vmatpush1.bf16.msra.mxu1 %v16736_v8  ;;  %v16752_v4 = vcombine.low %v1063_v38, %v1067_v5  ;;  %v202_v8 = vld [vmem:[#allocation2 + $0x3a0] sm:$0xff]  ;;  %v16760_v44 = vcombine.low %v1071_v27, %v1075_v15  ;;  %v16767_v55 = vcombine.high %v1078_v41, %v1082_v35  ;;  %v1099_v27 = vld [vmem:[#allocation5 + $0x17a8] sm:$0xff] }
 0x2c2   :  { %8791 = vmatprep.subr.bf16.mxu0 %v16743_v49  ;;  %10335 = vmatprep.subr.bf16.mxu1 %v16745_v22  ;;  %v210_v49 = vld [vmem:[#allocation2 + $0x3e0] sm:$0xff]  ;;  %v16758_v22 = vcombine.low %v1070_v13, %v1074_v12  ;;  %v20768_v38 = vcombine.low %v186_v20, %v194_v7  ;;  %v16769_v5 = vcombine.high %v1079_v31, %v1083_v32  ;;  %v1095_v12 = vld [vmem:[#allocation5 + $0x1788] sm:$0xff] }
 0x2c3   :  { %v1094_v20 = vld [vmem:[#allocation5 + $0x1780] sm:$0xff] }
 0x2c4   :  { %23536 = vst [vmem:[#allocation124_spill] sm:$0xff] %v20768_v38  ;;  %v1098_v7 = vld [vmem:[#allocation5 + $0x17a0] sm:$0xff] }
 0x2c5   :  { %8792 = vmatpush1.bf16.msra.mxu0 %v16742_v62  ;;  %10336 = vmatpush1.bf16.msra.mxu1 %v16744_v10  ;;  %v1086_v62 = vld [vmem:[#allocation5 + $0x1740] sm:$0xff] }
 0x2c6   :  { %8793 = vmatprep.subr.bf16.mxu0 %v16751_v17  ;;  %10337 = vmatprep.subr.bf16.mxu1 %v16753_v33  ;;  %v1090_v10 = vld [vmem:[#allocation5 + $0x1760] sm:$0xff]  ;;  %v20770_v17 = vcombine.high %v202_v8, %v210_v49  ;;  %v1087_v33 = vld [vmem:[#allocation5 + $0x1748] sm:$0xff] }
 0x2c7   :  { %8663 = vmatmul.mubr.bf16.gmra.mrb[20].mxu0 %v20760_v28  ;;  %10207 = vmatmul.mubr.bf16.gmra.mrb[20].mxu1 %v20760_v28  ;;  %v1091_v28 = vld [vmem:[#allocation5 + $0x1768] sm:$0xff]  ;;  %v16775_v13 = vcombine.high %v1086_v62, %v1090_v10 }
 0x2c8   :  { %8672 = vmatprep.mubr.bf16.mxu0 %v20762_v47  ;;  %10216 = vmatprep.mubr.bf16.mxu1 %v20762_v47  ;;  %23537 = vst [vmem:[#allocation125_spill] sm:$0xff] %v20770_v17  ;;  %v16766_v47 = vcombine.low %v1078_v41, %v1082_v35  ;;  %v16777_v15 = vcombine.high %v1087_v33, %v1091_v28 }
 0x2c9   :  { %8794 = vmatpush1.bf16.msra.mxu0 %v16750_v54  ;;  %10338 = vmatpush1.bf16.msra.mxu1 %v16752_v4  ;;  %v16768_v54 = vcombine.low %v1079_v31, %v1083_v32  ;;  %v218_v4 = vld [vmem:[#allocation2 + $0x420] sm:$0xff]  ;;  %v16776_v41 = vcombine.low %v1087_v33, %v1091_v28  ;;  %v16783_v35 = vcombine.high %v1094_v20, %v1098_v7 }
 0x2ca   :  { %8795 = vmatprep.subr.bf16.mxu0 %v16759_v61  ;;  %10339 = vmatprep.subr.bf16.mxu1 %v16761_v14  ;;  %v226_v61 = vld [vmem:[#allocation2 + $0x460] sm:$0xff]  ;;  %v16774_v14 = vcombine.low %v1086_v62, %v1090_v10  ;;  %v20776_v31 = vcombine.low %v202_v8, %v210_v49  ;;  %v16785_v32 = vcombine.high %v1095_v12, %v1099_v27 }
 0x2cb   :  { %v234_v8 = vld [vmem:[#allocation2 + $0x4a0] sm:$0xff] }
 0x2cc   :  { %23538 = vst [vmem:[#allocation126_spill] sm:$0xff] %v20776_v31  ;;  %v242_v49 = vld [vmem:[#allocation2 + $0x4e0] sm:$0xff] }
 0x2cd   :  { %8796 = vmatpush1.bf16.msra.mxu0 %v16758_v22  ;;  %10340 = vmatpush1.bf16.msra.mxu1 %v16760_v44  ;;  %v1102_v22 = vld [vmem:[#allocation5 + $0x17c0] sm:$0xff] }
 0x2ce   :  { %8797 = vmatprep.subr.bf16.mxu0 %v16767_v55  ;;  %10341 = vmatprep.subr.bf16.mxu1 %v16769_v5  ;;  %v1106_v44 = vld [vmem:[#allocation5 + $0x17e0] sm:$0xff]  ;;  %v20778_v55 = vcombine.high %v218_v4, %v226_v61  ;;  %v1103_v5 = vld [vmem:[#allocation5 + $0x17c8] sm:$0xff] }
 0x2cf   :  { %8673 = vmatmul.mubr.bf16.gmra.mrb[24].mxu0 %v20768_v38  ;;  %10217 = vmatmul.mubr.bf16.gmra.mrb[24].mxu1 %v20768_v38  ;;  %v1107_v38 = vld [vmem:[#allocation5 + $0x17e8] sm:$0xff]  ;;  %v16791_v62 = vcombine.high %v1102_v22, %v1106_v44  ;;  %v16790_v10 = vcombine.low %v1102_v22, %v1106_v44  ;;  %v298_v44 = vld [vmem:[#allocation2 + $0x6a0] sm:$0xff] }
 0x2d0   :  { %8682 = vmatprep.mubr.bf16.mxu0 %v20770_v17  ;;  %10226 = vmatprep.mubr.bf16.mxu1 %v20770_v17  ;;  %23539 = vst [vmem:[#allocation127_spill] sm:$0xff] %v20778_v55  ;;  %v16782_v17 = vcombine.low %v1094_v20, %v1098_v7  ;;  %v16793_v28 = vcombine.high %v1103_v5, %v1107_v38 }
 0x2d1   :  { %8798 = vmatpush1.bf16.msra.mxu0 %v16766_v47  ;;  %10342 = vmatpush1.bf16.msra.mxu1 %v16768_v54  ;;  %v16784_v47 = vcombine.low %v1095_v12, %v1099_v27  ;;  %v16792_v33 = vcombine.low %v1103_v5, %v1107_v38  ;;  %v16799_v54 = vcombine.high %v20707_v53, %v20709_v37  ;;  %v250_v38 = vld [vmem:[#allocation2 + $0x520] sm:$0xff] }
 0x2d2   :  { %8799 = vmatprep.subr.bf16.mxu0 %v16775_v13  ;;  %10343 = vmatprep.subr.bf16.mxu1 %v16777_v15  ;;  %v20786_v13 = vcombine.low %v218_v4, %v226_v61  ;;  %v16801_v15 = vcombine.high %v20717_v6, %v20719_v56  ;;  %v20790_v20 = vcombine.high %v234_v8, %v242_v49  ;;  %v266_v27 = vld [vmem:[#allocation2 + $0x5a0] sm:$0xff] }
 0x2d3   :  { %v20796_v7 = vcombine.low %v234_v8, %v242_v49  ;;  %v274_v4 = vld [vmem:[#allocation2 + $0x5e0] sm:$0xff] }
 0x2d4   :  { %23540 = vst [vmem:[#allocation128_spill] sm:$0xff] %v20786_v13  ;;  %23541 = vst [vmem:[#allocation129_spill] sm:$0xff] %v20790_v20  ;;  %v306_v5 = vld [vmem:[#allocation2 + $0x6e0] sm:$0xff] }
 0x2d5   :  { %8800 = vmatpush1.bf16.msra.mxu0 %v16774_v14  ;;  %10344 = vmatpush1.bf16.msra.mxu1 %v16776_v41  ;;  %23542 = vst [vmem:[#allocation130_spill] sm:$0xff] %v20796_v7  ;;  %v20806_v14 = vcombine.high %v266_v27, %v274_v4  ;;  %v282_v41 = vld [vmem:[#allocation2 + $0x620] sm:$0xff]  ;;  %v20828_v49 = vcombine.low %v298_v44, %v306_v5 }
 0x2d6   :  { %8801 = vmatprep.subr.bf16.mxu0 %v16783_v35  ;;  %10345 = vmatprep.subr.bf16.mxu1 %v16785_v32  ;;  %v290_v35 = vld [vmem:[#allocation2 + $0x660] sm:$0xff]  ;;  %v20812_v32 = vcombine.low %v266_v27, %v274_v4  ;;  %v99_v27 = vld [vmem:[#allocation2 + $0x68] sm:$0xff] }
 0x2d7   :  { %8683 = vmatmul.mubr.bf16.gmra.mrb[28].mxu0 %v20776_v31  ;;  %10227 = vmatmul.mubr.bf16.gmra.mrb[28].mxu1 %v20776_v31  ;;  %23545 = vst [vmem:[#allocation133_spill] sm:$0xff] %v20806_v14  ;;  %v20814_v22 = vcombine.high %v282_v41, %v290_v35  ;;  %v322_v8 = vld [vmem:[#allocation2 + $0x760] sm:$0xff]  ;;  %23550 = vst [vmem:[#allocation138_spill] sm:$0xff] %v20828_v49  ;;  %v1155_v31 = vld [vmem:[#allocation5 + $0x1968] sm:$0xff] }
 0x2d8   :  { %8692 = vmatprep.mubr.bf16.mxu0 %v20778_v55  ;;  %10236 = vmatprep.mubr.bf16.mxu1 %v20778_v55  ;;  %23546 = vst [vmem:[#allocation134_spill] sm:$0xff] %v20812_v32  ;;  %v1151_v55 = vld [vmem:[#allocation5 + $0x1948] sm:$0xff] }
 0x2d9   :  { %8802 = vmatpush1.bf16.msra.mxu0 %v16782_v17  ;;  %10346 = vmatpush1.bf16.msra.mxu1 %v16784_v47  ;;  %v258_v17 = vld [vmem:[#allocation2 + $0x560] sm:$0xff]  ;;  %23547 = vst [vmem:[#allocation135_spill] sm:$0xff] %v20814_v22  ;;  %v20820_v47 = vcombine.low %v282_v41, %v290_v35  ;;  %v107_v35 = vld [vmem:[#allocation2 + $0xa8] sm:$0xff] }
 0x2da   :  { %8803 = vmatprep.subr.bf16.mxu0 %v16791_v62  ;;  %10347 = vmatprep.subr.bf16.mxu1 %v16793_v28  ;;  %v20798_v12 = vcombine.high %v250_v38, %v258_v17  ;;  %v20804_v61 = vcombine.low %v250_v38, %v258_v17  ;;  %v20822_v62 = vcombine.high %v298_v44, %v306_v5  ;;  %v314_v28 = vld [vmem:[#allocation2 + $0x720] sm:$0xff]  ;;  %v91_v17 = vld [vmem:[#allocation2 + $0x28] sm:$0xff] }
 0x2db   :  { %23548 = vst [vmem:[#allocation136_spill] sm:$0xff] %v20820_v47  ;;  %v20846_v41 = vcombine.high %v91_v17, %v99_v27  ;;  %v115_v44 = vld [vmem:[#allocation2 + $0xe8] sm:$0xff]  ;;  %v20852_v5 = vcombine.low %v91_v17, %v99_v27  ;;  %v23558_v17 = vcombine.low %v20707_v53, %v20709_v37 }
 0x2dc   :  { %23543 = vst [vmem:[#allocation131_spill] sm:$0xff] %v20798_v12  ;;  %23544 = vst [vmem:[#allocation132_spill] sm:$0xff] %v20804_v61 }
 0x2dd   :  { %8804 = vmatpush1.bf16.msra.mxu0 %v16790_v10  ;;  %10348 = vmatpush1.bf16.msra.mxu1 %v16792_v33  ;;  %23549 = vst [vmem:[#allocation137_spill] sm:$0xff] %v20822_v62  ;;  %v20830_v10 = vcombine.high %v314_v28, %v322_v8  ;;  %v330_v33 = vld [vmem:[#allocation2 + $0x7a0] sm:$0xff]  ;;  %23555 = vst [vmem:[#allocation143_spill] sm:$0xff] %v20846_v41 }
 0x2de   :  { %8966 = vmatprep.subr.bf16.mxu0 %v16799_v54  ;;  %10510 = vmatprep.subr.bf16.mxu1 %v16801_v15  ;;  %v338_v54 = vld [vmem:[#allocation2 + $0x7e0] sm:$0xff]  ;;  %v20836_v15 = vcombine.low %v314_v28, %v322_v8  ;;  %23556 = vst [vmem:[#allocation144_spill] sm:$0xff] %v20852_v5 }
 0x2df   :  { %8693 = vmatmul.mubr.bf16.gmra.mrb[32].mxu0 %v20786_v13  ;;  %10237 = vmatmul.mubr.bf16.gmra.mrb[32].mxu1 %v20786_v13  ;;  %23551 = vst [vmem:[#allocation139_spill] sm:$0xff] %v20830_v10  ;;  %v20838_v38 = vcombine.high %v330_v33, %v338_v54  ;;  %v20844_v4 = vcombine.low %v330_v33, %v338_v54  ;;  %v1118_v28 = vld [vmem:[#allocation5 + $0x1840] sm:$0xff] }
 0x2e0   :  { %8702 = vmatprep.mubr.bf16.mxu0 %v20790_v20  ;;  %10246 = vmatprep.mubr.bf16.mxu1 %v20790_v20  ;;  %23552 = vst [vmem:[#allocation140_spill] sm:$0xff] %v20836_v15  ;;  %v1122_v8 = vld [vmem:[#allocation5 + $0x1860] sm:$0xff]  ;;  %v20854_v33 = vcombine.high %v107_v35, %v115_v44  ;;  %v131_v20 = vld [vmem:[#allocation2 + $0x168] sm:$0xff] }
 0x2e1   :  { %23553 = vst [vmem:[#allocation141_spill] sm:$0xff] %v20838_v38  ;;  %23554 = vst [vmem:[#allocation142_spill] sm:$0xff] %v20844_v4  ;;  %v16807_v54 = vcombine.high %v1118_v28, %v1122_v8  ;;  %v16806_v27 = vcombine.low %v1118_v28, %v1122_v8  ;;  %v20878_v28 = vcombine.low %v107_v35, %v115_v44  ;;  %v1134_v8 = vld [vmem:[#allocation5 + $0x18c0] sm:$0xff]  ;;  %v1147_v44 = vld [vmem:[#allocation5 + $0x1928] sm:$0xff] }
 0x2e2   :  { %23557 = vst [vmem:[#allocation145_spill] sm:$0xff] %v20854_v33  ;;  %v1146_v35 = vld [vmem:[#allocation5 + $0x1920] sm:$0xff] }
 0x2e3   :  { %23560 = vst [vmem:[#allocation146_spill] sm:$0xff] %v20878_v28 }
 0x2e7   :  { %8703 = vmatmul.mubr.bf16.gmra.mrb[36].mxu0 %v20796_v7  ;;  %10247 = vmatmul.mubr.bf16.gmra.mrb[36].mxu1 %v20796_v7 }
 0x2e8   :  { %8712 = vmatprep.mubr.bf16.mxu0 %v20798_v12  ;;  %10256 = vmatprep.mubr.bf16.mxu1 %v20798_v12  ;;  %v23559_v12 = vcombine.low %v20717_v6, %v20719_v56  ;;  %v1135_v6 = vld [vmem:[#allocation5 + $0x18c8] sm:$0xff] }
 0x2ef   :  { %8713 = vmatmul.mubr.bf16.gmra.mrb[40].mxu0 %v20804_v61  ;;  %10257 = vmatmul.mubr.bf16.gmra.mrb[40].mxu1 %v20804_v61  ;;  %v20869_v61 = vld [vmem:[#allocation5 + $0x1c28] sm:$0xff] }
 0x2f0   :  { %8722 = vmatprep.mubr.bf16.mxu0 %v20806_v14  ;;  %10266 = vmatprep.mubr.bf16.mxu1 %v20806_v14  ;;  %v20867_v14 = vld [vmem:[#allocation5 + $0x1c08] sm:$0xff] }
 0x2f7   :  { %8723 = vmatmul.mubr.bf16.gmra.mrb[44].mxu0 %v20812_v32  ;;  %10267 = vmatmul.mubr.bf16.gmra.mrb[44].mxu1 %v20812_v32  ;;  %v1142_v32 = vld [vmem:[#allocation5 + $0x1900] sm:$0xff] }
 0x2f8   :  { %8732 = vmatprep.mubr.bf16.mxu0 %v20814_v22  ;;  %10276 = vmatprep.mubr.bf16.mxu1 %v20814_v22  ;;  %v20857_v22 = vld [vmem:[#allocation5 + $0x1c00] sm:$0xff] }
 0x2ff   :  { %8733 = vmatmul.mubr.bf16.gmra.mrb[48].mxu0 %v20820_v47  ;;  %10277 = vmatmul.mubr.bf16.gmra.mrb[48].mxu1 %v20820_v47  ;;  %v1131_v47 = vld [vmem:[#allocation5 + $0x18a8] sm:$0xff] }
 0x300   :  { %8742 = vmatprep.mubr.bf16.mxu0 %v20822_v62  ;;  %10286 = vmatprep.mubr.bf16.mxu1 %v20822_v62  ;;  %v1127_v62 = vld [vmem:[#allocation5 + $0x1888] sm:$0xff] }
 0x301   :  { %v16817_v37 = vcombine.high %v1127_v62, %v1131_v47 }
 0x307   :  { %8743 = vmatmul.mubr.bf16.gmra.mrb[52].mxu0 %v20828_v49  ;;  %10287 = vmatmul.mubr.bf16.gmra.mrb[52].mxu1 %v20828_v49  ;;  %v1130_v49 = vld [vmem:[#allocation5 + $0x18a0] sm:$0xff] }
 0x308   :  { %8752 = vmatprep.mubr.bf16.mxu0 %v20830_v10  ;;  %10296 = vmatprep.mubr.bf16.mxu1 %v20830_v10  ;;  %v1126_v10 = vld [vmem:[#allocation5 + $0x1880] sm:$0xff] }
 0x309   :  { %v16815_v13 = vcombine.high %v1126_v10, %v1130_v49 }
 0x30f   :  { %8753 = vmatmul.mubr.bf16.gmra.mrb[56].mxu0 %v20836_v15  ;;  %10297 = vmatmul.mubr.bf16.gmra.mrb[56].mxu1 %v20836_v15  ;;  %v1123_v15 = vld [vmem:[#allocation5 + $0x1868] sm:$0xff] }
 0x310   :  { %8762 = vmatprep.mubr.bf16.mxu0 %v20838_v38  ;;  %10306 = vmatprep.mubr.bf16.mxu1 %v20838_v38  ;;  %v1119_v38 = vld [vmem:[#allocation5 + $0x1848] sm:$0xff] }
 0x311   :  { %v16808_v7 = vcombine.low %v1119_v38, %v1123_v15 }
 0x317   :  { %8763 = vmatmul.mubr.bf16.gmra.mrb[60].mxu0 %v20844_v4  ;;  %10307 = vmatmul.mubr.bf16.gmra.mrb[60].mxu1 %v20844_v4  ;;  %v16809_v4 = vcombine.high %v1119_v38, %v1123_v15  ;;  %v16814_v15 = vcombine.low %v1126_v10, %v1130_v49  ;;  %v16816_v38 = vcombine.low %v1127_v62, %v1131_v47  ;;  %v147_v49 = vld [vmem:[#allocation2 + $0x1e8] sm:$0xff] }
 0x318   :  { %8805 = vmatprep.mubr.bf16.mxu0 %v20846_v41  ;;  %10349 = vmatprep.mubr.bf16.mxu1 %v20846_v41  ;;  %v20859_v41 = vld [vmem:[#allocation5 + $0x1c20] sm:$0xff]  ;;  %v16831_v62 = vcombine.high %v1142_v32, %v1146_v35 }
 0x31f   :  { %8806 = vmatmul.mubr.bf16.vlgmr.msra.gmra.mrb[0].mxu0 %v20852_v5  ;;  %10350 = vmatmul.mubr.bf16.vlgmr.msra.gmra.mrb[0].mxu1 %v20852_v5  ;;  %v123_v5 = vld [vmem:[#allocation2 + $0x128] sm:$0xff] }
 0x320   :  { %8967 = vmatpush1.bf16.msra.mxu0 %v23558_v17  ;;  %10511 = vmatpush1.bf16.msra.mxu1 %v23559_v12  ;;  %v1138_v17 = vld [vmem:[#allocation5 + $0x18e0] sm:$0xff]  ;;  %v20880_v56 = vcombine.high %v123_v5, %v131_v20  ;;  %v1139_v12 = vld [vmem:[#allocation5 + $0x18e8] sm:$0xff]  ;;  %v20886_v10 = vcombine.low %v123_v5, %v131_v20 }
 0x321   :  { %8815 = vmatprep.mubr.bf16.mxu0 %v20854_v33  ;;  %10359 = vmatprep.mubr.bf16.mxu1 %v20854_v33  ;;  %v16823_v53 = vcombine.high %v1134_v8, %v1138_v17  ;;  %v16824_v47 = vcombine.low %v1135_v6, %v1139_v12  ;;  %v1158_v20 = vld [vmem:[#allocation5 + $0x1980] sm:$0xff] }
 0x322   :  { %8968 = vmatprep.subr.bf16.mxu0 %v16807_v54  ;;  %10512 = vmatprep.subr.bf16.mxu1 %v16809_v4  ;;  %23561 = vst [vmem:[#allocation147_spill] sm:$0xff] %v20880_v56  ;;  %v16825_v54 = vcombine.high %v1135_v6, %v1139_v12  ;;  %v1143_v4 = vld [vmem:[#allocation5 + $0x1908] sm:$0xff]  ;;  %23562 = vst [vmem:[#allocation148_spill] sm:$0xff] %v20886_v10  ;;  %v1162_v5 = vld [vmem:[#allocation5 + $0x19a0] sm:$0xff] }
 0x323   :  { %v1163_v6 = vld [vmem:[#allocation5 + $0x19a8] sm:$0xff] }
 0x324   :  { %8969 = vmatpush1.bf16.msra.mxu0 %v16806_v27  ;;  %10513 = vmatpush1.bf16.msra.mxu1 %v16808_v7  ;;  %v139_v7 = vld [vmem:[#allocation2 + $0x1a8] sm:$0xff]  ;;  %v16833_v27 = vcombine.high %v1143_v4, %v1147_v44 }
 0x325   :  { %8970 = vmatprep.subr.bf16.mxu0 %v16815_v13  ;;  %10514 = vmatprep.subr.bf16.mxu1 %v16817_v37  ;;  %v16822_v13 = vcombine.low %v1134_v8, %v1138_v17  ;;  %v1150_v37 = vld [vmem:[#allocation5 + $0x1940] sm:$0xff]  ;;  %v20888_v33 = vcombine.high %v139_v7, %v147_v49  ;;  %v1159_v17 = vld [vmem:[#allocation5 + $0x1988] sm:$0xff] }
 0x326   :  { %v155_v12 = vld [vmem:[#allocation2 + $0x228] sm:$0xff] }
 0x327   :  { %8816 = vmatmul.mubr.bf16.gmra.mrb[4].mxu0 %v20878_v28  ;;  %10360 = vmatmul.mubr.bf16.gmra.mrb[4].mxu1 %v20878_v28  ;;  %v1154_v28 = vld [vmem:[#allocation5 + $0x1960] sm:$0xff]  ;;  %23563 = vst [vmem:[#allocation149_spill] sm:$0xff] %v20888_v33 }
 0x328   :  { %8825 = vmatprep.mubr.bf16.mxu0 %v20880_v56  ;;  %10369 = vmatprep.mubr.bf16.mxu1 %v20880_v56  ;;  %v16830_v56 = vcombine.low %v1142_v32, %v1146_v35  ;;  %v16839_v8 = vcombine.high %v1150_v37, %v1154_v28  ;;  %v163_v32 = vld [vmem:[#allocation2 + $0x268] sm:$0xff]  ;;  %v16847_v35 = vcombine.high %v1158_v20, %v1162_v5 }
 0x329   :  { %8971 = vmatpush1.bf16.msra.mxu0 %v16814_v15  ;;  %10515 = vmatpush1.bf16.msra.mxu1 %v16816_v38  ;;  %v16832_v15 = vcombine.low %v1143_v4, %v1147_v44  ;;  %v16838_v38 = vcombine.low %v1150_v37, %v1154_v28  ;;  %v20894_v4 = vcombine.low %v139_v7, %v147_v49  ;;  %v1178_v7 = vld [vmem:[#allocation5 + $0x1a20] sm:$0xff]  ;;  %v1175_v49 = vld [vmem:[#allocation5 + $0x1a08] sm:$0xff] }
 0x32a   :  { %8972 = vmatprep.subr.bf16.mxu0 %v16823_v53  ;;  %10516 = vmatprep.subr.bf16.mxu1 %v16825_v54  ;;  %v16841_v53 = vcombine.high %v1151_v55, %v1155_v31  ;;  %v16840_v54 = vcombine.low %v1151_v55, %v1155_v31  ;;  %v16849_v44 = vcombine.high %v1159_v17, %v1163_v6  ;;  %v1174_v55 = vld [vmem:[#allocation5 + $0x1a00] sm:$0xff]  ;;  %v1179_v37 = vld [vmem:[#allocation5 + $0x1a28] sm:$0xff] }
 0x32b   :  { %23564 = vst [vmem:[#allocation150_spill] sm:$0xff] %v20894_v4 }
 0x32d   :  { %8973 = vmatpush1.bf16.msra.mxu0 %v16822_v13  ;;  %10517 = vmatpush1.bf16.msra.mxu1 %v16824_v47  ;;  %v1166_v13 = vld [vmem:[#allocation5 + $0x19c0] sm:$0xff] }
 0x32e   :  { %8974 = vmatprep.subr.bf16.mxu0 %v16831_v62  ;;  %10518 = vmatprep.subr.bf16.mxu1 %v16833_v27  ;;  %v1170_v47 = vld [vmem:[#allocation5 + $0x19e0] sm:$0xff]  ;;  %v20896_v62 = vcombine.high %v155_v12, %v163_v32  ;;  %v1167_v27 = vld [vmem:[#allocation5 + $0x19c8] sm:$0xff] }
 0x32f   :  { %8826 = vmatmul.mubr.bf16.gmra.mrb[8].mxu0 %v20886_v10  ;;  %10370 = vmatmul.mubr.bf16.gmra.mrb[8].mxu1 %v20886_v10  ;;  %v1171_v10 = vld [vmem:[#allocation5 + $0x19e8] sm:$0xff]  ;;  %v16855_v28 = vcombine.high %v1166_v13, %v1170_v47 }
 0x330   :  { %8835 = vmatprep.mubr.bf16.mxu0 %v20888_v33  ;;  %10379 = vmatprep.mubr.bf16.mxu1 %v20888_v33  ;;  %23565 = vst [vmem:[#allocation151_spill] sm:$0xff] %v20896_v62  ;;  %v16846_v33 = vcombine.low %v1158_v20, %v1162_v5  ;;  %v16857_v31 = vcombine.high %v1167_v27, %v1171_v10 }
 0x331   :  { %8975 = vmatpush1.bf16.msra.mxu0 %v16830_v56  ;;  %10519 = vmatpush1.bf16.msra.mxu1 %v16832_v15  ;;  %v16848_v56 = vcombine.low %v1159_v17, %v1163_v6  ;;  %v171_v15 = vld [vmem:[#allocation2 + $0x2a8] sm:$0xff]  ;;  %v16856_v20 = vcombine.low %v1167_v27, %v1171_v10  ;;  %v16863_v5 = vcombine.high %v1174_v55, %v1178_v7 }
 0x332   :  { %8976 = vmatprep.subr.bf16.mxu0 %v16839_v8  ;;  %10520 = vmatprep.subr.bf16.mxu1 %v16841_v53  ;;  %v179_v8 = vld [vmem:[#allocation2 + $0x2e8] sm:$0xff]  ;;  %v16854_v53 = vcombine.low %v1166_v13, %v1170_v47  ;;  %v20902_v17 = vcombine.low %v155_v12, %v163_v32  ;;  %v16865_v6 = vcombine.high %v1175_v49, %v1179_v37  ;;  %v1190_v12 = vld [vmem:[#allocation5 + $0x1a80] sm:$0xff] }
 0x333   :  { %v1194_v32 = vld [vmem:[#allocation5 + $0x1aa0] sm:$0xff]  ;;  %v1191_v47 = vld [vmem:[#allocation5 + $0x1a88] sm:$0xff] }
 0x334   :  { %23566 = vst [vmem:[#allocation152_spill] sm:$0xff] %v20902_v17  ;;  %v1195_v27 = vld [vmem:[#allocation5 + $0x1aa8] sm:$0xff] }
 0x335   :  { %8977 = vmatpush1.bf16.msra.mxu0 %v16838_v38  ;;  %10521 = vmatpush1.bf16.msra.mxu1 %v16840_v54  ;;  %v1182_v38 = vld [vmem:[#allocation5 + $0x1a40] sm:$0xff] }
 0x336   :  { %8978 = vmatprep.subr.bf16.mxu0 %v16847_v35  ;;  %10522 = vmatprep.subr.bf16.mxu1 %v16849_v44  ;;  %v1186_v54 = vld [vmem:[#allocation5 + $0x1a60] sm:$0xff]  ;;  %v20904_v35 = vcombine.high %v171_v15, %v179_v8  ;;  %v1183_v44 = vld [vmem:[#allocation5 + $0x1a48] sm:$0xff] }
 0x337   :  { %8836 = vmatmul.mubr.bf16.gmra.mrb[12].mxu0 %v20894_v4  ;;  %10380 = vmatmul.mubr.bf16.gmra.mrb[12].mxu1 %v20894_v4  ;;  %v1187_v4 = vld [vmem:[#allocation5 + $0x1a68] sm:$0xff]  ;;  %v16871_v13 = vcombine.high %v1182_v38, %v1186_v54 }
 0x338   :  { %8845 = vmatprep.mubr.bf16.mxu0 %v20896_v62  ;;  %10389 = vmatprep.mubr.bf16.mxu1 %v20896_v62  ;;  %23567 = vst [vmem:[#allocation153_spill] sm:$0xff] %v20904_v35  ;;  %v16862_v62 = vcombine.low %v1174_v55, %v1178_v7  ;;  %v16873_v10 = vcombine.high %v1183_v44, %v1187_v4 }
 0x339   :  { %8979 = vmatpush1.bf16.msra.mxu0 %v16846_v33  ;;  %10523 = vmatpush1.bf16.msra.mxu1 %v16848_v56  ;;  %v16864_v33 = vcombine.low %v1175_v49, %v1179_v37  ;;  %v187_v56 = vld [vmem:[#allocation2 + $0x328] sm:$0xff]  ;;  %v16872_v55 = vcombine.low %v1183_v44, %v1187_v4  ;;  %v16879_v7 = vcombine.high %v1190_v12, %v1194_v32 }
 0x33a   :  { %8980 = vmatprep.subr.bf16.mxu0 %v16855_v28  ;;  %10524 = vmatprep.subr.bf16.mxu1 %v16857_v31  ;;  %v195_v28 = vld [vmem:[#allocation2 + $0x368] sm:$0xff]  ;;  %v16870_v31 = vcombine.low %v1182_v38, %v1186_v54  ;;  %v20910_v49 = vcombine.low %v171_v15, %v179_v8  ;;  %v16881_v37 = vcombine.high %v1191_v47, %v1195_v27  ;;  %v1206_v15 = vld [vmem:[#allocation5 + $0x1b00] sm:$0xff] }
 0x33b   :  { %v1210_v8 = vld [vmem:[#allocation5 + $0x1b20] sm:$0xff]  ;;  %v1207_v54 = vld [vmem:[#allocation5 + $0x1b08] sm:$0xff] }
 0x33c   :  { %23568 = vst [vmem:[#allocation154_spill] sm:$0xff] %v20910_v49  ;;  %v1211_v44 = vld [vmem:[#allocation5 + $0x1b28] sm:$0xff] }
 0x33d   :  { %8981 = vmatpush1.bf16.msra.mxu0 %v16854_v53  ;;  %10525 = vmatpush1.bf16.msra.mxu1 %v16856_v20  ;;  %v1198_v53 = vld [vmem:[#allocation5 + $0x1ac0] sm:$0xff] }
 0x33e   :  { %8982 = vmatprep.subr.bf16.mxu0 %v16863_v5  ;;  %10526 = vmatprep.subr.bf16.mxu1 %v16865_v6  ;;  %v1202_v20 = vld [vmem:[#allocation5 + $0x1ae0] sm:$0xff]  ;;  %v20912_v5 = vcombine.high %v187_v56, %v195_v28  ;;  %v1199_v6 = vld [vmem:[#allocation5 + $0x1ac8] sm:$0xff] }
 0x33f   :  { %8846 = vmatmul.mubr.bf16.gmra.mrb[16].mxu0 %v20902_v17  ;;  %10390 = vmatmul.mubr.bf16.gmra.mrb[16].mxu1 %v20902_v17  ;;  %v1203_v17 = vld [vmem:[#allocation5 + $0x1ae8] sm:$0xff]  ;;  %v16887_v38 = vcombine.high %v1198_v53, %v1202_v20 }
 0x340   :  { %8855 = vmatprep.mubr.bf16.mxu0 %v20904_v35  ;;  %10399 = vmatprep.mubr.bf16.mxu1 %v20904_v35  ;;  %23569 = vst [vmem:[#allocation155_spill] sm:$0xff] %v20912_v5  ;;  %v16878_v35 = vcombine.low %v1190_v12, %v1194_v32  ;;  %v16889_v4 = vcombine.high %v1199_v6, %v1203_v17 }
 0x341   :  { %8983 = vmatpush1.bf16.msra.mxu0 %v16862_v62  ;;  %10527 = vmatpush1.bf16.msra.mxu1 %v16864_v33  ;;  %v16880_v62 = vcombine.low %v1191_v47, %v1195_v27  ;;  %v203_v33 = vld [vmem:[#allocation2 + $0x3a8] sm:$0xff]  ;;  %v16888_v12 = vcombine.low %v1199_v6, %v1203_v17  ;;  %v16895_v32 = vcombine.high %v1206_v15, %v1210_v8 }
 0x342   :  { %8984 = vmatprep.subr.bf16.mxu0 %v16871_v13  ;;  %10528 = vmatprep.subr.bf16.mxu1 %v16873_v10  ;;  %v211_v13 = vld [vmem:[#allocation2 + $0x3e8] sm:$0xff]  ;;  %v16886_v10 = vcombine.low %v1198_v53, %v1202_v20  ;;  %v20918_v47 = vcombine.low %v187_v56, %v195_v28  ;;  %v16897_v27 = vcombine.high %v1207_v54, %v1211_v44  ;;  %v1222_v56 = vld [vmem:[#allocation5 + $0x1b80] sm:$0xff] }
 0x343   :  { %v1226_v28 = vld [vmem:[#allocation5 + $0x1ba0] sm:$0xff]  ;;  %v1223_v20 = vld [vmem:[#allocation5 + $0x1b88] sm:$0xff] }
 0x344   :  { %23570 = vst [vmem:[#allocation156_spill] sm:$0xff] %v20918_v47  ;;  %v1227_v6 = vld [vmem:[#allocation5 + $0x1ba8] sm:$0xff] }
 0x345   :  { %8985 = vmatpush1.bf16.msra.mxu0 %v16870_v31  ;;  %10529 = vmatpush1.bf16.msra.mxu1 %v16872_v55  ;;  %v1214_v31 = vld [vmem:[#allocation5 + $0x1b40] sm:$0xff] }
 0x346   :  { %8986 = vmatprep.subr.bf16.mxu0 %v16879_v7  ;;  %10530 = vmatprep.subr.bf16.mxu1 %v16881_v37  ;;  %v1218_v55 = vld [vmem:[#allocation5 + $0x1b60] sm:$0xff]  ;;  %v20920_v7 = vcombine.high %v203_v33, %v211_v13  ;;  %v1215_v37 = vld [vmem:[#allocation5 + $0x1b48] sm:$0xff] }
 0x347   :  { %8856 = vmatmul.mubr.bf16.gmra.mrb[20].mxu0 %v20910_v49  ;;  %10400 = vmatmul.mubr.bf16.gmra.mrb[20].mxu1 %v20910_v49  ;;  %v1219_v49 = vld [vmem:[#allocation5 + $0x1b68] sm:$0xff]  ;;  %v16903_v53 = vcombine.high %v1214_v31, %v1218_v55 }
 0x348   :  { %8865 = vmatprep.mubr.bf16.mxu0 %v20912_v5  ;;  %10409 = vmatprep.mubr.bf16.mxu1 %v20912_v5  ;;  %23571 = vst [vmem:[#allocation157_spill] sm:$0xff] %v20920_v7  ;;  %v16894_v5 = vcombine.low %v1206_v15, %v1210_v8  ;;  %v16905_v17 = vcombine.high %v1215_v37, %v1219_v49 }
 0x349   :  { %8987 = vmatpush1.bf16.msra.mxu0 %v16878_v35  ;;  %10531 = vmatpush1.bf16.msra.mxu1 %v16880_v62  ;;  %v16896_v35 = vcombine.low %v1207_v54, %v1211_v44  ;;  %v219_v62 = vld [vmem:[#allocation2 + $0x428] sm:$0xff]  ;;  %v16904_v15 = vcombine.low %v1215_v37, %v1219_v49  ;;  %v16911_v8 = vcombine.high %v1222_v56, %v1226_v28 }
 0x34a   :  { %8988 = vmatprep.subr.bf16.mxu0 %v16887_v38  ;;  %10532 = vmatprep.subr.bf16.mxu1 %v16889_v4  ;;  %v227_v38 = vld [vmem:[#allocation2 + $0x468] sm:$0xff]  ;;  %v16902_v4 = vcombine.low %v1214_v31, %v1218_v55  ;;  %v20926_v54 = vcombine.low %v203_v33, %v211_v13  ;;  %v16913_v44 = vcombine.high %v1223_v20, %v1227_v6 }
 0x34b   :  { %v235_v33 = vld [vmem:[#allocation2 + $0x4a8] sm:$0xff] }
 0x34c   :  { %23572 = vst [vmem:[#allocation158_spill] sm:$0xff] %v20926_v54  ;;  %v243_v13 = vld [vmem:[#allocation2 + $0x4e8] sm:$0xff] }
 0x34d   :  { %8989 = vmatpush1.bf16.msra.mxu0 %v16886_v10  ;;  %10533 = vmatpush1.bf16.msra.mxu1 %v16888_v12  ;;  %v1230_v10 = vld [vmem:[#allocation5 + $0x1bc0] sm:$0xff] }
 0x34e   :  { %8990 = vmatprep.subr.bf16.mxu0 %v16895_v32  ;;  %10534 = vmatprep.subr.bf16.mxu1 %v16897_v27  ;;  %v1234_v12 = vld [vmem:[#allocation5 + $0x1be0] sm:$0xff]  ;;  %v20928_v32 = vcombine.high %v219_v62, %v227_v38  ;;  %v1231_v27 = vld [vmem:[#allocation5 + $0x1bc8] sm:$0xff] }
 0x34f   :  { %8866 = vmatmul.mubr.bf16.gmra.mrb[24].mxu0 %v20918_v47  ;;  %10410 = vmatmul.mubr.bf16.gmra.mrb[24].mxu1 %v20918_v47  ;;  %v1235_v47 = vld [vmem:[#allocation5 + $0x1be8] sm:$0xff]  ;;  %v16919_v31 = vcombine.high %v1230_v10, %v1234_v12  ;;  %v16918_v55 = vcombine.low %v1230_v10, %v1234_v12 }
 0x350   :  { %8875 = vmatprep.mubr.bf16.mxu0 %v20920_v7  ;;  %10419 = vmatprep.mubr.bf16.mxu1 %v20920_v7  ;;  %23573 = vst [vmem:[#allocation159_spill] sm:$0xff] %v20928_v32  ;;  %v16910_v7 = vcombine.low %v1222_v56, %v1226_v28  ;;  %v16921_v49 = vcombine.high %v1231_v27, %v1235_v47  ;;  %v299_v12 = vld [vmem:[#allocation2 + $0x6a8] sm:$0xff] }
 0x351   :  { %8991 = vmatpush1.bf16.msra.mxu0 %v16894_v5  ;;  %10535 = vmatpush1.bf16.msra.mxu1 %v16896_v35  ;;  %v16912_v5 = vcombine.low %v1223_v20, %v1227_v6  ;;  %v16920_v37 = vcombine.low %v1231_v27, %v1235_v47  ;;  %v16927_v35 = vcombine.high %v20857_v22, %v20859_v41  ;;  %v251_v47 = vld [vmem:[#allocation2 + $0x528] sm:$0xff] }
 0x352   :  { %8992 = vmatprep.subr.bf16.mxu0 %v16903_v53  ;;  %10536 = vmatprep.subr.bf16.mxu1 %v16905_v17  ;;  %v20936_v53 = vcombine.low %v219_v62, %v227_v38  ;;  %v16929_v17 = vcombine.high %v20867_v14, %v20869_v61  ;;  %v20940_v56 = vcombine.high %v235_v33, %v243_v13  ;;  %v267_v6 = vld [vmem:[#allocation2 + $0x5a8] sm:$0xff] }
 0x353   :  { %v20946_v28 = vcombine.low %v235_v33, %v243_v13  ;;  %v275_v62 = vld [vmem:[#allocation2 + $0x5e8] sm:$0xff] }
 0x354   :  { %23574 = vst [vmem:[#allocation160_spill] sm:$0xff] %v20936_v53  ;;  %23575 = vst [vmem:[#allocation161_spill] sm:$0xff] %v20940_v56  ;;  %v307_v27 = vld [vmem:[#allocation2 + $0x6e8] sm:$0xff] }
 0x355   :  { %8993 = vmatpush1.bf16.msra.mxu0 %v16902_v4  ;;  %10537 = vmatpush1.bf16.msra.mxu1 %v16904_v15  ;;  %23576 = vst [vmem:[#allocation162_spill] sm:$0xff] %v20946_v28  ;;  %v20956_v4 = vcombine.high %v267_v6, %v275_v62  ;;  %v283_v15 = vld [vmem:[#allocation2 + $0x628] sm:$0xff]  ;;  %v20978_v13 = vcombine.low %v299_v12, %v307_v27 }
 0x356   :  { %8994 = vmatprep.subr.bf16.mxu0 %v16911_v8  ;;  %10538 = vmatprep.subr.bf16.mxu1 %v16913_v44  ;;  %v291_v8 = vld [vmem:[#allocation2 + $0x668] sm:$0xff]  ;;  %v20962_v44 = vcombine.low %v267_v6, %v275_v62  ;;  %v100_v6 = vld [vmem:[#allocation2 + $0x70] sm:$0xff] }
 0x357   :  { %8876 = vmatmul.mubr.bf16.gmra.mrb[28].mxu0 %v20926_v54  ;;  %10420 = vmatmul.mubr.bf16.gmra.mrb[28].mxu1 %v20926_v54  ;;  %23579 = vst [vmem:[#allocation165_spill] sm:$0xff] %v20956_v4  ;;  %v20964_v10 = vcombine.high %v283_v15, %v291_v8  ;;  %v323_v33 = vld [vmem:[#allocation2 + $0x768] sm:$0xff]  ;;  %23584 = vst [vmem:[#allocation170_spill] sm:$0xff] %v20978_v13 }
 0x358   :  { %8885 = vmatprep.mubr.bf16.mxu0 %v20928_v32  ;;  %10429 = vmatprep.mubr.bf16.mxu1 %v20928_v32  ;;  %23580 = vst [vmem:[#allocation166_spill] sm:$0xff] %v20962_v44  ;;  %v1279_v32 = vld [vmem:[#allocation5 + $0x1d48] sm:$0xff] }
 0x359   :  { %8995 = vmatpush1.bf16.msra.mxu0 %v16910_v7  ;;  %10539 = vmatpush1.bf16.msra.mxu1 %v16912_v5  ;;  %v259_v7 = vld [vmem:[#allocation2 + $0x568] sm:$0xff]  ;;  %23581 = vst [vmem:[#allocation167_spill] sm:$0xff] %v20964_v10  ;;  %v20970_v5 = vcombine.low %v283_v15, %v291_v8  ;;  %v108_v8 = vld [vmem:[#allocation2 + $0xb0] sm:$0xff] }
 0x35a   :  { %8996 = vmatprep.subr.bf16.mxu0 %v16919_v31  ;;  %10540 = vmatprep.subr.bf16.mxu1 %v16921_v49  ;;  %v20948_v20 = vcombine.high %v251_v47, %v259_v7  ;;  %v20954_v38 = vcombine.low %v251_v47, %v259_v7  ;;  %v20972_v31 = vcombine.high %v299_v12, %v307_v27  ;;  %v315_v49 = vld [vmem:[#allocation2 + $0x728] sm:$0xff]  ;;  %v92_v7 = vld [vmem:[#allocation2 + $0x30] sm:$0xff] }
 0x35b   :  { %23582 = vst [vmem:[#allocation168_spill] sm:$0xff] %v20970_v5  ;;  %v20996_v15 = vcombine.high %v92_v7, %v100_v6  ;;  %v116_v12 = vld [vmem:[#allocation2 + $0xf0] sm:$0xff]  ;;  %v21002_v27 = vcombine.low %v92_v7, %v100_v6  ;;  %v23592_v7 = vcombine.low %v20857_v22, %v20859_v41  ;;  %v21023_v41 = vld [vmem:[#allocation5 + $0x38] sm:$0xff]  ;;  %v1283_v54 = vld [vmem:[#allocation5 + $0x1d68] sm:$0xff] }
 0x35c   :  { %23577 = vst [vmem:[#allocation163_spill] sm:$0xff] %v20948_v20  ;;  %23578 = vst [vmem:[#allocation164_spill] sm:$0xff] %v20954_v38 }
 0x35d   :  { %8997 = vmatpush1.bf16.msra.mxu0 %v16918_v55  ;;  %10541 = vmatpush1.bf16.msra.mxu1 %v16920_v37  ;;  %23583 = vst [vmem:[#allocation169_spill] sm:$0xff] %v20972_v31  ;;  %v20980_v55 = vcombine.high %v315_v49, %v323_v33  ;;  %v331_v37 = vld [vmem:[#allocation2 + $0x7a8] sm:$0xff]  ;;  %23589 = vst [vmem:[#allocation175_spill] sm:$0xff] %v20996_v15 }
 0x35e   :  { %9159 = vmatprep.subr.bf16.mxu0 %v16927_v35  ;;  %10703 = vmatprep.subr.bf16.mxu1 %v16929_v17  ;;  %v339_v35 = vld [vmem:[#allocation2 + $0x7e8] sm:$0xff]  ;;  %v20986_v17 = vcombine.low %v315_v49, %v323_v33  ;;  %23590 = vst [vmem:[#allocation176_spill] sm:$0xff] %v21002_v27  ;;  %v1246_v49 = vld [vmem:[#allocation5 + $0x1c40] sm:$0xff] }
 0x35f   :  { %8886 = vmatmul.mubr.bf16.gmra.mrb[32].mxu0 %v20936_v53  ;;  %10430 = vmatmul.mubr.bf16.gmra.mrb[32].mxu1 %v20936_v53  ;;  %23585 = vst [vmem:[#allocation171_spill] sm:$0xff] %v20980_v55  ;;  %v20988_v47 = vcombine.high %v331_v37, %v339_v35  ;;  %v20994_v62 = vcombine.low %v331_v37, %v339_v35  ;;  %v1250_v33 = vld [vmem:[#allocation5 + $0x1c60] sm:$0xff] }
 0x360   :  { %8895 = vmatprep.mubr.bf16.mxu0 %v20940_v56  ;;  %10439 = vmatprep.mubr.bf16.mxu1 %v20940_v56  ;;  %23586 = vst [vmem:[#allocation172_spill] sm:$0xff] %v20986_v17  ;;  %v21004_v37 = vcombine.high %v108_v8, %v116_v12  ;;  %v16935_v35 = vcombine.high %v1246_v49, %v1250_v33 }
 0x361   :  { %23587 = vst [vmem:[#allocation173_spill] sm:$0xff] %v20988_v47  ;;  %23588 = vst [vmem:[#allocation174_spill] sm:$0xff] %v20994_v62  ;;  %v16934_v6 = vcombine.low %v1246_v49, %v1250_v33  ;;  %v1270_v33 = vld [vmem:[#allocation5 + $0x1d00] sm:$0xff] }
 0x362   :  { %23591 = vst [vmem:[#allocation177_spill] sm:$0xff] %v21004_v37 }
 0x367   :  { %8896 = vmatmul.mubr.bf16.gmra.mrb[36].mxu0 %v20946_v28  ;;  %10440 = vmatmul.mubr.bf16.gmra.mrb[36].mxu1 %v20946_v28 }
 0x368   :  { %8905 = vmatprep.mubr.bf16.mxu0 %v20948_v20  ;;  %10449 = vmatprep.mubr.bf16.mxu1 %v20948_v20  ;;  %v124_v20 = vld [vmem:[#allocation2 + $0x130] sm:$0xff] }
 0x36f   :  { %8906 = vmatmul.mubr.bf16.gmra.mrb[40].mxu0 %v20954_v38  ;;  %10450 = vmatmul.mubr.bf16.gmra.mrb[40].mxu1 %v20954_v38 }
 0x370   :  { %8915 = vmatprep.mubr.bf16.mxu0 %v20956_v4  ;;  %10459 = vmatprep.mubr.bf16.mxu1 %v20956_v4  ;;  %v23593_v4 = vcombine.low %v20867_v14, %v20869_v61  ;;  %v21028_v61 = vcombine.low %v108_v8, %v116_v12  ;;  %v1262_v14 = vld [vmem:[#allocation5 + $0x1cc0] sm:$0xff]  ;;  %v1275_v12 = vld [vmem:[#allocation5 + $0x1d28] sm:$0xff] }
 0x371   :  { %v1274_v8 = vld [vmem:[#allocation5 + $0x1d20] sm:$0xff] }
 0x372   :  { %23594 = vst [vmem:[#allocation178_spill] sm:$0xff] %v21028_v61 }
 0x377   :  { %8916 = vmatmul.mubr.bf16.gmra.mrb[44].mxu0 %v20962_v44  ;;  %10460 = vmatmul.mubr.bf16.gmra.mrb[44].mxu1 %v20962_v44  ;;  %v21015_v44 = vld [vmem:[#allocation5 + $0x18] sm:$0xff] }
 0x378   :  { %8925 = vmatprep.mubr.bf16.mxu0 %v20964_v10  ;;  %10469 = vmatprep.mubr.bf16.mxu1 %v20964_v10  ;;  %v21013_v10 = vld [vmem:[#allocation5 + $0x30] sm:$0xff] }
 0x37f   :  { %8926 = vmatmul.mubr.bf16.gmra.mrb[48].mxu0 %v20970_v5  ;;  %10470 = vmatmul.mubr.bf16.gmra.mrb[48].mxu1 %v20970_v5  ;;  %v1259_v5 = vld [vmem:[#allocation5 + $0x1ca8] sm:$0xff] }
 0x380   :  { %8935 = vmatprep.mubr.bf16.mxu0 %v20972_v31  ;;  %10479 = vmatprep.mubr.bf16.mxu1 %v20972_v31  ;;  %v1255_v31 = vld [vmem:[#allocation5 + $0x1c88] sm:$0xff] }
 0x381   :  { %v16945_v49 = vcombine.high %v1255_v31, %v1259_v5  ;;  %v16944_v56 = vcombine.low %v1255_v31, %v1259_v5  ;;  %v16959_v31 = vcombine.high %v1270_v33, %v1274_v8 }
 0x387   :  { %8936 = vmatmul.mubr.bf16.gmra.mrb[52].mxu0 %v20978_v13  ;;  %10480 = vmatmul.mubr.bf16.gmra.mrb[52].mxu1 %v20978_v13  ;;  %v1258_v13 = vld [vmem:[#allocation5 + $0x1ca0] sm:$0xff] }
 0x388   :  { %8945 = vmatprep.mubr.bf16.mxu0 %v20980_v55  ;;  %10489 = vmatprep.mubr.bf16.mxu1 %v20980_v55  ;;  %v1254_v55 = vld [vmem:[#allocation5 + $0x1c80] sm:$0xff] }
 0x389   :  { %v16943_v28 = vcombine.high %v1254_v55, %v1258_v13  ;;  %v16942_v22 = vcombine.low %v1254_v55, %v1258_v13  ;;  %v148_v13 = vld [vmem:[#allocation2 + $0x1f0] sm:$0xff] }
 0x38f   :  { %8946 = vmatmul.mubr.bf16.gmra.mrb[56].mxu0 %v20986_v17  ;;  %10490 = vmatmul.mubr.bf16.gmra.mrb[56].mxu1 %v20986_v17  ;;  %v1251_v17 = vld [vmem:[#allocation5 + $0x1c68] sm:$0xff] }
 0x390   :  { %8955 = vmatprep.mubr.bf16.mxu0 %v20988_v47  ;;  %10499 = vmatprep.mubr.bf16.mxu1 %v20988_v47  ;;  %v1247_v47 = vld [vmem:[#allocation5 + $0x1c48] sm:$0xff] }
 0x391   :  { %v16936_v38 = vcombine.low %v1247_v47, %v1251_v17 }
 0x397   :  { %8956 = vmatmul.mubr.bf16.gmra.mrb[60].mxu0 %v20994_v62  ;;  %10500 = vmatmul.mubr.bf16.gmra.mrb[60].mxu1 %v20994_v62  ;;  %v16937_v62 = vcombine.high %v1247_v47, %v1251_v17  ;;  %v1263_v47 = vld [vmem:[#allocation5 + $0x1cc8] sm:$0xff] }
 0x398   :  { %8998 = vmatprep.mubr.bf16.mxu0 %v20996_v15  ;;  %10542 = vmatprep.mubr.bf16.mxu1 %v20996_v15  ;;  %v21011_v15 = vld [vmem:[#allocation5 + $0x10] sm:$0xff] }
 0x39f   :  { %8999 = vmatmul.mubr.bf16.vlgmr.msra.gmra.mrb[0].mxu0 %v21002_v27  ;;  %10543 = vmatmul.mubr.bf16.vlgmr.msra.gmra.mrb[0].mxu1 %v21002_v27  ;;  %v132_v27 = vld [vmem:[#allocation2 + $0x170] sm:$0xff] }
 0x3a0   :  { %9160 = vmatpush1.bf16.msra.mxu0 %v23592_v7  ;;  %10704 = vmatpush1.bf16.msra.mxu1 %v23593_v4  ;;  %v1266_v4 = vld [vmem:[#allocation5 + $0x1ce0] sm:$0xff]  ;;  %v21030_v17 = vcombine.high %v124_v20, %v132_v27  ;;  %v1267_v7 = vld [vmem:[#allocation5 + $0x1ce8] sm:$0xff]  ;;  %v21036_v55 = vcombine.low %v124_v20, %v132_v27 }
 0x3a1   :  { %9008 = vmatprep.mubr.bf16.mxu0 %v21004_v37  ;;  %10552 = vmatprep.mubr.bf16.mxu1 %v21004_v37  ;;  %v16953_v37 = vcombine.high %v1263_v47, %v1267_v7  ;;  %v16952_v5 = vcombine.low %v1263_v47, %v1267_v7  ;;  %v1286_v20 = vld [vmem:[#allocation5 + $0x1d80] sm:$0xff]  ;;  %v156_v47 = vld [vmem:[#allocation2 + $0x230] sm:$0xff] }
 0x3a2   :  { %9161 = vmatprep.subr.bf16.mxu0 %v16935_v35  ;;  %10705 = vmatprep.subr.bf16.mxu1 %v16937_v62  ;;  %23595 = vst [vmem:[#allocation179_spill] sm:$0xff] %v21030_v17  ;;  %v16951_v35 = vcombine.high %v1262_v14, %v1266_v4  ;;  %v1271_v62 = vld [vmem:[#allocation5 + $0x1d08] sm:$0xff]  ;;  %23596 = vst [vmem:[#allocation180_spill] sm:$0xff] %v21036_v55  ;;  %v1290_v27 = vld [vmem:[#allocation5 + $0x1da0] sm:$0xff] }
 0x3a4   :  { %9162 = vmatpush1.bf16.msra.mxu0 %v16934_v6  ;;  %10706 = vmatpush1.bf16.msra.mxu1 %v16936_v38  ;;  %v140_v38 = vld [vmem:[#allocation2 + $0x1b0] sm:$0xff]  ;;  %v16961_v6 = vcombine.high %v1271_v62, %v1275_v12 }
 0x3a5   :  { %9163 = vmatprep.subr.bf16.mxu0 %v16943_v28  ;;  %10707 = vmatprep.subr.bf16.mxu1 %v16945_v49  ;;  %v16950_v28 = vcombine.low %v1262_v14, %v1266_v4  ;;  %v1278_v49 = vld [vmem:[#allocation5 + $0x1d40] sm:$0xff]  ;;  %v21038_v53 = vcombine.high %v140_v38, %v148_v13  ;;  %v1291_v4 = vld [vmem:[#allocation5 + $0x1da8] sm:$0xff] }
 0x3a7   :  { %9009 = vmatmul.mubr.bf16.gmra.mrb[4].mxu0 %v21028_v61  ;;  %10553 = vmatmul.mubr.bf16.gmra.mrb[4].mxu1 %v21028_v61  ;;  %v1282_v61 = vld [vmem:[#allocation5 + $0x1d60] sm:$0xff]  ;;  %23597 = vst [vmem:[#allocation181_spill] sm:$0xff] %v21038_v53 }
 0x3a8   :  { %9018 = vmatprep.mubr.bf16.mxu0 %v21030_v17  ;;  %10562 = vmatprep.mubr.bf16.mxu1 %v21030_v17  ;;  %v16958_v17 = vcombine.low %v1270_v33, %v1274_v8  ;;  %v16967_v14 = vcombine.high %v1278_v49, %v1282_v61  ;;  %v164_v33 = vld [vmem:[#allocation2 + $0x270] sm:$0xff]  ;;  %v16966_v7 = vcombine.low %v1278_v49, %v1282_v61  ;;  %v1307_v49 = vld [vmem:[#allocation5 + $0x1e28] sm:$0xff] }
 0x3a9   :  { %9164 = vmatpush1.bf16.msra.mxu0 %v16942_v22  ;;  %10708 = vmatpush1.bf16.msra.mxu1 %v16944_v56  ;;  %v16960_v22 = vcombine.low %v1271_v62, %v1275_v12  ;;  %v16969_v56 = vcombine.high %v1279_v32, %v1283_v54  ;;  %v16975_v8 = vcombine.high %v1286_v20, %v1290_v27 }
 0x3aa   :  { %9165 = vmatprep.subr.bf16.mxu0 %v16951_v35  ;;  %10709 = vmatprep.subr.bf16.mxu1 %v16953_v37  ;;  %v1287_v37 = vld [vmem:[#allocation5 + $0x1d88] sm:$0xff]  ;;  %v16968_v35 = vcombine.low %v1279_v32, %v1283_v54  ;;  %v21044_v62 = vcombine.low %v140_v38, %v148_v13  ;;  %v1302_v32 = vld [vmem:[#allocation5 + $0x1e00] sm:$0xff] }
 0x3ab   :  { %v16977_v12 = vcombine.high %v1287_v37, %v1291_v4  ;;  %v1306_v38 = vld [vmem:[#allocation5 + $0x1e20] sm:$0xff]  ;;  %v1303_v13 = vld [vmem:[#allocation5 + $0x1e08] sm:$0xff] }
 0x3ac   :  { %23598 = vst [vmem:[#allocation182_spill] sm:$0xff] %v21044_v62 }
 0x3ad   :  { %9166 = vmatpush1.bf16.msra.mxu0 %v16950_v28  ;;  %10710 = vmatpush1.bf16.msra.mxu1 %v16952_v5  ;;  %v1294_v28 = vld [vmem:[#allocation5 + $0x1dc0] sm:$0xff] }
 0x3ae   :  { %9167 = vmatprep.subr.bf16.mxu0 %v16959_v31  ;;  %10711 = vmatprep.subr.bf16.mxu1 %v16961_v6  ;;  %v1298_v5 = vld [vmem:[#allocation5 + $0x1de0] sm:$0xff]  ;;  %v21046_v31 = vcombine.high %v156_v47, %v164_v33  ;;  %v1295_v6 = vld [vmem:[#allocation5 + $0x1dc8] sm:$0xff] }
 0x3af   :  { %9019 = vmatmul.mubr.bf16.gmra.mrb[8].mxu0 %v21036_v55  ;;  %10563 = vmatmul.mubr.bf16.gmra.mrb[8].mxu1 %v21036_v55  ;;  %v1299_v55 = vld [vmem:[#allocation5 + $0x1de8] sm:$0xff]  ;;  %v16983_v61 = vcombine.high %v1294_v28, %v1298_v5 }
 0x3b0   :  { %9028 = vmatprep.mubr.bf16.mxu0 %v21038_v53  ;;  %10572 = vmatprep.mubr.bf16.mxu1 %v21038_v53  ;;  %23599 = vst [vmem:[#allocation183_spill] sm:$0xff] %v21046_v31  ;;  %v16974_v53 = vcombine.low %v1286_v20, %v1290_v27  ;;  %v16985_v54 = vcombine.high %v1295_v6, %v1299_v55 }
 0x3b1   :  { %9168 = vmatpush1.bf16.msra.mxu0 %v16958_v17  ;;  %10712 = vmatpush1.bf16.msra.mxu1 %v16960_v22  ;;  %v16976_v17 = vcombine.low %v1287_v37, %v1291_v4  ;;  %v172_v22 = vld [vmem:[#allocation2 + $0x2b0] sm:$0xff]  ;;  %v16984_v20 = vcombine.low %v1295_v6, %v1299_v55  ;;  %v16991_v27 = vcombine.high %v1302_v32, %v1306_v38  ;;  %v1323_v6 = vld [vmem:[#allocation5 + $0x1ea8] sm:$0xff] }
 0x3b2   :  { %9169 = vmatprep.subr.bf16.mxu0 %v16967_v14  ;;  %10713 = vmatprep.subr.bf16.mxu1 %v16969_v56  ;;  %v180_v14 = vld [vmem:[#allocation2 + $0x2f0] sm:$0xff]  ;;  %v16982_v56 = vcombine.low %v1294_v28, %v1298_v5  ;;  %v21052_v37 = vcombine.low %v156_v47, %v164_v33  ;;  %v16993_v4 = vcombine.high %v1303_v13, %v1307_v49  ;;  %v1318_v47 = vld [vmem:[#allocation5 + $0x1e80] sm:$0xff]  ;;  %v1319_v5 = vld [vmem:[#allocation5 + $0x1e88] sm:$0xff] }
 0x3b3   :  { %v1322_v33 = vld [vmem:[#allocation5 + $0x1ea0] sm:$0xff] }
 0x3b4   :  { %23600 = vst [vmem:[#allocation184_spill] sm:$0xff] %v21052_v37 }
 0x3b5   :  { %9170 = vmatpush1.bf16.msra.mxu0 %v16966_v7  ;;  %10714 = vmatpush1.bf16.msra.mxu1 %v16968_v35  ;;  %v1310_v7 = vld [vmem:[#allocation5 + $0x1e40] sm:$0xff] }
 0x3b6   :  { %9171 = vmatprep.subr.bf16.mxu0 %v16975_v8  ;;  %10715 = vmatprep.subr.bf16.mxu1 %v16977_v12  ;;  %v1314_v35 = vld [vmem:[#allocation5 + $0x1e60] sm:$0xff]  ;;  %v21054_v8 = vcombine.high %v172_v22, %v180_v14  ;;  %v1311_v12 = vld [vmem:[#allocation5 + $0x1e48] sm:$0xff] }
 0x3b7   :  { %9029 = vmatmul.mubr.bf16.gmra.mrb[12].mxu0 %v21044_v62  ;;  %10573 = vmatmul.mubr.bf16.gmra.mrb[12].mxu1 %v21044_v62  ;;  %v1315_v62 = vld [vmem:[#allocation5 + $0x1e68] sm:$0xff]  ;;  %v16999_v28 = vcombine.high %v1310_v7, %v1314_v35 }
 0x3b8   :  { %9038 = vmatprep.mubr.bf16.mxu0 %v21046_v31  ;;  %10582 = vmatprep.mubr.bf16.mxu1 %v21046_v31  ;;  %23601 = vst [vmem:[#allocation185_spill] sm:$0xff] %v21054_v8  ;;  %v16990_v31 = vcombine.low %v1302_v32, %v1306_v38  ;;  %v17001_v55 = vcombine.high %v1311_v12, %v1315_v62 }
 0x3b9   :  { %9172 = vmatpush1.bf16.msra.mxu0 %v16974_v53  ;;  %10716 = vmatpush1.bf16.msra.mxu1 %v16976_v17  ;;  %v16992_v53 = vcombine.low %v1303_v13, %v1307_v49  ;;  %v188_v17 = vld [vmem:[#allocation2 + $0x330] sm:$0xff]  ;;  %v17000_v32 = vcombine.low %v1311_v12, %v1315_v62  ;;  %v17007_v38 = vcombine.high %v1318_v47, %v1322_v33  ;;  %v1339_v12 = vld [vmem:[#allocation5 + $0x1f28] sm:$0xff] }
 0x3ba   :  { %9173 = vmatprep.subr.bf16.mxu0 %v16983_v61  ;;  %10717 = vmatprep.subr.bf16.mxu1 %v16985_v54  ;;  %v196_v61 = vld [vmem:[#allocation2 + $0x370] sm:$0xff]  ;;  %v16998_v54 = vcombine.low %v1310_v7, %v1314_v35  ;;  %v21060_v13 = vcombine.low %v172_v22, %v180_v14  ;;  %v17009_v49 = vcombine.high %v1319_v5, %v1323_v6  ;;  %v1334_v22 = vld [vmem:[#allocation5 + $0x1f00] sm:$0xff]  ;;  %v1335_v35 = vld [vmem:[#allocation5 + $0x1f08] sm:$0xff] }
 0x3bb   :  { %v1338_v14 = vld [vmem:[#allocation5 + $0x1f20] sm:$0xff] }
 0x3bc   :  { %23602 = vst [vmem:[#allocation186_spill] sm:$0xff] %v21060_v13 }
 0x3bd   :  { %9174 = vmatpush1.bf16.msra.mxu0 %v16982_v56  ;;  %10718 = vmatpush1.bf16.msra.mxu1 %v16984_v20  ;;  %v1326_v56 = vld [vmem:[#allocation5 + $0x1ec0] sm:$0xff] }
 0x3be   :  { %9175 = vmatprep.subr.bf16.mxu0 %v16991_v27  ;;  %10719 = vmatprep.subr.bf16.mxu1 %v16993_v4  ;;  %v1330_v20 = vld [vmem:[#allocation5 + $0x1ee0] sm:$0xff]  ;;  %v21062_v27 = vcombine.high %v188_v17, %v196_v61  ;;  %v1327_v4 = vld [vmem:[#allocation5 + $0x1ec8] sm:$0xff] }
 0x3bf   :  { %9039 = vmatmul.mubr.bf16.gmra.mrb[16].mxu0 %v21052_v37  ;;  %10583 = vmatmul.mubr.bf16.gmra.mrb[16].mxu1 %v21052_v37  ;;  %v1331_v37 = vld [vmem:[#allocation5 + $0x1ee8] sm:$0xff]  ;;  %v17015_v7 = vcombine.high %v1326_v56, %v1330_v20 }
 0x3c0   :  { %9048 = vmatprep.mubr.bf16.mxu0 %v21054_v8  ;;  %10592 = vmatprep.mubr.bf16.mxu1 %v21054_v8  ;;  %23603 = vst [vmem:[#allocation187_spill] sm:$0xff] %v21062_v27  ;;  %v17006_v8 = vcombine.low %v1318_v47, %v1322_v33  ;;  %v17017_v62 = vcombine.high %v1327_v4, %v1331_v37 }
 0x3c1   :  { %9176 = vmatpush1.bf16.msra.mxu0 %v16990_v31  ;;  %10720 = vmatpush1.bf16.msra.mxu1 %v16992_v53  ;;  %v17008_v31 = vcombine.low %v1319_v5, %v1323_v6  ;;  %v204_v53 = vld [vmem:[#allocation2 + $0x3b0] sm:$0xff]  ;;  %v17016_v47 = vcombine.low %v1327_v4, %v1331_v37  ;;  %v17023_v33 = vcombine.high %v1334_v22, %v1338_v14  ;;  %v1355_v4 = vld [vmem:[#allocation5 + $0x1fa8] sm:$0xff] }
 0x3c2   :  { %9177 = vmatprep.subr.bf16.mxu0 %v16999_v28  ;;  %10721 = vmatprep.subr.bf16.mxu1 %v17001_v55  ;;  %v212_v28 = vld [vmem:[#allocation2 + $0x3f0] sm:$0xff]  ;;  %v17014_v55 = vcombine.low %v1326_v56, %v1330_v20  ;;  %v21068_v5 = vcombine.low %v188_v17, %v196_v61  ;;  %v17025_v6 = vcombine.high %v1335_v35, %v1339_v12  ;;  %v1350_v17 = vld [vmem:[#allocation5 + $0x1f80] sm:$0xff]  ;;  %v1351_v20 = vld [vmem:[#allocation5 + $0x1f88] sm:$0xff] }
 0x3c3   :  { %v1354_v61 = vld [vmem:[#allocation5 + $0x1fa0] sm:$0xff] }
 0x3c4   :  { %23604 = vst [vmem:[#allocation188_spill] sm:$0xff] %v21068_v5 }
 0x3c5   :  { %9178 = vmatpush1.bf16.msra.mxu0 %v16998_v54  ;;  %10722 = vmatpush1.bf16.msra.mxu1 %v17000_v32  ;;  %v1342_v54 = vld [vmem:[#allocation5 + $0x1f40] sm:$0xff] }
 0x3c6   :  { %9179 = vmatprep.subr.bf16.mxu0 %v17007_v38  ;;  %10723 = vmatprep.subr.bf16.mxu1 %v17009_v49  ;;  %v1346_v32 = vld [vmem:[#allocation5 + $0x1f60] sm:$0xff]  ;;  %v21070_v38 = vcombine.high %v204_v53, %v212_v28  ;;  %v1343_v49 = vld [vmem:[#allocation5 + $0x1f48] sm:$0xff] }
 0x3c7   :  { %9049 = vmatmul.mubr.bf16.gmra.mrb[20].mxu0 %v21060_v13  ;;  %10593 = vmatmul.mubr.bf16.gmra.mrb[20].mxu1 %v21060_v13  ;;  %v1347_v13 = vld [vmem:[#allocation5 + $0x1f68] sm:$0xff]  ;;  %v17031_v56 = vcombine.high %v1342_v54, %v1346_v32 }
 0x3c8   :  { %9058 = vmatprep.mubr.bf16.mxu0 %v21062_v27  ;;  %10602 = vmatprep.mubr.bf16.mxu1 %v21062_v27  ;;  %23605 = vst [vmem:[#allocation189_spill] sm:$0xff] %v21070_v38  ;;  %v17022_v27 = vcombine.low %v1334_v22, %v1338_v14  ;;  %v17033_v37 = vcombine.high %v1343_v49, %v1347_v13 }
 0x3c9   :  { %9180 = vmatpush1.bf16.msra.mxu0 %v17006_v8  ;;  %10724 = vmatpush1.bf16.msra.mxu1 %v17008_v31  ;;  %v17024_v8 = vcombine.low %v1335_v35, %v1339_v12  ;;  %v220_v31 = vld [vmem:[#allocation2 + $0x430] sm:$0xff]  ;;  %v17032_v22 = vcombine.low %v1343_v49, %v1347_v13  ;;  %v17039_v14 = vcombine.high %v1350_v17, %v1354_v61 }
 0x3ca   :  { %9181 = vmatprep.subr.bf16.mxu0 %v17015_v7  ;;  %10725 = vmatprep.subr.bf16.mxu1 %v17017_v62  ;;  %v228_v7 = vld [vmem:[#allocation2 + $0x470] sm:$0xff]  ;;  %v17030_v62 = vcombine.low %v1342_v54, %v1346_v32  ;;  %v21076_v35 = vcombine.low %v204_v53, %v212_v28  ;;  %v17041_v12 = vcombine.high %v1351_v20, %v1355_v4 }
 0x3cb   :  { %v236_v53 = vld [vmem:[#allocation2 + $0x4b0] sm:$0xff] }
 0x3cc   :  { %23606 = vst [vmem:[#allocation190_spill] sm:$0xff] %v21076_v35  ;;  %v244_v28 = vld [vmem:[#allocation2 + $0x4f0] sm:$0xff] }
 0x3cd   :  { %9182 = vmatpush1.bf16.msra.mxu0 %v17014_v55  ;;  %10726 = vmatpush1.bf16.msra.mxu1 %v17016_v47  ;;  %v1358_v55 = vld [vmem:[#allocation5 + $0x1fc0] sm:$0xff] }
 0x3ce   :  { %9183 = vmatprep.subr.bf16.mxu0 %v17023_v33  ;;  %10727 = vmatprep.subr.bf16.mxu1 %v17025_v6  ;;  %v1362_v47 = vld [vmem:[#allocation5 + $0x1fe0] sm:$0xff]  ;;  %v21078_v33 = vcombine.high %v220_v31, %v228_v7  ;;  %v1359_v6 = vld [vmem:[#allocation5 + $0x1fc8] sm:$0xff] }
 0x3cf   :  { %9059 = vmatmul.mubr.bf16.gmra.mrb[24].mxu0 %v21068_v5  ;;  %10603 = vmatmul.mubr.bf16.gmra.mrb[24].mxu1 %v21068_v5  ;;  %v1363_v5 = vld [vmem:[#allocation5 + $0x1fe8] sm:$0xff]  ;;  %v17047_v54 = vcombine.high %v1358_v55, %v1362_v47  ;;  %v17046_v32 = vcombine.low %v1358_v55, %v1362_v47  ;;  %v300_v47 = vld [vmem:[#allocation2 + $0x6b0] sm:$0xff] }
 0x3d0   :  { %9068 = vmatprep.mubr.bf16.mxu0 %v21070_v38  ;;  %10612 = vmatprep.mubr.bf16.mxu1 %v21070_v38  ;;  %23607 = vst [vmem:[#allocation191_spill] sm:$0xff] %v21078_v33  ;;  %v17038_v38 = vcombine.low %v1350_v17, %v1354_v61  ;;  %v17049_v13 = vcombine.high %v1359_v6, %v1363_v5 }
 0x3d1   :  { %9184 = vmatpush1.bf16.msra.mxu0 %v17022_v27  ;;  %10728 = vmatpush1.bf16.msra.mxu1 %v17024_v8  ;;  %v17040_v27 = vcombine.low %v1351_v20, %v1355_v4  ;;  %v17048_v49 = vcombine.low %v1359_v6, %v1363_v5  ;;  %v16035_v8 = vcombine.high %v21011_v15, %v21013_v10  ;;  %v252_v5 = vld [vmem:[#allocation2 + $0x530] sm:$0xff] }
 0x3d2   :  { %9185 = vmatprep.subr.bf16.mxu0 %v17031_v56  ;;  %10729 = vmatprep.subr.bf16.mxu1 %v17033_v37  ;;  %v21086_v56 = vcombine.low %v220_v31, %v228_v7  ;;  %v16037_v37 = vcombine.high %v21015_v44, %v21023_v41  ;;  %v21090_v17 = vcombine.high %v236_v53, %v244_v28  ;;  %v268_v4 = vld [vmem:[#allocation2 + $0x5b0] sm:$0xff] }
 0x3d3   :  { %v21096_v61 = vcombine.low %v236_v53, %v244_v28  ;;  %v276_v31 = vld [vmem:[#allocation2 + $0x5f0] sm:$0xff] }
 0x3d4   :  { %23608 = vst [vmem:[#allocation192_spill] sm:$0xff] %v21086_v56  ;;  %23609 = vst [vmem:[#allocation193_spill] sm:$0xff] %v21090_v17  ;;  %v308_v6 = vld [vmem:[#allocation2 + $0x6f0] sm:$0xff] }
 0x3d5   :  { %9186 = vmatpush1.bf16.msra.mxu0 %v17030_v62  ;;  %10730 = vmatpush1.bf16.msra.mxu1 %v17032_v22  ;;  %23610 = vst [vmem:[#allocation194_spill] sm:$0xff] %v21096_v61  ;;  %v21106_v62 = vcombine.high %v268_v4, %v276_v31  ;;  %v284_v22 = vld [vmem:[#allocation2 + $0x630] sm:$0xff]  ;;  %v21128_v28 = vcombine.low %v300_v47, %v308_v6 }
 0x3d6   :  { %9187 = vmatprep.subr.bf16.mxu0 %v17039_v14  ;;  %10731 = vmatprep.subr.bf16.mxu1 %v17041_v12  ;;  %v292_v14 = vld [vmem:[#allocation2 + $0x670] sm:$0xff]  ;;  %v21112_v12 = vcombine.low %v268_v4, %v276_v31  ;;  %v101_v4 = vld [vmem:[#allocation2 + $0x78] sm:$0xff] }
 0x3d7   :  { %9069 = vmatmul.mubr.bf16.gmra.mrb[28].mxu0 %v21076_v35  ;;  %10613 = vmatmul.mubr.bf16.gmra.mrb[28].mxu1 %v21076_v35  ;;  %23613 = vst [vmem:[#allocation197_spill] sm:$0xff] %v21106_v62  ;;  %v21114_v55 = vcombine.high %v284_v22, %v292_v14  ;;  %v324_v53 = vld [vmem:[#allocation2 + $0x770] sm:$0xff]  ;;  %23618 = vst [vmem:[#allocation202_spill] sm:$0xff] %v21128_v28  ;;  %v389_v35 = vld [vmem:[#allocation5 + $0x178] sm:$0xff] }
 0x3d8   :  { %9078 = vmatprep.mubr.bf16.mxu0 %v21078_v33  ;;  %10622 = vmatprep.mubr.bf16.mxu1 %v21078_v33  ;;  %23614 = vst [vmem:[#allocation198_spill] sm:$0xff] %v21112_v12  ;;  %v385_v33 = vld [vmem:[#allocation5 + $0x158] sm:$0xff] }
 0x3d9   :  { %9188 = vmatpush1.bf16.msra.mxu0 %v17038_v38  ;;  %10732 = vmatpush1.bf16.msra.mxu1 %v17040_v27  ;;  %v260_v38 = vld [vmem:[#allocation2 + $0x570] sm:$0xff]  ;;  %23615 = vst [vmem:[#allocation199_spill] sm:$0xff] %v21114_v55  ;;  %v21120_v27 = vcombine.low %v284_v22, %v292_v14  ;;  %v109_v14 = vld [vmem:[#allocation2 + $0xb8] sm:$0xff] }
 0x3da   :  { %9189 = vmatprep.subr.bf16.mxu0 %v17047_v54  ;;  %10733 = vmatprep.subr.bf16.mxu1 %v17049_v13  ;;  %v21098_v20 = vcombine.high %v252_v5, %v260_v38  ;;  %v21104_v7 = vcombine.low %v252_v5, %v260_v38  ;;  %v21122_v54 = vcombine.high %v300_v47, %v308_v6  ;;  %v316_v13 = vld [vmem:[#allocation2 + $0x730] sm:$0xff]  ;;  %v93_v38 = vld [vmem:[#allocation2 + $0x38] sm:$0xff] }
 0x3db   :  { %23616 = vst [vmem:[#allocation200_spill] sm:$0xff] %v21120_v27  ;;  %v21146_v22 = vcombine.high %v93_v38, %v101_v4  ;;  %v117_v47 = vld [vmem:[#allocation2 + $0xf8] sm:$0xff]  ;;  %v21152_v6 = vcombine.low %v93_v38, %v101_v4  ;;  %v23626_v38 = vcombine.low %v21011_v15, %v21013_v10 }
 0x3dc   :  { %23611 = vst [vmem:[#allocation195_spill] sm:$0xff] %v21098_v20  ;;  %23612 = vst [vmem:[#allocation196_spill] sm:$0xff] %v21104_v7 }
 0x3dd   :  { %9190 = vmatpush1.bf16.msra.mxu0 %v17046_v32  ;;  %10734 = vmatpush1.bf16.msra.mxu1 %v17048_v49  ;;  %23617 = vst [vmem:[#allocation201_spill] sm:$0xff] %v21122_v54  ;;  %v21130_v32 = vcombine.high %v316_v13, %v324_v53  ;;  %v332_v49 = vld [vmem:[#allocation2 + $0x7b0] sm:$0xff]  ;;  %23623 = vst [vmem:[#allocation207_spill] sm:$0xff] %v21146_v22 }
 0x3de   :  { %10896 = vmatprep.subr.bf16.mxu0 %v16035_v8  ;;  %12440 = vmatprep.subr.bf16.mxu1 %v16037_v37  ;;  %v340_v8 = vld [vmem:[#allocation2 + $0x7f0] sm:$0xff]  ;;  %v21136_v37 = vcombine.low %v316_v13, %v324_v53  ;;  %23624 = vst [vmem:[#allocation208_spill] sm:$0xff] %v21152_v6 }
 0x3df   :  { %9079 = vmatmul.mubr.bf16.gmra.mrb[32].mxu0 %v21086_v56  ;;  %10623 = vmatmul.mubr.bf16.gmra.mrb[32].mxu1 %v21086_v56  ;;  %23619 = vst [vmem:[#allocation203_spill] sm:$0xff] %v21130_v32  ;;  %v21138_v5 = vcombine.high %v332_v49, %v340_v8  ;;  %v21144_v31 = vcombine.low %v332_v49, %v340_v8  ;;  %v352_v13 = vld [vmem:[#allocation5 + $0x50] sm:$0xff] }
 0x3e0   :  { %9088 = vmatprep.mubr.bf16.mxu0 %v21090_v17  ;;  %10632 = vmatprep.mubr.bf16.mxu1 %v21090_v17  ;;  %23620 = vst [vmem:[#allocation204_spill] sm:$0xff] %v21136_v37  ;;  %v356_v53 = vld [vmem:[#allocation5 + $0x70] sm:$0xff]  ;;  %v21154_v49 = vcombine.high %v109_v14, %v117_v47  ;;  %v133_v17 = vld [vmem:[#allocation2 + $0x178] sm:$0xff] }
 0x3e1   :  { %23621 = vst [vmem:[#allocation205_spill] sm:$0xff] %v21138_v5  ;;  %23622 = vst [vmem:[#allocation206_spill] sm:$0xff] %v21144_v31  ;;  %v16043_v8 = vcombine.high %v352_v13, %v356_v53  ;;  %v16042_v4 = vcombine.low %v352_v13, %v356_v53  ;;  %v21178_v13 = vcombine.low %v109_v14, %v117_v47  ;;  %v368_v53 = vld [vmem:[#allocation5 + $0xd0] sm:$0xff]  ;;  %v381_v47 = vld [vmem:[#allocation5 + $0x138] sm:$0xff] }
 0x3e2   :  { %23625 = vst [vmem:[#allocation209_spill] sm:$0xff] %v21154_v49  ;;  %v380_v14 = vld [vmem:[#allocation5 + $0x130] sm:$0xff] }
 0x3e3   :  { %23628 = vst [vmem:[#allocation210_spill] sm:$0xff] %v21178_v13 }
 0x3e7   :  { %9089 = vmatmul.mubr.bf16.gmra.mrb[36].mxu0 %v21096_v61  ;;  %10633 = vmatmul.mubr.bf16.gmra.mrb[36].mxu1 %v21096_v61 }
 0x3e8   :  { %9098 = vmatprep.mubr.bf16.mxu0 %v21098_v20  ;;  %10642 = vmatprep.mubr.bf16.mxu1 %v21098_v20  ;;  %v23627_v20 = vcombine.low %v21015_v44, %v21023_v41  ;;  %v369_v41 = vld [vmem:[#allocation5 + $0xd8] sm:$0xff] }
 0x3ef   :  { %9099 = vmatmul.mubr.bf16.gmra.mrb[40].mxu0 %v21104_v7  ;;  %10643 = vmatmul.mubr.bf16.gmra.mrb[40].mxu1 %v21104_v7  ;;  %v21169_v7 = vld [vmem:[#allocation5 + $0x438] sm:$0xff] }
 0x3f0   :  { %9108 = vmatprep.mubr.bf16.mxu0 %v21106_v62  ;;  %10652 = vmatprep.mubr.bf16.mxu1 %v21106_v62  ;;  %v21167_v62 = vld [vmem:[#allocation5 + $0x418] sm:$0xff] }
 0x3f7   :  { %9109 = vmatmul.mubr.bf16.gmra.mrb[44].mxu0 %v21112_v12  ;;  %10653 = vmatmul.mubr.bf16.gmra.mrb[44].mxu1 %v21112_v12  ;;  %v376_v12 = vld [vmem:[#allocation5 + $0x110] sm:$0xff] }
 0x3f8   :  { %9118 = vmatprep.mubr.bf16.mxu0 %v21114_v55  ;;  %10662 = vmatprep.mubr.bf16.mxu1 %v21114_v55  ;;  %v21157_v55 = vld [vmem:[#allocation5 + $0x410] sm:$0xff] }
 0x3ff   :  { %9119 = vmatmul.mubr.bf16.gmra.mrb[48].mxu0 %v21120_v27  ;;  %10663 = vmatmul.mubr.bf16.gmra.mrb[48].mxu1 %v21120_v27  ;;  %v365_v27 = vld [vmem:[#allocation5 + $0xb8] sm:$0xff] }
 0x400   :  { %9128 = vmatprep.mubr.bf16.mxu0 %v21122_v54  ;;  %10672 = vmatprep.mubr.bf16.mxu1 %v21122_v54  ;;  %v361_v54 = vld [vmem:[#allocation5 + $0x98] sm:$0xff] }
 0x401   :  { %v16053_v15 = vcombine.high %v361_v54, %v365_v27 }
 0x407   :  { %9129 = vmatmul.mubr.bf16.gmra.mrb[52].mxu0 %v21128_v28  ;;  %10673 = vmatmul.mubr.bf16.gmra.mrb[52].mxu1 %v21128_v28  ;;  %v364_v28 = vld [vmem:[#allocation5 + $0xb0] sm:$0xff] }
 0x408   :  { %9138 = vmatprep.mubr.bf16.mxu0 %v21130_v32  ;;  %10682 = vmatprep.mubr.bf16.mxu1 %v21130_v32  ;;  %v360_v32 = vld [vmem:[#allocation5 + $0x90] sm:$0xff] }
 0x409   :  { %v16051_v56 = vcombine.high %v360_v32, %v364_v28 }
 0x40f   :  { %9139 = vmatmul.mubr.bf16.gmra.mrb[56].mxu0 %v21136_v37  ;;  %10683 = vmatmul.mubr.bf16.gmra.mrb[56].mxu1 %v21136_v37  ;;  %v357_v37 = vld [vmem:[#allocation5 + $0x78] sm:$0xff] }
 0x410   :  { %9148 = vmatprep.mubr.bf16.mxu0 %v21138_v5  ;;  %10692 = vmatprep.mubr.bf16.mxu1 %v21138_v5  ;;  %v353_v5 = vld [vmem:[#allocation5 + $0x58] sm:$0xff] }
 0x411   :  { %v16044_v61 = vcombine.low %v353_v5, %v357_v37 }
 0x417   :  { %9149 = vmatmul.mubr.bf16.gmra.mrb[60].mxu0 %v21144_v31  ;;  %10693 = vmatmul.mubr.bf16.gmra.mrb[60].mxu1 %v21144_v31  ;;  %v16045_v31 = vcombine.high %v353_v5, %v357_v37  ;;  %v16050_v37 = vcombine.low %v360_v32, %v364_v28  ;;  %v16052_v5 = vcombine.low %v361_v54, %v365_v27  ;;  %v149_v28 = vld [vmem:[#allocation2 + $0x1f8] sm:$0xff] }
 0x418   :  { %9191 = vmatprep.mubr.bf16.mxu0 %v21146_v22  ;;  %10735 = vmatprep.mubr.bf16.mxu1 %v21146_v22  ;;  %v21159_v22 = vld [vmem:[#allocation5 + $0x430] sm:$0xff]  ;;  %v16067_v54 = vcombine.high %v376_v12, %v380_v14 }
 0x41f   :  { %9192 = vmatmul.mubr.bf16.vlgmr.msra.gmra.mrb[0].mxu0 %v21152_v6  ;;  %10736 = vmatmul.mubr.bf16.vlgmr.msra.gmra.mrb[0].mxu1 %v21152_v6  ;;  %v125_v6 = vld [vmem:[#allocation2 + $0x138] sm:$0xff] }
 0x420   :  { %10897 = vmatpush1.bf16.msra.mxu0 %v23626_v38  ;;  %12441 = vmatpush1.bf16.msra.mxu1 %v23627_v20  ;;  %v372_v38 = vld [vmem:[#allocation5 + $0xf0] sm:$0xff]  ;;  %v21180_v44 = vcombine.high %v125_v6, %v133_v17  ;;  %v373_v20 = vld [vmem:[#allocation5 + $0xf8] sm:$0xff]  ;;  %v21186_v32 = vcombine.low %v125_v6, %v133_v17 }
 0x421   :  { %9201 = vmatprep.mubr.bf16.mxu0 %v21154_v49  ;;  %10745 = vmatprep.mubr.bf16.mxu1 %v21154_v49  ;;  %v16059_v10 = vcombine.high %v368_v53, %v372_v38  ;;  %v16060_v27 = vcombine.low %v369_v41, %v373_v20  ;;  %v392_v17 = vld [vmem:[#allocation5 + $0x190] sm:$0xff] }
 0x422   :  { %10898 = vmatprep.subr.bf16.mxu0 %v16043_v8  ;;  %12442 = vmatprep.subr.bf16.mxu1 %v16045_v31  ;;  %23629 = vst [vmem:[#allocation211_spill] sm:$0xff] %v21180_v44  ;;  %v16061_v8 = vcombine.high %v369_v41, %v373_v20  ;;  %v377_v31 = vld [vmem:[#allocation5 + $0x118] sm:$0xff]  ;;  %23630 = vst [vmem:[#allocation212_spill] sm:$0xff] %v21186_v32  ;;  %v396_v6 = vld [vmem:[#allocation5 + $0x1b0] sm:$0xff] }
 0x423   :  { %v397_v41 = vld [vmem:[#allocation5 + $0x1b8] sm:$0xff] }
 0x424   :  { %10899 = vmatpush1.bf16.msra.mxu0 %v16042_v4  ;;  %12443 = vmatpush1.bf16.msra.mxu1 %v16044_v61  ;;  %v141_v61 = vld [vmem:[#allocation2 + $0x1b8] sm:$0xff]  ;;  %v16069_v4 = vcombine.high %v377_v31, %v381_v47 }
 0x425   :  { %10900 = vmatprep.subr.bf16.mxu0 %v16051_v56  ;;  %12444 = vmatprep.subr.bf16.mxu1 %v16053_v15  ;;  %v16058_v56 = vcombine.low %v368_v53, %v372_v38  ;;  %v384_v15 = vld [vmem:[#allocation5 + $0x150] sm:$0xff]  ;;  %v21188_v49 = vcombine.high %v141_v61, %v149_v28  ;;  %v393_v38 = vld [vmem:[#allocation5 + $0x198] sm:$0xff] }
 0x426   :  { %v157_v20 = vld [vmem:[#allocation2 + $0x238] sm:$0xff] }
 0x427   :  { %9202 = vmatmul.mubr.bf16.gmra.mrb[4].mxu0 %v21178_v13  ;;  %10746 = vmatmul.mubr.bf16.gmra.mrb[4].mxu1 %v21178_v13  ;;  %v388_v13 = vld [vmem:[#allocation5 + $0x170] sm:$0xff]  ;;  %23631 = vst [vmem:[#allocation213_spill] sm:$0xff] %v21188_v49 }
 0x428   :  { %9211 = vmatprep.mubr.bf16.mxu0 %v21180_v44  ;;  %10755 = vmatprep.mubr.bf16.mxu1 %v21180_v44  ;;  %v16066_v44 = vcombine.low %v376_v12, %v380_v14  ;;  %v16075_v53 = vcombine.high %v384_v15, %v388_v13  ;;  %v165_v12 = vld [vmem:[#allocation2 + $0x278] sm:$0xff]  ;;  %v16083_v14 = vcombine.high %v392_v17, %v396_v6 }
 0x429   :  { %10901 = vmatpush1.bf16.msra.mxu0 %v16050_v37  ;;  %12445 = vmatpush1.bf16.msra.mxu1 %v16052_v5  ;;  %v16068_v37 = vcombine.low %v377_v31, %v381_v47  ;;  %v16074_v5 = vcombine.low %v384_v15, %v388_v13  ;;  %v21194_v31 = vcombine.low %v141_v61, %v149_v28  ;;  %v412_v61 = vld [vmem:[#allocation5 + $0x230] sm:$0xff]  ;;  %v409_v28 = vld [vmem:[#allocation5 + $0x218] sm:$0xff] }
 0x42a   :  { %10902 = vmatprep.subr.bf16.mxu0 %v16059_v10  ;;  %12446 = vmatprep.subr.bf16.mxu1 %v16061_v8  ;;  %v16077_v10 = vcombine.high %v385_v33, %v389_v35  ;;  %v16076_v8 = vcombine.low %v385_v33, %v389_v35  ;;  %v16085_v47 = vcombine.high %v393_v38, %v397_v41  ;;  %v408_v33 = vld [vmem:[#allocation5 + $0x210] sm:$0xff]  ;;  %v413_v15 = vld [vmem:[#allocation5 + $0x238] sm:$0xff] }
 0x42b   :  { %23632 = vst [vmem:[#allocation214_spill] sm:$0xff] %v21194_v31 }
 0x42d   :  { %10903 = vmatpush1.bf16.msra.mxu0 %v16058_v56  ;;  %12447 = vmatpush1.bf16.msra.mxu1 %v16060_v27  ;;  %v400_v56 = vld [vmem:[#allocation5 + $0x1d0] sm:$0xff] }
 0x42e   :  { %10904 = vmatprep.subr.bf16.mxu0 %v16067_v54  ;;  %12448 = vmatprep.subr.bf16.mxu1 %v16069_v4  ;;  %v404_v27 = vld [vmem:[#allocation5 + $0x1f0] sm:$0xff]  ;;  %v21196_v54 = vcombine.high %v157_v20, %v165_v12  ;;  %v401_v4 = vld [vmem:[#allocation5 + $0x1d8] sm:$0xff] }
 0x42f   :  { %9212 = vmatmul.mubr.bf16.gmra.mrb[8].mxu0 %v21186_v32  ;;  %10756 = vmatmul.mubr.bf16.gmra.mrb[8].mxu1 %v21186_v32  ;;  %v405_v32 = vld [vmem:[#allocation5 + $0x1f8] sm:$0xff]  ;;  %v16091_v13 = vcombine.high %v400_v56, %v404_v27 }
 0x430   :  { %9221 = vmatprep.mubr.bf16.mxu0 %v21188_v49  ;;  %10765 = vmatprep.mubr.bf16.mxu1 %v21188_v49  ;;  %23633 = vst [vmem:[#allocation215_spill] sm:$0xff] %v21196_v54  ;;  %v16082_v49 = vcombine.low %v392_v17, %v396_v6  ;;  %v16093_v35 = vcombine.high %v401_v4, %v405_v32 }
 0x431   :  { %10905 = vmatpush1.bf16.msra.mxu0 %v16066_v44  ;;  %12449 = vmatpush1.bf16.msra.mxu1 %v16068_v37  ;;  %v16084_v44 = vcombine.low %v393_v38, %v397_v41  ;;  %v173_v37 = vld [vmem:[#allocation2 + $0x2b8] sm:$0xff]  ;;  %v16092_v17 = vcombine.low %v401_v4, %v405_v32  ;;  %v16099_v6 = vcombine.high %v408_v33, %v412_v61 }
 0x432   :  { %10906 = vmatprep.subr.bf16.mxu0 %v16075_v53  ;;  %12450 = vmatprep.subr.bf16.mxu1 %v16077_v10  ;;  %v181_v53 = vld [vmem:[#allocation2 + $0x2f8] sm:$0xff]  ;;  %v16090_v10 = vcombine.low %v400_v56, %v404_v27  ;;  %v21202_v38 = vcombine.low %v157_v20, %v165_v12  ;;  %v16101_v41 = vcombine.high %v409_v28, %v413_v15  ;;  %v424_v20 = vld [vmem:[#allocation5 + $0x290] sm:$0xff] }
 0x433   :  { %v428_v12 = vld [vmem:[#allocation5 + $0x2b0] sm:$0xff]  ;;  %v425_v27 = vld [vmem:[#allocation5 + $0x298] sm:$0xff] }
 0x434   :  { %23634 = vst [vmem:[#allocation216_spill] sm:$0xff] %v21202_v38  ;;  %v429_v4 = vld [vmem:[#allocation5 + $0x2b8] sm:$0xff] }
 0x435   :  { %10907 = vmatpush1.bf16.msra.mxu0 %v16074_v5  ;;  %12451 = vmatpush1.bf16.msra.mxu1 %v16076_v8  ;;  %v416_v5 = vld [vmem:[#allocation5 + $0x250] sm:$0xff] }
 0x436   :  { %10908 = vmatprep.subr.bf16.mxu0 %v16083_v14  ;;  %12452 = vmatprep.subr.bf16.mxu1 %v16085_v47  ;;  %v420_v8 = vld [vmem:[#allocation5 + $0x270] sm:$0xff]  ;;  %v21204_v14 = vcombine.high %v173_v37, %v181_v53  ;;  %v417_v47 = vld [vmem:[#allocation5 + $0x258] sm:$0xff] }
 0x437   :  { %9222 = vmatmul.mubr.bf16.gmra.mrb[12].mxu0 %v21194_v31  ;;  %10766 = vmatmul.mubr.bf16.gmra.mrb[12].mxu1 %v21194_v31  ;;  %v421_v31 = vld [vmem:[#allocation5 + $0x278] sm:$0xff]  ;;  %v16107_v56 = vcombine.high %v416_v5, %v420_v8 }
 0x438   :  { %9231 = vmatprep.mubr.bf16.mxu0 %v21196_v54  ;;  %10775 = vmatprep.mubr.bf16.mxu1 %v21196_v54  ;;  %23635 = vst [vmem:[#allocation217_spill] sm:$0xff] %v21204_v14  ;;  %v16098_v54 = vcombine.low %v408_v33, %v412_v61  ;;  %v16109_v32 = vcombine.high %v417_v47, %v421_v31 }
 0x439   :  { %10909 = vmatpush1.bf16.msra.mxu0 %v16082_v49  ;;  %12453 = vmatpush1.bf16.msra.mxu1 %v16084_v44  ;;  %v16100_v49 = vcombine.low %v409_v28, %v413_v15  ;;  %v189_v44 = vld [vmem:[#allocation2 + $0x338] sm:$0xff]  ;;  %v16108_v33 = vcombine.low %v417_v47, %v421_v31  ;;  %v16115_v61 = vcombine.high %v424_v20, %v428_v12 }
 0x43a   :  { %10910 = vmatprep.subr.bf16.mxu0 %v16091_v13  ;;  %12454 = vmatprep.subr.bf16.mxu1 %v16093_v35  ;;  %v197_v13 = vld [vmem:[#allocation2 + $0x378] sm:$0xff]  ;;  %v16106_v35 = vcombine.low %v416_v5, %v420_v8  ;;  %v21210_v28 = vcombine.low %v173_v37, %v181_v53  ;;  %v16117_v15 = vcombine.high %v425_v27, %v429_v4  ;;  %v440_v37 = vld [vmem:[#allocation5 + $0x310] sm:$0xff] }
 0x43b   :  { %v444_v53 = vld [vmem:[#allocation5 + $0x330] sm:$0xff]  ;;  %v441_v8 = vld [vmem:[#allocation5 + $0x318] sm:$0xff] }
 0x43c   :  { %23636 = vst [vmem:[#allocation218_spill] sm:$0xff] %v21210_v28  ;;  %v445_v47 = vld [vmem:[#allocation5 + $0x338] sm:$0xff] }
 0x43d   :  { %10911 = vmatpush1.bf16.msra.mxu0 %v16090_v10  ;;  %12455 = vmatpush1.bf16.msra.mxu1 %v16092_v17  ;;  %v432_v10 = vld [vmem:[#allocation5 + $0x2d0] sm:$0xff] }
 0x43e   :  { %10912 = vmatprep.subr.bf16.mxu0 %v16099_v6  ;;  %12456 = vmatprep.subr.bf16.mxu1 %v16101_v41  ;;  %v436_v17 = vld [vmem:[#allocation5 + $0x2f0] sm:$0xff]  ;;  %v21212_v6 = vcombine.high %v189_v44, %v197_v13  ;;  %v433_v41 = vld [vmem:[#allocation5 + $0x2d8] sm:$0xff] }
 0x43f   :  { %9232 = vmatmul.mubr.bf16.gmra.mrb[16].mxu0 %v21202_v38  ;;  %10776 = vmatmul.mubr.bf16.gmra.mrb[16].mxu1 %v21202_v38  ;;  %v437_v38 = vld [vmem:[#allocation5 + $0x2f8] sm:$0xff]  ;;  %v16123_v5 = vcombine.high %v432_v10, %v436_v17 }
 0x440   :  { %9241 = vmatprep.mubr.bf16.mxu0 %v21204_v14  ;;  %10785 = vmatprep.mubr.bf16.mxu1 %v21204_v14  ;;  %23637 = vst [vmem:[#allocation219_spill] sm:$0xff] %v21212_v6  ;;  %v16114_v14 = vcombine.low %v424_v20, %v428_v12  ;;  %v16125_v31 = vcombine.high %v433_v41, %v437_v38 }
 0x441   :  { %10913 = vmatpush1.bf16.msra.mxu0 %v16098_v54  ;;  %12457 = vmatpush1.bf16.msra.mxu1 %v16100_v49  ;;  %v16116_v54 = vcombine.low %v425_v27, %v429_v4  ;;  %v205_v49 = vld [vmem:[#allocation2 + $0x3b8] sm:$0xff]  ;;  %v16124_v20 = vcombine.low %v433_v41, %v437_v38  ;;  %v16131_v12 = vcombine.high %v440_v37, %v444_v53 }
 0x442   :  { %10914 = vmatprep.subr.bf16.mxu0 %v16107_v56  ;;  %12458 = vmatprep.subr.bf16.mxu1 %v16109_v32  ;;  %v213_v56 = vld [vmem:[#allocation2 + $0x3f8] sm:$0xff]  ;;  %v16122_v32 = vcombine.low %v432_v10, %v436_v17  ;;  %v21218_v27 = vcombine.low %v189_v44, %v197_v13  ;;  %v16133_v4 = vcombine.high %v441_v8, %v445_v47  ;;  %v456_v44 = vld [vmem:[#allocation5 + $0x390] sm:$0xff] }
 0x443   :  { %v460_v13 = vld [vmem:[#allocation5 + $0x3b0] sm:$0xff]  ;;  %v457_v17 = vld [vmem:[#allocation5 + $0x398] sm:$0xff] }
 0x444   :  { %23638 = vst [vmem:[#allocation220_spill] sm:$0xff] %v21218_v27  ;;  %v461_v41 = vld [vmem:[#allocation5 + $0x3b8] sm:$0xff] }
 0x445   :  { %10915 = vmatpush1.bf16.msra.mxu0 %v16106_v35  ;;  %12459 = vmatpush1.bf16.msra.mxu1 %v16108_v33  ;;  %v448_v35 = vld [vmem:[#allocation5 + $0x350] sm:$0xff] }
 0x446   :  { %10916 = vmatprep.subr.bf16.mxu0 %v16115_v61  ;;  %12460 = vmatprep.subr.bf16.mxu1 %v16117_v15  ;;  %v452_v33 = vld [vmem:[#allocation5 + $0x370] sm:$0xff]  ;;  %v21220_v61 = vcombine.high %v205_v49, %v213_v56  ;;  %v449_v15 = vld [vmem:[#allocation5 + $0x358] sm:$0xff] }
 0x447   :  { %9242 = vmatmul.mubr.bf16.gmra.mrb[20].mxu0 %v21210_v28  ;;  %10786 = vmatmul.mubr.bf16.gmra.mrb[20].mxu1 %v21210_v28  ;;  %v453_v28 = vld [vmem:[#allocation5 + $0x378] sm:$0xff]  ;;  %v16139_v10 = vcombine.high %v448_v35, %v452_v33 }
 0x448   :  { %9251 = vmatprep.mubr.bf16.mxu0 %v21212_v6  ;;  %10795 = vmatprep.mubr.bf16.mxu1 %v21212_v6  ;;  %23639 = vst [vmem:[#allocation221_spill] sm:$0xff] %v21220_v61  ;;  %v16130_v6 = vcombine.low %v440_v37, %v444_v53  ;;  %v16141_v38 = vcombine.high %v449_v15, %v453_v28 }
 0x449   :  { %10917 = vmatpush1.bf16.msra.mxu0 %v16114_v14  ;;  %12461 = vmatpush1.bf16.msra.mxu1 %v16116_v54  ;;  %v16132_v14 = vcombine.low %v441_v8, %v445_v47  ;;  %v221_v54 = vld [vmem:[#allocation2 + $0x438] sm:$0xff]  ;;  %v16140_v37 = vcombine.low %v449_v15, %v453_v28  ;;  %v16147_v53 = vcombine.high %v456_v44, %v460_v13 }
 0x44a   :  { %10918 = vmatprep.subr.bf16.mxu0 %v16123_v5  ;;  %12462 = vmatprep.subr.bf16.mxu1 %v16125_v31  ;;  %v229_v5 = vld [vmem:[#allocation2 + $0x478] sm:$0xff]  ;;  %v16138_v31 = vcombine.low %v448_v35, %v452_v33  ;;  %v21226_v8 = vcombine.low %v205_v49, %v213_v56  ;;  %v16149_v47 = vcombine.high %v457_v17, %v461_v41 }
 0x44b   :  { %v237_v49 = vld [vmem:[#allocation2 + $0x4b8] sm:$0xff] }
 0x44c   :  { %v245_v56 = vld [vmem:[#allocation2 + $0x4f8] sm:$0xff] }
 0x44d   :  { %10919 = vmatpush1.bf16.msra.mxu0 %v16122_v32  ;;  %12463 = vmatpush1.bf16.msra.mxu1 %v16124_v20  ;;  %v464_v32 = vld [vmem:[#allocation5 + $0x3d0] sm:$0xff] }
 0x44e   :  { %10920 = vmatprep.subr.bf16.mxu0 %v16131_v12  ;;  %12464 = vmatprep.subr.bf16.mxu1 %v16133_v4  ;;  %v468_v20 = vld [vmem:[#allocation5 + $0x3f0] sm:$0xff]  ;;  %v21228_v12 = vcombine.high %v221_v54, %v229_v5  ;;  %v465_v4 = vld [vmem:[#allocation5 + $0x3d8] sm:$0xff] }
 0x44f   :  { %9252 = vmatmul.mubr.bf16.gmra.mrb[24].mxu0 %v21218_v27  ;;  %10796 = vmatmul.mubr.bf16.gmra.mrb[24].mxu1 %v21218_v27  ;;  %v469_v27 = vld [vmem:[#allocation5 + $0x3f8] sm:$0xff]  ;;  %v16155_v35 = vcombine.high %v464_v32, %v468_v20  ;;  %v16154_v33 = vcombine.low %v464_v32, %v468_v20 }
 0x450   :  { %9261 = vmatprep.mubr.bf16.mxu0 %v21220_v61  ;;  %10805 = vmatprep.mubr.bf16.mxu1 %v21220_v61  ;;  %v16146_v61 = vcombine.low %v456_v44, %v460_v13  ;;  %v16157_v28 = vcombine.high %v465_v4, %v469_v27  ;;  %v16156_v15 = vcombine.low %v465_v4, %v469_v27  ;;  %v253_v27 = vld [vmem:[#allocation2 + $0x538] sm:$0xff] }
 0x451   :  { %10921 = vmatpush1.bf16.msra.mxu0 %v16130_v6  ;;  %12465 = vmatpush1.bf16.msra.mxu1 %v16132_v14  ;;  %v16148_v6 = vcombine.low %v457_v17, %v461_v41  ;;  %v16163_v14 = vcombine.high %v21157_v55, %v21159_v22  ;;  %v21240_v44 = vcombine.high %v237_v49, %v245_v56  ;;  %v269_v41 = vld [vmem:[#allocation2 + $0x5b8] sm:$0xff] }
 0x452   :  { %10922 = vmatprep.subr.bf16.mxu0 %v16139_v10  ;;  %12466 = vmatprep.subr.bf16.mxu1 %v16141_v38  ;;  %v21236_v10 = vcombine.low %v221_v54, %v229_v5  ;;  %v16165_v38 = vcombine.high %v21167_v62, %v21169_v7  ;;  %v21246_v13 = vcombine.low %v237_v49, %v245_v56  ;;  %v277_v54 = vld [vmem:[#allocation2 + $0x5f8] sm:$0xff] }
 0x453   :  { %v301_v20 = vld [vmem:[#allocation2 + $0x6b8] sm:$0xff] }
 0x454   :  { %v309_v4 = vld [vmem:[#allocation2 + $0x6f8] sm:$0xff] }
 0x455   :  { %10923 = vmatpush1.bf16.msra.mxu0 %v16138_v31  ;;  %12467 = vmatpush1.bf16.msra.mxu1 %v16140_v37  ;;  %v21256_v31 = vcombine.high %v269_v41, %v277_v54  ;;  %v285_v37 = vld [vmem:[#allocation2 + $0x638] sm:$0xff]  ;;  %v21278_v56 = vcombine.low %v301_v20, %v309_v4 }
 0x456   :  { %10924 = vmatprep.subr.bf16.mxu0 %v16147_v53  ;;  %12468 = vmatprep.subr.bf16.mxu1 %v16149_v47  ;;  %v293_v53 = vld [vmem:[#allocation2 + $0x678] sm:$0xff]  ;;  %v21262_v47 = vcombine.low %v269_v41, %v277_v54  ;;  %v480_v41 = vld [vmem:[#allocation5 + $0x450] sm:$0xff] }
 0x457   :  { %9262 = vmatmul.mubr.bf16.gmra.mrb[28].mxu0 %v21226_v8  ;;  %10806 = vmatmul.mubr.bf16.gmra.mrb[28].mxu1 %v21226_v8  ;;  %v21264_v32 = vcombine.high %v285_v37, %v293_v53  ;;  %v325_v49 = vld [vmem:[#allocation2 + $0x778] sm:$0xff]  ;;  %23644 = vst [vmem:[#allocation226_spill] sm:$0xff] %v21278_v56  ;;  %v484_v54 = vld [vmem:[#allocation5 + $0x470] sm:$0xff] }
 0x458   :  { %9271 = vmatprep.mubr.bf16.mxu0 %v21228_v12  ;;  %10815 = vmatprep.mubr.bf16.mxu1 %v21228_v12  ;;  %23640 = vst [vmem:[#allocation222_spill] sm:$0xff] %v21262_v47 }
 0x459   :  { %10925 = vmatpush1.bf16.msra.mxu0 %v16146_v61  ;;  %12469 = vmatpush1.bf16.msra.mxu1 %v16148_v6  ;;  %v261_v61 = vld [vmem:[#allocation2 + $0x578] sm:$0xff]  ;;  %23641 = vst [vmem:[#allocation223_spill] sm:$0xff] %v21264_v32  ;;  %v21270_v6 = vcombine.low %v285_v37, %v293_v53 }
 0x45a   :  { %10926 = vmatprep.subr.bf16.mxu0 %v16155_v35  ;;  %12470 = vmatprep.subr.bf16.mxu1 %v16157_v28  ;;  %v21248_v17 = vcombine.high %v253_v27, %v261_v61  ;;  %v21254_v5 = vcombine.low %v253_v27, %v261_v61  ;;  %v21272_v35 = vcombine.high %v301_v20, %v309_v4  ;;  %v317_v28 = vld [vmem:[#allocation2 + $0x738] sm:$0xff]  ;;  %v488_v4 = vld [vmem:[#allocation5 + $0x490] sm:$0xff] }
 0x45b   :  { %23642 = vst [vmem:[#allocation224_spill] sm:$0xff] %v21270_v6  ;;  %v481_v37 = vld [vmem:[#allocation5 + $0x458] sm:$0xff]  ;;  %v16171_v20 = vcombine.high %v480_v41, %v484_v54 }
 0x45c   :  { %23643 = vst [vmem:[#allocation225_spill] sm:$0xff] %v21272_v35  ;;  %v485_v53 = vld [vmem:[#allocation5 + $0x478] sm:$0xff] }
 0x45d   :  { %10927 = vmatpush1.bf16.msra.mxu0 %v16154_v33  ;;  %12471 = vmatpush1.bf16.msra.mxu1 %v16156_v15  ;;  %v21280_v33 = vcombine.high %v317_v28, %v325_v49  ;;  %v333_v15 = vld [vmem:[#allocation2 + $0x7b8] sm:$0xff] }
 0x45e   :  { %11089 = vmatprep.subr.bf16.mxu0 %v16163_v14  ;;  %12633 = vmatprep.subr.bf16.mxu1 %v16165_v38  ;;  %v341_v14 = vld [vmem:[#allocation2 + $0x7f8] sm:$0xff]  ;;  %v21286_v38 = vcombine.low %v317_v28, %v325_v49  ;;  %v492_v28 = vld [vmem:[#allocation5 + $0x4b0] sm:$0xff]  ;;  %v16173_v49 = vcombine.high %v481_v37, %v485_v53 }
 0x45f   :  { %9272 = vmatmul.mubr.bf16.gmra.mrb[32].mxu0 %v21236_v10  ;;  %10816 = vmatmul.mubr.bf16.gmra.mrb[32].mxu1 %v21236_v10  ;;  %23645 = vst [vmem:[#allocation227_spill] sm:$0xff] %v21280_v33  ;;  %v21288_v27 = vcombine.high %v333_v15, %v341_v14  ;;  %v21294_v61 = vcombine.low %v333_v15, %v341_v14  ;;  %v489_v15 = vld [vmem:[#allocation5 + $0x498] sm:$0xff] }
 0x460   :  { %9281 = vmatprep.mubr.bf16.mxu0 %v21240_v44  ;;  %10825 = vmatprep.mubr.bf16.mxu1 %v21240_v44  ;;  %23646 = vst [vmem:[#allocation228_spill] sm:$0xff] %v21286_v38  ;;  %v493_v14 = vld [vmem:[#allocation5 + $0x4b8] sm:$0xff] }
 0x461   :  { %23647 = vst [vmem:[#allocation229_spill] sm:$0xff] %v21288_v27  ;;  %23648 = vst [vmem:[#allocation230_spill] sm:$0xff] %v21294_v61 }
 0x467   :  { %9282 = vmatmul.mubr.bf16.gmra.mrb[36].mxu0 %v21246_v13  ;;  %10826 = vmatmul.mubr.bf16.gmra.mrb[36].mxu1 %v21246_v13 }
 0x468   :  { %9291 = vmatprep.mubr.bf16.mxu0 %v21248_v17  ;;  %10835 = vmatprep.mubr.bf16.mxu1 %v21248_v17 }
 0x46f   :  { %9292 = vmatmul.mubr.bf16.gmra.mrb[40].mxu0 %v21254_v5  ;;  %10836 = vmatmul.mubr.bf16.gmra.mrb[40].mxu1 %v21254_v5 }
 0x470   :  { %9301 = vmatprep.mubr.bf16.mxu0 %v21256_v31  ;;  %10845 = vmatprep.mubr.bf16.mxu1 %v21256_v31 }
 0x477   :  { %9302 = vmatmul.mubr.bf16.gmra.mrb[44].mxu0 %v21262_v47  ;;  %10846 = vmatmul.mubr.bf16.gmra.mrb[44].mxu1 %v21262_v47 }
 0x478   :  { %9311 = vmatprep.mubr.bf16.mxu0 %v21264_v32  ;;  %10855 = vmatprep.mubr.bf16.mxu1 %v21264_v32 }
 0x47f   :  { %9312 = vmatmul.mubr.bf16.gmra.mrb[48].mxu0 %v21270_v6  ;;  %10856 = vmatmul.mubr.bf16.gmra.mrb[48].mxu1 %v21270_v6  ;;  %v500_v6 = vld [vmem:[#allocation5 + $0x4f0] sm:$0xff] }
 0x480   :  { %9321 = vmatprep.mubr.bf16.mxu0 %v21272_v35  ;;  %10865 = vmatprep.mubr.bf16.mxu1 %v21272_v35  ;;  %v496_v35 = vld [vmem:[#allocation5 + $0x4d0] sm:$0xff] }
 0x487   :  { %9322 = vmatmul.mubr.bf16.gmra.mrb[52].mxu0 %v21278_v56  ;;  %10866 = vmatmul.mubr.bf16.gmra.mrb[52].mxu1 %v21278_v56  ;;  %v16181_v56 = vcombine.high %v489_v15, %v493_v14 }
 0x488   :  { %9331 = vmatprep.mubr.bf16.mxu0 %v21280_v33  ;;  %10875 = vmatprep.mubr.bf16.mxu1 %v21280_v33  ;;  %v16179_v33 = vcombine.high %v488_v4, %v492_v28 }
 0x48f   :  { %9332 = vmatmul.mubr.bf16.gmra.mrb[56].mxu0 %v21286_v38  ;;  %10876 = vmatmul.mubr.bf16.gmra.mrb[56].mxu1 %v21286_v38  ;;  %v16172_v38 = vcombine.low %v481_v37, %v485_v53  ;;  %v16180_v37 = vcombine.low %v489_v15, %v493_v14  ;;  %v16187_v53 = vcombine.high %v496_v35, %v500_v6  ;;  %v516_v15 = vld [vmem:[#allocation5 + $0x570] sm:$0xff]  ;;  %v513_v14 = vld [vmem:[#allocation5 + $0x558] sm:$0xff] }
 0x490   :  { %9341 = vmatprep.mubr.bf16.mxu0 %v21288_v27  ;;  %10885 = vmatprep.mubr.bf16.mxu1 %v21288_v27  ;;  %v16170_v27 = vcombine.low %v480_v41, %v484_v54  ;;  %v21318_v41 = vld [vmem:[#allocation5 + $0x838] sm:$0xff] }
 0x491   :  { %v517_v54 = vld [vmem:[#allocation5 + $0x578] sm:$0xff] }
 0x497   :  { %9342 = vmatmul.mubr.bf16.gmra.mrb[60].mxu0 %v21294_v61  ;;  %10886 = vmatmul.mubr.bf16.gmra.mrb[60].mxu1 %v21294_v61  ;;  %v23649_v61 = vcombine.low %v21157_v55, %v21159_v22  ;;  %v21312_v55 = vld [vmem:[#allocation5 + $0x830] sm:$0xff]  ;;  %v21314_v22 = vld [vmem:[#allocation5 + $0x818] sm:$0xff] }
 0x498   :  { %10928 = vmatprep.mubr.bf16.mxu0 %v20102_v58  ;;  %12472 = vmatprep.mubr.bf16.mxu1 %v20102_v58  ;;  %v23650_v58 = vcombine.low %v21167_v62, %v21169_v7  ;;  %v497_v7 = vld [vmem:[#allocation5 + $0x4d8] sm:$0xff] }
 0x499   :  { %v501_v62 = vld [vmem:[#allocation5 + $0x4f8] sm:$0xff] }
 0x49f   :  { %10929 = vmatmul.mubr.bf16.vlgmr.msra.gmra.mrb[64].mxu0 %v20108_v18  ;;  %12473 = vmatmul.mubr.bf16.vlgmr.msra.gmra.mrb[64].mxu1 %v20108_v18  ;;  %v21310_v18 = vld [vmem:[#allocation5 + $0x810] sm:$0xff] }
 0x4a0   :  { %11090 = vmatpush1.bf16.msra.mxu0 %v23649_v61  ;;  %12634 = vmatpush1.bf16.msra.mxu1 %v23650_v58  ;;  %v505_v58 = vld [vmem:[#allocation5 + $0x518] sm:$0xff] }
 0x4a1   :  { %10938 = vmatprep.mubr.bf16.mxu0 %v20110_v23  ;;  %12482 = vmatprep.mubr.bf16.mxu1 %v20110_v23  ;;  %v16178_v23 = vcombine.low %v488_v4, %v492_v28  ;;  %v509_v61 = vld [vmem:[#allocation5 + $0x538] sm:$0xff]  ;;  %v512_v28 = vld [vmem:[#allocation5 + $0x550] sm:$0xff] }
 0x4a2   :  { %11091 = vmatprep.subr.bf16.mxu0 %v16171_v20  ;;  %12635 = vmatprep.subr.bf16.mxu1 %v16173_v49  ;;  %v16189_v20 = vcombine.high %v497_v7, %v501_v62  ;;  %v508_v49 = vld [vmem:[#allocation5 + $0x530] sm:$0xff]  ;;  %v16197_v4 = vcombine.high %v505_v58, %v509_v61  ;;  %v16196_v32 = vcombine.low %v505_v58, %v509_v61  ;;  %v533_v58 = vld [vmem:[#allocation5 + $0x5f8] sm:$0xff] }
 0x4a3   :  { %v16203_v47 = vcombine.high %v512_v28, %v516_v15  ;;  %v16204_v61 = vcombine.low %v513_v14, %v517_v54 }
 0x4a4   :  { %11092 = vmatpush1.bf16.msra.mxu0 %v16170_v27  ;;  %12636 = vmatpush1.bf16.msra.mxu1 %v16172_v38  ;;  %v504_v27 = vld [vmem:[#allocation5 + $0x510] sm:$0xff]  ;;  %v16188_v38 = vcombine.low %v497_v7, %v501_v62  ;;  %v521_v7 = vld [vmem:[#allocation5 + $0x598] sm:$0xff] }
 0x4a5   :  { %11093 = vmatprep.subr.bf16.mxu0 %v16179_v33  ;;  %12637 = vmatprep.subr.bf16.mxu1 %v16181_v56  ;;  %v16186_v33 = vcombine.low %v496_v35, %v500_v6  ;;  %v16195_v56 = vcombine.high %v504_v27, %v508_v49  ;;  %v520_v6 = vld [vmem:[#allocation5 + $0x590] sm:$0xff]  ;;  %v525_v62 = vld [vmem:[#allocation5 + $0x5b8] sm:$0xff] }
 0x4a6   :  { %v524_v35 = vld [vmem:[#allocation5 + $0x5b0] sm:$0xff] }
 0x4a7   :  { %10939 = vmatmul.mubr.bf16.gmra.mrb[68].mxu0 %v20128_v42  ;;  %12483 = vmatmul.mubr.bf16.gmra.mrb[68].mxu1 %v20128_v42  ;;  %v16194_v42 = vcombine.low %v504_v27, %v508_v49  ;;  %v532_v27 = vld [vmem:[#allocation5 + $0x5f0] sm:$0xff]  ;;  %v529_v49 = vld [vmem:[#allocation5 + $0x5d8] sm:$0xff] }
 0x4a8   :  { %10948 = vmatprep.mubr.bf16.mxu0 %v20130_v43  ;;  %12492 = vmatprep.mubr.bf16.mxu1 %v20130_v43  ;;  %v16205_v43 = vcombine.high %v513_v14, %v517_v54  ;;  %v537_v54 = vld [vmem:[#allocation5 + $0x618] sm:$0xff] }
 0x4a9   :  { %11094 = vmatpush1.bf16.msra.mxu0 %v16178_v23  ;;  %12638 = vmatpush1.bf16.msra.mxu1 %v16180_v37  ;;  %v16202_v23 = vcombine.low %v512_v28, %v516_v15  ;;  %v16211_v37 = vcombine.high %v520_v6, %v524_v35  ;;  %v16220_v28 = vcombine.low %v529_v49, %v533_v58 }
 0x4aa   :  { %11095 = vmatprep.subr.bf16.mxu0 %v16187_v53  ;;  %12639 = vmatprep.subr.bf16.mxu1 %v16189_v20  ;;  %v16213_v53 = vcombine.high %v521_v7, %v525_v62  ;;  %v528_v20 = vld [vmem:[#allocation5 + $0x5d0] sm:$0xff] }
 0x4ad   :  { %11096 = vmatpush1.bf16.msra.mxu0 %v16186_v33  ;;  %12640 = vmatpush1.bf16.msra.mxu1 %v16188_v38  ;;  %v16212_v33 = vcombine.low %v521_v7, %v525_v62  ;;  %v16219_v38 = vcombine.high %v528_v20, %v532_v27 }
 0x4ae   :  { %11097 = vmatprep.subr.bf16.mxu0 %v16195_v56  ;;  %12641 = vmatprep.subr.bf16.mxu1 %v16197_v4  ;;  %v541_v56 = vld [vmem:[#allocation5 + $0x638] sm:$0xff]  ;;  %v16218_v4 = vcombine.low %v528_v20, %v532_v27 }
 0x4af   :  { %10949 = vmatmul.mubr.bf16.gmra.mrb[72].mxu0 %v20136_v0  ;;  %12493 = vmatmul.mubr.bf16.gmra.mrb[72].mxu1 %v20136_v0  ;;  %v16210_v0 = vcombine.low %v520_v6, %v524_v35  ;;  %v16229_v14 = vcombine.high %v537_v54, %v541_v56  ;;  %v545_v6 = vld [vmem:[#allocation5 + $0x658] sm:$0xff]  ;;  %v16228_v7 = vcombine.low %v537_v54, %v541_v56  ;;  %v568_v54 = vld [vmem:[#allocation5 + $0x710] sm:$0xff] }
 0x4b0   :  { %10958 = vmatprep.mubr.bf16.mxu0 %v20138_v2  ;;  %12502 = vmatprep.mubr.bf16.mxu1 %v20138_v2  ;;  %v16221_v2 = vcombine.high %v529_v49, %v533_v58  ;;  %v549_v35 = vld [vmem:[#allocation5 + $0x678] sm:$0xff]  ;;  %v572_v56 = vld [vmem:[#allocation5 + $0x730] sm:$0xff] }
 0x4b1   :  { %11098 = vmatpush1.bf16.msra.mxu0 %v16194_v42  ;;  %12642 = vmatpush1.bf16.msra.mxu1 %v16196_v32  ;;  %v536_v32 = vld [vmem:[#allocation5 + $0x610] sm:$0xff]  ;;  %v16236_v27 = vcombine.low %v545_v6, %v549_v35 }
 0x4b2   :  { %11099 = vmatprep.subr.bf16.mxu0 %v16203_v47  ;;  %12643 = vmatprep.subr.bf16.mxu1 %v16205_v43  ;;  %v540_v47 = vld [vmem:[#allocation5 + $0x630] sm:$0xff] }
 0x4b3   :  { %v16227_v15 = vcombine.high %v536_v32, %v540_v47  ;;  %v544_v42 = vld [vmem:[#allocation5 + $0x650] sm:$0xff] }
 0x4b4   :  { %v548_v43 = vld [vmem:[#allocation5 + $0x670] sm:$0xff] }
 0x4b5   :  { %11100 = vmatpush1.bf16.msra.mxu0 %v16202_v23  ;;  %12644 = vmatpush1.bf16.msra.mxu1 %v16204_v61  ;;  %v16235_v62 = vcombine.high %v544_v42, %v548_v43  ;;  %v552_v23 = vld [vmem:[#allocation5 + $0x690] sm:$0xff]  ;;  %v16234_v20 = vcombine.low %v544_v42, %v548_v43  ;;  %v16259_v42 = vcombine.high %v568_v54, %v572_v56 }
 0x4b6   :  { %11101 = vmatprep.subr.bf16.mxu0 %v16211_v37  ;;  %12645 = vmatprep.subr.bf16.mxu1 %v16213_v53  ;;  %v556_v61 = vld [vmem:[#allocation5 + $0x6b0] sm:$0xff]  ;;  %v553_v37 = vld [vmem:[#allocation5 + $0x698] sm:$0xff] }
 0x4b7   :  { %10959 = vmatmul.mubr.bf16.gmra.mrb[76].mxu0 %v20144_v21  ;;  %12503 = vmatmul.mubr.bf16.gmra.mrb[76].mxu1 %v20144_v21  ;;  %v16226_v21 = vcombine.low %v536_v32, %v540_v47  ;;  %v557_v53 = vld [vmem:[#allocation5 + $0x6b8] sm:$0xff]  ;;  %v16243_v49 = vcombine.high %v552_v23, %v556_v61 }
 0x4b8   :  { %10968 = vmatprep.mubr.bf16.mxu0 %v20146_v24  ;;  %12512 = vmatprep.mubr.bf16.mxu1 %v20146_v24  ;;  %v16237_v24 = vcombine.high %v545_v6, %v549_v35  ;;  %v16245_v58 = vcombine.high %v553_v37, %v557_v53  ;;  %v16244_v32 = vcombine.low %v553_v37, %v557_v53  ;;  %v576_v6 = vld [vmem:[#allocation5 + $0x750] sm:$0xff]  ;;  %v585_v37 = vld [vmem:[#allocation5 + $0x798] sm:$0xff] }
 0x4b9   :  { %11102 = vmatpush1.bf16.msra.mxu0 %v16210_v0  ;;  %12646 = vmatpush1.bf16.msra.mxu1 %v16212_v33  ;;  %v560_v0 = vld [vmem:[#allocation5 + $0x6d0] sm:$0xff]  ;;  %v589_v53 = vld [vmem:[#allocation5 + $0x7b8] sm:$0xff] }
 0x4ba   :  { %11103 = vmatprep.subr.bf16.mxu0 %v16219_v38  ;;  %12647 = vmatprep.subr.bf16.mxu1 %v16221_v2  ;;  %v564_v33 = vld [vmem:[#allocation5 + $0x6f0] sm:$0xff]  ;;  %v561_v38 = vld [vmem:[#allocation5 + $0x6d8] sm:$0xff] }
 0x4bb   :  { %v565_v2 = vld [vmem:[#allocation5 + $0x6f8] sm:$0xff]  ;;  %v16251_v47 = vcombine.high %v560_v0, %v564_v33  ;;  %v580_v35 = vld [vmem:[#allocation5 + $0x770] sm:$0xff] }
 0x4bd   :  { %11104 = vmatpush1.bf16.msra.mxu0 %v16218_v4  ;;  %12648 = vmatpush1.bf16.msra.mxu1 %v16220_v28  ;;  %v569_v4 = vld [vmem:[#allocation5 + $0x718] sm:$0xff] }
 0x4be   :  { %11105 = vmatprep.subr.bf16.mxu0 %v16227_v15  ;;  %12649 = vmatprep.subr.bf16.mxu1 %v16229_v14  ;;  %v573_v28 = vld [vmem:[#allocation5 + $0x738] sm:$0xff]  ;;  %v16250_v15 = vcombine.low %v560_v0, %v564_v33  ;;  %v16252_v14 = vcombine.low %v561_v38, %v565_v2  ;;  %v592_v0 = vld [vmem:[#allocation5 + $0x7d0] sm:$0xff] }
 0x4bf   :  { %10969 = vmatmul.mubr.bf16.gmra.mrb[80].mxu0 %v20152_v48  ;;  %12513 = vmatmul.mubr.bf16.gmra.mrb[80].mxu1 %v20152_v48  ;;  %v16242_v48 = vcombine.low %v552_v23, %v556_v61  ;;  %v16261_v43 = vcombine.high %v569_v4, %v573_v28  ;;  %v584_v23 = vld [vmem:[#allocation5 + $0x790] sm:$0xff] }
 0x4c0   :  { %10978 = vmatprep.mubr.bf16.mxu0 %v20154_v50  ;;  %12522 = vmatprep.mubr.bf16.mxu1 %v20154_v50  ;;  %v16253_v50 = vcombine.high %v561_v38, %v565_v2  ;;  %v588_v61 = vld [vmem:[#allocation5 + $0x7b0] sm:$0xff]  ;;  %v593_v38 = vld [vmem:[#allocation5 + $0x7d8] sm:$0xff] }
 0x4c1   :  { %11106 = vmatpush1.bf16.msra.mxu0 %v16226_v21  ;;  %12650 = vmatpush1.bf16.msra.mxu1 %v16228_v7  ;;  %v577_v21 = vld [vmem:[#allocation5 + $0x758] sm:$0xff]  ;;  %v596_v33 = vld [vmem:[#allocation5 + $0x7f0] sm:$0xff] }
 0x4c2   :  { %11107 = vmatprep.subr.bf16.mxu0 %v16235_v62  ;;  %12651 = vmatprep.subr.bf16.mxu1 %v16237_v24  ;;  %v581_v7 = vld [vmem:[#allocation5 + $0x778] sm:$0xff]  ;;  %v16260_v62 = vcombine.low %v569_v4, %v573_v28  ;;  %v16267_v24 = vcombine.high %v576_v6, %v580_v35  ;;  %v1366_v28 = vld [vmem:[#allocation7] sm:$0xff] }
 0x4c3   :  { %v597_v2 = vld [vmem:[#allocation5 + $0x7f8] sm:$0xff] }
 0x4c5   :  { %11108 = vmatpush1.bf16.msra.mxu0 %v16234_v20  ;;  %12652 = vmatpush1.bf16.msra.mxu1 %v16236_v27  ;;  %v16266_v20 = vcombine.low %v576_v6, %v580_v35  ;;  %v16268_v27 = vcombine.low %v577_v21, %v581_v7 }
 0x4c6   :  { %11109 = vmatprep.subr.bf16.mxu0 %v16243_v49  ;;  %12653 = vmatprep.subr.bf16.mxu1 %v16245_v58  ;;  %v16275_v49 = vcombine.high %v584_v23, %v588_v61  ;;  %v16277_v58 = vcombine.high %v585_v37, %v589_v53 }
 0x4c7   :  { %10979 = vmatmul.mubr.bf16.gmra.mrb[84].mxu0 %v20160_v9  ;;  %12523 = vmatmul.mubr.bf16.gmra.mrb[84].mxu1 %v20160_v9  ;;  %v16258_v9 = vcombine.low %v568_v54, %v572_v56  ;;  %v16291_v54 = vcombine.high %v21310_v18, %v21312_v55  ;;  %v16293_v56 = vcombine.high %v21314_v22, %v21318_v41 }
 0x4c8   :  { %10988 = vmatprep.mubr.bf16.mxu0 %v20162_v11  ;;  %12532 = vmatprep.mubr.bf16.mxu1 %v20162_v11  ;;  %v16269_v11 = vcombine.high %v577_v21, %v581_v7 }
 0x4c9   :  { %11110 = vmatpush1.bf16.msra.mxu0 %v16242_v48  ;;  %12654 = vmatpush1.bf16.msra.mxu1 %v16244_v32  ;;  %v16276_v48 = vcombine.low %v585_v37, %v589_v53  ;;  %v16283_v32 = vcombine.high %v592_v0, %v596_v33 }
 0x4ca   :  { %11111 = vmatprep.subr.bf16.mxu0 %v16251_v47  ;;  %12655 = vmatprep.subr.bf16.mxu1 %v16253_v50  ;;  %v16282_v47 = vcombine.low %v592_v0, %v596_v33  ;;  %v16284_v50 = vcombine.low %v593_v38, %v597_v2 }
 0x4cd   :  { %11112 = vmatpush1.bf16.msra.mxu0 %v16250_v15  ;;  %12656 = vmatpush1.bf16.msra.mxu1 %v16252_v14 }
 0x4ce   :  { %11113 = vmatprep.subr.bf16.mxu0 %v16259_v42  ;;  %12657 = vmatprep.subr.bf16.mxu1 %v16261_v43 }
 0x4cf   :  { %10989 = vmatmul.mubr.bf16.gmra.mrb[88].mxu0 %v20168_v29  ;;  %12533 = vmatmul.mubr.bf16.gmra.mrb[88].mxu1 %v20168_v29  ;;  %v16274_v29 = vcombine.low %v584_v23, %v588_v61 }
 0x4d0   :  { %10998 = vmatprep.mubr.bf16.mxu0 %v20170_v36  ;;  %12542 = vmatprep.mubr.bf16.mxu1 %v20170_v36  ;;  %v16285_v36 = vcombine.high %v593_v38, %v597_v2 }
 0x4d1   :  { %11114 = vmatpush1.bf16.msra.mxu0 %v16258_v9  ;;  %12658 = vmatpush1.bf16.msra.mxu1 %v16260_v62 }
 0x4d2   :  { %11115 = vmatprep.subr.bf16.mxu0 %v16267_v24  ;;  %12659 = vmatprep.subr.bf16.mxu1 %v16269_v11 }
 0x4d5   :  { %11116 = vmatpush1.bf16.msra.mxu0 %v16266_v20  ;;  %12660 = vmatpush1.bf16.msra.mxu1 %v16268_v27 }
 0x4d6   :  { %11117 = vmatprep.subr.bf16.mxu0 %v16275_v49  ;;  %12661 = vmatprep.subr.bf16.mxu1 %v16277_v58 }
 0x4d7   :  { %10999 = vmatmul.mubr.bf16.gmra.mrb[92].mxu0 %v20176_v60  ;;  %12543 = vmatmul.mubr.bf16.gmra.mrb[92].mxu1 %v20176_v60  ;;  %v1368_v60 = vlaneseq }
 0x4d8   :  { %11008 = vmatprep.mubr.bf16.mxu0 %v20178_v1  ;;  %12552 = vmatprep.mubr.bf16.mxu1 %v20178_v1 }
 0x4d9   :  { %11118 = vmatpush1.bf16.msra.mxu0 %v16274_v29  ;;  %12662 = vmatpush1.bf16.msra.mxu1 %v16276_v48  ;;  %v21359_v1 = vshrl.u32 %v1368_v60, 7 }
 0x4da   :  { %11119 = vmatprep.subr.bf16.mxu0 %v16283_v32  ;;  %12663 = vmatprep.subr.bf16.mxu1 %v16285_v36 }
 0x4db   :  { %23651 = vst [vmem:[#allocation231_spill] sm:$0xff] %v21359_v1  ;;  %v1370_v4 = vsub.s32 0, %v21359_v1  ;;  %v1374_v15 = vsub.s32 1, %v21359_v1 }
 0x4dd   :  { %11120 = vmatpush1.bf16.msra.mxu0 %v16282_v47  ;;  %12664 = vmatpush1.bf16.msra.mxu1 %v16284_v50  ;;  %v21369_v14 = vrot.slane %v1366_v28, %v1370_v4  ;;  %v21374_v42 = vrot.slane %v1366_v28, %v1374_v15 }
 0x4de   :  { %11282 = vmatprep.subr.bf16.mxu0 %v16291_v54  ;;  %12826 = vmatprep.subr.bf16.mxu1 %v16293_v56 }
 0x4df   :  { %11009 = vmatmul.mubr.bf16.gmra.mrb[96].mxu0 %v20186_v16  ;;  %12553 = vmatmul.mubr.bf16.gmra.mrb[96].mxu1 %v20186_v16  ;;  %v1378_v16 = vsub.s32 2, %v21359_v1 }
 0x4e0   :  { %11018 = vmatprep.mubr.bf16.mxu0 %v20190_v19  ;;  %12562 = vmatprep.mubr.bf16.mxu1 %v20190_v19  ;;  %v1382_v19 = vsub.s32 3, %v21359_v1 }
 0x4e7   :  { %11019 = vmatmul.mubr.bf16.gmra.mrb[100].mxu0 %v20196_v25  ;;  %12563 = vmatmul.mubr.bf16.gmra.mrb[100].mxu1 %v20196_v25  ;;  %v21372_v25 = vrot.slane %v1366_v28, %v1378_v16 }
 0x4e8   :  { %11028 = vmatprep.mubr.bf16.mxu0 %v20198_v26  ;;  %12572 = vmatprep.mubr.bf16.mxu1 %v20198_v26  ;;  %v21377_v26 = vrot.slane %v1366_v28, %v1382_v19 }
 0x4ef   :  { %11029 = vmatmul.mubr.bf16.gmra.mrb[104].mxu0 %v20204_v30  ;;  %12573 = vmatmul.mubr.bf16.gmra.mrb[104].mxu1 %v20204_v30 }
 0x4f0   :  { %11038 = vmatprep.mubr.bf16.mxu0 %v20206_v34  ;;  %12582 = vmatprep.mubr.bf16.mxu1 %v20206_v34 }
 0x4f2   :  { %v9193_v43 = vpop.f32.mrb[0].mxu0  ;;  %v10737_v35 = vpop.f32.mrb[0].mxu1 }
 0x4f3   :  { %v17599_v6 = vadd.f32 %v9193_v43, %v21369_v14  ;;  %v9195_v21 = vpop.f32.mrb[1].mxu0  ;;  %v17663_v7 = vadd.f32 %v10737_v35, %v21372_v25  ;;  %v10739_v30 = vpop.f32.mrb[1].mxu1 }
 0x4f4   :  { %v17600_v9 = vadd.f32 %v9195_v21, %v21374_v42  ;;  %v9197_v62 = vpop.f32.mrb[2].mxu0  ;;  %v17664_v24 = vadd.f32 %v10739_v30, %v21377_v26  ;;  %v10741_v23 = vpop.f32.mrb[2].mxu1 }
 0x4f5   :  { %v17601_v11 = vadd.f32 %v9197_v62, %v21369_v14  ;;  %v9199_v61 = vpop.f32.mrb[3].mxu0  ;;  %v17665_v37 = vadd.f32 %v10741_v23, %v21372_v25  ;;  %v10743_v53 = vpop.f32.mrb[3].mxu1  ;;  %v13984_v20 = vmax.f32 %v17599_v6, 0.0  ;;  %v13986_v58 = vmax.f32 %v17663_v7, 0.0 }
 0x4f6   :  { %v17602_v34 = vadd.f32 %v9199_v61, %v21374_v42  ;;  %v17666_v49 = vadd.f32 %v10743_v53, %v21377_v26  ;;  %v13985_v0 = vmax.f32 %v17600_v9, 0.0  ;;  %v13987_v2 = vmax.f32 %v17664_v24, 0.0 }
 0x4f7   :  { %v13992_v27 = vmax.f32 %v17601_v11, 0.0  ;;  %11039 = vmatmul.mubr.bf16.gmra.mrb[108].mxu0 %v20212_v39  ;;  %v13994_v33 = vmax.f32 %v17665_v37, 0.0  ;;  %12583 = vmatmul.mubr.bf16.gmra.mrb[108].mxu1 %v20212_v39 }
 0x4f8   :  { %v13993_v38 = vmax.f32 %v17602_v34, 0.0  ;;  %11048 = vmatprep.mubr.bf16.mxu0 %v20214_v40  ;;  %v13995_v48 = vmax.f32 %v17666_v49, 0.0  ;;  %12592 = vmatprep.mubr.bf16.mxu1 %v20214_v40 }
 0x4f9   :  { %v21391_v29 = vpack.c.bf16 %v13992_v27, %v13984_v20  ;;  %v21394_v32 = vpack.c.bf16 %v13994_v33, %v13986_v58 }
 0x4fa   :  { %v21396_v36 = vpack.c.bf16 %v13993_v38, %v13985_v0  ;;  %v9203_v47 = vpop.f32.mrb[4].mxu0  ;;  %v21398_v50 = vpack.c.bf16 %v13995_v48, %v13987_v2  ;;  %v10747_v56 = vpop.f32.mrb[4].mxu1 }
 0x4fb   :  { %v17603_v54 = vadd.f32 %v9203_v47, %v21369_v14  ;;  %v9205_v60 = vpop.f32.mrb[5].mxu0  ;;  %v17667_v39 = vadd.f32 %v10747_v56, %v21372_v25  ;;  %v10749_v28 = vpop.f32.mrb[5].mxu1 }
 0x4fc   :  { %v17604_v4 = vadd.f32 %v9205_v60, %v21374_v42  ;;  %v9207_v16 = vpop.f32.mrb[6].mxu0  ;;  %v17668_v15 = vadd.f32 %v10749_v28, %v21377_v26  ;;  %v10751_v19 = vpop.f32.mrb[6].mxu1 }
 0x4fd   :  { %v17605_v40 = vadd.f32 %v9207_v16, %v21369_v14  ;;  %v9209_v43 = vpop.f32.mrb[7].mxu0  ;;  %v17669_v6 = vadd.f32 %v10751_v19, %v21372_v25  ;;  %v10753_v21 = vpop.f32.mrb[7].mxu1  ;;  %v14000_v7 = vmax.f32 %v17603_v54, 0.0  ;;  %v14002_v62 = vmax.f32 %v17667_v39, 0.0 }
 0x4fe   :  { %v17606_v35 = vadd.f32 %v9209_v43, %v21374_v42  ;;  %v17670_v30 = vadd.f32 %v10753_v21, %v21377_v26  ;;  %v14001_v24 = vmax.f32 %v17604_v4, 0.0  ;;  %v14003_v61 = vmax.f32 %v17668_v15, 0.0 }
 0x4ff   :  { %v14008_v9 = vmax.f32 %v17605_v40, 0.0  ;;  %11049 = vmatmul.mubr.bf16.gmra.mrb[112].mxu0 %v20220_v45  ;;  %v14010_v11 = vmax.f32 %v17669_v6, 0.0  ;;  %12593 = vmatmul.mubr.bf16.gmra.mrb[112].mxu1 %v20220_v45 }
 0x500   :  { %v14009_v23 = vmax.f32 %v17606_v35, 0.0  ;;  %11058 = vmatprep.mubr.bf16.mxu0 %v20222_v46  ;;  %v14011_v34 = vmax.f32 %v17670_v30, 0.0  ;;  %12602 = vmatprep.mubr.bf16.mxu1 %v20222_v46 }
 0x501   :  { %v21411_v37 = vpack.c.bf16 %v14008_v9, %v14000_v7  ;;  %v21414_v53 = vpack.c.bf16 %v14010_v11, %v14002_v62 }
 0x502   :  { %v21416_v20 = vpack.c.bf16 %v14009_v23, %v14001_v24  ;;  %v9213_v27 = vpop.f32.mrb[8].mxu0  ;;  %v21418_v49 = vpack.c.bf16 %v14011_v34, %v14003_v61  ;;  %v10757_v0 = vpop.f32.mrb[8].mxu1 }
 0x503   :  { %v17607_v58 = vadd.f32 %v9213_v27, %v21369_v14  ;;  %v9215_v33 = vpop.f32.mrb[9].mxu0  ;;  %v17671_v45 = vadd.f32 %v10757_v0, %v21372_v25  ;;  %v10759_v2 = vpop.f32.mrb[9].mxu1 }
 0x504   :  { %v17608_v38 = vadd.f32 %v9215_v33, %v21374_v42  ;;  %v9217_v48 = vpop.f32.mrb[10].mxu0  ;;  %v17672_v47 = vadd.f32 %v10759_v2, %v21377_v26  ;;  %v10761_v54 = vpop.f32.mrb[10].mxu1 }
 0x505   :  { %v17609_v46 = vadd.f32 %v9217_v48, %v21369_v14  ;;  %v9219_v56 = vpop.f32.mrb[11].mxu0  ;;  %v17673_v60 = vadd.f32 %v10761_v54, %v21372_v25  ;;  %v10763_v4 = vpop.f32.mrb[11].mxu1  ;;  %v14016_v28 = vmax.f32 %v17607_v58, 0.0  ;;  %v14018_v40 = vmax.f32 %v17671_v45, 0.0 }
 0x506   :  { %v17610_v39 = vadd.f32 %v9219_v56, %v21374_v42  ;;  %v17674_v15 = vadd.f32 %v10763_v4, %v21377_v26  ;;  %v14017_v19 = vmax.f32 %v17608_v38, 0.0  ;;  %v14019_v35 = vmax.f32 %v17672_v47, 0.0 }
 0x507   :  { %v14024_v16 = vmax.f32 %v17609_v46, 0.0  ;;  %11059 = vmatmul.mubr.bf16.gmra.mrb[116].mxu0 %v20228_v51  ;;  %v14026_v43 = vmax.f32 %v17673_v60, 0.0  ;;  %12603 = vmatmul.mubr.bf16.gmra.mrb[116].mxu1 %v20228_v51 }
 0x508   :  { %v14025_v6 = vmax.f32 %v17610_v39, 0.0  ;;  %11068 = vmatprep.mubr.bf16.mxu0 %v20230_v52  ;;  %v14027_v7 = vmax.f32 %v17674_v15, 0.0  ;;  %12612 = vmatprep.mubr.bf16.mxu1 %v20230_v52 }
 0x509   :  { %v21431_v21 = vpack.c.bf16 %v14024_v16, %v14016_v28  ;;  %v21434_v9 = vpack.c.bf16 %v14026_v43, %v14018_v40 }
 0x50a   :  { %v21436_v30 = vpack.c.bf16 %v14025_v6, %v14017_v19  ;;  %v9223_v62 = vpop.f32.mrb[12].mxu0  ;;  %v21438_v24 = vpack.c.bf16 %v14027_v7, %v14019_v35  ;;  %v10767_v23 = vpop.f32.mrb[12].mxu1 }
 0x50b   :  { %v17611_v11 = vadd.f32 %v9223_v62, %v21369_v14  ;;  %v9225_v61 = vpop.f32.mrb[13].mxu0  ;;  %v17675_v51 = vadd.f32 %v10767_v23, %v21372_v25  ;;  %v10769_v27 = vpop.f32.mrb[13].mxu1 }
 0x50c   :  { %v17612_v34 = vadd.f32 %v9225_v61, %v21374_v42  ;;  %v9227_v58 = vpop.f32.mrb[14].mxu0  ;;  %v17676_v0 = vadd.f32 %v10769_v27, %v21377_v26  ;;  %v10771_v33 = vpop.f32.mrb[14].mxu1 }
 0x50d   :  { %v17613_v52 = vadd.f32 %v9227_v58, %v21369_v14  ;;  %v9229_v45 = vpop.f32.mrb[15].mxu0  ;;  %v17677_v38 = vadd.f32 %v10771_v33, %v21372_v25  ;;  %v10773_v48 = vpop.f32.mrb[15].mxu1  ;;  %v14032_v47 = vmax.f32 %v17611_v11, 0.0  ;;  %v14034_v56 = vmax.f32 %v17675_v51, 0.0 }
 0x50e   :  { %v17614_v2 = vadd.f32 %v9229_v45, %v21374_v42  ;;  %v17678_v54 = vadd.f32 %v10773_v48, %v21377_v26  ;;  %v14033_v60 = vmax.f32 %v17612_v34, 0.0  ;;  %v14035_v28 = vmax.f32 %v17676_v0, 0.0 }
 0x50f   :  { %v14040_v46 = vmax.f32 %v17613_v52, 0.0  ;;  %11069 = vmatmul.mubr.bf16.gmra.mrb[120].mxu0 %v20236_v57  ;;  %v14042_v39 = vmax.f32 %v17677_v38, 0.0  ;;  %12613 = vmatmul.mubr.bf16.gmra.mrb[120].mxu1 %v20236_v57 }
 0x510   :  { %v14041_v4 = vmax.f32 %v17614_v2, 0.0  ;;  %11078 = vmatprep.mubr.bf16.mxu0 %v20238_v59  ;;  %v14043_v15 = vmax.f32 %v17678_v54, 0.0  ;;  %12622 = vmatprep.mubr.bf16.mxu1 %v20238_v59 }
 0x511   :  { %v21451_v16 = vpack.c.bf16 %v14040_v46, %v14032_v47  ;;  %v21454_v40 = vpack.c.bf16 %v14042_v39, %v14034_v56  ;;  %v21474_v39 = vld [vmem:[#allocation5 + $0x850] sm:$0xff] }
 0x512   :  { %v21456_v19 = vpack.c.bf16 %v14041_v4, %v14033_v60  ;;  %v9233_v43 = vpop.f32.mrb[16].mxu0  ;;  %v21458_v6 = vpack.c.bf16 %v14043_v15, %v14035_v28  ;;  %v10777_v7 = vpop.f32.mrb[16].mxu1  ;;  %v21476_v4 = vld [vmem:[#allocation5 + $0x870] sm:$0xff] }
 0x513   :  { %v17615_v35 = vadd.f32 %v9233_v43, %v21369_v14  ;;  %v9235_v62 = vpop.f32.mrb[17].mxu0  ;;  %v17679_v57 = vadd.f32 %v10777_v7, %v21372_v25  ;;  %v10779_v23 = vpop.f32.mrb[17].mxu1 }
 0x514   :  { %v17616_v11 = vadd.f32 %v9235_v62, %v21374_v42  ;;  %v9237_v61 = vpop.f32.mrb[18].mxu0  ;;  %v17680_v51 = vadd.f32 %v10779_v23, %v21377_v26  ;;  %v10781_v34 = vpop.f32.mrb[18].mxu1  ;;  %v21491_v23 = vld [vmem:[#allocation5 + $0x8b0] sm:$0xff] }
 0x515   :  { %v17617_v59 = vadd.f32 %v9237_v61, %v21369_v14  ;;  %v9239_v27 = vpop.f32.mrb[19].mxu0  ;;  %v17681_v58 = vadd.f32 %v10781_v34, %v21372_v25  ;;  %v10783_v52 = vpop.f32.mrb[19].mxu1  ;;  %v14048_v33 = vmax.f32 %v17615_v35, 0.0  ;;  %v14050_v2 = vmax.f32 %v17679_v57, 0.0  ;;  %v21482_v35 = vld [vmem:[#allocation5 + $0x858] sm:$0xff] }
 0x516   :  { %v17618_v0 = vadd.f32 %v9239_v27, %v21374_v42  ;;  %v17682_v38 = vadd.f32 %v10783_v52, %v21377_v26  ;;  %v14049_v48 = vmax.f32 %v17616_v11, 0.0  ;;  %v14051_v54 = vmax.f32 %v17680_v51, 0.0 }
 0x517   :  { %v14056_v45 = vmax.f32 %v17617_v59, 0.0  ;;  %11079 = vmatmul.mubr.bf16.gmra.mrb[124].mxu0 %v20244_v63  ;;  %v14058_v47 = vmax.f32 %v17681_v58, 0.0  ;;  %12623 = vmatmul.mubr.bf16.gmra.mrb[124].mxu1 %v20244_v63  ;;  %v21484_v63 = vld [vmem:[#allocation5 + $0x878] sm:$0xff]  ;;  %v16298_v27 = vcombine.low %v21474_v39, %v21476_v4 }
 0x518   :  { %v14057_v46 = vmax.f32 %v17618_v0, 0.0  ;;  %11121 = vmatprep.mubr.bf16.mxu0 %v20246_v3  ;;  %v14059_v60 = vmax.f32 %v17682_v38, 0.0  ;;  %12665 = vmatprep.mubr.bf16.mxu1 %v20246_v3  ;;  %v21489_v3 = vld [vmem:[#allocation5 + $0x890] sm:$0xff]  ;;  %v16300_v38 = vcombine.low %v21482_v35, %v21484_v63 }
 0x519   :  { %v21471_v56 = vpack.c.bf16 %v14056_v45, %v14048_v33  ;;  %v21478_v28 = vpack.c.bf16 %v14058_v47, %v14050_v2  ;;  %v16299_v45 = vcombine.high %v21474_v39, %v21476_v4  ;;  %v23654_v4 = vld [vmem:[#allocation16_spill] sm:$0xff] }
 0x51a   :  { %v21480_v15 = vpack.c.bf16 %v14057_v46, %v14049_v48  ;;  %v9243_v43 = vpop.f32.mrb[20].mxu0  ;;  %v21486_v7 = vpack.c.bf16 %v14059_v60, %v14051_v54  ;;  %v10787_v57 = vpop.f32.mrb[20].mxu1  ;;  %v16301_v46 = vcombine.high %v21482_v35, %v21484_v63  ;;  %v16307_v54 = vcombine.high %v21489_v3, %v21491_v23  ;;  %v21509_v60 = vld [vmem:[#allocation5 + $0x898] sm:$0xff] }
 0x51b   :  { %23652 = vst [vmem:[#allocation232_spill] sm:$0xff] %v21471_v56  ;;  %23653 = vst [vmem:[#allocation233_spill] sm:$0xff] %v21478_v28  ;;  %v17619_v62 = vadd.f32 %v9243_v43, %v21369_v14  ;;  %v9245_v11 = vpop.f32.mrb[21].mxu0  ;;  %v17683_v61 = vadd.f32 %v10787_v57, %v21372_v25  ;;  %v10789_v59 = vpop.f32.mrb[21].mxu1 }
 0x51c   :  { %v17620_v51 = vadd.f32 %v9245_v11, %v21374_v42  ;;  %v9247_v34 = vpop.f32.mrb[22].mxu0  ;;  %v17684_v58 = vadd.f32 %v10789_v59, %v21377_v26  ;;  %v10791_v52 = vpop.f32.mrb[22].mxu1  ;;  %v21513_v59 = vld [vmem:[#allocation5 + $0x8b8] sm:$0xff] }
 0x51d   :  { %v17621_v0 = vadd.f32 %v9247_v34, %v21369_v14  ;;  %v9249_v33 = vpop.f32.mrb[23].mxu0  ;;  %v17685_v2 = vadd.f32 %v10791_v52, %v21372_v25  ;;  %v10793_v47 = vpop.f32.mrb[23].mxu1  ;;  %v14064_v43 = vmax.f32 %v17619_v62, 0.0  ;;  %v14066_v57 = vmax.f32 %v17683_v61, 0.0  ;;  %v21515_v34 = vld [vmem:[#allocation5 + $0xc10] sm:$0xff] }
 0x51e   :  { %v17622_v48 = vadd.f32 %v9249_v33, %v21374_v42  ;;  %v17686_v39 = vadd.f32 %v10793_v47, %v21377_v26  ;;  %v21517_v52 = vld [vmem:[#allocation5 + $0xc30] sm:$0xff]  ;;  %v14065_v33 = vmax.f32 %v17620_v51, 0.0  ;;  %v23655_v62 = vcombine.low %v21310_v18, %v21312_v55  ;;  %v21527_v47 = vld [vmem:[#allocation5 + $0xc38] sm:$0xff] }
 0x51f   :  { %v14072_v11 = vmax.f32 %v17621_v0, 0.0  ;;  %11122 = vmatmul.mubr.bf16.vlgmr.msra.gmra.mrb[64].mxu0 %v23654_v4  ;;  %v14074_v35 = vmax.f32 %v17685_v2, 0.0  ;;  %12666 = vmatmul.mubr.bf16.vlgmr.msra.gmra.mrb[64].mxu1 %v23654_v4  ;;  %v21525_v0 = vld [vmem:[#allocation5 + $0xc18] sm:$0xff]  ;;  %v14067_v1 = vmax.f32 %v17684_v58, 0.0  ;;  %v23657_v51 = vcombine.low %v21314_v22, %v21318_v41 }
 0x520   :  { %v14073_v63 = vmax.f32 %v17622_v48, 0.0  ;;  %11283 = vmatpush1.bf16.msra.mxu0 %v23655_v62  ;;  %v14075_v56 = vmax.f32 %v17686_v39, 0.0  ;;  %v23658_v2 = vld [vmem:[#allocation17_spill] sm:$0xff]  ;;  %v16309_v58 = vcombine.high %v21509_v60, %v21513_v59 }
 0x521   :  { %v21529_v28 = vpack.c.bf16 %v14072_v11, %v14064_v43  ;;  %12827 = vmatpush1.bf16.msra.mxu1 %v23657_v51  ;;  %11131 = vmatprep.mubr.bf16.mxu0 %v23658_v2  ;;  %v21537_v55 = vpack.c.bf16 %v14074_v35, %v14066_v57  ;;  %v21547_v39 = vld [vmem:[#allocation5 + $0x8d0] sm:$0xff]  ;;  %v21557_v62 = vld [vmem:[#allocation5 + $0x8f8] sm:$0xff] }
 0x522   :  { %v21539_v48 = vpack.c.bf16 %v14073_v63, %v14065_v33  ;;  %v9253_v4 = vpop.f32.mrb[24].mxu0  ;;  %12675 = vmatprep.mubr.bf16.mxu1 %v23658_v2  ;;  %11284 = vmatprep.subr.bf16.mxu0 %v16299_v45  ;;  %v21544_v43 = vpack.c.bf16 %v14075_v56, %v14067_v1  ;;  %v10797_v41 = vpop.f32.mrb[24].mxu1  ;;  %v21549_v57 = vld [vmem:[#allocation5 + $0x8f0] sm:$0xff]  ;;  %v16306_v1 = vcombine.low %v21489_v3, %v21491_v23  ;;  %v21555_v56 = vld [vmem:[#allocation5 + $0x8d8] sm:$0xff] }
 0x523   :  { %23656 = vst [vmem:[#allocation16_spill] sm:$0xff] %v21529_v28  ;;  %23659 = vst [vmem:[#allocation17_spill] sm:$0xff] %v21537_v55  ;;  %v17623_v22 = vadd.f32 %v9253_v4, %v21369_v14  ;;  %v9255_v11 = vpop.f32.mrb[25].mxu0  ;;  %12828 = vmatprep.subr.bf16.mxu1 %v16301_v46  ;;  %v17687_v33 = vadd.f32 %v10797_v41, %v21372_v25  ;;  %v10799_v63 = vpop.f32.mrb[25].mxu1  ;;  %v16308_v41 = vcombine.low %v21509_v60, %v21513_v59  ;;  %v21573_v59 = vld [vmem:[#allocation5 + $0x910] sm:$0xff] }
 0x524   :  { %23660 = vst [vmem:[#allocation234_spill] sm:$0xff] %v21544_v43  ;;  %v17624_v35 = vadd.f32 %v9255_v11, %v21374_v42  ;;  %v9257_v45 = vpop.f32.mrb[26].mxu0  ;;  %11285 = vmatpush1.bf16.msra.mxu0 %v16298_v27  ;;  %v17688_v46 = vadd.f32 %v10799_v63, %v21377_v26  ;;  %v10801_v2 = vpop.f32.mrb[26].mxu1  ;;  %v16314_v23 = vcombine.low %v21547_v39, %v21549_v57 }
 0x525   :  { %v17625_v51 = vadd.f32 %v9257_v45, %v21369_v14  ;;  %v9259_v4 = vpop.f32.mrb[27].mxu0  ;;  %12829 = vmatpush1.bf16.msra.mxu1 %v16300_v38  ;;  %11286 = vmatprep.subr.bf16.mxu0 %v16307_v54  ;;  %v17689_v27 = vadd.f32 %v10801_v2, %v21372_v25  ;;  %v10803_v3 = vpop.f32.mrb[27].mxu1  ;;  %v16315_v63 = vcombine.high %v21547_v39, %v21549_v57  ;;  %v14080_v45 = vmax.f32 %v17623_v22, 0.0  ;;  %v23661_v54 = vld [vmem:[#allocation18_spill] sm:$0xff]  ;;  %v21575_v2 = vld [vmem:[#allocation5 + $0x930] sm:$0xff]  ;;  %v23662_v39 = vld [vmem:[#allocation19_spill] sm:$0xff] }
 0x526   :  { %v17626_v11 = vadd.f32 %v9259_v4, %v21374_v42  ;;  %12830 = vmatprep.subr.bf16.mxu1 %v16309_v58  ;;  %v17690_v38 = vadd.f32 %v10803_v3, %v21377_v26  ;;  %v16317_v60 = vcombine.high %v21555_v56, %v21557_v62  ;;  %v14082_v58 = vmax.f32 %v17687_v33, 0.0  ;;  %v21579_v22 = vld [vmem:[#allocation5 + $0x918] sm:$0xff] }
 0x527   :  { %v14088_v18 = vmax.f32 %v17625_v51, 0.0  ;;  %11132 = vmatmul.mubr.bf16.gmra.mrb[68].mxu0 %v23661_v54  ;;  %v14081_v4 = vmax.f32 %v17624_v35, 0.0  ;;  %v14090_v61 = vmax.f32 %v17689_v27, 0.0  ;;  %12676 = vmatmul.mubr.bf16.gmra.mrb[68].mxu1 %v23661_v54  ;;  %v21581_v57 = vld [vmem:[#allocation5 + $0x938] sm:$0xff]  ;;  %v14083_v51 = vmax.f32 %v17688_v46, 0.0  ;;  %v21594_v46 = vld [vmem:[#allocation5 + $0x950] sm:$0xff] }
 0x528   :  { %v14089_v55 = vmax.f32 %v17626_v11, 0.0  ;;  %11141 = vmatprep.mubr.bf16.mxu0 %v23662_v39  ;;  %v14091_v28 = vmax.f32 %v17690_v38, 0.0  ;;  %12685 = vmatprep.mubr.bf16.mxu1 %v23662_v39  ;;  %v16316_v33 = vcombine.low %v21555_v56, %v21557_v62  ;;  %v16323_v54 = vcombine.high %v21573_v59, %v21575_v2 }
 0x529   :  { %v21583_v3 = vpack.c.bf16 %v14088_v18, %v14080_v45  ;;  %11287 = vmatpush1.bf16.msra.mxu0 %v16306_v1  ;;  %v21588_v35 = vpack.c.bf16 %v14090_v61, %v14082_v58  ;;  %12831 = vmatpush1.bf16.msra.mxu1 %v16308_v41  ;;  %v21596_v18 = vld [vmem:[#allocation5 + $0x970] sm:$0xff]  ;;  %v16325_v61 = vcombine.high %v21579_v22, %v21581_v57 }
 0x52a   :  { %v21590_v27 = vpack.c.bf16 %v14089_v55, %v14081_v4  ;;  %v9263_v11 = vpop.f32.mrb[28].mxu0  ;;  %11288 = vmatprep.subr.bf16.mxu0 %v16315_v63  ;;  %v21598_v45 = vpack.c.bf16 %v14091_v28, %v14083_v51  ;;  %v10807_v38 = vpop.f32.mrb[28].mxu1  ;;  %12832 = vmatprep.subr.bf16.mxu1 %v16317_v60  ;;  %v16322_v58 = vcombine.low %v21573_v59, %v21575_v2  ;;  %v21607_v4 = vld [vmem:[#allocation5 + $0x958] sm:$0xff] }
 0x52b   :  { %23663 = vst [vmem:[#allocation18_spill] sm:$0xff] %v21583_v3  ;;  %23664 = vst [vmem:[#allocation19_spill] sm:$0xff] %v21588_v35  ;;  %v17627_v1 = vadd.f32 %v9263_v11, %v21369_v14  ;;  %v9265_v56 = vpop.f32.mrb[29].mxu0  ;;  %v17691_v55 = vadd.f32 %v10807_v38, %v21372_v25  ;;  %v10809_v41 = vpop.f32.mrb[29].mxu1  ;;  %v21609_v28 = vld [vmem:[#allocation5 + $0x978] sm:$0xff]  ;;  %v16324_v38 = vcombine.low %v21579_v22, %v21581_v57  ;;  %v21625_v57 = vld [vmem:[#allocation5 + $0x990] sm:$0xff] }
 0x52c   :  { %23665 = vst [vmem:[#allocation235_spill] sm:$0xff] %v21590_v27  ;;  %23666 = vst [vmem:[#allocation236_spill] sm:$0xff] %v21598_v45  ;;  %v17628_v62 = vadd.f32 %v9265_v56, %v21374_v42  ;;  %v9267_v63 = vpop.f32.mrb[30].mxu0  ;;  %v17692_v39 = vadd.f32 %v10809_v41, %v21377_v26  ;;  %v10811_v51 = vpop.f32.mrb[30].mxu1  ;;  %v16330_v56 = vcombine.low %v21594_v46, %v21596_v18  ;;  %v23667_v45 = vld [vmem:[#allocation20_spill] sm:$0xff] }
 0x52d   :  { %v17629_v60 = vadd.f32 %v9267_v63, %v21369_v14  ;;  %v9269_v11 = vpop.f32.mrb[31].mxu0  ;;  %11289 = vmatpush1.bf16.msra.mxu0 %v16314_v23  ;;  %v17693_v35 = vadd.f32 %v10811_v51, %v21372_v25  ;;  %v10813_v2 = vpop.f32.mrb[31].mxu1  ;;  %12833 = vmatpush1.bf16.msra.mxu1 %v16316_v33  ;;  %v16331_v41 = vcombine.high %v21594_v46, %v21596_v18  ;;  %v14096_v63 = vmax.f32 %v17627_v1, 0.0  ;;  %v21627_v51 = vld [vmem:[#allocation5 + $0x9b0] sm:$0xff]  ;;  %v21631_v18 = vld [vmem:[#allocation5 + $0x998] sm:$0xff] }
 0x52e   :  { %v17630_v59 = vadd.f32 %v9269_v11, %v21374_v42  ;;  %11290 = vmatprep.subr.bf16.mxu0 %v16323_v54  ;;  %v17694_v23 = vadd.f32 %v10813_v2, %v21377_v26  ;;  %12834 = vmatprep.subr.bf16.mxu1 %v16325_v61  ;;  %v16333_v22 = vcombine.high %v21607_v4, %v21609_v28  ;;  %v14098_v11 = vmax.f32 %v17691_v55, 0.0  ;;  %v23668_v46 = vld [vmem:[#allocation21_spill] sm:$0xff] }
 0x52f   :  { %v14104_v3 = vmax.f32 %v17629_v60, 0.0  ;;  %11142 = vmatmul.mubr.bf16.gmra.mrb[72].mxu0 %v23667_v45  ;;  %v14097_v33 = vmax.f32 %v17628_v62, 0.0  ;;  %v14106_v54 = vmax.f32 %v17693_v35, 0.0  ;;  %12686 = vmatmul.mubr.bf16.gmra.mrb[72].mxu1 %v23667_v45  ;;  %v21633_v1 = vld [vmem:[#allocation5 + $0x9b8] sm:$0xff]  ;;  %v14099_v61 = vmax.f32 %v17692_v39, 0.0  ;;  %v21646_v39 = vld [vmem:[#allocation5 + $0x9d0] sm:$0xff] }
 0x530   :  { %v14105_v27 = vmax.f32 %v17630_v59, 0.0  ;;  %11151 = vmatprep.mubr.bf16.mxu0 %v23668_v46  ;;  %v14107_v2 = vmax.f32 %v17694_v23, 0.0  ;;  %12695 = vmatprep.mubr.bf16.mxu1 %v23668_v46  ;;  %v16332_v55 = vcombine.low %v21607_v4, %v21609_v28  ;;  %v16339_v59 = vcombine.high %v21625_v57, %v21627_v51  ;;  %v21661_v46 = vld [vmem:[#allocation5 + $0x9f8] sm:$0xff] }
 0x531   :  { %v21635_v60 = vpack.c.bf16 %v14104_v3, %v14096_v63  ;;  %11291 = vmatpush1.bf16.msra.mxu0 %v16322_v58  ;;  %v21640_v35 = vpack.c.bf16 %v14106_v54, %v14098_v11  ;;  %12835 = vmatpush1.bf16.msra.mxu1 %v16324_v38  ;;  %v21648_v3 = vld [vmem:[#allocation5 + $0x9f0] sm:$0xff]  ;;  %v21659_v54 = vld [vmem:[#allocation5 + $0x9d8] sm:$0xff] }
 0x532   :  { %v21642_v62 = vpack.c.bf16 %v14105_v27, %v14097_v33  ;;  %v9273_v45 = vpop.f32.mrb[32].mxu0  ;;  %11292 = vmatprep.subr.bf16.mxu0 %v16331_v41  ;;  %v21650_v63 = vpack.c.bf16 %v14107_v2, %v14099_v61  ;;  %v10817_v23 = vpop.f32.mrb[32].mxu1  ;;  %12836 = vmatprep.subr.bf16.mxu1 %v16333_v22  ;;  %v16341_v27 = vcombine.high %v21631_v18, %v21633_v1 }
 0x533   :  { %23669 = vst [vmem:[#allocation20_spill] sm:$0xff] %v21635_v60  ;;  %23670 = vst [vmem:[#allocation21_spill] sm:$0xff] %v21640_v35  ;;  %v17631_v58 = vadd.f32 %v9273_v45, %v21369_v14  ;;  %v9275_v4 = vpop.f32.mrb[33].mxu0  ;;  %v17695_v28 = vadd.f32 %v10817_v23, %v21372_v25  ;;  %v10819_v41 = vpop.f32.mrb[33].mxu1  ;;  %v16338_v33 = vcombine.low %v21625_v57, %v21627_v51 }
 0x534   :  { %23671 = vst [vmem:[#allocation237_spill] sm:$0xff] %v21642_v62  ;;  %23672 = vst [vmem:[#allocation238_spill] sm:$0xff] %v21650_v63  ;;  %v17632_v38 = vadd.f32 %v9275_v4, %v21374_v42  ;;  %v9277_v11 = vpop.f32.mrb[34].mxu0  ;;  %v17696_v61 = vadd.f32 %v10819_v41, %v21377_v26  ;;  %v10821_v2 = vpop.f32.mrb[34].mxu1  ;;  %v16340_v23 = vcombine.low %v21631_v18, %v21633_v1  ;;  %v23673_v63 = vld [vmem:[#allocation22_spill] sm:$0xff]  ;;  %v21677_v1 = vld [vmem:[#allocation5 + $0xa10] sm:$0xff] }
 0x535   :  { %v17633_v22 = vadd.f32 %v9277_v11, %v21369_v14  ;;  %v9279_v45 = vpop.f32.mrb[35].mxu0  ;;  %11293 = vmatpush1.bf16.msra.mxu0 %v16330_v56  ;;  %v16346_v4 = vcombine.low %v21646_v39, %v21648_v3  ;;  %v17697_v35 = vadd.f32 %v10821_v2, %v21372_v25  ;;  %v10823_v51 = vpop.f32.mrb[35].mxu1  ;;  %12837 = vmatpush1.bf16.msra.mxu1 %v16332_v55  ;;  %v14112_v11 = vmax.f32 %v17631_v58, 0.0  ;;  %v21679_v2 = vld [vmem:[#allocation5 + $0xa30] sm:$0xff]  ;;  %v21685_v58 = vld [vmem:[#allocation5 + $0xa38] sm:$0xff] }
 0x536   :  { %v17634_v57 = vadd.f32 %v9279_v45, %v21374_v42  ;;  %11294 = vmatprep.subr.bf16.mxu0 %v16339_v59  ;;  %v16347_v41 = vcombine.high %v21646_v39, %v21648_v3  ;;  %v17698_v56 = vadd.f32 %v10823_v51, %v21377_v26  ;;  %12838 = vmatprep.subr.bf16.mxu1 %v16341_v27  ;;  %v14114_v45 = vmax.f32 %v17695_v28, 0.0  ;;  %v23674_v39 = vld [vmem:[#allocation23_spill] sm:$0xff]  ;;  %v21683_v3 = vld [vmem:[#allocation5 + $0xa18] sm:$0xff] }
 0x537   :  { %v14120_v60 = vmax.f32 %v17633_v22, 0.0  ;;  %11152 = vmatmul.mubr.bf16.gmra.mrb[76].mxu0 %v23673_v63  ;;  %v16349_v18 = vcombine.high %v21659_v54, %v21661_v46  ;;  %v14113_v55 = vmax.f32 %v17632_v38, 0.0  ;;  %v14122_v59 = vmax.f32 %v17697_v35, 0.0  ;;  %12696 = vmatmul.mubr.bf16.gmra.mrb[76].mxu1 %v23673_v63 }
 0x538   :  { %v14121_v62 = vmax.f32 %v17634_v57, 0.0  ;;  %11161 = vmatprep.mubr.bf16.mxu0 %v23674_v39  ;;  %v14115_v27 = vmax.f32 %v17696_v61, 0.0  ;;  %v14123_v51 = vmax.f32 %v17698_v56, 0.0  ;;  %12705 = vmatprep.mubr.bf16.mxu1 %v23674_v39  ;;  %v16348_v28 = vcombine.low %v21659_v54, %v21661_v46  ;;  %v21698_v61 = vld [vmem:[#allocation5 + $0xa50] sm:$0xff]  ;;  %v21713_v39 = vld [vmem:[#allocation5 + $0xa78] sm:$0xff] }
 0x539   :  { %v21687_v22 = vpack.c.bf16 %v14120_v60, %v14112_v11  ;;  %11295 = vmatpush1.bf16.msra.mxu0 %v16338_v33  ;;  %v21692_v35 = vpack.c.bf16 %v14122_v59, %v14114_v45  ;;  %12839 = vmatpush1.bf16.msra.mxu1 %v16340_v23  ;;  %v16355_v57 = vcombine.high %v21677_v1, %v21679_v2  ;;  %v21700_v60 = vld [vmem:[#allocation5 + $0xa70] sm:$0xff]  ;;  %v21711_v59 = vld [vmem:[#allocation5 + $0xa58] sm:$0xff] }
 0x53a   :  { %v21694_v38 = vpack.c.bf16 %v14121_v62, %v14113_v55  ;;  %v9283_v63 = vpop.f32.mrb[36].mxu0  ;;  %11296 = vmatprep.subr.bf16.mxu0 %v16347_v41  ;;  %v21702_v11 = vpack.c.bf16 %v14123_v51, %v14115_v27  ;;  %v10827_v56 = vpop.f32.mrb[36].mxu1  ;;  %12840 = vmatprep.subr.bf16.mxu1 %v16349_v18  ;;  %v16357_v62 = vcombine.high %v21683_v3, %v21685_v58 }
 0x53b   :  { %23675 = vst [vmem:[#allocation22_spill] sm:$0xff] %v21687_v22  ;;  %23676 = vst [vmem:[#allocation23_spill] sm:$0xff] %v21692_v35  ;;  %v17635_v33 = vadd.f32 %v9283_v63, %v21369_v14  ;;  %v9285_v54 = vpop.f32.mrb[37].mxu0  ;;  %v17699_v46 = vadd.f32 %v10827_v56, %v21372_v25  ;;  %v10829_v41 = vpop.f32.mrb[37].mxu1  ;;  %v16354_v55 = vcombine.low %v21677_v1, %v21679_v2 }
 0x53c   :  { %23677 = vst [vmem:[#allocation239_spill] sm:$0xff] %v21694_v38  ;;  %23678 = vst [vmem:[#allocation240_spill] sm:$0xff] %v21702_v11  ;;  %v17636_v23 = vadd.f32 %v9285_v54, %v21374_v42  ;;  %v9287_v45 = vpop.f32.mrb[38].mxu0  ;;  %v17700_v27 = vadd.f32 %v10829_v41, %v21377_v26  ;;  %v10831_v51 = vpop.f32.mrb[38].mxu1  ;;  %v16356_v56 = vcombine.low %v21683_v3, %v21685_v58  ;;  %v23679_v11 = vld [vmem:[#allocation24_spill] sm:$0xff] }
 0x53d   :  { %v17637_v18 = vadd.f32 %v9287_v45, %v21369_v14  ;;  %v9289_v63 = vpop.f32.mrb[39].mxu0  ;;  %11297 = vmatpush1.bf16.msra.mxu0 %v16346_v4  ;;  %v16362_v54 = vcombine.low %v21698_v61, %v21700_v60  ;;  %v17701_v35 = vadd.f32 %v10831_v51, %v21372_v25  ;;  %v10833_v2 = vpop.f32.mrb[39].mxu1  ;;  %12841 = vmatpush1.bf16.msra.mxu1 %v16348_v28  ;;  %v14128_v45 = vmax.f32 %v17635_v33, 0.0  ;;  %v21729_v58 = vld [vmem:[#allocation5 + $0xa90] sm:$0xff]  ;;  %v21737_v33 = vld [vmem:[#allocation5 + $0xab8] sm:$0xff] }
 0x53e   :  { %v17638_v1 = vadd.f32 %v9289_v63, %v21374_v42  ;;  %11298 = vmatprep.subr.bf16.mxu0 %v16355_v57  ;;  %v16363_v41 = vcombine.high %v21698_v61, %v21700_v60  ;;  %v17702_v4 = vadd.f32 %v10833_v2, %v21377_v26  ;;  %12842 = vmatprep.subr.bf16.mxu1 %v16357_v62  ;;  %v21731_v51 = vld [vmem:[#allocation5 + $0xab0] sm:$0xff]  ;;  %v14130_v63 = vmax.f32 %v17699_v46, 0.0  ;;  %v21735_v60 = vld [vmem:[#allocation5 + $0xa98] sm:$0xff] }
 0x53f   :  { %v14136_v22 = vmax.f32 %v17637_v18, 0.0  ;;  %11162 = vmatmul.mubr.bf16.gmra.mrb[80].mxu0 %v23679_v11  ;;  %v16365_v3 = vcombine.high %v21711_v59, %v21713_v39  ;;  %v14129_v28 = vmax.f32 %v17636_v23, 0.0  ;;  %v14138_v57 = vmax.f32 %v17701_v35, 0.0  ;;  %12706 = vmatmul.mubr.bf16.gmra.mrb[80].mxu1 %v23679_v11  ;;  %v23680_v61 = vld [vmem:[#allocation25_spill] sm:$0xff] }
 0x540   :  { %v14137_v38 = vmax.f32 %v17638_v1, 0.0  ;;  %11171 = vmatprep.mubr.bf16.mxu0 %v23680_v61  ;;  %v14131_v62 = vmax.f32 %v17700_v27, 0.0  ;;  %v14139_v2 = vmax.f32 %v17702_v4, 0.0  ;;  %12715 = vmatprep.mubr.bf16.mxu1 %v23680_v61  ;;  %v16364_v46 = vcombine.low %v21711_v59, %v21713_v39  ;;  %v21750_v27 = vld [vmem:[#allocation5 + $0xad0] sm:$0xff]  ;;  %v21765_v61 = vld [vmem:[#allocation5 + $0xaf8] sm:$0xff] }
 0x541   :  { %v21739_v18 = vpack.c.bf16 %v14136_v22, %v14128_v45  ;;  %11299 = vmatpush1.bf16.msra.mxu0 %v16354_v55  ;;  %v21744_v35 = vpack.c.bf16 %v14138_v57, %v14130_v63  ;;  %12843 = vmatpush1.bf16.msra.mxu1 %v16356_v56  ;;  %v16371_v1 = vcombine.high %v21729_v58, %v21731_v51  ;;  %v21752_v22 = vld [vmem:[#allocation5 + $0xaf0] sm:$0xff]  ;;  %v21763_v57 = vld [vmem:[#allocation5 + $0xad8] sm:$0xff] }
 0x542   :  { %v21746_v23 = vpack.c.bf16 %v14137_v38, %v14129_v28  ;;  %v9293_v11 = vpop.f32.mrb[40].mxu0  ;;  %11300 = vmatprep.subr.bf16.mxu0 %v16363_v41  ;;  %v21754_v45 = vpack.c.bf16 %v14139_v2, %v14131_v62  ;;  %v10837_v4 = vpop.f32.mrb[40].mxu1  ;;  %12844 = vmatprep.subr.bf16.mxu1 %v16365_v3  ;;  %v16373_v38 = vcombine.high %v21735_v60, %v21737_v33 }
 0x543   :  { %23681 = vst [vmem:[#allocation24_spill] sm:$0xff] %v21739_v18  ;;  %23682 = vst [vmem:[#allocation25_spill] sm:$0xff] %v21744_v35  ;;  %v17639_v55 = vadd.f32 %v9293_v11, %v21369_v14  ;;  %v9295_v59 = vpop.f32.mrb[41].mxu0  ;;  %v17703_v39 = vadd.f32 %v10837_v4, %v21372_v25  ;;  %v10839_v41 = vpop.f32.mrb[41].mxu1  ;;  %v16370_v28 = vcombine.low %v21729_v58, %v21731_v51 }
 0x544   :  { %23683 = vst [vmem:[#allocation241_spill] sm:$0xff] %v21746_v23  ;;  %23684 = vst [vmem:[#allocation242_spill] sm:$0xff] %v21754_v45  ;;  %v17640_v56 = vadd.f32 %v9295_v59, %v21374_v42  ;;  %v9297_v63 = vpop.f32.mrb[42].mxu0  ;;  %v17704_v62 = vadd.f32 %v10839_v41, %v21377_v26  ;;  %v10841_v2 = vpop.f32.mrb[42].mxu1  ;;  %v16372_v4 = vcombine.low %v21735_v60, %v21737_v33  ;;  %v23685_v45 = vld [vmem:[#allocation26_spill] sm:$0xff]  ;;  %v21781_v33 = vld [vmem:[#allocation5 + $0xb10] sm:$0xff] }
 0x545   :  { %v17641_v3 = vadd.f32 %v9297_v63, %v21369_v14  ;;  %v9299_v11 = vpop.f32.mrb[43].mxu0  ;;  %11301 = vmatpush1.bf16.msra.mxu0 %v16362_v54  ;;  %v16378_v59 = vcombine.low %v21750_v27, %v21752_v22  ;;  %v17705_v35 = vadd.f32 %v10841_v2, %v21372_v25  ;;  %v10843_v51 = vpop.f32.mrb[43].mxu1  ;;  %12845 = vmatpush1.bf16.msra.mxu1 %v16364_v46  ;;  %v14144_v63 = vmax.f32 %v17639_v55, 0.0  ;;  %v21783_v2 = vld [vmem:[#allocation5 + $0xb30] sm:$0xff]  ;;  %v21789_v55 = vld [vmem:[#allocation5 + $0xb38] sm:$0xff] }
 0x546   :  { %v17642_v58 = vadd.f32 %v9299_v11, %v21374_v42  ;;  %11302 = vmatprep.subr.bf16.mxu0 %v16371_v1  ;;  %v16379_v41 = vcombine.high %v21750_v27, %v21752_v22  ;;  %v17706_v54 = vadd.f32 %v10843_v51, %v21377_v26  ;;  %12846 = vmatprep.subr.bf16.mxu1 %v16373_v38  ;;  %v14146_v11 = vmax.f32 %v17703_v39, 0.0  ;;  %v23686_v27 = vld [vmem:[#allocation27_spill] sm:$0xff]  ;;  %v21787_v22 = vld [vmem:[#allocation5 + $0xb18] sm:$0xff] }
 0x547   :  { %v14152_v18 = vmax.f32 %v17641_v3, 0.0  ;;  %11172 = vmatmul.mubr.bf16.gmra.mrb[84].mxu0 %v23685_v45  ;;  %v16381_v60 = vcombine.high %v21763_v57, %v21765_v61  ;;  %v14145_v46 = vmax.f32 %v17640_v56, 0.0  ;;  %v14154_v1 = vmax.f32 %v17705_v35, 0.0  ;;  %12716 = vmatmul.mubr.bf16.gmra.mrb[84].mxu1 %v23685_v45 }
 0x548   :  { %v14153_v23 = vmax.f32 %v17642_v58, 0.0  ;;  %11181 = vmatprep.mubr.bf16.mxu0 %v23686_v27  ;;  %v14147_v38 = vmax.f32 %v17704_v62, 0.0  ;;  %v14155_v51 = vmax.f32 %v17706_v54, 0.0  ;;  %12725 = vmatprep.mubr.bf16.mxu1 %v23686_v27  ;;  %v16380_v39 = vcombine.low %v21763_v57, %v21765_v61  ;;  %v21802_v62 = vld [vmem:[#allocation5 + $0xb50] sm:$0xff]  ;;  %v21817_v27 = vld [vmem:[#allocation5 + $0xb78] sm:$0xff] }
 0x549   :  { %v21791_v3 = vpack.c.bf16 %v14152_v18, %v14144_v63  ;;  %11303 = vmatpush1.bf16.msra.mxu0 %v16370_v28  ;;  %v21796_v35 = vpack.c.bf16 %v14154_v1, %v14146_v11  ;;  %12847 = vmatpush1.bf16.msra.mxu1 %v16372_v4  ;;  %v16387_v58 = vcombine.high %v21781_v33, %v21783_v2  ;;  %v21804_v18 = vld [vmem:[#allocation5 + $0xb70] sm:$0xff]  ;;  %v21815_v1 = vld [vmem:[#allocation5 + $0xb58] sm:$0xff] }
 0x54a   :  { %v21798_v56 = vpack.c.bf16 %v14153_v23, %v14145_v46  ;;  %v9303_v45 = vpop.f32.mrb[44].mxu0  ;;  %11304 = vmatprep.subr.bf16.mxu0 %v16379_v41  ;;  %v21806_v63 = vpack.c.bf16 %v14155_v51, %v14147_v38  ;;  %v10847_v54 = vpop.f32.mrb[44].mxu1  ;;  %12848 = vmatprep.subr.bf16.mxu1 %v16381_v60  ;;  %v16389_v23 = vcombine.high %v21787_v22, %v21789_v55 }
 0x54b   :  { %23687 = vst [vmem:[#allocation26_spill] sm:$0xff] %v21791_v3  ;;  %23688 = vst [vmem:[#allocation27_spill] sm:$0xff] %v21796_v35  ;;  %v17643_v28 = vadd.f32 %v9303_v45, %v21369_v14  ;;  %v9305_v57 = vpop.f32.mrb[45].mxu0  ;;  %v17707_v61 = vadd.f32 %v10847_v54, %v21372_v25  ;;  %v10849_v41 = vpop.f32.mrb[45].mxu1  ;;  %v16386_v46 = vcombine.low %v21781_v33, %v21783_v2 }
 0x54c   :  { %23689 = vst [vmem:[#allocation243_spill] sm:$0xff] %v21798_v56  ;;  %23690 = vst [vmem:[#allocation244_spill] sm:$0xff] %v21806_v63  ;;  %v17644_v4 = vadd.f32 %v9305_v57, %v21374_v42  ;;  %v9307_v11 = vpop.f32.mrb[46].mxu0  ;;  %v17708_v38 = vadd.f32 %v10849_v41, %v21377_v26  ;;  %v10851_v51 = vpop.f32.mrb[46].mxu1  ;;  %v16388_v54 = vcombine.low %v21787_v22, %v21789_v55  ;;  %v23691_v63 = vld [vmem:[#allocation28_spill] sm:$0xff] }
 0x54d   :  { %v17645_v60 = vadd.f32 %v9307_v11, %v21369_v14  ;;  %v9309_v45 = vpop.f32.mrb[47].mxu0  ;;  %11305 = vmatpush1.bf16.msra.mxu0 %v16378_v59  ;;  %v16394_v57 = vcombine.low %v21802_v62, %v21804_v18  ;;  %v17709_v35 = vadd.f32 %v10851_v51, %v21372_v25  ;;  %v10853_v2 = vpop.f32.mrb[47].mxu1  ;;  %12849 = vmatpush1.bf16.msra.mxu1 %v16380_v39  ;;  %v14160_v11 = vmax.f32 %v17643_v28, 0.0  ;;  %v21833_v55 = vld [vmem:[#allocation5 + $0xb90] sm:$0xff]  ;;  %v717_v28 = vld [vmem:[#allocation5 + $0xbb8] sm:$0xff] }
 0x54e   :  { %v17646_v33 = vadd.f32 %v9309_v45, %v21374_v42  ;;  %11306 = vmatprep.subr.bf16.mxu0 %v16387_v58  ;;  %v16395_v41 = vcombine.high %v21802_v62, %v21804_v18  ;;  %v17710_v59 = vadd.f32 %v10853_v2, %v21377_v26  ;;  %12850 = vmatprep.subr.bf16.mxu1 %v16389_v23  ;;  %v21835_v51 = vld [vmem:[#allocation5 + $0xbb0] sm:$0xff]  ;;  %v14162_v45 = vmax.f32 %v17707_v61, 0.0  ;;  %v21839_v18 = vld [vmem:[#allocation5 + $0xb98] sm:$0xff] }
 0x54f   :  { %v14168_v3 = vmax.f32 %v17645_v60, 0.0  ;;  %11182 = vmatmul.mubr.bf16.gmra.mrb[88].mxu0 %v23691_v63  ;;  %v16397_v22 = vcombine.high %v21815_v1, %v21817_v27  ;;  %v14161_v39 = vmax.f32 %v17644_v4, 0.0  ;;  %v14170_v58 = vmax.f32 %v17709_v35, 0.0  ;;  %12726 = vmatmul.mubr.bf16.gmra.mrb[88].mxu1 %v23691_v63  ;;  %v23692_v62 = vld [vmem:[#allocation29_spill] sm:$0xff] }
 0x550   :  { %v14169_v56 = vmax.f32 %v17646_v33, 0.0  ;;  %11191 = vmatprep.mubr.bf16.mxu0 %v23692_v62  ;;  %v14163_v60 = vmax.f32 %v17708_v38, 0.0  ;;  %v14171_v2 = vmax.f32 %v17710_v59, 0.0  ;;  %12735 = vmatprep.mubr.bf16.mxu1 %v23692_v62  ;;  %v16396_v61 = vcombine.low %v21815_v1, %v21817_v27  ;;  %v21852_v38 = vld [vmem:[#allocation5 + $0xbd0] sm:$0xff]  ;;  %v725_v62 = vld [vmem:[#allocation5 + $0xbf8] sm:$0xff] }
 0x551   :  { %v21841_v23 = vpack.c.bf16 %v14168_v3, %v14160_v11  ;;  %11307 = vmatpush1.bf16.msra.mxu0 %v16386_v46  ;;  %v21846_v4 = vpack.c.bf16 %v14170_v58, %v14162_v45  ;;  %12851 = vmatpush1.bf16.msra.mxu1 %v16388_v54  ;;  %v16403_v33 = vcombine.high %v21833_v55, %v21835_v51  ;;  %v21854_v3 = vld [vmem:[#allocation5 + $0xbf0] sm:$0xff]  ;;  %v721_v58 = vld [vmem:[#allocation5 + $0xbd8] sm:$0xff] }
 0x552   :  { %v21848_v35 = vpack.c.bf16 %v14169_v56, %v14161_v39  ;;  %v9313_v63 = vpop.f32.mrb[48].mxu0  ;;  %11308 = vmatprep.subr.bf16.mxu0 %v16395_v41  ;;  %v21856_v11 = vpack.c.bf16 %v14171_v2, %v14163_v60  ;;  %v10857_v59 = vpop.f32.mrb[48].mxu1  ;;  %12852 = vmatprep.subr.bf16.mxu1 %v16397_v22  ;;  %v16405_v56 = vcombine.high %v21839_v18, %v717_v28 }
 0x553   :  { %23693 = vst [vmem:[#allocation28_spill] sm:$0xff] %v21841_v23  ;;  %23694 = vst [vmem:[#allocation29_spill] sm:$0xff] %v21846_v4  ;;  %v17647_v46 = vadd.f32 %v9313_v63, %v21369_v14  ;;  %v9315_v1 = vpop.f32.mrb[49].mxu0  ;;  %v17711_v27 = vadd.f32 %v10857_v59, %v21372_v25  ;;  %v10859_v41 = vpop.f32.mrb[49].mxu1  ;;  %v16402_v39 = vcombine.low %v21833_v55, %v21835_v51 }
 0x554   :  { %23695 = vst [vmem:[#allocation245_spill] sm:$0xff] %v21848_v35  ;;  %23696 = vst [vmem:[#allocation246_spill] sm:$0xff] %v21856_v11  ;;  %v17648_v54 = vadd.f32 %v9315_v1, %v21374_v42  ;;  %v9317_v45 = vpop.f32.mrb[50].mxu0  ;;  %v17712_v60 = vadd.f32 %v10859_v41, %v21377_v26  ;;  %v10861_v63 = vpop.f32.mrb[50].mxu1  ;;  %v16404_v22 = vcombine.low %v21839_v18, %v717_v28 }
 0x555   :  { %v17649_v2 = vadd.f32 %v9317_v45, %v21369_v14  ;;  %v9319_v4 = vpop.f32.mrb[51].mxu0  ;;  %11309 = vmatpush1.bf16.msra.mxu0 %v16394_v57  ;;  %v16410_v59 = vcombine.low %v21852_v38, %v21854_v3  ;;  %v17713_v1 = vadd.f32 %v10861_v63, %v21372_v25  ;;  %v10863_v11 = vpop.f32.mrb[51].mxu1  ;;  %12853 = vmatpush1.bf16.msra.mxu1 %v16396_v61  ;;  %v14176_v51 = vmax.f32 %v17647_v46, 0.0  ;;  %v23697_v57 = vld [vmem:[#allocation30_spill] sm:$0xff] }
 0x556   :  { %v17650_v23 = vadd.f32 %v9319_v4, %v21374_v42  ;;  %11310 = vmatprep.subr.bf16.mxu0 %v16403_v33  ;;  %v16411_v55 = vcombine.high %v21852_v38, %v21854_v3  ;;  %v17714_v45 = vadd.f32 %v10863_v11, %v21377_v26  ;;  %12854 = vmatprep.subr.bf16.mxu1 %v16405_v56  ;;  %v14178_v28 = vmax.f32 %v17711_v27, 0.0  ;;  %v23698_v4 = vld [vmem:[#allocation31_spill] sm:$0xff] }
 0x557   :  { %v14184_v41 = vmax.f32 %v17649_v2, 0.0  ;;  %11192 = vmatmul.mubr.bf16.gmra.mrb[92].mxu0 %v23697_v57  ;;  %v16413_v18 = vcombine.high %v721_v58, %v725_v62  ;;  %v14177_v35 = vmax.f32 %v17648_v54, 0.0  ;;  %v14186_v43 = vmax.f32 %v17713_v1, 0.0  ;;  %12736 = vmatmul.mubr.bf16.gmra.mrb[92].mxu1 %v23697_v57 }
 0x558   :  { %v14185_v63 = vmax.f32 %v17650_v23, 0.0  ;;  %11201 = vmatprep.mubr.bf16.mxu0 %v23698_v4  ;;  %v14179_v61 = vmax.f32 %v17712_v60, 0.0  ;;  %v14187_v38 = vmax.f32 %v17714_v45, 0.0  ;;  %12745 = vmatprep.mubr.bf16.mxu1 %v23698_v4  ;;  %v16412_v3 = vcombine.low %v721_v58, %v725_v62  ;;  %v23699_v4 = vld [vmem:[#allocation32_spill] sm:$0xff] }
 0x559   :  { %v21877_v33 = vpack.c.bf16 %v14184_v41, %v14176_v51  ;;  %11311 = vmatpush1.bf16.msra.mxu0 %v16402_v39  ;;  %v21880_v11 = vpack.c.bf16 %v14186_v43, %v14178_v28  ;;  %12855 = vmatpush1.bf16.msra.mxu1 %v16404_v22  ;;  %v16419_v23 = vcombine.high %v21515_v34, %v21517_v52 }
 0x55a   :  { %v21882_v46 = vpack.c.bf16 %v14185_v63, %v14177_v35  ;;  %v9323_v56 = vpop.f32.mrb[52].mxu0  ;;  %11312 = vmatprep.subr.bf16.mxu0 %v16411_v55  ;;  %v21886_v27 = vpack.c.bf16 %v14187_v38, %v14179_v61  ;;  %v10867_v60 = vpop.f32.mrb[52].mxu1  ;;  %12856 = vmatprep.subr.bf16.mxu1 %v16413_v18  ;;  %v16421_v39 = vcombine.high %v21525_v0, %v21527_v47 }
 0x55b   :  { %v17651_v54 = vadd.f32 %v9323_v56, %v21369_v14  ;;  %v9325_v2 = vpop.f32.mrb[53].mxu0  ;;  %v17715_v43 = vadd.f32 %v10867_v60, %v21372_v25  ;;  %v10869_v58 = vpop.f32.mrb[53].mxu1 }
 0x55c   :  { %v17652_v35 = vadd.f32 %v9325_v2, %v21374_v42  ;;  %v9327_v62 = vpop.f32.mrb[54].mxu0  ;;  %v17716_v22 = vadd.f32 %v10869_v58, %v21377_v26  ;;  %v10871_v55 = vpop.f32.mrb[54].mxu1 }
 0x55d   :  { %v17653_v1 = vadd.f32 %v9327_v62, %v21369_v14  ;;  %v9329_v51 = vpop.f32.mrb[55].mxu0  ;;  %11313 = vmatpush1.bf16.msra.mxu0 %v16410_v59  ;;  %v17717_v41 = vadd.f32 %v10871_v55, %v21372_v25  ;;  %v10873_v57 = vpop.f32.mrb[55].mxu1  ;;  %12857 = vmatpush1.bf16.msra.mxu1 %v16412_v3  ;;  %v14192_v18 = vmax.f32 %v17651_v54, 0.0  ;;  %v14194_v61 = vmax.f32 %v17715_v43, 0.0  ;;  %v23700_v59 = vld [vmem:[#allocation33_spill] sm:$0xff] }
 0x55e   :  { %v17654_v45 = vadd.f32 %v9329_v51, %v21374_v42  ;;  %11475 = vmatprep.subr.bf16.mxu0 %v16419_v23  ;;  %v17718_v63 = vadd.f32 %v10873_v57, %v21377_v26  ;;  %13019 = vmatprep.subr.bf16.mxu1 %v16421_v39  ;;  %v14193_v38 = vmax.f32 %v17652_v35, 0.0  ;;  %v14195_v2 = vmax.f32 %v17716_v22, 0.0 }
 0x55f   :  { %v14200_v28 = vmax.f32 %v17653_v1, 0.0  ;;  %11202 = vmatmul.mubr.bf16.gmra.mrb[96].mxu0 %v23699_v4  ;;  %v14202_v56 = vmax.f32 %v17717_v41, 0.0  ;;  %12746 = vmatmul.mubr.bf16.gmra.mrb[96].mxu1 %v23699_v4 }
 0x560   :  { %v14201_v60 = vmax.f32 %v17654_v45, 0.0  ;;  %11211 = vmatprep.mubr.bf16.mxu0 %v23700_v59  ;;  %v14203_v3 = vmax.f32 %v17718_v63, 0.0  ;;  %12755 = vmatprep.mubr.bf16.mxu1 %v23700_v59  ;;  %v23701_v59 = vld [vmem:[#allocation34_spill] sm:$0xff] }
 0x561   :  { %v21901_v58 = vpack.c.bf16 %v14200_v28, %v14192_v18  ;;  %v21904_v23 = vpack.c.bf16 %v14202_v56, %v14194_v61 }
 0x562   :  { %v21906_v54 = vpack.c.bf16 %v14201_v60, %v14193_v38  ;;  %v9333_v62 = vpop.f32.mrb[56].mxu0  ;;  %v21908_v39 = vpack.c.bf16 %v14203_v3, %v14195_v2  ;;  %v10877_v35 = vpop.f32.mrb[56].mxu1 }
 0x563   :  { %v17655_v43 = vadd.f32 %v9333_v62, %v21369_v14  ;;  %v9335_v1 = vpop.f32.mrb[57].mxu0  ;;  %v17719_v55 = vadd.f32 %v10877_v35, %v21372_v25  ;;  %v10879_v51 = vpop.f32.mrb[57].mxu1 }
 0x564   :  { %v17656_v22 = vadd.f32 %v9335_v1, %v21374_v42  ;;  %v9337_v41 = vpop.f32.mrb[58].mxu0  ;;  %v17720_v45 = vadd.f32 %v10879_v51, %v21377_v26  ;;  %v10881_v18 = vpop.f32.mrb[58].mxu1  ;;  %v23702_v1 = vld [vmem:[#allocation35_spill] sm:$0xff] }
 0x565   :  { %v17657_v57 = vadd.f32 %v9337_v41, %v21369_v14  ;;  %v9339_v28 = vpop.f32.mrb[59].mxu0  ;;  %v17721_v63 = vadd.f32 %v10881_v18, %v21372_v25  ;;  %v10883_v61 = vpop.f32.mrb[59].mxu1  ;;  %v14208_v38 = vmax.f32 %v17655_v43, 0.0  ;;  %v14210_v2 = vmax.f32 %v17719_v55, 0.0 }
 0x566   :  { %v17658_v4 = vadd.f32 %v9339_v28, %v21374_v42  ;;  %v17722_v60 = vadd.f32 %v10883_v61, %v21377_v26  ;;  %v14209_v3 = vmax.f32 %v17656_v22, 0.0  ;;  %v14211_v51 = vmax.f32 %v17720_v45, 0.0 }
 0x567   :  { %v14216_v56 = vmax.f32 %v17657_v57, 0.0  ;;  %11212 = vmatmul.mubr.bf16.gmra.mrb[100].mxu0 %v23701_v59  ;;  %v14218_v62 = vmax.f32 %v17721_v63, 0.0  ;;  %12756 = vmatmul.mubr.bf16.gmra.mrb[100].mxu1 %v23701_v59 }
 0x568   :  { %v14217_v35 = vmax.f32 %v17658_v4, 0.0  ;;  %11221 = vmatprep.mubr.bf16.mxu0 %v23702_v1  ;;  %v14219_v18 = vmax.f32 %v17722_v60, 0.0  ;;  %12765 = vmatprep.mubr.bf16.mxu1 %v23702_v1 }
 0x569   :  { %v21921_v41 = vpack.c.bf16 %v14216_v56, %v14208_v38  ;;  %v21924_v43 = vpack.c.bf16 %v14218_v62, %v14210_v2 }
 0x56a   :  { %v21926_v57 = vpack.c.bf16 %v14217_v35, %v14209_v3  ;;  %v9343_v28 = vpop.f32.mrb[60].mxu0  ;;  %v21928_v61 = vpack.c.bf16 %v14219_v18, %v14211_v51  ;;  %v10887_v22 = vpop.f32.mrb[60].mxu1 }
 0x56b   :  { %23703 = vst [vmem:[#allocation30_spill] sm:$0xff] %v21921_v41  ;;  %23704 = vst [vmem:[#allocation31_spill] sm:$0xff] %v21924_v43  ;;  %v17659_v55 = vadd.f32 %v9343_v28, %v21369_v14  ;;  %v9345_v63 = vpop.f32.mrb[61].mxu0  ;;  %v17723_v4 = vadd.f32 %v10887_v22, %v21372_v25  ;;  %v10889_v38 = vpop.f32.mrb[61].mxu1  ;;  %v23707_v22 = vld [vmem:[#allocation36_spill] sm:$0xff] }
 0x56c   :  { %23705 = vst [vmem:[#allocation32_spill] sm:$0xff] %v21926_v57  ;;  %23706 = vst [vmem:[#allocation33_spill] sm:$0xff] %v21928_v61  ;;  %v17660_v45 = vadd.f32 %v9345_v63, %v21374_v42  ;;  %v9347_v56 = vpop.f32.mrb[62].mxu0  ;;  %v17724_v60 = vadd.f32 %v10889_v38, %v21377_v26  ;;  %v10891_v2 = vpop.f32.mrb[62].mxu1  ;;  %v23729_v57 = vld [vmem:[#allocation52_spill] sm:$0xff] }
 0x56d   :  { %v17661_v59 = vadd.f32 %v9347_v56, %v21369_v14  ;;  %v9349_v3 = vpop.f32.mrb[63].mxu0  ;;  %v17725_v62 = vadd.f32 %v10891_v2, %v21372_v25  ;;  %v10893_v1 = vpop.f32.mrb[63].mxu1  ;;  %v14224_v51 = vmax.f32 %v17659_v55, 0.0  ;;  %v14226_v63 = vmax.f32 %v17723_v4, 0.0  ;;  %v23708_v14 = vld [vmem:[#allocation37_spill] sm:$0xff]  ;;  %v23713_v4 = vld [vmem:[#allocation38_spill] sm:$0xff] }
 0x56e   :  { %v17662_v35 = vadd.f32 %v9349_v3, %v21374_v42  ;;  %v17726_v28 = vadd.f32 %v10893_v1, %v21377_v26  ;;  %v14225_v43 = vmax.f32 %v17660_v45, 0.0  ;;  %v14227_v38 = vmax.f32 %v17724_v60, 0.0  ;;  %v23714_v45 = vld [vmem:[#allocation39_spill] sm:$0xff]  ;;  %v23715_v60 = vld [vmem:[#allocation40_spill] sm:$0xff]  ;;  %v23720_v2 = vld [vmem:[#allocation45_spill] sm:$0xff] }
 0x56f   :  { %v14232_v18 = vmax.f32 %v17661_v59, 0.0  ;;  %11222 = vmatmul.mubr.bf16.gmra.mrb[104].mxu0 %v23707_v22  ;;  %v14234_v41 = vmax.f32 %v17725_v62, 0.0  ;;  %12766 = vmatmul.mubr.bf16.gmra.mrb[104].mxu1 %v23707_v22  ;;  %v23716_v59 = vld [vmem:[#allocation41_spill] sm:$0xff]  ;;  %v23721_v3 = vld [vmem:[#allocation46_spill] sm:$0xff]  ;;  %v23722_v62 = vld [vmem:[#allocation47_spill] sm:$0xff] }
 0x570   :  { %v14233_v61 = vmax.f32 %v17662_v35, 0.0  ;;  %11231 = vmatprep.mubr.bf16.mxu0 %v23708_v14  ;;  %v14235_v25 = vmax.f32 %v17726_v28, 0.0  ;;  %12775 = vmatprep.mubr.bf16.mxu1 %v23708_v14  ;;  %v736_v35 = vld [vmem:[#allocation5 + $0xc50] sm:$0xff]  ;;  %v745_v14 = vld [vmem:[#allocation5 + $0xc98] sm:$0xff] }
 0x571   :  { %v21941_v56 = vpack.c.bf16 %v14232_v18, %v14224_v51  ;;  %v21944_v42 = vpack.c.bf16 %v14234_v41, %v14226_v63  ;;  %v23717_v41 = vld [vmem:[#allocation42_spill] sm:$0xff]  ;;  %v740_v1 = vld [vmem:[#allocation5 + $0xc70] sm:$0xff] }
 0x572   :  { %v21946_v55 = vpack.c.bf16 %v14233_v61, %v14225_v43  ;;  %v21948_v26 = vpack.c.bf16 %v14235_v25, %v14227_v38  ;;  %v23718_v43 = vld [vmem:[#allocation43_spill] sm:$0xff]  ;;  %v23719_v61 = vld [vmem:[#allocation44_spill] sm:$0xff]  ;;  %v737_v51 = vld [vmem:[#allocation5 + $0xc58] sm:$0xff]  ;;  %v16427_v28 = vcombine.high %v736_v35, %v740_v1 }
 0x573   :  { %23709 = vst [vmem:[#allocation34_spill] sm:$0xff] %v21941_v56  ;;  %23710 = vst [vmem:[#allocation35_spill] sm:$0xff] %v21944_v42  ;;  %v741_v18 = vld [vmem:[#allocation5 + $0xc78] sm:$0xff]  ;;  %v744_v22 = vld [vmem:[#allocation5 + $0xc90] sm:$0xff] }
 0x574   :  { %23711 = vst [vmem:[#allocation36_spill] sm:$0xff] %v21946_v55  ;;  %23712 = vst [vmem:[#allocation37_spill] sm:$0xff] %v21948_v26  ;;  %v748_v63 = vld [vmem:[#allocation5 + $0xcb0] sm:$0xff]  ;;  %v16429_v25 = vcombine.high %v737_v51, %v741_v18  ;;  %v16428_v42 = vcombine.low %v737_v51, %v741_v18  ;;  %v23727_v18 = vld [vmem:[#allocation50_spill] sm:$0xff] }
 0x575   :  { %v23723_v38 = vld [vmem:[#allocation48_spill] sm:$0xff] }
 0x576   :  { %v764_v56 = vld [vmem:[#allocation5 + $0xd30] sm:$0xff] }
 0x577   :  { %11232 = vmatmul.mubr.bf16.gmra.mrb[108].mxu0 %v23713_v4  ;;  %12776 = vmatmul.mubr.bf16.gmra.mrb[108].mxu1 %v23713_v4  ;;  %v749_v4 = vld [vmem:[#allocation5 + $0xcb8] sm:$0xff] }
 0x578   :  { %11241 = vmatprep.mubr.bf16.mxu0 %v23714_v45  ;;  %12785 = vmatprep.mubr.bf16.mxu1 %v23714_v45  ;;  %v21971_v45 = vld [vmem:[#allocation5 + $0x1010] sm:$0xff] }
 0x57f   :  { %11242 = vmatmul.mubr.bf16.gmra.mrb[112].mxu0 %v23715_v60  ;;  %12786 = vmatmul.mubr.bf16.gmra.mrb[112].mxu1 %v23715_v60  ;;  %v21973_v60 = vld [vmem:[#allocation5 + $0x1030] sm:$0xff] }
 0x580   :  { %11251 = vmatprep.mubr.bf16.mxu0 %v23716_v59  ;;  %12795 = vmatprep.mubr.bf16.mxu1 %v23716_v59  ;;  %v23724_v59 = vcombine.low %v21515_v34, %v21517_v52  ;;  %v16437_v52 = vcombine.high %v745_v14, %v749_v4  ;;  %v760_v34 = vld [vmem:[#allocation5 + $0xd10] sm:$0xff] }
 0x587   :  { %11252 = vmatmul.mubr.bf16.gmra.mrb[116].mxu0 %v23717_v41  ;;  %12796 = vmatmul.mubr.bf16.gmra.mrb[116].mxu1 %v23717_v41  ;;  %v16426_v41 = vcombine.low %v736_v35, %v740_v1  ;;  %v752_v35 = vld [vmem:[#allocation5 + $0xcd0] sm:$0xff] }
 0x588   :  { %11261 = vmatprep.mubr.bf16.mxu0 %v23718_v43  ;;  %12805 = vmatprep.mubr.bf16.mxu1 %v23718_v43  ;;  %v756_v1 = vld [vmem:[#allocation5 + $0xcf0] sm:$0xff]  ;;  %v757_v43 = vld [vmem:[#allocation5 + $0xcf8] sm:$0xff] }
 0x589   :  { %v16443_v51 = vcombine.high %v752_v35, %v756_v1 }
 0x58f   :  { %11262 = vmatmul.mubr.bf16.gmra.mrb[120].mxu0 %v23719_v61  ;;  %12806 = vmatmul.mubr.bf16.gmra.mrb[120].mxu1 %v23719_v61  ;;  %v21981_v61 = vld [vmem:[#allocation5 + $0x1018] sm:$0xff] }
 0x590   :  { %11271 = vmatprep.mubr.bf16.mxu0 %v23720_v2  ;;  %12815 = vmatprep.mubr.bf16.mxu1 %v23720_v2  ;;  %v21983_v2 = vld [vmem:[#allocation5 + $0x1038] sm:$0xff] }
 0x597   :  { %11272 = vmatmul.mubr.bf16.gmra.mrb[124].mxu0 %v23721_v3  ;;  %12816 = vmatmul.mubr.bf16.gmra.mrb[124].mxu1 %v23721_v3  ;;  %v23725_v3 = vcombine.low %v21525_v0, %v21527_v47  ;;  %v16434_v0 = vcombine.low %v744_v22, %v748_v63  ;;  %v16436_v47 = vcombine.low %v745_v14, %v749_v4  ;;  %v768_v4 = vld [vmem:[#allocation5 + $0xd50] sm:$0xff] }
 0x598   :  { %11314 = vmatprep.mubr.bf16.mxu0 %v23722_v62  ;;  %12858 = vmatprep.mubr.bf16.mxu1 %v23722_v62  ;;  %v23726_v62 = vld [vmem:[#allocation49_spill] sm:$0xff] }
 0x59f   :  { %11315 = vmatmul.mubr.bf16.vlgmr.msra.gmra.mrb[64].mxu0 %v23723_v38  ;;  %12859 = vmatmul.mubr.bf16.vlgmr.msra.gmra.mrb[64].mxu1 %v23723_v38  ;;  %v16435_v38 = vcombine.high %v744_v22, %v748_v63  ;;  %v16451_v63 = vcombine.high %v760_v34, %v764_v56 }
 0x5a0   :  { %11476 = vmatpush1.bf16.msra.mxu0 %v23724_v59  ;;  %13020 = vmatpush1.bf16.msra.mxu1 %v23725_v3  ;;  %v753_v59 = vld [vmem:[#allocation5 + $0xcd8] sm:$0xff] }
 0x5a1   :  { %11324 = vmatprep.mubr.bf16.mxu0 %v23726_v62  ;;  %12868 = vmatprep.mubr.bf16.mxu1 %v23726_v62  ;;  %v16445_v3 = vcombine.high %v753_v59, %v757_v43  ;;  %v765_v62 = vld [vmem:[#allocation5 + $0xd38] sm:$0xff]  ;;  %v16444_v22 = vcombine.low %v753_v59, %v757_v43 }
 0x5a2   :  { %11477 = vmatprep.subr.bf16.mxu0 %v16427_v28  ;;  %13021 = vmatprep.subr.bf16.mxu1 %v16429_v25  ;;  %v23728_v28 = vld [vmem:[#allocation51_spill] sm:$0xff]  ;;  %v761_v25 = vld [vmem:[#allocation5 + $0xd18] sm:$0xff] }
 0x5a3   :  { %v16453_v14 = vcombine.high %v761_v25, %v765_v62  ;;  %v16452_v26 = vcombine.low %v761_v25, %v765_v62  ;;  %v23730_v43 = vld [vmem:[#allocation53_spill] sm:$0xff] }
 0x5a4   :  { %11478 = vmatpush1.bf16.msra.mxu0 %v16426_v41  ;;  %13022 = vmatpush1.bf16.msra.mxu1 %v16428_v42  ;;  %v16442_v42 = vcombine.low %v752_v35, %v756_v1  ;;  %v772_v41 = vld [vmem:[#allocation5 + $0xd70] sm:$0xff]  ;;  %v777_v59 = vld [vmem:[#allocation5 + $0xd98] sm:$0xff] }
 0x5a5   :  { %11479 = vmatprep.subr.bf16.mxu0 %v16435_v38  ;;  %13023 = vmatprep.subr.bf16.mxu1 %v16437_v52  ;;  %v769_v38 = vld [vmem:[#allocation5 + $0xd58] sm:$0xff]  ;;  %v16459_v55 = vcombine.high %v768_v4, %v772_v41  ;;  %v776_v1 = vld [vmem:[#allocation5 + $0xd90] sm:$0xff] }
 0x5a6   :  { %v773_v52 = vld [vmem:[#allocation5 + $0xd78] sm:$0xff]  ;;  %v788_v25 = vld [vmem:[#allocation5 + $0xdf0] sm:$0xff] }
 0x5a7   :  { %11325 = vmatmul.mubr.bf16.gmra.mrb[68].mxu0 %v23727_v18  ;;  %12869 = vmatmul.mubr.bf16.gmra.mrb[68].mxu1 %v23727_v18  ;;  %v16450_v18 = vcombine.low %v760_v34, %v764_v56  ;;  %v16461_v35 = vcombine.high %v769_v38, %v773_v52  ;;  %v16458_v56 = vcombine.low %v768_v4, %v772_v41  ;;  %v785_v62 = vld [vmem:[#allocation5 + $0xdd8] sm:$0xff]  ;;  %v23732_v41 = vld [vmem:[#allocation55_spill] sm:$0xff] }
 0x5a8   :  { %11334 = vmatprep.mubr.bf16.mxu0 %v23728_v28  ;;  %12878 = vmatprep.mubr.bf16.mxu1 %v23728_v28  ;;  %v16460_v34 = vcombine.low %v769_v38, %v773_v52  ;;  %v784_v28 = vld [vmem:[#allocation5 + $0xdd0] sm:$0xff]  ;;  %v793_v38 = vld [vmem:[#allocation5 + $0xe18] sm:$0xff] }
 0x5a9   :  { %11480 = vmatpush1.bf16.msra.mxu0 %v16434_v0  ;;  %13024 = vmatpush1.bf16.msra.mxu1 %v16436_v47  ;;  %v780_v0 = vld [vmem:[#allocation5 + $0xdb0] sm:$0xff]  ;;  %v781_v47 = vld [vmem:[#allocation5 + $0xdb8] sm:$0xff] }
 0x5aa   :  { %11481 = vmatprep.subr.bf16.mxu0 %v16443_v51  ;;  %13025 = vmatprep.subr.bf16.mxu1 %v16445_v3  ;;  %v16467_v51 = vcombine.high %v776_v1, %v780_v0  ;;  %v16469_v3 = vcombine.high %v777_v59, %v781_v47  ;;  %v797_v52 = vld [vmem:[#allocation5 + $0xe38] sm:$0xff] }
 0x5ad   :  { %11482 = vmatpush1.bf16.msra.mxu0 %v16442_v42  ;;  %13026 = vmatpush1.bf16.msra.mxu1 %v16444_v22  ;;  %v789_v42 = vld [vmem:[#allocation5 + $0xdf8] sm:$0xff]  ;;  %v16468_v22 = vcombine.low %v777_v59, %v781_v47  ;;  %v804_v59 = vld [vmem:[#allocation5 + $0xe70] sm:$0xff] }
 0x5ae   :  { %11483 = vmatprep.subr.bf16.mxu0 %v16451_v63  ;;  %13027 = vmatprep.subr.bf16.mxu1 %v16453_v14  ;;  %v16475_v63 = vcombine.high %v784_v28, %v788_v25  ;;  %v23731_v14 = vld [vmem:[#allocation54_spill] sm:$0xff]  ;;  %v16477_v4 = vcombine.high %v785_v62, %v789_v42 }
 0x5af   :  { %11335 = vmatmul.mubr.bf16.gmra.mrb[72].mxu0 %v23729_v57  ;;  %12879 = vmatmul.mubr.bf16.gmra.mrb[72].mxu1 %v23729_v57  ;;  %v16466_v57 = vcombine.low %v776_v1, %v780_v0  ;;  %v16485_v0 = vcombine.high %v793_v38, %v797_v52  ;;  %v801_v47 = vld [vmem:[#allocation5 + $0xe58] sm:$0xff] }
 0x5b0   :  { %11344 = vmatprep.mubr.bf16.mxu0 %v23730_v43  ;;  %12888 = vmatprep.mubr.bf16.mxu1 %v23730_v43  ;;  %v800_v43 = vld [vmem:[#allocation5 + $0xe50] sm:$0xff] }
 0x5b1   :  { %11484 = vmatpush1.bf16.msra.mxu0 %v16450_v18  ;;  %13028 = vmatpush1.bf16.msra.mxu1 %v16452_v26  ;;  %v792_v26 = vld [vmem:[#allocation5 + $0xe10] sm:$0xff]  ;;  %v16474_v18 = vcombine.low %v784_v28, %v788_v25 }
 0x5b2   :  { %11485 = vmatprep.subr.bf16.mxu0 %v16459_v55  ;;  %13029 = vmatprep.subr.bf16.mxu1 %v16461_v35  ;;  %v796_v55 = vld [vmem:[#allocation5 + $0xe30] sm:$0xff]  ;;  %v16476_v35 = vcombine.low %v785_v62, %v789_v42  ;;  %v809_v42 = vld [vmem:[#allocation5 + $0xe98] sm:$0xff] }
 0x5b3   :  { %v16483_v1 = vcombine.high %v792_v26, %v796_v55  ;;  %v808_v25 = vld [vmem:[#allocation5 + $0xe90] sm:$0xff] }
 0x5b4   :  { %v23734_v62 = vld [vmem:[#allocation57_spill] sm:$0xff] }
 0x5b5   :  { %11486 = vmatpush1.bf16.msra.mxu0 %v16458_v56  ;;  %13030 = vmatpush1.bf16.msra.mxu1 %v16460_v34  ;;  %v805_v56 = vld [vmem:[#allocation5 + $0xe78] sm:$0xff]  ;;  %v16482_v34 = vcombine.low %v792_v26, %v796_v55 }
 0x5b6   :  { %11487 = vmatprep.subr.bf16.mxu0 %v16467_v51  ;;  %13031 = vmatprep.subr.bf16.mxu1 %v16469_v3  ;;  %v16484_v51 = vcombine.low %v793_v38, %v797_v52  ;;  %v16491_v3 = vcombine.high %v800_v43, %v804_v59  ;;  %v16493_v28 = vcombine.high %v801_v47, %v805_v56  ;;  %v820_v38 = vld [vmem:[#allocation5 + $0xef0] sm:$0xff]  ;;  %v817_v52 = vld [vmem:[#allocation5 + $0xed8] sm:$0xff] }
 0x5b7   :  { %11345 = vmatmul.mubr.bf16.gmra.mrb[76].mxu0 %v23731_v14  ;;  %12889 = vmatmul.mubr.bf16.gmra.mrb[76].mxu1 %v23731_v14  ;;  %v23733_v14 = vld [vmem:[#allocation56_spill] sm:$0xff] }
 0x5b8   :  { %11354 = vmatprep.mubr.bf16.mxu0 %v23732_v41  ;;  %12898 = vmatprep.mubr.bf16.mxu1 %v23732_v41  ;;  %v816_v41 = vld [vmem:[#allocation5 + $0xed0] sm:$0xff] }
 0x5b9   :  { %11488 = vmatpush1.bf16.msra.mxu0 %v16466_v57  ;;  %13032 = vmatpush1.bf16.msra.mxu1 %v16468_v22  ;;  %v812_v57 = vld [vmem:[#allocation5 + $0xeb0] sm:$0xff]  ;;  %v813_v22 = vld [vmem:[#allocation5 + $0xeb8] sm:$0xff] }
 0x5ba   :  { %11489 = vmatprep.subr.bf16.mxu0 %v16475_v63  ;;  %13033 = vmatprep.subr.bf16.mxu1 %v16477_v4  ;;  %v16490_v63 = vcombine.low %v800_v43, %v804_v59  ;;  %v16492_v4 = vcombine.low %v801_v47, %v805_v56  ;;  %v16499_v26 = vcombine.high %v808_v25, %v812_v57  ;;  %v824_v59 = vld [vmem:[#allocation5 + $0xf10] sm:$0xff]  ;;  %v23736_v47 = vld [vmem:[#allocation59_spill] sm:$0xff]  ;;  %v825_v56 = vld [vmem:[#allocation5 + $0xf18] sm:$0xff] }
 0x5bb   :  { %v16501_v55 = vcombine.high %v809_v42, %v813_v22 }
 0x5bd   :  { %11490 = vmatpush1.bf16.msra.mxu0 %v16474_v18  ;;  %13034 = vmatpush1.bf16.msra.mxu1 %v16476_v35  ;;  %v821_v18 = vld [vmem:[#allocation5 + $0xef8] sm:$0xff]  ;;  %v16498_v35 = vcombine.low %v808_v25, %v812_v57 }
 0x5be   :  { %11491 = vmatprep.subr.bf16.mxu0 %v16483_v1  ;;  %13035 = vmatprep.subr.bf16.mxu1 %v16485_v0  ;;  %v16500_v1 = vcombine.low %v809_v42, %v813_v22  ;;  %v16507_v0 = vcombine.high %v816_v41, %v820_v38  ;;  %v16509_v43 = vcombine.high %v817_v52, %v821_v18  ;;  %v836_v42 = vld [vmem:[#allocation5 + $0xf70] sm:$0xff]  ;;  %v833_v22 = vld [vmem:[#allocation5 + $0xf58] sm:$0xff] }
 0x5bf   :  { %11355 = vmatmul.mubr.bf16.gmra.mrb[80].mxu0 %v23733_v14  ;;  %12899 = vmatmul.mubr.bf16.gmra.mrb[80].mxu1 %v23733_v14  ;;  %v23735_v14 = vld [vmem:[#allocation58_spill] sm:$0xff] }
 0x5c0   :  { %11364 = vmatprep.mubr.bf16.mxu0 %v23734_v62  ;;  %12908 = vmatprep.mubr.bf16.mxu1 %v23734_v62  ;;  %v832_v62 = vld [vmem:[#allocation5 + $0xf50] sm:$0xff] }
 0x5c1   :  { %11492 = vmatpush1.bf16.msra.mxu0 %v16482_v34  ;;  %13036 = vmatpush1.bf16.msra.mxu1 %v16484_v51  ;;  %v828_v34 = vld [vmem:[#allocation5 + $0xf30] sm:$0xff]  ;;  %v829_v51 = vld [vmem:[#allocation5 + $0xf38] sm:$0xff] }
 0x5c2   :  { %11493 = vmatprep.subr.bf16.mxu0 %v16491_v3  ;;  %13037 = vmatprep.subr.bf16.mxu1 %v16493_v28  ;;  %v16506_v3 = vcombine.low %v816_v41, %v820_v38  ;;  %v16508_v28 = vcombine.low %v817_v52, %v821_v18  ;;  %v16515_v25 = vcombine.high %v824_v59, %v828_v34  ;;  %v840_v38 = vld [vmem:[#allocation5 + $0xf90] sm:$0xff]  ;;  %v841_v18 = vld [vmem:[#allocation5 + $0xf98] sm:$0xff] }
 0x5c3   :  { %v16517_v57 = vcombine.high %v825_v56, %v829_v51  ;;  %v23738_v52 = vld [vmem:[#allocation61_spill] sm:$0xff] }
 0x5c5   :  { %11494 = vmatpush1.bf16.msra.mxu0 %v16490_v63  ;;  %13038 = vmatpush1.bf16.msra.mxu1 %v16492_v4  ;;  %v837_v63 = vld [vmem:[#allocation5 + $0xf78] sm:$0xff]  ;;  %v16514_v4 = vcombine.low %v824_v59, %v828_v34 }
 0x5c6   :  { %11495 = vmatprep.subr.bf16.mxu0 %v16499_v26  ;;  %13039 = vmatprep.subr.bf16.mxu1 %v16501_v55  ;;  %v16516_v26 = vcombine.low %v825_v56, %v829_v51  ;;  %v16523_v55 = vcombine.high %v832_v62, %v836_v42  ;;  %v16525_v41 = vcombine.high %v833_v22, %v837_v63  ;;  %v852_v56 = vld [vmem:[#allocation5 + $0xff0] sm:$0xff]  ;;  %v849_v51 = vld [vmem:[#allocation5 + $0xfd8] sm:$0xff] }
 0x5c7   :  { %11365 = vmatmul.mubr.bf16.gmra.mrb[84].mxu0 %v23735_v14  ;;  %12909 = vmatmul.mubr.bf16.gmra.mrb[84].mxu1 %v23735_v14  ;;  %v23737_v14 = vld [vmem:[#allocation60_spill] sm:$0xff] }
 0x5c8   :  { %11374 = vmatprep.mubr.bf16.mxu0 %v23736_v47  ;;  %12918 = vmatprep.mubr.bf16.mxu1 %v23736_v47  ;;  %v848_v47 = vld [vmem:[#allocation5 + $0xfd0] sm:$0xff] }
 0x5c9   :  { %11496 = vmatpush1.bf16.msra.mxu0 %v16498_v35  ;;  %13040 = vmatpush1.bf16.msra.mxu1 %v16500_v1  ;;  %v844_v35 = vld [vmem:[#allocation5 + $0xfb0] sm:$0xff]  ;;  %v845_v1 = vld [vmem:[#allocation5 + $0xfb8] sm:$0xff] }
 0x5ca   :  { %11497 = vmatprep.subr.bf16.mxu0 %v16507_v0  ;;  %13041 = vmatprep.subr.bf16.mxu1 %v16509_v43  ;;  %v16522_v0 = vcombine.low %v832_v62, %v836_v42  ;;  %v16524_v43 = vcombine.low %v833_v22, %v837_v63  ;;  %v16531_v59 = vcombine.high %v840_v38, %v844_v35  ;;  %v23740_v42 = vld [vmem:[#allocation63_spill] sm:$0xff] }
 0x5cb   :  { %v16533_v34 = vcombine.high %v841_v18, %v845_v1  ;;  %v16538_v22 = vcombine.low %v848_v47, %v852_v56 }
 0x5cd   :  { %11498 = vmatpush1.bf16.msra.mxu0 %v16506_v3  ;;  %13042 = vmatpush1.bf16.msra.mxu1 %v16508_v28  ;;  %v853_v3 = vld [vmem:[#allocation5 + $0xff8] sm:$0xff]  ;;  %v16530_v28 = vcombine.low %v840_v38, %v844_v35  ;;  %v23744_v35 = vld [vmem:[#allocation67_spill] sm:$0xff] }
 0x5ce   :  { %11499 = vmatprep.subr.bf16.mxu0 %v16515_v25  ;;  %13043 = vmatprep.subr.bf16.mxu1 %v16517_v57  ;;  %v16532_v25 = vcombine.low %v841_v18, %v845_v1  ;;  %v16539_v57 = vcombine.high %v848_v47, %v852_v56  ;;  %v16541_v62 = vcombine.high %v849_v51, %v853_v3  ;;  %v23743_v38 = vld [vmem:[#allocation66_spill] sm:$0xff]  ;;  %v23746_v18 = vld [vmem:[#allocation69_spill] sm:$0xff]  ;;  %v23752_v47 = vld [vmem:[#allocation75_spill] sm:$0xff] }
 0x5cf   :  { %11375 = vmatmul.mubr.bf16.gmra.mrb[88].mxu0 %v23737_v14  ;;  %12919 = vmatmul.mubr.bf16.gmra.mrb[88].mxu1 %v23737_v14  ;;  %v23739_v14 = vld [vmem:[#allocation62_spill] sm:$0xff]  ;;  %v16540_v63 = vcombine.low %v849_v51, %v853_v3  ;;  %v23753_v56 = vld [vmem:[#allocation76_spill] sm:$0xff]  ;;  %v23754_v51 = vld [vmem:[#allocation77_spill] sm:$0xff] }
 0x5d0   :  { %11384 = vmatprep.mubr.bf16.mxu0 %v23738_v52  ;;  %12928 = vmatprep.mubr.bf16.mxu1 %v23738_v52  ;;  %v23745_v52 = vld [vmem:[#allocation68_spill] sm:$0xff]  ;;  %v23747_v1 = vld [vmem:[#allocation70_spill] sm:$0xff] }
 0x5d1   :  { %11500 = vmatpush1.bf16.msra.mxu0 %v16514_v4  ;;  %13044 = vmatpush1.bf16.msra.mxu1 %v16516_v26  ;;  %v16547_v4 = vcombine.high %v21971_v45, %v21973_v60  ;;  %v16549_v26 = vcombine.high %v21981_v61, %v21983_v2  ;;  %v23755_v3 = vld [vmem:[#allocation78_spill] sm:$0xff] }
 0x5d2   :  { %11501 = vmatprep.subr.bf16.mxu0 %v16523_v55  ;;  %13045 = vmatprep.subr.bf16.mxu1 %v16525_v41  ;;  %v23741_v55 = vld [vmem:[#allocation64_spill] sm:$0xff]  ;;  %v23742_v41 = vld [vmem:[#allocation65_spill] sm:$0xff] }
 0x5d5   :  { %11502 = vmatpush1.bf16.msra.mxu0 %v16522_v0  ;;  %13046 = vmatpush1.bf16.msra.mxu1 %v16524_v43  ;;  %v23748_v0 = vld [vmem:[#allocation71_spill] sm:$0xff]  ;;  %v23749_v43 = vld [vmem:[#allocation72_spill] sm:$0xff] }
 0x5d6   :  { %11503 = vmatprep.subr.bf16.mxu0 %v16531_v59  ;;  %13047 = vmatprep.subr.bf16.mxu1 %v16533_v34  ;;  %v23750_v59 = vld [vmem:[#allocation73_spill] sm:$0xff]  ;;  %v23751_v34 = vld [vmem:[#allocation74_spill] sm:$0xff] }
 0x5d7   :  { %11385 = vmatmul.mubr.bf16.gmra.mrb[92].mxu0 %v23739_v14  ;;  %12929 = vmatmul.mubr.bf16.gmra.mrb[92].mxu1 %v23739_v14  ;;  %v865_v14 = vld [vmem:[#allocation5 + $0x1058] sm:$0xff] }
 0x5d8   :  { %11394 = vmatprep.mubr.bf16.mxu0 %v23740_v42  ;;  %12938 = vmatprep.mubr.bf16.mxu1 %v23740_v42 }
 0x5d9   :  { %11504 = vmatpush1.bf16.msra.mxu0 %v16530_v28  ;;  %13048 = vmatpush1.bf16.msra.mxu1 %v16532_v25  ;;  %v23756_v28 = vld [vmem:[#allocation79_spill] sm:$0xff]  ;;  %v864_v25 = vld [vmem:[#allocation5 + $0x1050] sm:$0xff] }
 0x5da   :  { %11505 = vmatprep.subr.bf16.mxu0 %v16539_v57  ;;  %13049 = vmatprep.subr.bf16.mxu1 %v16541_v62  ;;  %v868_v57 = vld [vmem:[#allocation5 + $0x1070] sm:$0xff]  ;;  %v869_v62 = vld [vmem:[#allocation5 + $0x1078] sm:$0xff] }
 0x5db   :  { %v16555_v42 = vcombine.high %v864_v25, %v868_v57 }
 0x5dd   :  { %11506 = vmatpush1.bf16.msra.mxu0 %v16538_v22  ;;  %13050 = vmatpush1.bf16.msra.mxu1 %v16540_v63  ;;  %v872_v22 = vld [vmem:[#allocation5 + $0x1090] sm:$0xff] }
 0x5de   :  { %11668 = vmatprep.subr.bf16.mxu0 %v16547_v4  ;;  %13212 = vmatprep.subr.bf16.mxu1 %v16549_v26  ;;  %v876_v63 = vld [vmem:[#allocation5 + $0x10b0] sm:$0xff]  ;;  %v873_v4 = vld [vmem:[#allocation5 + $0x1098] sm:$0xff] }
 0x5df   :  { %11395 = vmatmul.mubr.bf16.gmra.mrb[96].mxu0 %v23741_v55  ;;  %12939 = vmatmul.mubr.bf16.gmra.mrb[96].mxu1 %v23741_v55  ;;  %v23757_v26 = vld [vmem:[#allocation80_spill] sm:$0xff]  ;;  %v16557_v55 = vcombine.high %v865_v14, %v869_v62 }
 0x5e0   :  { %11404 = vmatprep.mubr.bf16.mxu0 %v23742_v41  ;;  %12948 = vmatprep.mubr.bf16.mxu1 %v23742_v41  ;;  %v877_v41 = vld [vmem:[#allocation5 + $0x10b8] sm:$0xff] }
 0x5e7   :  { %11405 = vmatmul.mubr.bf16.gmra.mrb[100].mxu0 %v23743_v38  ;;  %12949 = vmatmul.mubr.bf16.gmra.mrb[100].mxu1 %v23743_v38  ;;  %v22057_v38 = vld [vmem:[#allocation5 + $0x1410] sm:$0xff] }
 0x5e8   :  { %11414 = vmatprep.mubr.bf16.mxu0 %v23744_v35  ;;  %12958 = vmatprep.mubr.bf16.mxu1 %v23744_v35  ;;  %v22059_v35 = vld [vmem:[#allocation5 + $0x1430] sm:$0xff] }
 0x5ef   :  { %11415 = vmatmul.mubr.bf16.gmra.mrb[104].mxu0 %v23745_v52  ;;  %12959 = vmatmul.mubr.bf16.gmra.mrb[104].mxu1 %v23745_v52  ;;  %v23758_v52 = vcombine.low %v21971_v45, %v21973_v60  ;;  %v16565_v60 = vcombine.high %v873_v4, %v877_v41 }
 0x5f0   :  { %11424 = vmatprep.mubr.bf16.mxu0 %v23746_v18  ;;  %12968 = vmatprep.mubr.bf16.mxu1 %v23746_v18  ;;  %v16554_v18 = vcombine.low %v864_v25, %v868_v57  ;;  %v885_v25 = vld [vmem:[#allocation5 + $0x10f8] sm:$0xff] }
 0x5f7   :  { %11425 = vmatmul.mubr.bf16.gmra.mrb[108].mxu0 %v23747_v1  ;;  %12969 = vmatmul.mubr.bf16.gmra.mrb[108].mxu1 %v23747_v1  ;;  %v23763_v1 = vld [vmem:[#allocation84_spill] sm:$0xff] }
 0x5f8   :  { %11434 = vmatprep.mubr.bf16.mxu0 %v23748_v0  ;;  %12978 = vmatprep.mubr.bf16.mxu1 %v23748_v0  ;;  %v22067_v0 = vld [vmem:[#allocation5 + $0x1418] sm:$0xff] }
 0x5ff   :  { %11435 = vmatmul.mubr.bf16.gmra.mrb[112].mxu0 %v23749_v43  ;;  %12979 = vmatmul.mubr.bf16.gmra.mrb[112].mxu1 %v23749_v43  ;;  %v22069_v43 = vld [vmem:[#allocation5 + $0x1438] sm:$0xff] }
 0x600   :  { %11444 = vmatprep.mubr.bf16.mxu0 %v23750_v59  ;;  %12988 = vmatprep.mubr.bf16.mxu1 %v23750_v59  ;;  %v23759_v59 = vcombine.low %v21981_v61, %v21983_v2  ;;  %v16562_v61 = vcombine.low %v872_v22, %v876_v63  ;;  %v16564_v2 = vcombine.low %v873_v4, %v877_v41  ;;  %v896_v41 = vld [vmem:[#allocation5 + $0x1150] sm:$0xff] }
 0x607   :  { %11445 = vmatmul.mubr.bf16.gmra.mrb[116].mxu0 %v23751_v34  ;;  %12989 = vmatmul.mubr.bf16.gmra.mrb[116].mxu1 %v23751_v34  ;;  %v23760_v34 = vld [vmem:[#allocation81_spill] sm:$0xff] }
 0x608   :  { %11454 = vmatprep.mubr.bf16.mxu0 %v23752_v47  ;;  %12998 = vmatprep.mubr.bf16.mxu1 %v23752_v47  ;;  %v16556_v47 = vcombine.low %v865_v14, %v869_v62  ;;  %v23761_v14 = vld [vmem:[#allocation82_spill] sm:$0xff] }
 0x60f   :  { %11455 = vmatmul.mubr.bf16.gmra.mrb[120].mxu0 %v23753_v56  ;;  %12999 = vmatmul.mubr.bf16.gmra.mrb[120].mxu1 %v23753_v56  ;;  %v16563_v56 = vcombine.high %v872_v22, %v876_v63 }
 0x610   :  { %11464 = vmatprep.mubr.bf16.mxu0 %v23754_v51  ;;  %13008 = vmatprep.mubr.bf16.mxu1 %v23754_v51  ;;  %v880_v51 = vld [vmem:[#allocation5 + $0x10d0] sm:$0xff] }
 0x617   :  { %11465 = vmatmul.mubr.bf16.gmra.mrb[124].mxu0 %v23755_v3  ;;  %13009 = vmatmul.mubr.bf16.gmra.mrb[124].mxu1 %v23755_v3  ;;  %v884_v3 = vld [vmem:[#allocation5 + $0x10f0] sm:$0xff] }
 0x618   :  { %11507 = vmatprep.mubr.bf16.mxu0 %v23756_v28  ;;  %13051 = vmatprep.mubr.bf16.mxu1 %v23756_v28  ;;  %v881_v28 = vld [vmem:[#allocation5 + $0x10d8] sm:$0xff]  ;;  %v16571_v57 = vcombine.high %v880_v51, %v884_v3 }
 0x619   :  { %v16573_v62 = vcombine.high %v881_v28, %v885_v25  ;;  %v16572_v22 = vcombine.low %v881_v28, %v885_v25  ;;  %v23764_v28 = vld [vmem:[#allocation85_spill] sm:$0xff] }
 0x61a   :  { %v905_v25 = vld [vmem:[#allocation5 + $0x1198] sm:$0xff] }
 0x61f   :  { %11508 = vmatmul.mubr.bf16.vlgmr.msra.gmra.mrb[64].mxu0 %v23757_v26  ;;  %13052 = vmatmul.mubr.bf16.vlgmr.msra.gmra.mrb[64].mxu1 %v23757_v26  ;;  %v888_v26 = vld [vmem:[#allocation5 + $0x1110] sm:$0xff] }
 0x620   :  { %11669 = vmatpush1.bf16.msra.mxu0 %v23758_v52  ;;  %13213 = vmatpush1.bf16.msra.mxu1 %v23759_v59  ;;  %v892_v52 = vld [vmem:[#allocation5 + $0x1130] sm:$0xff]  ;;  %v893_v59 = vld [vmem:[#allocation5 + $0x1138] sm:$0xff] }
 0x621   :  { %11517 = vmatprep.mubr.bf16.mxu0 %v23760_v34  ;;  %13061 = vmatprep.mubr.bf16.mxu1 %v23760_v34  ;;  %v16579_v63 = vcombine.high %v888_v26, %v892_v52  ;;  %v900_v34 = vld [vmem:[#allocation5 + $0x1170] sm:$0xff] }
 0x622   :  { %11670 = vmatprep.subr.bf16.mxu0 %v16555_v42  ;;  %13214 = vmatprep.subr.bf16.mxu1 %v16557_v55  ;;  %v23762_v42 = vld [vmem:[#allocation83_spill] sm:$0xff]  ;;  %v889_v55 = vld [vmem:[#allocation5 + $0x1118] sm:$0xff]  ;;  %v16587_v45 = vcombine.high %v896_v41, %v900_v34 }
 0x623   :  { %v16581_v4 = vcombine.high %v889_v55, %v893_v59 }
 0x624   :  { %11671 = vmatpush1.bf16.msra.mxu0 %v16554_v18  ;;  %13215 = vmatpush1.bf16.msra.mxu1 %v16556_v47  ;;  %v16570_v18 = vcombine.low %v880_v51, %v884_v3  ;;  %v897_v47 = vld [vmem:[#allocation5 + $0x1158] sm:$0xff]  ;;  %v904_v3 = vld [vmem:[#allocation5 + $0x1190] sm:$0xff] }
 0x625   :  { %11672 = vmatprep.subr.bf16.mxu0 %v16563_v56  ;;  %13216 = vmatprep.subr.bf16.mxu1 %v16565_v60  ;;  %v901_v56 = vld [vmem:[#allocation5 + $0x1178] sm:$0xff]  ;;  %v16578_v60 = vcombine.low %v888_v26, %v892_v52 }
 0x626   :  { %v16589_v51 = vcombine.high %v897_v47, %v901_v56 }
 0x627   :  { %11518 = vmatmul.mubr.bf16.gmra.mrb[68].mxu0 %v23761_v14  ;;  %13062 = vmatmul.mubr.bf16.gmra.mrb[68].mxu1 %v23761_v14  ;;  %v16580_v14 = vcombine.low %v889_v55, %v893_v59  ;;  %v916_v55 = vld [vmem:[#allocation5 + $0x11f0] sm:$0xff]  ;;  %v913_v59 = vld [vmem:[#allocation5 + $0x11d8] sm:$0xff] }
 0x628   :  { %11527 = vmatprep.mubr.bf16.mxu0 %v23762_v42  ;;  %13071 = vmatprep.mubr.bf16.mxu1 %v23762_v42  ;;  %v912_v42 = vld [vmem:[#allocation5 + $0x11d0] sm:$0xff] }
 0x629   :  { %11673 = vmatpush1.bf16.msra.mxu0 %v16562_v61  ;;  %13217 = vmatpush1.bf16.msra.mxu1 %v16564_v2  ;;  %v908_v61 = vld [vmem:[#allocation5 + $0x11b0] sm:$0xff]  ;;  %v909_v2 = vld [vmem:[#allocation5 + $0x11b8] sm:$0xff] }
 0x62a   :  { %11674 = vmatprep.subr.bf16.mxu0 %v16571_v57  ;;  %13218 = vmatprep.subr.bf16.mxu1 %v16573_v62  ;;  %v16586_v57 = vcombine.low %v896_v41, %v900_v34  ;;  %v16588_v62 = vcombine.low %v897_v47, %v901_v56  ;;  %v16595_v26 = vcombine.high %v904_v3, %v908_v61  ;;  %v920_v34 = vld [vmem:[#allocation5 + $0x1210] sm:$0xff]  ;;  %v23766_v47 = vld [vmem:[#allocation87_spill] sm:$0xff]  ;;  %v921_v56 = vld [vmem:[#allocation5 + $0x1218] sm:$0xff] }
 0x62b   :  { %v16597_v52 = vcombine.high %v905_v25, %v909_v2 }
 0x62d   :  { %11675 = vmatpush1.bf16.msra.mxu0 %v16570_v18  ;;  %13219 = vmatpush1.bf16.msra.mxu1 %v16572_v22  ;;  %v917_v18 = vld [vmem:[#allocation5 + $0x11f8] sm:$0xff]  ;;  %v16596_v22 = vcombine.low %v905_v25, %v909_v2  ;;  %v932_v25 = vld [vmem:[#allocation5 + $0x1270] sm:$0xff] }
 0x62e   :  { %11676 = vmatprep.subr.bf16.mxu0 %v16579_v63  ;;  %13220 = vmatprep.subr.bf16.mxu1 %v16581_v4  ;;  %v16603_v63 = vcombine.high %v912_v42, %v916_v55  ;;  %v23765_v4 = vld [vmem:[#allocation86_spill] sm:$0xff]  ;;  %v16605_v41 = vcombine.high %v913_v59, %v917_v18 }
 0x62f   :  { %11528 = vmatmul.mubr.bf16.gmra.mrb[72].mxu0 %v23763_v1  ;;  %13072 = vmatmul.mubr.bf16.gmra.mrb[72].mxu1 %v23763_v1  ;;  %v16594_v1 = vcombine.low %v904_v3, %v908_v61  ;;  %v929_v2 = vld [vmem:[#allocation5 + $0x1258] sm:$0xff] }
 0x630   :  { %11537 = vmatprep.mubr.bf16.mxu0 %v23764_v28  ;;  %13081 = vmatprep.mubr.bf16.mxu1 %v23764_v28  ;;  %v928_v28 = vld [vmem:[#allocation5 + $0x1250] sm:$0xff] }
 0x631   :  { %11677 = vmatpush1.bf16.msra.mxu0 %v16578_v60  ;;  %13221 = vmatpush1.bf16.msra.mxu1 %v16580_v14  ;;  %v925_v60 = vld [vmem:[#allocation5 + $0x1238] sm:$0xff]  ;;  %v16602_v14 = vcombine.low %v912_v42, %v916_v55  ;;  %v936_v55 = vld [vmem:[#allocation5 + $0x1290] sm:$0xff] }
 0x632   :  { %11678 = vmatprep.subr.bf16.mxu0 %v16587_v45  ;;  %13222 = vmatprep.subr.bf16.mxu1 %v16589_v51  ;;  %v924_v45 = vld [vmem:[#allocation5 + $0x1230] sm:$0xff]  ;;  %v16604_v51 = vcombine.low %v913_v59, %v917_v18  ;;  %v16613_v61 = vcombine.high %v921_v56, %v925_v60  ;;  %v937_v18 = vld [vmem:[#allocation5 + $0x1298] sm:$0xff] }
 0x633   :  { %v16611_v3 = vcombine.high %v920_v34, %v924_v45  ;;  %v23768_v59 = vld [vmem:[#allocation89_spill] sm:$0xff] }
 0x635   :  { %11679 = vmatpush1.bf16.msra.mxu0 %v16586_v57  ;;  %13223 = vmatpush1.bf16.msra.mxu1 %v16588_v62  ;;  %v933_v57 = vld [vmem:[#allocation5 + $0x1278] sm:$0xff]  ;;  %v16610_v62 = vcombine.low %v920_v34, %v924_v45 }
 0x636   :  { %11680 = vmatprep.subr.bf16.mxu0 %v16595_v26  ;;  %13224 = vmatprep.subr.bf16.mxu1 %v16597_v52  ;;  %v16612_v26 = vcombine.low %v921_v56, %v925_v60  ;;  %v16619_v52 = vcombine.high %v928_v28, %v932_v25  ;;  %v16621_v42 = vcombine.high %v929_v2, %v933_v57  ;;  %v948_v56 = vld [vmem:[#allocation5 + $0x12f0] sm:$0xff]  ;;  %v945_v60 = vld [vmem:[#allocation5 + $0x12d8] sm:$0xff] }
 0x637   :  { %11538 = vmatmul.mubr.bf16.gmra.mrb[76].mxu0 %v23765_v4  ;;  %13082 = vmatmul.mubr.bf16.gmra.mrb[76].mxu1 %v23765_v4  ;;  %v23767_v4 = vld [vmem:[#allocation88_spill] sm:$0xff] }
 0x638   :  { %11547 = vmatprep.mubr.bf16.mxu0 %v23766_v47  ;;  %13091 = vmatprep.mubr.bf16.mxu1 %v23766_v47  ;;  %v944_v47 = vld [vmem:[#allocation5 + $0x12d0] sm:$0xff] }
 0x639   :  { %11681 = vmatpush1.bf16.msra.mxu0 %v16594_v1  ;;  %13225 = vmatpush1.bf16.msra.mxu1 %v16596_v22  ;;  %v940_v1 = vld [vmem:[#allocation5 + $0x12b0] sm:$0xff]  ;;  %v941_v22 = vld [vmem:[#allocation5 + $0x12b8] sm:$0xff] }
 0x63a   :  { %11682 = vmatprep.subr.bf16.mxu0 %v16603_v63  ;;  %13226 = vmatprep.subr.bf16.mxu1 %v16605_v41  ;;  %v16618_v63 = vcombine.low %v928_v28, %v932_v25  ;;  %v16620_v41 = vcombine.low %v929_v2, %v933_v57  ;;  %v16627_v34 = vcombine.high %v936_v55, %v940_v1  ;;  %v952_v25 = vld [vmem:[#allocation5 + $0x1310] sm:$0xff]  ;;  %v23770_v2 = vld [vmem:[#allocation91_spill] sm:$0xff]  ;;  %v953_v57 = vld [vmem:[#allocation5 + $0x1318] sm:$0xff] }
 0x63b   :  { %v16629_v45 = vcombine.high %v937_v18, %v941_v22 }
 0x63d   :  { %11683 = vmatpush1.bf16.msra.mxu0 %v16602_v14  ;;  %13227 = vmatpush1.bf16.msra.mxu1 %v16604_v51  ;;  %v949_v14 = vld [vmem:[#allocation5 + $0x12f8] sm:$0xff]  ;;  %v16626_v51 = vcombine.low %v936_v55, %v940_v1 }
 0x63e   :  { %11684 = vmatprep.subr.bf16.mxu0 %v16611_v3  ;;  %13228 = vmatprep.subr.bf16.mxu1 %v16613_v61  ;;  %v16628_v3 = vcombine.low %v937_v18, %v941_v22  ;;  %v16635_v61 = vcombine.high %v944_v47, %v948_v56  ;;  %v16637_v28 = vcombine.high %v945_v60, %v949_v14  ;;  %v964_v18 = vld [vmem:[#allocation5 + $0x1370] sm:$0xff]  ;;  %v961_v22 = vld [vmem:[#allocation5 + $0x1358] sm:$0xff] }
 0x63f   :  { %11548 = vmatmul.mubr.bf16.gmra.mrb[80].mxu0 %v23767_v4  ;;  %13092 = vmatmul.mubr.bf16.gmra.mrb[80].mxu1 %v23767_v4  ;;  %v23769_v4 = vld [vmem:[#allocation90_spill] sm:$0xff] }
 0x640   :  { %11557 = vmatprep.mubr.bf16.mxu0 %v23768_v59  ;;  %13101 = vmatprep.mubr.bf16.mxu1 %v23768_v59  ;;  %v960_v59 = vld [vmem:[#allocation5 + $0x1350] sm:$0xff] }
 0x641   :  { %11685 = vmatpush1.bf16.msra.mxu0 %v16610_v62  ;;  %13229 = vmatpush1.bf16.msra.mxu1 %v16612_v26  ;;  %v956_v62 = vld [vmem:[#allocation5 + $0x1330] sm:$0xff]  ;;  %v957_v26 = vld [vmem:[#allocation5 + $0x1338] sm:$0xff] }
 0x642   :  { %11686 = vmatprep.subr.bf16.mxu0 %v16619_v52  ;;  %13230 = vmatprep.subr.bf16.mxu1 %v16621_v42  ;;  %v16634_v52 = vcombine.low %v944_v47, %v948_v56  ;;  %v16636_v42 = vcombine.low %v945_v60, %v949_v14  ;;  %v16643_v55 = vcombine.high %v952_v25, %v956_v62  ;;  %v968_v56 = vld [vmem:[#allocation5 + $0x1390] sm:$0xff]  ;;  %v969_v14 = vld [vmem:[#allocation5 + $0x1398] sm:$0xff] }
 0x643   :  { %v16645_v1 = vcombine.high %v953_v57, %v957_v26  ;;  %v23772_v60 = vld [vmem:[#allocation93_spill] sm:$0xff] }
 0x645   :  { %11687 = vmatpush1.bf16.msra.mxu0 %v16618_v63  ;;  %13231 = vmatpush1.bf16.msra.mxu1 %v16620_v41  ;;  %v965_v63 = vld [vmem:[#allocation5 + $0x1378] sm:$0xff]  ;;  %v16642_v41 = vcombine.low %v952_v25, %v956_v62 }
 0x646   :  { %11688 = vmatprep.subr.bf16.mxu0 %v16627_v34  ;;  %13232 = vmatprep.subr.bf16.mxu1 %v16629_v45  ;;  %v16644_v34 = vcombine.low %v953_v57, %v957_v26  ;;  %v16651_v45 = vcombine.high %v960_v59, %v964_v18  ;;  %v16653_v47 = vcombine.high %v961_v22, %v965_v63  ;;  %v980_v57 = vld [vmem:[#allocation5 + $0x13f0] sm:$0xff]  ;;  %v977_v26 = vld [vmem:[#allocation5 + $0x13d8] sm:$0xff] }
 0x647   :  { %11558 = vmatmul.mubr.bf16.gmra.mrb[84].mxu0 %v23769_v4  ;;  %13102 = vmatmul.mubr.bf16.gmra.mrb[84].mxu1 %v23769_v4  ;;  %v23771_v4 = vld [vmem:[#allocation92_spill] sm:$0xff] }
 0x648   :  { %11567 = vmatprep.mubr.bf16.mxu0 %v23770_v2  ;;  %13111 = vmatprep.mubr.bf16.mxu1 %v23770_v2  ;;  %v976_v2 = vld [vmem:[#allocation5 + $0x13d0] sm:$0xff] }
 0x649   :  { %11689 = vmatpush1.bf16.msra.mxu0 %v16626_v51  ;;  %13233 = vmatpush1.bf16.msra.mxu1 %v16628_v3  ;;  %v972_v51 = vld [vmem:[#allocation5 + $0x13b0] sm:$0xff]  ;;  %v973_v3 = vld [vmem:[#allocation5 + $0x13b8] sm:$0xff] }
 0x64a   :  { %11690 = vmatprep.subr.bf16.mxu0 %v16635_v61  ;;  %13234 = vmatprep.subr.bf16.mxu1 %v16637_v28  ;;  %v16650_v61 = vcombine.low %v960_v59, %v964_v18  ;;  %v16652_v28 = vcombine.low %v961_v22, %v965_v63  ;;  %v16659_v25 = vcombine.high %v968_v56, %v972_v51  ;;  %v23774_v18 = vld [vmem:[#allocation95_spill] sm:$0xff] }
 0x64b   :  { %v16661_v62 = vcombine.high %v969_v14, %v973_v3  ;;  %v16666_v22 = vcombine.low %v976_v2, %v980_v57 }
 0x64d   :  { %11691 = vmatpush1.bf16.msra.mxu0 %v16634_v52  ;;  %13235 = vmatpush1.bf16.msra.mxu1 %v16636_v42  ;;  %v981_v52 = vld [vmem:[#allocation5 + $0x13f8] sm:$0xff]  ;;  %v16658_v42 = vcombine.low %v968_v56, %v972_v51  ;;  %v23778_v51 = vld [vmem:[#allocation99_spill] sm:$0xff] }
 0x64e   :  { %11692 = vmatprep.subr.bf16.mxu0 %v16643_v55  ;;  %13236 = vmatprep.subr.bf16.mxu1 %v16645_v1  ;;  %v16660_v55 = vcombine.low %v969_v14, %v973_v3  ;;  %v16667_v1 = vcombine.high %v976_v2, %v980_v57  ;;  %v16669_v59 = vcombine.high %v977_v26, %v981_v52  ;;  %v23777_v56 = vld [vmem:[#allocation98_spill] sm:$0xff]  ;;  %v23780_v14 = vld [vmem:[#allocation101_spill] sm:$0xff]  ;;  %v23786_v2 = vld [vmem:[#allocation107_spill] sm:$0xff] }
 0x64f   :  { %11568 = vmatmul.mubr.bf16.gmra.mrb[88].mxu0 %v23771_v4  ;;  %13112 = vmatmul.mubr.bf16.gmra.mrb[88].mxu1 %v23771_v4  ;;  %v23773_v4 = vld [vmem:[#allocation94_spill] sm:$0xff]  ;;  %v16668_v63 = vcombine.low %v977_v26, %v981_v52  ;;  %v23787_v57 = vld [vmem:[#allocation108_spill] sm:$0xff]  ;;  %v23788_v26 = vld [vmem:[#allocation109_spill] sm:$0xff] }
 0x650   :  { %11577 = vmatprep.mubr.bf16.mxu0 %v23772_v60  ;;  %13121 = vmatprep.mubr.bf16.mxu1 %v23772_v60  ;;  %v23779_v60 = vld [vmem:[#allocation100_spill] sm:$0xff]  ;;  %v23781_v3 = vld [vmem:[#allocation102_spill] sm:$0xff] }
 0x651   :  { %11693 = vmatpush1.bf16.msra.mxu0 %v16642_v41  ;;  %13237 = vmatpush1.bf16.msra.mxu1 %v16644_v34  ;;  %v16675_v41 = vcombine.high %v22057_v38, %v22059_v35  ;;  %v16677_v34 = vcombine.high %v22067_v0, %v22069_v43  ;;  %v23789_v52 = vld [vmem:[#allocation110_spill] sm:$0xff] }
 0x652   :  { %11694 = vmatprep.subr.bf16.mxu0 %v16651_v45  ;;  %13238 = vmatprep.subr.bf16.mxu1 %v16653_v47  ;;  %v23775_v45 = vld [vmem:[#allocation96_spill] sm:$0xff]  ;;  %v23776_v47 = vld [vmem:[#allocation97_spill] sm:$0xff] }
 0x655   :  { %11695 = vmatpush1.bf16.msra.mxu0 %v16650_v61  ;;  %13239 = vmatpush1.bf16.msra.mxu1 %v16652_v28  ;;  %v23782_v61 = vld [vmem:[#allocation103_spill] sm:$0xff]  ;;  %v23783_v28 = vld [vmem:[#allocation104_spill] sm:$0xff] }
 0x656   :  { %11696 = vmatprep.subr.bf16.mxu0 %v16659_v25  ;;  %13240 = vmatprep.subr.bf16.mxu1 %v16661_v62  ;;  %v23784_v25 = vld [vmem:[#allocation105_spill] sm:$0xff]  ;;  %v23785_v62 = vld [vmem:[#allocation106_spill] sm:$0xff] }
 0x657   :  { %11578 = vmatmul.mubr.bf16.gmra.mrb[92].mxu0 %v23773_v4  ;;  %13122 = vmatmul.mubr.bf16.gmra.mrb[92].mxu1 %v23773_v4  ;;  %v993_v4 = vld [vmem:[#allocation5 + $0x1458] sm:$0xff] }
 0x658   :  { %11587 = vmatprep.mubr.bf16.mxu0 %v23774_v18  ;;  %13131 = vmatprep.mubr.bf16.mxu1 %v23774_v18 }
 0x659   :  { %11697 = vmatpush1.bf16.msra.mxu0 %v16658_v42  ;;  %13241 = vmatpush1.bf16.msra.mxu1 %v16660_v55  ;;  %v23790_v42 = vld [vmem:[#allocation111_spill] sm:$0xff]  ;;  %v992_v55 = vld [vmem:[#allocation5 + $0x1450] sm:$0xff] }
 0x65a   :  { %11698 = vmatprep.subr.bf16.mxu0 %v16667_v1  ;;  %13242 = vmatprep.subr.bf16.mxu1 %v16669_v59  ;;  %v996_v1 = vld [vmem:[#allocation5 + $0x1470] sm:$0xff]  ;;  %v997_v59 = vld [vmem:[#allocation5 + $0x1478] sm:$0xff] }
 0x65b   :  { %v16683_v18 = vcombine.high %v992_v55, %v996_v1 }
 0x65d   :  { %11699 = vmatpush1.bf16.msra.mxu0 %v16666_v22  ;;  %13243 = vmatpush1.bf16.msra.mxu1 %v16668_v63  ;;  %v1000_v22 = vld [vmem:[#allocation5 + $0x1490] sm:$0xff] }
 0x65e   :  { %11861 = vmatprep.subr.bf16.mxu0 %v16675_v41  ;;  %13405 = vmatprep.subr.bf16.mxu1 %v16677_v34  ;;  %v1004_v63 = vld [vmem:[#allocation5 + $0x14b0] sm:$0xff]  ;;  %v1001_v41 = vld [vmem:[#allocation5 + $0x1498] sm:$0xff] }
 0x65f   :  { %11588 = vmatmul.mubr.bf16.gmra.mrb[96].mxu0 %v23775_v45  ;;  %13132 = vmatmul.mubr.bf16.gmra.mrb[96].mxu1 %v23775_v45  ;;  %v23791_v34 = vld [vmem:[#allocation112_spill] sm:$0xff]  ;;  %v16685_v45 = vcombine.high %v993_v4, %v997_v59 }
 0x660   :  { %11597 = vmatprep.mubr.bf16.mxu0 %v23776_v47  ;;  %13141 = vmatprep.mubr.bf16.mxu1 %v23776_v47  ;;  %v1005_v47 = vld [vmem:[#allocation5 + $0x14b8] sm:$0xff] }
 0x667   :  { %11598 = vmatmul.mubr.bf16.gmra.mrb[100].mxu0 %v23777_v56  ;;  %13142 = vmatmul.mubr.bf16.gmra.mrb[100].mxu1 %v23777_v56  ;;  %v22143_v56 = vld [vmem:[#allocation5 + $0x1810] sm:$0xff] }
 0x668   :  { %11607 = vmatprep.mubr.bf16.mxu0 %v23778_v51  ;;  %13151 = vmatprep.mubr.bf16.mxu1 %v23778_v51  ;;  %v22145_v51 = vld [vmem:[#allocation5 + $0x1830] sm:$0xff] }
 0x66f   :  { %11608 = vmatmul.mubr.bf16.gmra.mrb[104].mxu0 %v23779_v60  ;;  %13152 = vmatmul.mubr.bf16.gmra.mrb[104].mxu1 %v23779_v60  ;;  %v23792_v60 = vcombine.low %v22057_v38, %v22059_v35  ;;  %v16693_v35 = vcombine.high %v1001_v41, %v1005_v47 }
 0x670   :  { %11617 = vmatprep.mubr.bf16.mxu0 %v23780_v14  ;;  %13161 = vmatprep.mubr.bf16.mxu1 %v23780_v14  ;;  %v16682_v14 = vcombine.low %v992_v55, %v996_v1  ;;  %v1013_v55 = vld [vmem:[#allocation5 + $0x14f8] sm:$0xff] }
 0x677   :  { %11618 = vmatmul.mubr.bf16.gmra.mrb[108].mxu0 %v23781_v3  ;;  %13162 = vmatmul.mubr.bf16.gmra.mrb[108].mxu1 %v23781_v3  ;;  %v23797_v3 = vld [vmem:[#allocation116_spill] sm:$0xff] }
 0x678   :  { %11627 = vmatprep.mubr.bf16.mxu0 %v23782_v61  ;;  %13171 = vmatprep.mubr.bf16.mxu1 %v23782_v61  ;;  %v22153_v61 = vld [vmem:[#allocation5 + $0x1818] sm:$0xff] }
 0x67f   :  { %11628 = vmatmul.mubr.bf16.gmra.mrb[112].mxu0 %v23783_v28  ;;  %13172 = vmatmul.mubr.bf16.gmra.mrb[112].mxu1 %v23783_v28  ;;  %v22155_v28 = vld [vmem:[#allocation5 + $0x1838] sm:$0xff] }
 0x680   :  { %11637 = vmatprep.mubr.bf16.mxu0 %v23784_v25  ;;  %13181 = vmatprep.mubr.bf16.mxu1 %v23784_v25  ;;  %v23793_v25 = vcombine.low %v22067_v0, %v22069_v43  ;;  %v16690_v0 = vcombine.low %v1000_v22, %v1004_v63  ;;  %v16692_v43 = vcombine.low %v1001_v41, %v1005_v47  ;;  %v1024_v47 = vld [vmem:[#allocation5 + $0x1550] sm:$0xff] }
 0x687   :  { %11638 = vmatmul.mubr.bf16.gmra.mrb[116].mxu0 %v23785_v62  ;;  %13182 = vmatmul.mubr.bf16.gmra.mrb[116].mxu1 %v23785_v62  ;;  %v23794_v62 = vld [vmem:[#allocation113_spill] sm:$0xff] }
 0x688   :  { %11647 = vmatprep.mubr.bf16.mxu0 %v23786_v2  ;;  %13191 = vmatprep.mubr.bf16.mxu1 %v23786_v2  ;;  %v16684_v2 = vcombine.low %v993_v4, %v997_v59  ;;  %v23795_v4 = vld [vmem:[#allocation114_spill] sm:$0xff] }
 0x68f   :  { %11648 = vmatmul.mubr.bf16.gmra.mrb[120].mxu0 %v23787_v57  ;;  %13192 = vmatmul.mubr.bf16.gmra.mrb[120].mxu1 %v23787_v57  ;;  %v16691_v57 = vcombine.high %v1000_v22, %v1004_v63 }
 0x690   :  { %11657 = vmatprep.mubr.bf16.mxu0 %v23788_v26  ;;  %13201 = vmatprep.mubr.bf16.mxu1 %v23788_v26  ;;  %v1008_v26 = vld [vmem:[#allocation5 + $0x14d0] sm:$0xff] }
 0x697   :  { %11658 = vmatmul.mubr.bf16.gmra.mrb[124].mxu0 %v23789_v52  ;;  %13202 = vmatmul.mubr.bf16.gmra.mrb[124].mxu1 %v23789_v52  ;;  %v1012_v52 = vld [vmem:[#allocation5 + $0x14f0] sm:$0xff] }
 0x698   :  { %11700 = vmatprep.mubr.bf16.mxu0 %v23790_v42  ;;  %13244 = vmatprep.mubr.bf16.mxu1 %v23790_v42  ;;  %v1009_v42 = vld [vmem:[#allocation5 + $0x14d8] sm:$0xff]  ;;  %v16699_v1 = vcombine.high %v1008_v26, %v1012_v52 }
 0x699   :  { %v16701_v59 = vcombine.high %v1009_v42, %v1013_v55  ;;  %v16700_v22 = vcombine.low %v1009_v42, %v1013_v55  ;;  %v23798_v42 = vld [vmem:[#allocation117_spill] sm:$0xff] }
 0x69a   :  { %v1033_v55 = vld [vmem:[#allocation5 + $0x1598] sm:$0xff] }
 0x69f   :  { %11701 = vmatmul.mubr.bf16.vlgmr.msra.gmra.mrb[64].mxu0 %v23791_v34  ;;  %13245 = vmatmul.mubr.bf16.vlgmr.msra.gmra.mrb[64].mxu1 %v23791_v34  ;;  %v1016_v34 = vld [vmem:[#allocation5 + $0x1510] sm:$0xff] }
 0x6a0   :  { %11862 = vmatpush1.bf16.msra.mxu0 %v23792_v60  ;;  %13406 = vmatpush1.bf16.msra.mxu1 %v23793_v25  ;;  %v1020_v60 = vld [vmem:[#allocation5 + $0x1530] sm:$0xff]  ;;  %v1021_v25 = vld [vmem:[#allocation5 + $0x1538] sm:$0xff] }
 0x6a1   :  { %11710 = vmatprep.mubr.bf16.mxu0 %v23794_v62  ;;  %13254 = vmatprep.mubr.bf16.mxu1 %v23794_v62  ;;  %v16707_v63 = vcombine.high %v1016_v34, %v1020_v60  ;;  %v1028_v62 = vld [vmem:[#allocation5 + $0x1570] sm:$0xff] }
 0x6a2   :  { %11863 = vmatprep.subr.bf16.mxu0 %v16683_v18  ;;  %13407 = vmatprep.subr.bf16.mxu1 %v16685_v45  ;;  %v23796_v18 = vld [vmem:[#allocation115_spill] sm:$0xff]  ;;  %v1017_v45 = vld [vmem:[#allocation5 + $0x1518] sm:$0xff]  ;;  %v16715_v38 = vcombine.high %v1024_v47, %v1028_v62 }
 0x6a3   :  { %v16709_v41 = vcombine.high %v1017_v45, %v1021_v25 }
 0x6a4   :  { %11864 = vmatpush1.bf16.msra.mxu0 %v16682_v14  ;;  %13408 = vmatpush1.bf16.msra.mxu1 %v16684_v2  ;;  %v16698_v14 = vcombine.low %v1008_v26, %v1012_v52  ;;  %v1025_v2 = vld [vmem:[#allocation5 + $0x1558] sm:$0xff]  ;;  %v1032_v52 = vld [vmem:[#allocation5 + $0x1590] sm:$0xff] }
 0x6a5   :  { %11865 = vmatprep.subr.bf16.mxu0 %v16691_v57  ;;  %13409 = vmatprep.subr.bf16.mxu1 %v16693_v35  ;;  %v1029_v57 = vld [vmem:[#allocation5 + $0x1578] sm:$0xff]  ;;  %v16706_v35 = vcombine.low %v1016_v34, %v1020_v60 }
 0x6a6   :  { %v16717_v26 = vcombine.high %v1025_v2, %v1029_v57 }
 0x6a7   :  { %11711 = vmatmul.mubr.bf16.gmra.mrb[68].mxu0 %v23795_v4  ;;  %13255 = vmatmul.mubr.bf16.gmra.mrb[68].mxu1 %v23795_v4  ;;  %v16708_v4 = vcombine.low %v1017_v45, %v1021_v25  ;;  %v1044_v45 = vld [vmem:[#allocation5 + $0x15f0] sm:$0xff]  ;;  %v1041_v25 = vld [vmem:[#allocation5 + $0x15d8] sm:$0xff] }
 0x6a8   :  { %11720 = vmatprep.mubr.bf16.mxu0 %v23796_v18  ;;  %13264 = vmatprep.mubr.bf16.mxu1 %v23796_v18  ;;  %v1040_v18 = vld [vmem:[#allocation5 + $0x15d0] sm:$0xff] }
 0x6a9   :  { %11866 = vmatpush1.bf16.msra.mxu0 %v16690_v0  ;;  %13410 = vmatpush1.bf16.msra.mxu1 %v16692_v43  ;;  %v1036_v0 = vld [vmem:[#allocation5 + $0x15b0] sm:$0xff]  ;;  %v1037_v43 = vld [vmem:[#allocation5 + $0x15b8] sm:$0xff] }
 0x6aa   :  { %11867 = vmatprep.subr.bf16.mxu0 %v16699_v1  ;;  %13411 = vmatprep.subr.bf16.mxu1 %v16701_v59  ;;  %v16714_v1 = vcombine.low %v1024_v47, %v1028_v62  ;;  %v16716_v59 = vcombine.low %v1025_v2, %v1029_v57  ;;  %v16723_v34 = vcombine.high %v1032_v52, %v1036_v0  ;;  %v1048_v62 = vld [vmem:[#allocation5 + $0x1610] sm:$0xff]  ;;  %v23800_v2 = vld [vmem:[#allocation119_spill] sm:$0xff]  ;;  %v1049_v57 = vld [vmem:[#allocation5 + $0x1618] sm:$0xff] }
 0x6ab   :  { %v16725_v60 = vcombine.high %v1033_v55, %v1037_v43 }
 0x6ad   :  { %11868 = vmatpush1.bf16.msra.mxu0 %v16698_v14  ;;  %13412 = vmatpush1.bf16.msra.mxu1 %v16700_v22  ;;  %v1045_v14 = vld [vmem:[#allocation5 + $0x15f8] sm:$0xff]  ;;  %v16724_v22 = vcombine.low %v1033_v55, %v1037_v43  ;;  %v1060_v55 = vld [vmem:[#allocation5 + $0x1670] sm:$0xff] }
 0x6ae   :  { %11869 = vmatprep.subr.bf16.mxu0 %v16707_v63  ;;  %13413 = vmatprep.subr.bf16.mxu1 %v16709_v41  ;;  %v16731_v63 = vcombine.high %v1040_v18, %v1044_v45  ;;  %v23799_v41 = vld [vmem:[#allocation118_spill] sm:$0xff]  ;;  %v16733_v47 = vcombine.high %v1041_v25, %v1045_v14 }
 0x6af   :  { %11721 = vmatmul.mubr.bf16.gmra.mrb[72].mxu0 %v23797_v3  ;;  %13265 = vmatmul.mubr.bf16.gmra.mrb[72].mxu1 %v23797_v3  ;;  %v16722_v3 = vcombine.low %v1032_v52, %v1036_v0  ;;  %v1057_v43 = vld [vmem:[#allocation5 + $0x1658] sm:$0xff] }
 0x6b0   :  { %11730 = vmatprep.mubr.bf16.mxu0 %v23798_v42  ;;  %13274 = vmatprep.mubr.bf16.mxu1 %v23798_v42  ;;  %v1056_v42 = vld [vmem:[#allocation5 + $0x1650] sm:$0xff] }
 0x6b1   :  { %11870 = vmatpush1.bf16.msra.mxu0 %v16706_v35  ;;  %13414 = vmatpush1.bf16.msra.mxu1 %v16708_v4  ;;  %v1053_v35 = vld [vmem:[#allocation5 + $0x1638] sm:$0xff]  ;;  %v16730_v4 = vcombine.low %v1040_v18, %v1044_v45  ;;  %v1064_v45 = vld [vmem:[#allocation5 + $0x1690] sm:$0xff] }
 0x6b2   :  { %11871 = vmatprep.subr.bf16.mxu0 %v16715_v38  ;;  %13415 = vmatprep.subr.bf16.mxu1 %v16717_v26  ;;  %v1052_v38 = vld [vmem:[#allocation5 + $0x1630] sm:$0xff]  ;;  %v16732_v26 = vcombine.low %v1041_v25, %v1045_v14  ;;  %v16741_v0 = vcombine.high %v1049_v57, %v1053_v35  ;;  %v1065_v14 = vld [vmem:[#allocation5 + $0x1698] sm:$0xff] }
 0x6b3   :  { %v16739_v52 = vcombine.high %v1048_v62, %v1052_v38  ;;  %v23802_v25 = vld [vmem:[#allocation121_spill] sm:$0xff] }
 0x6b5   :  { %11872 = vmatpush1.bf16.msra.mxu0 %v16714_v1  ;;  %13416 = vmatpush1.bf16.msra.mxu1 %v16716_v59  ;;  %v1061_v1 = vld [vmem:[#allocation5 + $0x1678] sm:$0xff]  ;;  %v16738_v59 = vcombine.low %v1048_v62, %v1052_v38 }
 0x6b6   :  { %11873 = vmatprep.subr.bf16.mxu0 %v16723_v34  ;;  %13417 = vmatprep.subr.bf16.mxu1 %v16725_v60  ;;  %v16740_v34 = vcombine.low %v1049_v57, %v1053_v35  ;;  %v16747_v60 = vcombine.high %v1056_v42, %v1060_v55  ;;  %v16749_v18 = vcombine.high %v1057_v43, %v1061_v1  ;;  %v1076_v57 = vld [vmem:[#allocation5 + $0x16f0] sm:$0xff]  ;;  %v1073_v35 = vld [vmem:[#allocation5 + $0x16d8] sm:$0xff] }
 0x6b7   :  { %11731 = vmatmul.mubr.bf16.gmra.mrb[76].mxu0 %v23799_v41  ;;  %13275 = vmatmul.mubr.bf16.gmra.mrb[76].mxu1 %v23799_v41  ;;  %v23801_v41 = vld [vmem:[#allocation120_spill] sm:$0xff] }
 0x6b8   :  { %11740 = vmatprep.mubr.bf16.mxu0 %v23800_v2  ;;  %13284 = vmatprep.mubr.bf16.mxu1 %v23800_v2  ;;  %v1072_v2 = vld [vmem:[#allocation5 + $0x16d0] sm:$0xff] }
 0x6b9   :  { %11874 = vmatpush1.bf16.msra.mxu0 %v16722_v3  ;;  %13418 = vmatpush1.bf16.msra.mxu1 %v16724_v22  ;;  %v1068_v3 = vld [vmem:[#allocation5 + $0x16b0] sm:$0xff]  ;;  %v1069_v22 = vld [vmem:[#allocation5 + $0x16b8] sm:$0xff] }
 0x6ba   :  { %11875 = vmatprep.subr.bf16.mxu0 %v16731_v63  ;;  %13419 = vmatprep.subr.bf16.mxu1 %v16733_v47  ;;  %v16746_v63 = vcombine.low %v1056_v42, %v1060_v55  ;;  %v16748_v47 = vcombine.low %v1057_v43, %v1061_v1  ;;  %v16755_v62 = vcombine.high %v1064_v45, %v1068_v3  ;;  %v1080_v55 = vld [vmem:[#allocation5 + $0x1710] sm:$0xff]  ;;  %v23804_v43 = vld [vmem:[#allocation123_spill] sm:$0xff]  ;;  %v1081_v1 = vld [vmem:[#allocation5 + $0x1718] sm:$0xff] }
 0x6bb   :  { %v16757_v38 = vcombine.high %v1065_v14, %v1069_v22 }
 0x6bd   :  { %11876 = vmatpush1.bf16.msra.mxu0 %v16730_v4  ;;  %13420 = vmatpush1.bf16.msra.mxu1 %v16732_v26  ;;  %v1077_v4 = vld [vmem:[#allocation5 + $0x16f8] sm:$0xff]  ;;  %v16754_v26 = vcombine.low %v1064_v45, %v1068_v3 }
 0x6be   :  { %11877 = vmatprep.subr.bf16.mxu0 %v16739_v52  ;;  %13421 = vmatprep.subr.bf16.mxu1 %v16741_v0  ;;  %v16756_v52 = vcombine.low %v1065_v14, %v1069_v22  ;;  %v16763_v0 = vcombine.high %v1072_v2, %v1076_v57  ;;  %v16765_v42 = vcombine.high %v1073_v35, %v1077_v4  ;;  %v1092_v14 = vld [vmem:[#allocation5 + $0x1770] sm:$0xff]  ;;  %v1089_v22 = vld [vmem:[#allocation5 + $0x1758] sm:$0xff] }
 0x6bf   :  { %11741 = vmatmul.mubr.bf16.gmra.mrb[80].mxu0 %v23801_v41  ;;  %13285 = vmatmul.mubr.bf16.gmra.mrb[80].mxu1 %v23801_v41  ;;  %v23803_v41 = vld [vmem:[#allocation122_spill] sm:$0xff] }
 0x6c0   :  { %11750 = vmatprep.mubr.bf16.mxu0 %v23802_v25  ;;  %13294 = vmatprep.mubr.bf16.mxu1 %v23802_v25  ;;  %v1088_v25 = vld [vmem:[#allocation5 + $0x1750] sm:$0xff] }
 0x6c1   :  { %11878 = vmatpush1.bf16.msra.mxu0 %v16738_v59  ;;  %13422 = vmatpush1.bf16.msra.mxu1 %v16740_v34  ;;  %v1084_v59 = vld [vmem:[#allocation5 + $0x1730] sm:$0xff]  ;;  %v1085_v34 = vld [vmem:[#allocation5 + $0x1738] sm:$0xff] }
 0x6c2   :  { %11879 = vmatprep.subr.bf16.mxu0 %v16747_v60  ;;  %13423 = vmatprep.subr.bf16.mxu1 %v16749_v18  ;;  %v16762_v60 = vcombine.low %v1072_v2, %v1076_v57  ;;  %v16764_v18 = vcombine.low %v1073_v35, %v1077_v4  ;;  %v16771_v45 = vcombine.high %v1080_v55, %v1084_v59  ;;  %v1096_v57 = vld [vmem:[#allocation5 + $0x1790] sm:$0xff]  ;;  %v1097_v4 = vld [vmem:[#allocation5 + $0x1798] sm:$0xff] }
 0x6c3   :  { %v16773_v3 = vcombine.high %v1081_v1, %v1085_v34  ;;  %v23806_v35 = vld [vmem:[#allocation125_spill] sm:$0xff] }
 0x6c5   :  { %11880 = vmatpush1.bf16.msra.mxu0 %v16746_v63  ;;  %13424 = vmatpush1.bf16.msra.mxu1 %v16748_v47  ;;  %v1093_v63 = vld [vmem:[#allocation5 + $0x1778] sm:$0xff]  ;;  %v16770_v47 = vcombine.low %v1080_v55, %v1084_v59 }
 0x6c6   :  { %11881 = vmatprep.subr.bf16.mxu0 %v16755_v62  ;;  %13425 = vmatprep.subr.bf16.mxu1 %v16757_v38  ;;  %v16772_v62 = vcombine.low %v1081_v1, %v1085_v34  ;;  %v16779_v38 = vcombine.high %v1088_v25, %v1092_v14  ;;  %v16781_v2 = vcombine.high %v1089_v22, %v1093_v63  ;;  %v1108_v1 = vld [vmem:[#allocation5 + $0x17f0] sm:$0xff]  ;;  %v1105_v34 = vld [vmem:[#allocation5 + $0x17d8] sm:$0xff] }
 0x6c7   :  { %11751 = vmatmul.mubr.bf16.gmra.mrb[84].mxu0 %v23803_v41  ;;  %13295 = vmatmul.mubr.bf16.gmra.mrb[84].mxu1 %v23803_v41  ;;  %v23805_v41 = vld [vmem:[#allocation124_spill] sm:$0xff] }
 0x6c8   :  { %11760 = vmatprep.mubr.bf16.mxu0 %v23804_v43  ;;  %13304 = vmatprep.mubr.bf16.mxu1 %v23804_v43  ;;  %v1104_v43 = vld [vmem:[#allocation5 + $0x17d0] sm:$0xff] }
 0x6c9   :  { %11882 = vmatpush1.bf16.msra.mxu0 %v16754_v26  ;;  %13426 = vmatpush1.bf16.msra.mxu1 %v16756_v52  ;;  %v1100_v26 = vld [vmem:[#allocation5 + $0x17b0] sm:$0xff]  ;;  %v1101_v52 = vld [vmem:[#allocation5 + $0x17b8] sm:$0xff] }
 0x6ca   :  { %11883 = vmatprep.subr.bf16.mxu0 %v16763_v0  ;;  %13427 = vmatprep.subr.bf16.mxu1 %v16765_v42  ;;  %v16778_v0 = vcombine.low %v1088_v25, %v1092_v14  ;;  %v16780_v42 = vcombine.low %v1089_v22, %v1093_v63  ;;  %v16787_v55 = vcombine.high %v1096_v57, %v1100_v26  ;;  %v23808_v14 = vld [vmem:[#allocation127_spill] sm:$0xff] }
 0x6cb   :  { %v16789_v59 = vcombine.high %v1097_v4, %v1101_v52  ;;  %v16794_v22 = vcombine.low %v1104_v43, %v1108_v1 }
 0x6cd   :  { %11884 = vmatpush1.bf16.msra.mxu0 %v16762_v60  ;;  %13428 = vmatpush1.bf16.msra.mxu1 %v16764_v18  ;;  %v1109_v60 = vld [vmem:[#allocation5 + $0x17f8] sm:$0xff]  ;;  %v16786_v18 = vcombine.low %v1096_v57, %v1100_v26  ;;  %v23812_v26 = vld [vmem:[#allocation131_spill] sm:$0xff] }
 0x6ce   :  { %11885 = vmatprep.subr.bf16.mxu0 %v16771_v45  ;;  %13429 = vmatprep.subr.bf16.mxu1 %v16773_v3  ;;  %v16788_v45 = vcombine.low %v1097_v4, %v1101_v52  ;;  %v16795_v3 = vcombine.high %v1104_v43, %v1108_v1  ;;  %v16797_v25 = vcombine.high %v1105_v34, %v1109_v60  ;;  %v23811_v57 = vld [vmem:[#allocation130_spill] sm:$0xff]  ;;  %v23814_v4 = vld [vmem:[#allocation133_spill] sm:$0xff]  ;;  %v23820_v43 = vld [vmem:[#allocation139_spill] sm:$0xff] }
 0x6cf   :  { %11761 = vmatmul.mubr.bf16.gmra.mrb[88].mxu0 %v23805_v41  ;;  %13305 = vmatmul.mubr.bf16.gmra.mrb[88].mxu1 %v23805_v41  ;;  %v23807_v41 = vld [vmem:[#allocation126_spill] sm:$0xff]  ;;  %v16796_v63 = vcombine.low %v1105_v34, %v1109_v60  ;;  %v23821_v1 = vld [vmem:[#allocation140_spill] sm:$0xff]  ;;  %v23822_v34 = vld [vmem:[#allocation141_spill] sm:$0xff] }
 0x6d0   :  { %11770 = vmatprep.mubr.bf16.mxu0 %v23806_v35  ;;  %13314 = vmatprep.mubr.bf16.mxu1 %v23806_v35  ;;  %v23813_v35 = vld [vmem:[#allocation132_spill] sm:$0xff]  ;;  %v23815_v52 = vld [vmem:[#allocation134_spill] sm:$0xff] }
 0x6d1   :  { %11886 = vmatpush1.bf16.msra.mxu0 %v16770_v47  ;;  %13430 = vmatpush1.bf16.msra.mxu1 %v16772_v62  ;;  %v16803_v47 = vcombine.high %v22143_v56, %v22145_v51  ;;  %v16805_v62 = vcombine.high %v22153_v61, %v22155_v28  ;;  %v23823_v60 = vld [vmem:[#allocation142_spill] sm:$0xff] }
 0x6d2   :  { %11887 = vmatprep.subr.bf16.mxu0 %v16779_v38  ;;  %13431 = vmatprep.subr.bf16.mxu1 %v16781_v2  ;;  %v23809_v38 = vld [vmem:[#allocation128_spill] sm:$0xff]  ;;  %v23810_v2 = vld [vmem:[#allocation129_spill] sm:$0xff] }
 0x6d5   :  { %11888 = vmatpush1.bf16.msra.mxu0 %v16778_v0  ;;  %13432 = vmatpush1.bf16.msra.mxu1 %v16780_v42  ;;  %v23816_v0 = vld [vmem:[#allocation135_spill] sm:$0xff]  ;;  %v23817_v42 = vld [vmem:[#allocation136_spill] sm:$0xff] }
 0x6d6   :  { %11889 = vmatprep.subr.bf16.mxu0 %v16787_v55  ;;  %13433 = vmatprep.subr.bf16.mxu1 %v16789_v59  ;;  %v23818_v55 = vld [vmem:[#allocation137_spill] sm:$0xff]  ;;  %v23819_v59 = vld [vmem:[#allocation138_spill] sm:$0xff] }
 0x6d7   :  { %11771 = vmatmul.mubr.bf16.gmra.mrb[92].mxu0 %v23807_v41  ;;  %13315 = vmatmul.mubr.bf16.gmra.mrb[92].mxu1 %v23807_v41  ;;  %v1121_v41 = vld [vmem:[#allocation5 + $0x1858] sm:$0xff] }
 0x6d8   :  { %11780 = vmatprep.mubr.bf16.mxu0 %v23808_v14  ;;  %13324 = vmatprep.mubr.bf16.mxu1 %v23808_v14 }
 0x6d9   :  { %11890 = vmatpush1.bf16.msra.mxu0 %v16786_v18  ;;  %13434 = vmatpush1.bf16.msra.mxu1 %v16788_v45  ;;  %v23824_v18 = vld [vmem:[#allocation143_spill] sm:$0xff]  ;;  %v1120_v45 = vld [vmem:[#allocation5 + $0x1850] sm:$0xff] }
 0x6da   :  { %11891 = vmatprep.subr.bf16.mxu0 %v16795_v3  ;;  %13435 = vmatprep.subr.bf16.mxu1 %v16797_v25  ;;  %v1124_v3 = vld [vmem:[#allocation5 + $0x1870] sm:$0xff]  ;;  %v1125_v25 = vld [vmem:[#allocation5 + $0x1878] sm:$0xff] }
 0x6db   :  { %v16811_v14 = vcombine.high %v1120_v45, %v1124_v3 }
 0x6dd   :  { %11892 = vmatpush1.bf16.msra.mxu0 %v16794_v22  ;;  %13436 = vmatpush1.bf16.msra.mxu1 %v16796_v63  ;;  %v1128_v22 = vld [vmem:[#allocation5 + $0x1890] sm:$0xff] }
 0x6de   :  { %12054 = vmatprep.subr.bf16.mxu0 %v16803_v47  ;;  %13598 = vmatprep.subr.bf16.mxu1 %v16805_v62  ;;  %v1132_v63 = vld [vmem:[#allocation5 + $0x18b0] sm:$0xff]  ;;  %v1129_v47 = vld [vmem:[#allocation5 + $0x1898] sm:$0xff] }
 0x6df   :  { %11781 = vmatmul.mubr.bf16.gmra.mrb[96].mxu0 %v23809_v38  ;;  %13325 = vmatmul.mubr.bf16.gmra.mrb[96].mxu1 %v23809_v38  ;;  %v23825_v62 = vld [vmem:[#allocation144_spill] sm:$0xff]  ;;  %v16813_v38 = vcombine.high %v1121_v41, %v1125_v25 }
 0x6e0   :  { %11790 = vmatprep.mubr.bf16.mxu0 %v23810_v2  ;;  %13334 = vmatprep.mubr.bf16.mxu1 %v23810_v2  ;;  %v1133_v2 = vld [vmem:[#allocation5 + $0x18b8] sm:$0xff] }
 0x6e7   :  { %11791 = vmatmul.mubr.bf16.gmra.mrb[100].mxu0 %v23811_v57  ;;  %13335 = vmatmul.mubr.bf16.gmra.mrb[100].mxu1 %v23811_v57  ;;  %v22229_v57 = vld [vmem:[#allocation5 + $0x1c10] sm:$0xff] }
 0x6e8   :  { %11800 = vmatprep.mubr.bf16.mxu0 %v23812_v26  ;;  %13344 = vmatprep.mubr.bf16.mxu1 %v23812_v26  ;;  %v22231_v26 = vld [vmem:[#allocation5 + $0x1c30] sm:$0xff] }
 0x6ef   :  { %11801 = vmatmul.mubr.bf16.gmra.mrb[104].mxu0 %v23813_v35  ;;  %13345 = vmatmul.mubr.bf16.gmra.mrb[104].mxu1 %v23813_v35  ;;  %v23826_v35 = vcombine.low %v22143_v56, %v22145_v51  ;;  %v16821_v51 = vcombine.high %v1129_v47, %v1133_v2 }
 0x6f0   :  { %11810 = vmatprep.mubr.bf16.mxu0 %v23814_v4  ;;  %13354 = vmatprep.mubr.bf16.mxu1 %v23814_v4  ;;  %v16810_v4 = vcombine.low %v1120_v45, %v1124_v3  ;;  %v1141_v45 = vld [vmem:[#allocation5 + $0x18f8] sm:$0xff] }
 0x6f7   :  { %11811 = vmatmul.mubr.bf16.gmra.mrb[108].mxu0 %v23815_v52  ;;  %13355 = vmatmul.mubr.bf16.gmra.mrb[108].mxu1 %v23815_v52  ;;  %v23831_v52 = vld [vmem:[#allocation148_spill] sm:$0xff] }
 0x6f8   :  { %11820 = vmatprep.mubr.bf16.mxu0 %v23816_v0  ;;  %13364 = vmatprep.mubr.bf16.mxu1 %v23816_v0  ;;  %v22239_v0 = vld [vmem:[#allocation5 + $0x1c18] sm:$0xff] }
 0x6ff   :  { %11821 = vmatmul.mubr.bf16.gmra.mrb[112].mxu0 %v23817_v42  ;;  %13365 = vmatmul.mubr.bf16.gmra.mrb[112].mxu1 %v23817_v42  ;;  %v22241_v42 = vld [vmem:[#allocation5 + $0x1c38] sm:$0xff] }
 0x700   :  { %11830 = vmatprep.mubr.bf16.mxu0 %v23818_v55  ;;  %13374 = vmatprep.mubr.bf16.mxu1 %v23818_v55  ;;  %v23827_v55 = vcombine.low %v22153_v61, %v22155_v28  ;;  %v16818_v61 = vcombine.low %v1128_v22, %v1132_v63  ;;  %v16820_v28 = vcombine.low %v1129_v47, %v1133_v2  ;;  %v1152_v2 = vld [vmem:[#allocation5 + $0x1950] sm:$0xff] }
 0x707   :  { %11831 = vmatmul.mubr.bf16.gmra.mrb[116].mxu0 %v23819_v59  ;;  %13375 = vmatmul.mubr.bf16.gmra.mrb[116].mxu1 %v23819_v59  ;;  %v23828_v59 = vld [vmem:[#allocation145_spill] sm:$0xff] }
 0x708   :  { %11840 = vmatprep.mubr.bf16.mxu0 %v23820_v43  ;;  %13384 = vmatprep.mubr.bf16.mxu1 %v23820_v43  ;;  %v16812_v43 = vcombine.low %v1121_v41, %v1125_v25  ;;  %v23829_v41 = vld [vmem:[#allocation146_spill] sm:$0xff] }
 0x70f   :  { %11841 = vmatmul.mubr.bf16.gmra.mrb[120].mxu0 %v23821_v1  ;;  %13385 = vmatmul.mubr.bf16.gmra.mrb[120].mxu1 %v23821_v1  ;;  %v16819_v1 = vcombine.high %v1128_v22, %v1132_v63 }
 0x710   :  { %11850 = vmatprep.mubr.bf16.mxu0 %v23822_v34  ;;  %13394 = vmatprep.mubr.bf16.mxu1 %v23822_v34  ;;  %v1136_v34 = vld [vmem:[#allocation5 + $0x18d0] sm:$0xff] }
 0x717   :  { %11851 = vmatmul.mubr.bf16.gmra.mrb[124].mxu0 %v23823_v60  ;;  %13395 = vmatmul.mubr.bf16.gmra.mrb[124].mxu1 %v23823_v60  ;;  %v1140_v60 = vld [vmem:[#allocation5 + $0x18f0] sm:$0xff] }
 0x718   :  { %11893 = vmatprep.mubr.bf16.mxu0 %v23824_v18  ;;  %13437 = vmatprep.mubr.bf16.mxu1 %v23824_v18  ;;  %v1137_v18 = vld [vmem:[#allocation5 + $0x18d8] sm:$0xff]  ;;  %v16827_v3 = vcombine.high %v1136_v34, %v1140_v60 }
 0x719   :  { %v16829_v25 = vcombine.high %v1137_v18, %v1141_v45  ;;  %v16828_v22 = vcombine.low %v1137_v18, %v1141_v45  ;;  %v23832_v18 = vld [vmem:[#allocation149_spill] sm:$0xff] }
 0x71a   :  { %v1161_v45 = vld [vmem:[#allocation5 + $0x1998] sm:$0xff] }
 0x71f   :  { %11894 = vmatmul.mubr.bf16.vlgmr.msra.gmra.mrb[64].mxu0 %v23825_v62  ;;  %13438 = vmatmul.mubr.bf16.vlgmr.msra.gmra.mrb[64].mxu1 %v23825_v62  ;;  %v1144_v62 = vld [vmem:[#allocation5 + $0x1910] sm:$0xff] }
 0x720   :  { %12055 = vmatpush1.bf16.msra.mxu0 %v23826_v35  ;;  %13599 = vmatpush1.bf16.msra.mxu1 %v23827_v55  ;;  %v1148_v35 = vld [vmem:[#allocation5 + $0x1930] sm:$0xff]  ;;  %v1149_v55 = vld [vmem:[#allocation5 + $0x1938] sm:$0xff] }
 0x721   :  { %11903 = vmatprep.mubr.bf16.mxu0 %v23828_v59  ;;  %13447 = vmatprep.mubr.bf16.mxu1 %v23828_v59  ;;  %v16835_v63 = vcombine.high %v1144_v62, %v1148_v35  ;;  %v1156_v59 = vld [vmem:[#allocation5 + $0x1970] sm:$0xff] }
 0x722   :  { %12056 = vmatprep.subr.bf16.mxu0 %v16811_v14  ;;  %13600 = vmatprep.subr.bf16.mxu1 %v16813_v38  ;;  %v23830_v14 = vld [vmem:[#allocation147_spill] sm:$0xff]  ;;  %v1145_v38 = vld [vmem:[#allocation5 + $0x1918] sm:$0xff]  ;;  %v16843_v56 = vcombine.high %v1152_v2, %v1156_v59 }
 0x723   :  { %v16837_v47 = vcombine.high %v1145_v38, %v1149_v55 }
 0x724   :  { %12057 = vmatpush1.bf16.msra.mxu0 %v16810_v4  ;;  %13601 = vmatpush1.bf16.msra.mxu1 %v16812_v43  ;;  %v16826_v4 = vcombine.low %v1136_v34, %v1140_v60  ;;  %v1153_v43 = vld [vmem:[#allocation5 + $0x1958] sm:$0xff]  ;;  %v1160_v60 = vld [vmem:[#allocation5 + $0x1990] sm:$0xff] }
 0x725   :  { %12058 = vmatprep.subr.bf16.mxu0 %v16819_v1  ;;  %13602 = vmatprep.subr.bf16.mxu1 %v16821_v51  ;;  %v1157_v1 = vld [vmem:[#allocation5 + $0x1978] sm:$0xff]  ;;  %v16834_v51 = vcombine.low %v1144_v62, %v1148_v35 }
 0x726   :  { %v16845_v34 = vcombine.high %v1153_v43, %v1157_v1 }
 0x727   :  { %11904 = vmatmul.mubr.bf16.gmra.mrb[68].mxu0 %v23829_v41  ;;  %13448 = vmatmul.mubr.bf16.gmra.mrb[68].mxu1 %v23829_v41  ;;  %v16836_v41 = vcombine.low %v1145_v38, %v1149_v55  ;;  %v1172_v38 = vld [vmem:[#allocation5 + $0x19f0] sm:$0xff]  ;;  %v1169_v55 = vld [vmem:[#allocation5 + $0x19d8] sm:$0xff] }
 0x728   :  { %11913 = vmatprep.mubr.bf16.mxu0 %v23830_v14  ;;  %13457 = vmatprep.mubr.bf16.mxu1 %v23830_v14  ;;  %v1168_v14 = vld [vmem:[#allocation5 + $0x19d0] sm:$0xff] }
 0x729   :  { %12059 = vmatpush1.bf16.msra.mxu0 %v16818_v61  ;;  %13603 = vmatpush1.bf16.msra.mxu1 %v16820_v28  ;;  %v1164_v61 = vld [vmem:[#allocation5 + $0x19b0] sm:$0xff]  ;;  %v1165_v28 = vld [vmem:[#allocation5 + $0x19b8] sm:$0xff] }
 0x72a   :  { %12060 = vmatprep.subr.bf16.mxu0 %v16827_v3  ;;  %13604 = vmatprep.subr.bf16.mxu1 %v16829_v25  ;;  %v16842_v3 = vcombine.low %v1152_v2, %v1156_v59  ;;  %v16844_v25 = vcombine.low %v1153_v43, %v1157_v1  ;;  %v16851_v62 = vcombine.high %v1160_v60, %v1164_v61  ;;  %v1176_v59 = vld [vmem:[#allocation5 + $0x1a10] sm:$0xff]  ;;  %v23834_v43 = vld [vmem:[#allocation151_spill] sm:$0xff]  ;;  %v1177_v1 = vld [vmem:[#allocation5 + $0x1a18] sm:$0xff] }
 0x72b   :  { %v16853_v35 = vcombine.high %v1161_v45, %v1165_v28 }
 0x72d   :  { %12061 = vmatpush1.bf16.msra.mxu0 %v16826_v4  ;;  %13605 = vmatpush1.bf16.msra.mxu1 %v16828_v22  ;;  %v1173_v4 = vld [vmem:[#allocation5 + $0x19f8] sm:$0xff]  ;;  %v16852_v22 = vcombine.low %v1161_v45, %v1165_v28  ;;  %v1188_v45 = vld [vmem:[#allocation5 + $0x1a70] sm:$0xff] }
 0x72e   :  { %12062 = vmatprep.subr.bf16.mxu0 %v16835_v63  ;;  %13606 = vmatprep.subr.bf16.mxu1 %v16837_v47  ;;  %v16859_v63 = vcombine.high %v1168_v14, %v1172_v38  ;;  %v23833_v47 = vld [vmem:[#allocation150_spill] sm:$0xff]  ;;  %v16861_v2 = vcombine.high %v1169_v55, %v1173_v4 }
 0x72f   :  { %11914 = vmatmul.mubr.bf16.gmra.mrb[72].mxu0 %v23831_v52  ;;  %13458 = vmatmul.mubr.bf16.gmra.mrb[72].mxu1 %v23831_v52  ;;  %v16850_v52 = vcombine.low %v1160_v60, %v1164_v61  ;;  %v1185_v28 = vld [vmem:[#allocation5 + $0x1a58] sm:$0xff] }
 0x730   :  { %11923 = vmatprep.mubr.bf16.mxu0 %v23832_v18  ;;  %13467 = vmatprep.mubr.bf16.mxu1 %v23832_v18  ;;  %v1184_v18 = vld [vmem:[#allocation5 + $0x1a50] sm:$0xff] }
 0x731   :  { %12063 = vmatpush1.bf16.msra.mxu0 %v16834_v51  ;;  %13607 = vmatpush1.bf16.msra.mxu1 %v16836_v41  ;;  %v1181_v51 = vld [vmem:[#allocation5 + $0x1a38] sm:$0xff]  ;;  %v16858_v41 = vcombine.low %v1168_v14, %v1172_v38  ;;  %v1192_v38 = vld [vmem:[#allocation5 + $0x1a90] sm:$0xff] }
 0x732   :  { %12064 = vmatprep.subr.bf16.mxu0 %v16843_v56  ;;  %13608 = vmatprep.subr.bf16.mxu1 %v16845_v34  ;;  %v1180_v56 = vld [vmem:[#allocation5 + $0x1a30] sm:$0xff]  ;;  %v16860_v34 = vcombine.low %v1169_v55, %v1173_v4  ;;  %v16869_v61 = vcombine.high %v1177_v1, %v1181_v51  ;;  %v1193_v4 = vld [vmem:[#allocation5 + $0x1a98] sm:$0xff] }
 0x733   :  { %v16867_v60 = vcombine.high %v1176_v59, %v1180_v56  ;;  %v23836_v55 = vld [vmem:[#allocation153_spill] sm:$0xff] }
 0x735   :  { %12065 = vmatpush1.bf16.msra.mxu0 %v16842_v3  ;;  %13609 = vmatpush1.bf16.msra.mxu1 %v16844_v25  ;;  %v1189_v3 = vld [vmem:[#allocation5 + $0x1a78] sm:$0xff]  ;;  %v16866_v25 = vcombine.low %v1176_v59, %v1180_v56 }
 0x736   :  { %12066 = vmatprep.subr.bf16.mxu0 %v16851_v62  ;;  %13610 = vmatprep.subr.bf16.mxu1 %v16853_v35  ;;  %v16868_v62 = vcombine.low %v1177_v1, %v1181_v51  ;;  %v16875_v35 = vcombine.high %v1184_v18, %v1188_v45  ;;  %v16877_v14 = vcombine.high %v1185_v28, %v1189_v3  ;;  %v1204_v1 = vld [vmem:[#allocation5 + $0x1af0] sm:$0xff]  ;;  %v1201_v51 = vld [vmem:[#allocation5 + $0x1ad8] sm:$0xff] }
 0x737   :  { %11924 = vmatmul.mubr.bf16.gmra.mrb[76].mxu0 %v23833_v47  ;;  %13468 = vmatmul.mubr.bf16.gmra.mrb[76].mxu1 %v23833_v47  ;;  %v23835_v47 = vld [vmem:[#allocation152_spill] sm:$0xff] }
 0x738   :  { %11933 = vmatprep.mubr.bf16.mxu0 %v23834_v43  ;;  %13477 = vmatprep.mubr.bf16.mxu1 %v23834_v43  ;;  %v1200_v43 = vld [vmem:[#allocation5 + $0x1ad0] sm:$0xff] }
 0x739   :  { %12067 = vmatpush1.bf16.msra.mxu0 %v16850_v52  ;;  %13611 = vmatpush1.bf16.msra.mxu1 %v16852_v22  ;;  %v1196_v52 = vld [vmem:[#allocation5 + $0x1ab0] sm:$0xff]  ;;  %v1197_v22 = vld [vmem:[#allocation5 + $0x1ab8] sm:$0xff] }
 0x73a   :  { %12068 = vmatprep.subr.bf16.mxu0 %v16859_v63  ;;  %13612 = vmatprep.subr.bf16.mxu1 %v16861_v2  ;;  %v16874_v63 = vcombine.low %v1184_v18, %v1188_v45  ;;  %v16876_v2 = vcombine.low %v1185_v28, %v1189_v3  ;;  %v16883_v59 = vcombine.high %v1192_v38, %v1196_v52  ;;  %v1208_v45 = vld [vmem:[#allocation5 + $0x1b10] sm:$0xff]  ;;  %v23838_v28 = vld [vmem:[#allocation155_spill] sm:$0xff]  ;;  %v1209_v3 = vld [vmem:[#allocation5 + $0x1b18] sm:$0xff] }
 0x73b   :  { %v16885_v56 = vcombine.high %v1193_v4, %v1197_v22 }
 0x73d   :  { %12069 = vmatpush1.bf16.msra.mxu0 %v16858_v41  ;;  %13613 = vmatpush1.bf16.msra.mxu1 %v16860_v34  ;;  %v1205_v41 = vld [vmem:[#allocation5 + $0x1af8] sm:$0xff]  ;;  %v16882_v34 = vcombine.low %v1192_v38, %v1196_v52 }
 0x73e   :  { %12070 = vmatprep.subr.bf16.mxu0 %v16867_v60  ;;  %13614 = vmatprep.subr.bf16.mxu1 %v16869_v61  ;;  %v16884_v60 = vcombine.low %v1193_v4, %v1197_v22  ;;  %v16891_v61 = vcombine.high %v1200_v43, %v1204_v1  ;;  %v16893_v18 = vcombine.high %v1201_v51, %v1205_v41  ;;  %v1220_v4 = vld [vmem:[#allocation5 + $0x1b70] sm:$0xff]  ;;  %v1217_v22 = vld [vmem:[#allocation5 + $0x1b58] sm:$0xff] }
 0x73f   :  { %11934 = vmatmul.mubr.bf16.gmra.mrb[80].mxu0 %v23835_v47  ;;  %13478 = vmatmul.mubr.bf16.gmra.mrb[80].mxu1 %v23835_v47  ;;  %v23837_v47 = vld [vmem:[#allocation154_spill] sm:$0xff] }
 0x740   :  { %11943 = vmatprep.mubr.bf16.mxu0 %v23836_v55  ;;  %13487 = vmatprep.mubr.bf16.mxu1 %v23836_v55  ;;  %v1216_v55 = vld [vmem:[#allocation5 + $0x1b50] sm:$0xff] }
 0x741   :  { %12071 = vmatpush1.bf16.msra.mxu0 %v16866_v25  ;;  %13615 = vmatpush1.bf16.msra.mxu1 %v16868_v62  ;;  %v1212_v25 = vld [vmem:[#allocation5 + $0x1b30] sm:$0xff]  ;;  %v1213_v62 = vld [vmem:[#allocation5 + $0x1b38] sm:$0xff] }
 0x742   :  { %12072 = vmatprep.subr.bf16.mxu0 %v16875_v35  ;;  %13616 = vmatprep.subr.bf16.mxu1 %v16877_v14  ;;  %v16890_v35 = vcombine.low %v1200_v43, %v1204_v1  ;;  %v16892_v14 = vcombine.low %v1201_v51, %v1205_v41  ;;  %v16899_v38 = vcombine.high %v1208_v45, %v1212_v25  ;;  %v1224_v1 = vld [vmem:[#allocation5 + $0x1b90] sm:$0xff]  ;;  %v1225_v41 = vld [vmem:[#allocation5 + $0x1b98] sm:$0xff] }
 0x743   :  { %v16901_v52 = vcombine.high %v1209_v3, %v1213_v62  ;;  %v23840_v51 = vld [vmem:[#allocation157_spill] sm:$0xff] }
 0x745   :  { %12073 = vmatpush1.bf16.msra.mxu0 %v16874_v63  ;;  %13617 = vmatpush1.bf16.msra.mxu1 %v16876_v2  ;;  %v1221_v63 = vld [vmem:[#allocation5 + $0x1b78] sm:$0xff]  ;;  %v16898_v2 = vcombine.low %v1208_v45, %v1212_v25 }
 0x746   :  { %12074 = vmatprep.subr.bf16.mxu0 %v16883_v59  ;;  %13618 = vmatprep.subr.bf16.mxu1 %v16885_v56  ;;  %v16900_v59 = vcombine.low %v1209_v3, %v1213_v62  ;;  %v16907_v56 = vcombine.high %v1216_v55, %v1220_v4  ;;  %v16909_v43 = vcombine.high %v1217_v22, %v1221_v63  ;;  %v1236_v3 = vld [vmem:[#allocation5 + $0x1bf0] sm:$0xff]  ;;  %v1233_v62 = vld [vmem:[#allocation5 + $0x1bd8] sm:$0xff] }
 0x747   :  { %11944 = vmatmul.mubr.bf16.gmra.mrb[84].mxu0 %v23837_v47  ;;  %13488 = vmatmul.mubr.bf16.gmra.mrb[84].mxu1 %v23837_v47  ;;  %v23839_v47 = vld [vmem:[#allocation156_spill] sm:$0xff] }
 0x748   :  { %11953 = vmatprep.mubr.bf16.mxu0 %v23838_v28  ;;  %13497 = vmatprep.mubr.bf16.mxu1 %v23838_v28  ;;  %v1232_v28 = vld [vmem:[#allocation5 + $0x1bd0] sm:$0xff] }
 0x749   :  { %12075 = vmatpush1.bf16.msra.mxu0 %v16882_v34  ;;  %13619 = vmatpush1.bf16.msra.mxu1 %v16884_v60  ;;  %v1228_v34 = vld [vmem:[#allocation5 + $0x1bb0] sm:$0xff]  ;;  %v1229_v60 = vld [vmem:[#allocation5 + $0x1bb8] sm:$0xff] }
 0x74a   :  { %12076 = vmatprep.subr.bf16.mxu0 %v16891_v61  ;;  %13620 = vmatprep.subr.bf16.mxu1 %v16893_v18  ;;  %v16906_v61 = vcombine.low %v1216_v55, %v1220_v4  ;;  %v16908_v18 = vcombine.low %v1217_v22, %v1221_v63  ;;  %v16915_v45 = vcombine.high %v1224_v1, %v1228_v34  ;;  %v23842_v4 = vld [vmem:[#allocation159_spill] sm:$0xff] }
 0x74b   :  { %v16917_v25 = vcombine.high %v1225_v41, %v1229_v60  ;;  %v16922_v22 = vcombine.low %v1232_v28, %v1236_v3 }
 0x74d   :  { %12077 = vmatpush1.bf16.msra.mxu0 %v16890_v35  ;;  %13621 = vmatpush1.bf16.msra.mxu1 %v16892_v14  ;;  %v1237_v35 = vld [vmem:[#allocation5 + $0x1bf8] sm:$0xff]  ;;  %v16914_v14 = vcombine.low %v1224_v1, %v1228_v34  ;;  %v23846_v34 = vld [vmem:[#allocation163_spill] sm:$0xff] }
 0x74e   :  { %12078 = vmatprep.subr.bf16.mxu0 %v16899_v38  ;;  %13622 = vmatprep.subr.bf16.mxu1 %v16901_v52  ;;  %v16916_v38 = vcombine.low %v1225_v41, %v1229_v60  ;;  %v16923_v52 = vcombine.high %v1232_v28, %v1236_v3  ;;  %v16925_v55 = vcombine.high %v1233_v62, %v1237_v35  ;;  %v23845_v1 = vld [vmem:[#allocation162_spill] sm:$0xff]  ;;  %v23848_v41 = vld [vmem:[#allocation165_spill] sm:$0xff]  ;;  %v23854_v28 = vld [vmem:[#allocation171_spill] sm:$0xff] }
 0x74f   :  { %11954 = vmatmul.mubr.bf16.gmra.mrb[88].mxu0 %v23839_v47  ;;  %13498 = vmatmul.mubr.bf16.gmra.mrb[88].mxu1 %v23839_v47  ;;  %v23841_v47 = vld [vmem:[#allocation158_spill] sm:$0xff]  ;;  %v16924_v63 = vcombine.low %v1233_v62, %v1237_v35  ;;  %v23855_v3 = vld [vmem:[#allocation172_spill] sm:$0xff]  ;;  %v23856_v62 = vld [vmem:[#allocation173_spill] sm:$0xff] }
 0x750   :  { %11963 = vmatprep.mubr.bf16.mxu0 %v23840_v51  ;;  %13507 = vmatprep.mubr.bf16.mxu1 %v23840_v51  ;;  %v23847_v51 = vld [vmem:[#allocation164_spill] sm:$0xff]  ;;  %v23849_v60 = vld [vmem:[#allocation166_spill] sm:$0xff] }
 0x751   :  { %12079 = vmatpush1.bf16.msra.mxu0 %v16898_v2  ;;  %13623 = vmatpush1.bf16.msra.mxu1 %v16900_v59  ;;  %v16931_v2 = vcombine.high %v22229_v57, %v22231_v26  ;;  %v16933_v59 = vcombine.high %v22239_v0, %v22241_v42  ;;  %v23857_v35 = vld [vmem:[#allocation174_spill] sm:$0xff] }
 0x752   :  { %12080 = vmatprep.subr.bf16.mxu0 %v16907_v56  ;;  %13624 = vmatprep.subr.bf16.mxu1 %v16909_v43  ;;  %v23843_v56 = vld [vmem:[#allocation160_spill] sm:$0xff]  ;;  %v23844_v43 = vld [vmem:[#allocation161_spill] sm:$0xff] }
 0x755   :  { %12081 = vmatpush1.bf16.msra.mxu0 %v16906_v61  ;;  %13625 = vmatpush1.bf16.msra.mxu1 %v16908_v18  ;;  %v23850_v61 = vld [vmem:[#allocation167_spill] sm:$0xff]  ;;  %v23851_v18 = vld [vmem:[#allocation168_spill] sm:$0xff] }
 0x756   :  { %12082 = vmatprep.subr.bf16.mxu0 %v16915_v45  ;;  %13626 = vmatprep.subr.bf16.mxu1 %v16917_v25  ;;  %v23852_v45 = vld [vmem:[#allocation169_spill] sm:$0xff]  ;;  %v23853_v25 = vld [vmem:[#allocation170_spill] sm:$0xff] }
 0x757   :  { %11964 = vmatmul.mubr.bf16.gmra.mrb[92].mxu0 %v23841_v47  ;;  %13508 = vmatmul.mubr.bf16.gmra.mrb[92].mxu1 %v23841_v47  ;;  %v1249_v47 = vld [vmem:[#allocation5 + $0x1c58] sm:$0xff] }
 0x758   :  { %11973 = vmatprep.mubr.bf16.mxu0 %v23842_v4  ;;  %13517 = vmatprep.mubr.bf16.mxu1 %v23842_v4 }
 0x759   :  { %12083 = vmatpush1.bf16.msra.mxu0 %v16914_v14  ;;  %13627 = vmatpush1.bf16.msra.mxu1 %v16916_v38  ;;  %v23858_v14 = vld [vmem:[#allocation175_spill] sm:$0xff]  ;;  %v1248_v38 = vld [vmem:[#allocation5 + $0x1c50] sm:$0xff] }
 0x75a   :  { %12084 = vmatprep.subr.bf16.mxu0 %v16923_v52  ;;  %13628 = vmatprep.subr.bf16.mxu1 %v16925_v55  ;;  %v1252_v52 = vld [vmem:[#allocation5 + $0x1c70] sm:$0xff]  ;;  %v1253_v55 = vld [vmem:[#allocation5 + $0x1c78] sm:$0xff] }
 0x75b   :  { %v16939_v4 = vcombine.high %v1248_v38, %v1252_v52 }
 0x75d   :  { %12085 = vmatpush1.bf16.msra.mxu0 %v16922_v22  ;;  %13629 = vmatpush1.bf16.msra.mxu1 %v16924_v63  ;;  %v1256_v22 = vld [vmem:[#allocation5 + $0x1c90] sm:$0xff] }
 0x75e   :  { %12247 = vmatprep.subr.bf16.mxu0 %v16931_v2  ;;  %13791 = vmatprep.subr.bf16.mxu1 %v16933_v59  ;;  %v1260_v63 = vld [vmem:[#allocation5 + $0x1cb0] sm:$0xff]  ;;  %v16941_v59 = vcombine.high %v1249_v47, %v1253_v55 }
 0x75f   :  { %11974 = vmatmul.mubr.bf16.gmra.mrb[96].mxu0 %v23843_v56  ;;  %13518 = vmatmul.mubr.bf16.gmra.mrb[96].mxu1 %v23843_v56  ;;  %v23859_v2 = vld [vmem:[#allocation176_spill] sm:$0xff]  ;;  %v1257_v56 = vld [vmem:[#allocation5 + $0x1c98] sm:$0xff] }
 0x760   :  { %11983 = vmatprep.mubr.bf16.mxu0 %v23844_v43  ;;  %13527 = vmatprep.mubr.bf16.mxu1 %v23844_v43  ;;  %v1261_v43 = vld [vmem:[#allocation5 + $0x1cb8] sm:$0xff] }
 0x767   :  { %11984 = vmatmul.mubr.bf16.gmra.mrb[100].mxu0 %v23845_v1  ;;  %13528 = vmatmul.mubr.bf16.gmra.mrb[100].mxu1 %v23845_v1  ;;  %v23860_v1 = vcombine.low %v22229_v57, %v22231_v26  ;;  %v1269_v57 = vld [vmem:[#allocation5 + $0x1cf8] sm:$0xff]  ;;  %v16946_v26 = vcombine.low %v1256_v22, %v1260_v63 }
 0x768   :  { %11993 = vmatprep.mubr.bf16.mxu0 %v23846_v34  ;;  %13537 = vmatprep.mubr.bf16.mxu1 %v23846_v34  ;;  %v16938_v34 = vcombine.low %v1248_v38, %v1252_v52  ;;  %v23864_v38 = vld [vmem:[#allocation179_spill] sm:$0xff]  ;;  %v1273_v52 = vld [vmem:[#allocation5 + $0x1d18] sm:$0xff] }
 0x76f   :  { %11994 = vmatmul.mubr.bf16.gmra.mrb[104].mxu0 %v23847_v51  ;;  %13538 = vmatmul.mubr.bf16.gmra.mrb[104].mxu1 %v23847_v51  ;;  %v23861_v51 = vcombine.low %v22239_v0, %v22241_v42  ;;  %v23863_v42 = vld [vmem:[#allocation178_spill] sm:$0xff] }
 0x770   :  { %12003 = vmatprep.mubr.bf16.mxu0 %v23848_v41  ;;  %13547 = vmatprep.mubr.bf16.mxu1 %v23848_v41  ;;  %v23862_v41 = vld [vmem:[#allocation177_spill] sm:$0xff] }
 0x777   :  { %12004 = vmatmul.mubr.bf16.gmra.mrb[108].mxu0 %v23849_v60  ;;  %13548 = vmatmul.mubr.bf16.gmra.mrb[108].mxu1 %v23849_v60  ;;  %v16940_v60 = vcombine.low %v1249_v47, %v1253_v55  ;;  %v1277_v47 = vld [vmem:[#allocation5 + $0x1d38] sm:$0xff] }
 0x778   :  { %12013 = vmatprep.mubr.bf16.mxu0 %v23850_v61  ;;  %13557 = vmatprep.mubr.bf16.mxu1 %v23850_v61  ;;  %v16947_v61 = vcombine.high %v1256_v22, %v1260_v63  ;;  %v16965_v63 = vcombine.high %v1273_v52, %v1277_v47 }
 0x77f   :  { %12014 = vmatmul.mubr.bf16.gmra.mrb[112].mxu0 %v23851_v18  ;;  %13558 = vmatmul.mubr.bf16.gmra.mrb[112].mxu1 %v23851_v18  ;;  %v16949_v18 = vcombine.high %v1257_v56, %v1261_v43 }
 0x780   :  { %12023 = vmatprep.mubr.bf16.mxu0 %v23852_v45  ;;  %13567 = vmatprep.mubr.bf16.mxu1 %v23852_v45  ;;  %v1264_v45 = vld [vmem:[#allocation5 + $0x1cd0] sm:$0xff] }
 0x787   :  { %12024 = vmatmul.mubr.bf16.gmra.mrb[116].mxu0 %v23853_v25  ;;  %13568 = vmatmul.mubr.bf16.gmra.mrb[116].mxu1 %v23853_v25  ;;  %v1268_v25 = vld [vmem:[#allocation5 + $0x1cf0] sm:$0xff] }
 0x788   :  { %12033 = vmatprep.mubr.bf16.mxu0 %v23854_v28  ;;  %13577 = vmatprep.mubr.bf16.mxu1 %v23854_v28  ;;  %v1265_v28 = vld [vmem:[#allocation5 + $0x1cd8] sm:$0xff]  ;;  %v16955_v0 = vcombine.high %v1264_v45, %v1268_v25  ;;  %v16954_v55 = vcombine.low %v1264_v45, %v1268_v25 }
 0x789   :  { %v23866_v45 = vld [vmem:[#allocation181_spill] sm:$0xff] }
 0x78a   :  { %v1289_v25 = vld [vmem:[#allocation5 + $0x1d98] sm:$0xff] }
 0x78f   :  { %12034 = vmatmul.mubr.bf16.gmra.mrb[120].mxu0 %v23855_v3  ;;  %13578 = vmatmul.mubr.bf16.gmra.mrb[120].mxu1 %v23855_v3  ;;  %v16948_v3 = vcombine.low %v1257_v56, %v1261_v43  ;;  %v1281_v56 = vld [vmem:[#allocation5 + $0x1d58] sm:$0xff] }
 0x790   :  { %12043 = vmatprep.mubr.bf16.mxu0 %v23856_v62  ;;  %13587 = vmatprep.mubr.bf16.mxu1 %v23856_v62  ;;  %v16957_v62 = vcombine.high %v1265_v28, %v1269_v57  ;;  %v1285_v43 = vld [vmem:[#allocation5 + $0x1d78] sm:$0xff] }
 0x797   :  { %12044 = vmatmul.mubr.bf16.gmra.mrb[124].mxu0 %v23857_v35  ;;  %13588 = vmatmul.mubr.bf16.gmra.mrb[124].mxu1 %v23857_v35  ;;  %v1272_v35 = vld [vmem:[#allocation5 + $0x1d10] sm:$0xff] }
 0x798   :  { %12086 = vmatprep.mubr.bf16.mxu0 %v23858_v14  ;;  %13630 = vmatprep.mubr.bf16.mxu1 %v23858_v14  ;;  %v1276_v14 = vld [vmem:[#allocation5 + $0x1d30] sm:$0xff] }
 0x799   :  { %v16963_v22 = vcombine.high %v1272_v35, %v1276_v14 }
 0x79f   :  { %12087 = vmatmul.mubr.bf16.vlgmr.msra.gmra.mrb[64].mxu0 %v23859_v2  ;;  %13631 = vmatmul.mubr.bf16.vlgmr.msra.gmra.mrb[64].mxu1 %v23859_v2  ;;  %v1280_v2 = vld [vmem:[#allocation5 + $0x1d50] sm:$0xff] }
 0x7a0   :  { %12248 = vmatpush1.bf16.msra.mxu0 %v23860_v1  ;;  %13792 = vmatpush1.bf16.msra.mxu1 %v23861_v51  ;;  %v16962_v1 = vcombine.low %v1272_v35, %v1276_v14  ;;  %v1297_v35 = vld [vmem:[#allocation5 + $0x1dd8] sm:$0xff] }
 0x7a1   :  { %12096 = vmatprep.mubr.bf16.mxu0 %v23862_v41  ;;  %13640 = vmatprep.mubr.bf16.mxu1 %v23862_v41  ;;  %v23865_v41 = vld [vmem:[#allocation180_spill] sm:$0xff]  ;;  %v1301_v14 = vld [vmem:[#allocation5 + $0x1df8] sm:$0xff] }
 0x7a2   :  { %12249 = vmatprep.subr.bf16.mxu0 %v16939_v4  ;;  %13793 = vmatprep.subr.bf16.mxu1 %v16941_v59  ;;  %v16956_v4 = vcombine.low %v1265_v28, %v1269_v57  ;;  %v1284_v59 = vld [vmem:[#allocation5 + $0x1d70] sm:$0xff]  ;;  %v1293_v28 = vld [vmem:[#allocation5 + $0x1db8] sm:$0xff] }
 0x7a3   :  { %v16971_v51 = vcombine.high %v1280_v2, %v1284_v59  ;;  %v16970_v57 = vcombine.low %v1280_v2, %v1284_v59  ;;  %v23868_v2 = vld [vmem:[#allocation183_spill] sm:$0xff]  ;;  %v1305_v59 = vld [vmem:[#allocation5 + $0x1e18] sm:$0xff] }
 0x7a4   :  { %12250 = vmatpush1.bf16.msra.mxu0 %v16938_v34  ;;  %13794 = vmatpush1.bf16.msra.mxu1 %v16940_v60  ;;  %v16964_v34 = vcombine.low %v1273_v52, %v1277_v47  ;;  %v16973_v60 = vcombine.high %v1281_v56, %v1285_v43  ;;  %v16980_v52 = vcombine.low %v1289_v25, %v1293_v28 }
 0x7a5   :  { %12251 = vmatprep.subr.bf16.mxu0 %v16947_v61  ;;  %13795 = vmatprep.subr.bf16.mxu1 %v16949_v18  ;;  %v1288_v61 = vld [vmem:[#allocation5 + $0x1d90] sm:$0xff] }
 0x7a6   :  { %v1292_v18 = vld [vmem:[#allocation5 + $0x1db0] sm:$0xff] }
 0x7a7   :  { %12097 = vmatmul.mubr.bf16.gmra.mrb[68].mxu0 %v23863_v42  ;;  %13641 = vmatmul.mubr.bf16.gmra.mrb[68].mxu1 %v23863_v42  ;;  %v1296_v42 = vld [vmem:[#allocation5 + $0x1dd0] sm:$0xff] }
 0x7a8   :  { %12106 = vmatprep.mubr.bf16.mxu0 %v23864_v38  ;;  %13650 = vmatprep.mubr.bf16.mxu1 %v23864_v38  ;;  %v16978_v38 = vcombine.low %v1288_v61, %v1292_v18 }
 0x7a9   :  { %12252 = vmatpush1.bf16.msra.mxu0 %v16946_v26  ;;  %13796 = vmatpush1.bf16.msra.mxu1 %v16948_v3  ;;  %v16972_v26 = vcombine.low %v1281_v56, %v1285_v43  ;;  %v16979_v3 = vcombine.high %v1288_v61, %v1292_v18  ;;  %v1309_v56 = vld [vmem:[#allocation5 + $0x1e38] sm:$0xff] }
 0x7aa   :  { %12253 = vmatprep.subr.bf16.mxu0 %v16955_v0  ;;  %13797 = vmatprep.subr.bf16.mxu1 %v16957_v62  ;;  %v16981_v0 = vcombine.high %v1289_v25, %v1293_v28  ;;  %v1300_v62 = vld [vmem:[#allocation5 + $0x1df0] sm:$0xff]  ;;  %v1313_v61 = vld [vmem:[#allocation5 + $0x1e58] sm:$0xff]  ;;  %v16996_v25 = vcombine.low %v1305_v59, %v1309_v56 }
 0x7ab   :  { %v16987_v47 = vcombine.high %v1296_v42, %v1300_v62  ;;  %v16986_v43 = vcombine.low %v1296_v42, %v1300_v62  ;;  %v1317_v18 = vld [vmem:[#allocation5 + $0x1e78] sm:$0xff] }
 0x7ac   :  { %v23870_v42 = vld [vmem:[#allocation185_spill] sm:$0xff] }
 0x7ad   :  { %12254 = vmatpush1.bf16.msra.mxu0 %v16954_v55  ;;  %13798 = vmatpush1.bf16.msra.mxu1 %v16956_v4  ;;  %v23867_v55 = vld [vmem:[#allocation182_spill] sm:$0xff]  ;;  %v16989_v4 = vcombine.high %v1297_v35, %v1301_v14 }
 0x7ae   :  { %12255 = vmatprep.subr.bf16.mxu0 %v16963_v22  ;;  %13799 = vmatprep.subr.bf16.mxu1 %v16965_v63  ;;  %v1304_v22 = vld [vmem:[#allocation5 + $0x1e10] sm:$0xff]  ;;  %v1321_v62 = vld [vmem:[#allocation5 + $0x1e98] sm:$0xff] }
 0x7af   :  { %12107 = vmatmul.mubr.bf16.gmra.mrb[72].mxu0 %v23865_v41  ;;  %13651 = vmatmul.mubr.bf16.gmra.mrb[72].mxu1 %v23865_v41  ;;  %v1308_v63 = vld [vmem:[#allocation5 + $0x1e30] sm:$0xff] }
 0x7b0   :  { %12116 = vmatprep.mubr.bf16.mxu0 %v23866_v45  ;;  %13660 = vmatprep.mubr.bf16.mxu1 %v23866_v45  ;;  %v1312_v41 = vld [vmem:[#allocation5 + $0x1e50] sm:$0xff]  ;;  %v16994_v45 = vcombine.low %v1304_v22, %v1308_v63 }
 0x7b1   :  { %12256 = vmatpush1.bf16.msra.mxu0 %v16962_v1  ;;  %13800 = vmatpush1.bf16.msra.mxu1 %v16964_v34  ;;  %v16988_v1 = vcombine.low %v1297_v35, %v1301_v14  ;;  %v16995_v34 = vcombine.high %v1304_v22, %v1308_v63  ;;  %v1325_v35 = vld [vmem:[#allocation5 + $0x1eb8] sm:$0xff] }
 0x7b2   :  { %12257 = vmatprep.subr.bf16.mxu0 %v16971_v51  ;;  %13801 = vmatprep.subr.bf16.mxu1 %v16973_v60  ;;  %v16997_v51 = vcombine.high %v1305_v59, %v1309_v56  ;;  %v1316_v60 = vld [vmem:[#allocation5 + $0x1e70] sm:$0xff]  ;;  %v1329_v22 = vld [vmem:[#allocation5 + $0x1ed8] sm:$0xff]  ;;  %v17012_v59 = vcombine.low %v1321_v62, %v1325_v35 }
 0x7b3   :  { %v17003_v28 = vcombine.high %v1312_v41, %v1316_v60  ;;  %v17002_v14 = vcombine.low %v1312_v41, %v1316_v60  ;;  %v1333_v63 = vld [vmem:[#allocation5 + $0x1ef8] sm:$0xff]  ;;  %v23872_v41 = vld [vmem:[#allocation187_spill] sm:$0xff] }
 0x7b4   :  { %v1337_v60 = vld [vmem:[#allocation5 + $0x1f18] sm:$0xff] }
 0x7b5   :  { %12258 = vmatpush1.bf16.msra.mxu0 %v16970_v57  ;;  %13802 = vmatpush1.bf16.msra.mxu1 %v16972_v26  ;;  %v23869_v57 = vld [vmem:[#allocation184_spill] sm:$0xff]  ;;  %v17005_v26 = vcombine.high %v1313_v61, %v1317_v18 }
 0x7b6   :  { %12259 = vmatprep.subr.bf16.mxu0 %v16979_v3  ;;  %13803 = vmatprep.subr.bf16.mxu1 %v16981_v0  ;;  %v1320_v3 = vld [vmem:[#allocation5 + $0x1e90] sm:$0xff] }
 0x7b7   :  { %12117 = vmatmul.mubr.bf16.gmra.mrb[76].mxu0 %v23867_v55  ;;  %13661 = vmatmul.mubr.bf16.gmra.mrb[76].mxu1 %v23867_v55  ;;  %v1324_v0 = vld [vmem:[#allocation5 + $0x1eb0] sm:$0xff] }
 0x7b8   :  { %12126 = vmatprep.mubr.bf16.mxu0 %v23868_v2  ;;  %13670 = vmatprep.mubr.bf16.mxu1 %v23868_v2  ;;  %v1328_v55 = vld [vmem:[#allocation5 + $0x1ed0] sm:$0xff]  ;;  %v17010_v2 = vcombine.low %v1320_v3, %v1324_v0 }
 0x7b9   :  { %12260 = vmatpush1.bf16.msra.mxu0 %v16978_v38  ;;  %13804 = vmatpush1.bf16.msra.mxu1 %v16980_v52  ;;  %v17004_v38 = vcombine.low %v1313_v61, %v1317_v18  ;;  %v17011_v52 = vcombine.high %v1320_v3, %v1324_v0  ;;  %v1341_v61 = vld [vmem:[#allocation5 + $0x1f38] sm:$0xff] }
 0x7ba   :  { %12261 = vmatprep.subr.bf16.mxu0 %v16987_v47  ;;  %13805 = vmatprep.subr.bf16.mxu1 %v16989_v4  ;;  %v17013_v47 = vcombine.high %v1321_v62, %v1325_v35  ;;  %v1332_v4 = vld [vmem:[#allocation5 + $0x1ef0] sm:$0xff]  ;;  %v1345_v3 = vld [vmem:[#allocation5 + $0x1f58] sm:$0xff]  ;;  %v17028_v62 = vcombine.low %v1337_v60, %v1341_v61 }
 0x7bb   :  { %v17019_v56 = vcombine.high %v1328_v55, %v1332_v4  ;;  %v17018_v18 = vcombine.low %v1328_v55, %v1332_v4  ;;  %v1349_v0 = vld [vmem:[#allocation5 + $0x1f78] sm:$0xff] }
 0x7bc   :  { %v23874_v55 = vld [vmem:[#allocation189_spill] sm:$0xff] }
 0x7bd   :  { %12262 = vmatpush1.bf16.msra.mxu0 %v16986_v43  ;;  %13806 = vmatpush1.bf16.msra.mxu1 %v16988_v1  ;;  %v23871_v43 = vld [vmem:[#allocation186_spill] sm:$0xff]  ;;  %v17021_v1 = vcombine.high %v1329_v22, %v1333_v63 }
 0x7be   :  { %12263 = vmatprep.subr.bf16.mxu0 %v16995_v34  ;;  %13807 = vmatprep.subr.bf16.mxu1 %v16997_v51  ;;  %v1336_v34 = vld [vmem:[#allocation5 + $0x1f10] sm:$0xff]  ;;  %v1353_v4 = vld [vmem:[#allocation5 + $0x1f98] sm:$0xff] }
 0x7bf   :  { %12127 = vmatmul.mubr.bf16.gmra.mrb[80].mxu0 %v23869_v57  ;;  %13671 = vmatmul.mubr.bf16.gmra.mrb[80].mxu1 %v23869_v57  ;;  %v1340_v51 = vld [vmem:[#allocation5 + $0x1f30] sm:$0xff] }
 0x7c0   :  { %12136 = vmatprep.mubr.bf16.mxu0 %v23870_v42  ;;  %13680 = vmatprep.mubr.bf16.mxu1 %v23870_v42  ;;  %v1344_v57 = vld [vmem:[#allocation5 + $0x1f50] sm:$0xff]  ;;  %v17026_v42 = vcombine.low %v1336_v34, %v1340_v51 }
 0x7c1   :  { %12264 = vmatpush1.bf16.msra.mxu0 %v16994_v45  ;;  %13808 = vmatpush1.bf16.msra.mxu1 %v16996_v25  ;;  %v17020_v45 = vcombine.low %v1329_v22, %v1333_v63  ;;  %v17027_v25 = vcombine.high %v1336_v34, %v1340_v51  ;;  %v1357_v22 = vld [vmem:[#allocation5 + $0x1fb8] sm:$0xff] }
 0x7c2   :  { %12265 = vmatprep.subr.bf16.mxu0 %v17003_v28  ;;  %13809 = vmatprep.subr.bf16.mxu1 %v17005_v26  ;;  %v17029_v28 = vcombine.high %v1337_v60, %v1341_v61  ;;  %v1348_v26 = vld [vmem:[#allocation5 + $0x1f70] sm:$0xff]  ;;  %v1361_v34 = vld [vmem:[#allocation5 + $0x1fd8] sm:$0xff]  ;;  %v17044_v60 = vcombine.low %v1353_v4, %v1357_v22 }
 0x7c3   :  { %v17035_v35 = vcombine.high %v1344_v57, %v1348_v26  ;;  %v17034_v63 = vcombine.low %v1344_v57, %v1348_v26  ;;  %v1365_v51 = vld [vmem:[#allocation5 + $0x1ff8] sm:$0xff]  ;;  %v19660_v26 = vld [vmem:[#allocation8 + $0x40] sm:$0xff]  }
 0x7c4   :  { %v17052_v57 = vcombine.low %v1361_v34, %v1365_v51 }
 0x7c5   :  { %12266 = vmatpush1.bf16.msra.mxu0 %v17002_v14  ;;  %13810 = vmatpush1.bf16.msra.mxu1 %v17004_v38  ;;  %v23873_v14 = vld [vmem:[#allocation188_spill] sm:$0xff]  ;;  %v17037_v38 = vcombine.high %v1345_v3, %v1349_v0 }
 0x7c6   :  { %12267 = vmatprep.subr.bf16.mxu0 %v17011_v52  ;;  %13811 = vmatprep.subr.bf16.mxu1 %v17013_v47  ;;  %v1352_v52 = vld [vmem:[#allocation5 + $0x1f90] sm:$0xff] }
 0x7c7   :  { %12137 = vmatmul.mubr.bf16.gmra.mrb[84].mxu0 %v23871_v43  ;;  %13681 = vmatmul.mubr.bf16.gmra.mrb[84].mxu1 %v23871_v43  ;;  %v1356_v47 = vld [vmem:[#allocation5 + $0x1fb0] sm:$0xff] }
 0x7c8   :  { %12146 = vmatprep.mubr.bf16.mxu0 %v23872_v41  ;;  %13690 = vmatprep.mubr.bf16.mxu1 %v23872_v41  ;;  %v1360_v43 = vld [vmem:[#allocation5 + $0x1fd0] sm:$0xff]  ;;  %v17042_v41 = vcombine.low %v1352_v52, %v1356_v47 }
 0x7c9   :  { %12268 = vmatpush1.bf16.msra.mxu0 %v17010_v2  ;;  %13812 = vmatpush1.bf16.msra.mxu1 %v17012_v59  ;;  %v17036_v2 = vcombine.low %v1345_v3, %v1349_v0  ;;  %v17043_v59 = vcombine.high %v1352_v52, %v1356_v47  ;;  %v19662_v3 = vld [vmem:[#allocation8 + $0xc0] sm:$0xff]   ;;  %v23883_v52 = vld [vmem:[#allocation198_spill] sm:$0xff] }
 0x7ca   :  { %12269 = vmatprep.subr.bf16.mxu0 %v17019_v56  ;;  %13813 = vmatprep.subr.bf16.mxu1 %v17021_v1  ;;  %v17045_v56 = vcombine.high %v1353_v4, %v1357_v22  ;;  %v1364_v1 = vld [vmem:[#allocation5 + $0x1ff0] sm:$0xff]  ;;  %v23884_v47 = vld [vmem:[#allocation199_spill] sm:$0xff]  ;;  %v23887_v22 = vld [vmem:[#allocation202_spill] sm:$0xff] }
 0x7cb   :  { %v17051_v61 = vcombine.high %v1360_v43, %v1364_v1  ;;  %v23877_v0 = vld [vmem:[#allocation192_spill] sm:$0xff]  ;;  %v23886_v4 = vld [vmem:[#allocation201_spill] sm:$0xff] }
 0x7cd   :  { %12270 = vmatpush1.bf16.msra.mxu0 %v17018_v18  ;;  %13814 = vmatpush1.bf16.msra.mxu1 %v17020_v45  ;;  %v23875_v18 = vld [vmem:[#allocation190_spill] sm:$0xff]  ;;  %v17053_v45 = vcombine.high %v1361_v34, %v1365_v51  ;;  %v19663_v34 = vld [vmem:[#allocation8 + $0x80] sm:$0xff]   ;;  %v19664_v51 = vld [vmem:[#allocation8 + $0x48] sm:$0xff]  }
 0x7ce   :  { %12271 = vmatprep.subr.bf16.mxu0 %v17027_v25  ;;  %13815 = vmatprep.subr.bf16.mxu1 %v17029_v28  ;;  %v23876_v25 = vld [vmem:[#allocation191_spill] sm:$0xff]  ;;  %v17050_v28 = vcombine.low %v1360_v43, %v1364_v1 }
 0x7cf   :  { %12147 = vmatmul.mubr.bf16.gmra.mrb[88].mxu0 %v23873_v14  ;;  %13691 = vmatmul.mubr.bf16.gmra.mrb[88].mxu1 %v23873_v14  ;;  %v23881_v14 = vld [vmem:[#allocation196_spill] sm:$0xff]  ;;  %v23892_v43 = vld [vmem:[#allocation207_spill] sm:$0xff] }
 0x7d0   :  { %12156 = vmatprep.mubr.bf16.mxu0 %v23874_v55  ;;  %13700 = vmatprep.mubr.bf16.mxu1 %v23874_v55  ;;  %v23885_v55 = vld [vmem:[#allocation200_spill] sm:$0xff] }
 0x7d1   :  { %12272 = vmatpush1.bf16.msra.mxu0 %v17026_v42  ;;  %13816 = vmatpush1.bf16.msra.mxu1 %v17028_v62  ;;  %v23878_v42 = vld [vmem:[#allocation193_spill] sm:$0xff]  ;;  %v23879_v62 = vld [vmem:[#allocation194_spill] sm:$0xff]  ;;  %v19661_v1 = vld [vmem:[#allocation8] sm:$0xff]  }
 0x7d2   :  { %12273 = vmatprep.subr.bf16.mxu0 %v17035_v35  ;;  %13817 = vmatprep.subr.bf16.mxu1 %v17037_v38  ;;  %v23880_v35 = vld [vmem:[#allocation195_spill] sm:$0xff]  ;;  %v23882_v38 = vld [vmem:[#allocation197_spill] sm:$0xff] }
 0x7d5   :  { %12274 = vmatpush1.bf16.msra.mxu0 %v17034_v63  ;;  %13818 = vmatpush1.bf16.msra.mxu1 %v17036_v2  ;;  %v23888_v63 = vld [vmem:[#allocation203_spill] sm:$0xff]  ;;  %v23889_v2 = vld [vmem:[#allocation204_spill] sm:$0xff] }
 0x7d6   :  { %12275 = vmatprep.subr.bf16.mxu0 %v17043_v59  ;;  %13819 = vmatprep.subr.bf16.mxu1 %v17045_v56  ;;  %v23890_v59 = vld [vmem:[#allocation205_spill] sm:$0xff]  ;;  %v23891_v56 = vld [vmem:[#allocation206_spill] sm:$0xff] }
 0x7d7   :  { %12157 = vmatmul.mubr.bf16.gmra.mrb[92].mxu0 %v23875_v18  ;;  %13701 = vmatmul.mubr.bf16.gmra.mrb[92].mxu1 %v23875_v18  ;;  %v23894_v18 = vld [vmem:[#allocation209_spill] sm:$0xff] }
 0x7d8   :  { %12166 = vmatprep.mubr.bf16.mxu0 %v23876_v25  ;;  %13710 = vmatprep.mubr.bf16.mxu1 %v23876_v25  ;;  %v19668_v25 = vld [vmem:[#allocation8 + $0x50] sm:$0xff]  }
 0x7d9   :  { %12276 = vmatpush1.bf16.msra.mxu0 %v17042_v41  ;;  %13820 = vmatpush1.bf16.msra.mxu1 %v17044_v60  ;;  %v23893_v41 = vld [vmem:[#allocation208_spill] sm:$0xff] }
 0x7da   :  { %12277 = vmatprep.subr.bf16.mxu0 %v17051_v61  ;;  %13821 = vmatprep.subr.bf16.mxu1 %v17053_v45  ;;  %v19666_v60 = vld [vmem:[#allocation8 + $0xc8] sm:$0xff]  }
 0x7db   :  { %v19665_v61 = vld [vmem:[#allocation8 + $0x8] sm:$0xff]  }
 0x7dc   :  { %v19667_v45 = vld [vmem:[#allocation8 + $0x88] sm:$0xff]  }
 0x7dd   :  { %12278 = vmatpush1.bf16.msra.mxu0 %v17050_v28  ;;  %13822 = vmatpush1.bf16.msra.mxu1 %v17052_v57  ;;  %v19670_v28 = vld [vmem:[#allocation8 + $0xd0] sm:$0xff]  }
 0x7de   :  { %17151 = vmatprep.subr.bf16.mxu0 %v19660_v26  ;;  %17263 = vmatprep.subr.bf16.mxu1 %v19662_v3  ;;  %v19669_v57 = vld [vmem:[#allocation8 + $0x10] sm:$0xff]   ;;  %v19672_v3 = vld [vmem:[#allocation8 + $0x58] sm:$0xff]  }
 0x7df   :  { %12167 = vmatmul.mubr.bf16.gmra.mrb[96].mxu0 %v23877_v0  ;;  %13711 = vmatmul.mubr.bf16.gmra.mrb[96].mxu1 %v23877_v0  ;;  %v19671_v26 = vld [vmem:[#allocation8 + $0x90] sm:$0xff]  }
 0x7e0   :  { %12176 = vmatprep.mubr.bf16.mxu0 %v23878_v42  ;;  %13720 = vmatprep.mubr.bf16.mxu1 %v23878_v42  ;;  %v23895_v0 = vld [vmem:[#allocation210_spill] sm:$0xff] }
 0x7e1   :  { %v19674_v42 = vld [vmem:[#allocation8 + $0xd8] sm:$0xff]  }
 0x7e7   :  { %12177 = vmatmul.mubr.bf16.gmra.mrb[100].mxu0 %v23879_v62  ;;  %13721 = vmatmul.mubr.bf16.gmra.mrb[100].mxu1 %v23879_v62  ;;  %v23896_v62 = vld [vmem:[#allocation211_spill] sm:$0xff] }
 0x7e8   :  { %12186 = vmatprep.mubr.bf16.mxu0 %v23880_v35  ;;  %13730 = vmatprep.mubr.bf16.mxu1 %v23880_v35  ;;  %v19673_v35 = vld [vmem:[#allocation8 + $0x18] sm:$0xff]  }
 0x7ef   :  { %12187 = vmatmul.mubr.bf16.gmra.mrb[104].mxu0 %v23881_v14  ;;  %13731 = vmatmul.mubr.bf16.gmra.mrb[104].mxu1 %v23881_v14  ;;  %v19675_v14 = vld [vmem:[#allocation8 + $0x98] sm:$0xff]  }
 0x7f0   :  { %12196 = vmatprep.mubr.bf16.mxu0 %v23882_v38  ;;  %13740 = vmatprep.mubr.bf16.mxu1 %v23882_v38  ;;  %v19676_v38 = vld [vmem:[#allocation8 + $0x60] sm:$0xff]  }
 0x7f7   :  { %12197 = vmatmul.mubr.bf16.gmra.mrb[108].mxu0 %v23883_v52  ;;  %13741 = vmatmul.mubr.bf16.gmra.mrb[108].mxu1 %v23883_v52  ;;  %v19678_v52 = vld [vmem:[#allocation8 + $0xe0] sm:$0xff]  }
 0x7f8   :  { %12206 = vmatprep.mubr.bf16.mxu0 %v23884_v47  ;;  %13750 = vmatprep.mubr.bf16.mxu1 %v23884_v47  ;;  %v19677_v47 = vld [vmem:[#allocation8 + $0x20] sm:$0xff]  }
 0x7ff   :  { %12207 = vmatmul.mubr.bf16.gmra.mrb[112].mxu0 %v23885_v55  ;;  %13751 = vmatmul.mubr.bf16.gmra.mrb[112].mxu1 %v23885_v55  ;;  %v19679_v55 = vld [vmem:[#allocation8 + $0xa0] sm:$0xff]  }
 0x800   :  { %12216 = vmatprep.mubr.bf16.mxu0 %v23886_v4  ;;  %13760 = vmatprep.mubr.bf16.mxu1 %v23886_v4  ;;  %v19680_v4 = vld [vmem:[#allocation8 + $0x68] sm:$0xff]  }
 0x807   :  { %12217 = vmatmul.mubr.bf16.gmra.mrb[116].mxu0 %v23887_v22  ;;  %13761 = vmatmul.mubr.bf16.gmra.mrb[116].mxu1 %v23887_v22  ;;  %v23897_v22 = vld [vmem:[#allocation212_spill] sm:$0xff] }
 0x808   :  { %12226 = vmatprep.mubr.bf16.mxu0 %v23888_v63  ;;  %13770 = vmatprep.mubr.bf16.mxu1 %v23888_v63  ;;  %v19682_v63 = vld [vmem:[#allocation8 + $0xe8] sm:$0xff]  }
 0x80f   :  { %12227 = vmatmul.mubr.bf16.gmra.mrb[120].mxu0 %v23889_v2  ;;  %13771 = vmatmul.mubr.bf16.gmra.mrb[120].mxu1 %v23889_v2  ;;  %v23898_v2 = vld [vmem:[#allocation213_spill] sm:$0xff] }
 0x810   :  { %12236 = vmatprep.mubr.bf16.mxu0 %v23890_v59  ;;  %13780 = vmatprep.mubr.bf16.mxu1 %v23890_v59  ;;  %v19681_v59 = vld [vmem:[#allocation8 + $0x28] sm:$0xff]  }
 0x817   :  { %12237 = vmatmul.mubr.bf16.gmra.mrb[124].mxu0 %v23891_v56  ;;  %13781 = vmatmul.mubr.bf16.gmra.mrb[124].mxu1 %v23891_v56  ;;  %v19683_v56 = vld [vmem:[#allocation8 + $0xa8] sm:$0xff]  }
 0x818   :  { %12279 = vmatprep.mubr.bf16.mxu0 %v23892_v43  ;;  %13823 = vmatprep.mubr.bf16.mxu1 %v23892_v43  ;;  %v19684_v43 = vld [vmem:[#allocation8 + $0x70] sm:$0xff]  }
 0x81f   :  { %12280 = vmatmul.mubr.bf16.vlgmr.msra.gmra.mrb[64].mxu0 %v23893_v41  ;;  %13824 = vmatmul.mubr.bf16.vlgmr.msra.gmra.mrb[64].mxu1 %v23893_v41  ;;  %v19688_v41 = vld [vmem:[#allocation8 + $0x78] sm:$0xff]  }
 0x820   :  { %17152 = vmatpush3.bf16.msra.mxu0 %v19661_v1  ;;  %17264 = vmatpush3.bf16.msra.mxu1 %v19663_v34  ;;  %v19686_v1 = vld [vmem:[#allocation8 + $0xf0] sm:$0xff]  }
 0x821   :  { %12289 = vmatprep.mubr.bf16.mxu0 %v23894_v18  ;;  %13833 = vmatprep.mubr.bf16.mxu1 %v23894_v18  ;;  %v19685_v34 = vld [vmem:[#allocation8 + $0x30] sm:$0xff]   ;;  %v23900_v18 = vld [vmem:[#allocation215_spill] sm:$0xff] }
 0x822   :  { %17153 = vmatprep.subr.bf16.mxu0 %v19664_v51  ;;  %17265 = vmatprep.subr.bf16.mxu1 %v19666_v60  ;;  %v19687_v51 = vld [vmem:[#allocation8 + $0xb0] sm:$0xff]  }
 0x823   :  { %v23899_v60 = vld [vmem:[#allocation214_spill] sm:$0xff] }
 0x824   :  { %17154 = vmatpush3.bf16.msra.mxu0 %v19665_v61  ;;  %17266 = vmatpush3.bf16.msra.mxu1 %v19667_v45  ;;  %v19690_v61 = vld [vmem:[#allocation8 + $0xf8] sm:$0xff]  }
 0x825   :  { %17155 = vmatprep.subr.bf16.mxu0 %v19668_v25  ;;  %17267 = vmatprep.subr.bf16.mxu1 %v19670_v28  ;;  %v19689_v45 = vld [vmem:[#allocation8 + $0x38] sm:$0xff]   ;;  %v19692_v28 = vld [vmem:[#allocation8 + $0x140] sm:$0xff]  }
 0x826   :  { %v19691_v25 = vld [vmem:[#allocation8 + $0xb8] sm:$0xff]  }
 0x827   :  { %12290 = vmatmul.mubr.bf16.gmra.mrb[68].mxu0 %v23895_v0  ;;  %13834 = vmatmul.mubr.bf16.gmra.mrb[68].mxu1 %v23895_v0  ;;  %v23903_v0 = vld [vmem:[#allocation218_spill] sm:$0xff] }
 0x828   :  { %12299 = vmatprep.mubr.bf16.mxu0 %v23896_v62  ;;  %13843 = vmatprep.mubr.bf16.mxu1 %v23896_v62  ;;  %v23905_v62 = vld [vmem:[#allocation220_spill] sm:$0xff] }
 0x829   :  { %17156 = vmatpush3.bf16.msra.mxu0 %v19669_v57  ;;  %17268 = vmatpush3.bf16.msra.mxu1 %v19671_v26  ;;  %v19694_v57 = vld [vmem:[#allocation8 + $0x1c0] sm:$0xff]  }
 0x82a   :  { %17157 = vmatprep.subr.bf16.mxu0 %v19672_v3  ;;  %17269 = vmatprep.subr.bf16.mxu1 %v19674_v42  ;;  %v23901_v26 = vld [vmem:[#allocation216_spill] sm:$0xff]  ;;  %v23902_v3 = vld [vmem:[#allocation217_spill] sm:$0xff]  ;;  %v23904_v42 = vld [vmem:[#allocation219_spill] sm:$0xff] }
 0x82d   :  { %17158 = vmatpush3.bf16.msra.mxu0 %v19673_v35  ;;  %17270 = vmatpush3.bf16.msra.mxu1 %v19675_v14  ;;  %v23906_v35 = vld [vmem:[#allocation221_spill] sm:$0xff]  ;;  %v23915_v14 = vld [vmem:[#allocation230_spill] sm:$0xff] }
 0x82e   :  { %17159 = vmatprep.subr.bf16.mxu0 %v19676_v38  ;;  %17271 = vmatprep.subr.bf16.mxu1 %v19678_v52  ;;  %v19693_v38 = vld [vmem:[#allocation8 + $0x100] sm:$0xff]  }
 0x82f   :  { %12300 = vmatmul.mubr.bf16.gmra.mrb[72].mxu0 %v23897_v22  ;;  %13844 = vmatmul.mubr.bf16.gmra.mrb[72].mxu1 %v23897_v22  ;;  %v19695_v52 = vld [vmem:[#allocation8 + $0x180] sm:$0xff]   ;;  %v19699_v22 = vld [vmem:[#allocation8 + $0x188] sm:$0xff]  }
 0x830   :  { %12309 = vmatprep.mubr.bf16.mxu0 %v23898_v2  ;;  %13853 = vmatprep.mubr.bf16.mxu1 %v23898_v2  ;;  %v19704_v2 = vld [vmem:[#allocation8 + $0x158] sm:$0xff]  }
 0x831   :  { %17160 = vmatpush3.bf16.msra.mxu0 %v19677_v47  ;;  %17272 = vmatpush3.bf16.msra.mxu1 %v19679_v55  ;;  %v19696_v47 = vld [vmem:[#allocation8 + $0x148] sm:$0xff]  }
 0x832   :  { %17161 = vmatprep.subr.bf16.mxu0 %v19680_v4  ;;  %17273 = vmatprep.subr.bf16.mxu1 %v19682_v63  ;;  %v19698_v55 = vld [vmem:[#allocation8 + $0x1c8] sm:$0xff]   ;;  %v19701_v63 = vld [vmem:[#allocation8 + $0x110] sm:$0xff]  }
 0x833   :  { %v19697_v4 = vld [vmem:[#allocation8 + $0x108] sm:$0xff]  }
 0x835   :  { %17162 = vmatpush3.bf16.msra.mxu0 %v19681_v59  ;;  %17274 = vmatpush3.bf16.msra.mxu1 %v19683_v56  ;;  %v19708_v59 = vld [vmem:[#allocation8 + $0x160] sm:$0xff]  }
 0x836   :  { %17163 = vmatprep.subr.bf16.mxu0 %v19684_v43  ;;  %17275 = vmatprep.subr.bf16.mxu1 %v19686_v1  ;;  %v19710_v56 = vld [vmem:[#allocation8 + $0x1e0] sm:$0xff]   ;;  %v19712_v1 = vld [vmem:[#allocation8 + $0x168] sm:$0xff]  }
 0x837   :  { %12310 = vmatmul.mubr.bf16.gmra.mrb[76].mxu0 %v23899_v60  ;;  %13854 = vmatmul.mubr.bf16.gmra.mrb[76].mxu1 %v23899_v60  ;;  %v19709_v43 = vld [vmem:[#allocation8 + $0x120] sm:$0xff]   ;;  %v19720_v60 = vld [vmem:[#allocation8 + $0x178] sm:$0xff]  }
 0x838   :  { %12319 = vmatprep.mubr.bf16.mxu0 %v23900_v18  ;;  %13863 = vmatprep.mubr.bf16.mxu1 %v23900_v18  ;;  %v23917_v18 = vld [vmem:[#allocation233_spill] sm:$0xff] }
 0x839   :  { %17164 = vmatpush3.bf16.msra.mxu0 %v19685_v34  ;;  %17276 = vmatpush3.bf16.msra.mxu1 %v19687_v51  ;;  %v19716_v34 = vld [vmem:[#allocation8 + $0x170] sm:$0xff]  }
 0x83a   :  { %17165 = vmatprep.subr.bf16.mxu0 %v19688_v41  ;;  %17277 = vmatprep.subr.bf16.mxu1 %v19690_v61  ;;  %v19718_v51 = vld [vmem:[#allocation8 + $0x1f0] sm:$0xff]   ;;  %v23916_v61 = vld [vmem:[#allocation232_spill] sm:$0xff] }
 0x83b   :  { %v19717_v41 = vld [vmem:[#allocation8 + $0x130] sm:$0xff]  }
 0x83d   :  { %17166 = vmatpush3.bf16.msra.mxu0 %v19689_v45  ;;  %17278 = vmatpush3.bf16.msra.mxu1 %v19691_v25  ;;  %v23922_v45 = vld [vmem:[#allocation236_spill] sm:$0xff]  ;;  %v23923_v25 = vld [vmem:[#allocation18_spill] sm:$0xff] }
 0x83e   :  { %17375 = vmatprep.subr.bf16.mxu0 %v19692_v28  ;;  %17487 = vmatprep.subr.bf16.mxu1 %v19694_v57  ;;  %v23924_v28 = vld [vmem:[#allocation19_spill] sm:$0xff]  ;;  %v23925_v57 = vld [vmem:[#allocation237_spill] sm:$0xff] }
 0x83f   :  { %12320 = vmatmul.mubr.bf16.gmra.mrb[80].mxu0 %v23901_v26  ;;  %13864 = vmatmul.mubr.bf16.gmra.mrb[80].mxu1 %v23901_v26  ;;  %v23926_v26 = vld [vmem:[#allocation238_spill] sm:$0xff] }
 0x840   :  { %12329 = vmatprep.mubr.bf16.mxu0 %v23902_v3  ;;  %13873 = vmatprep.mubr.bf16.mxu1 %v23902_v3  ;;  %v23927_v3 = vld [vmem:[#allocation20_spill] sm:$0xff] }
 0x847   :  { %12330 = vmatmul.mubr.bf16.gmra.mrb[84].mxu0 %v23903_v0  ;;  %13874 = vmatmul.mubr.bf16.gmra.mrb[84].mxu1 %v23903_v0  ;;  %v23929_v0 = vld [vmem:[#allocation239_spill] sm:$0xff] }
 0x848   :  { %12339 = vmatprep.mubr.bf16.mxu0 %v23904_v42  ;;  %13883 = vmatprep.mubr.bf16.mxu1 %v23904_v42  ;;  %v23930_v42 = vld [vmem:[#allocation240_spill] sm:$0xff] }
 0x84f   :  { %12340 = vmatmul.mubr.bf16.gmra.mrb[88].mxu0 %v23905_v62  ;;  %13884 = vmatmul.mubr.bf16.gmra.mrb[88].mxu1 %v23905_v62  ;;  %v23931_v62 = vld [vmem:[#allocation22_spill] sm:$0xff] }
 0x850   :  { %12349 = vmatprep.mubr.bf16.mxu0 %v23906_v35  ;;  %13893 = vmatprep.mubr.bf16.mxu1 %v23906_v35  ;;  %v23932_v35 = vld [vmem:[#allocation23_spill] sm:$0xff] }
 0x857   :  { %12350 = vmatmul.mubr.bf16.gmra.mrb[92].mxu0 %v21226_v8  ;;  %13894 = vmatmul.mubr.bf16.gmra.mrb[92].mxu1 %v21226_v8  ;;  %v23907_v8 = vld [vmem:[#allocation222_spill] sm:$0xff] }
 0x858   :  { %12359 = vmatprep.mubr.bf16.mxu0 %v21228_v12  ;;  %13903 = vmatprep.mubr.bf16.mxu1 %v21228_v12  ;;  %v23908_v12 = vld [vmem:[#allocation223_spill] sm:$0xff] }
 0x85f   :  { %12360 = vmatmul.mubr.bf16.gmra.mrb[96].mxu0 %v21236_v10  ;;  %13904 = vmatmul.mubr.bf16.gmra.mrb[96].mxu1 %v21236_v10  ;;  %v23909_v10 = vld [vmem:[#allocation224_spill] sm:$0xff] }
 0x860   :  { %12369 = vmatprep.mubr.bf16.mxu0 %v21240_v44  ;;  %13913 = vmatprep.mubr.bf16.mxu1 %v21240_v44  ;;  %v23910_v44 = vld [vmem:[#allocation225_spill] sm:$0xff] }
 0x867   :  { %12370 = vmatmul.mubr.bf16.gmra.mrb[100].mxu0 %v21246_v13  ;;  %13914 = vmatmul.mubr.bf16.gmra.mrb[100].mxu1 %v21246_v13  ;;  %v23911_v13 = vld [vmem:[#allocation226_spill] sm:$0xff] }
 0x868   :  { %12379 = vmatprep.mubr.bf16.mxu0 %v21248_v17  ;;  %13923 = vmatprep.mubr.bf16.mxu1 %v21248_v17  ;;  %v23912_v17 = vld [vmem:[#allocation227_spill] sm:$0xff] }
 0x86f   :  { %12380 = vmatmul.mubr.bf16.gmra.mrb[104].mxu0 %v21254_v5  ;;  %13924 = vmatmul.mubr.bf16.gmra.mrb[104].mxu1 %v21254_v5  ;;  %v23913_v5 = vld [vmem:[#allocation228_spill] sm:$0xff] }
 0x870   :  { %12389 = vmatprep.mubr.bf16.mxu0 %v21256_v31  ;;  %13933 = vmatprep.mubr.bf16.mxu1 %v21256_v31  ;;  %v23914_v31 = vld [vmem:[#allocation229_spill] sm:$0xff] }
 0x877   :  { %12390 = vmatmul.mubr.bf16.gmra.mrb[108].mxu0 %v23907_v8  ;;  %13934 = vmatmul.mubr.bf16.gmra.mrb[108].mxu1 %v23907_v8  ;;  %v23933_v8 = vld [vmem:[#allocation241_spill] sm:$0xff] }
 0x878   :  { %12399 = vmatprep.mubr.bf16.mxu0 %v23908_v12  ;;  %13943 = vmatprep.mubr.bf16.mxu1 %v23908_v12  ;;  %v23934_v12 = vld [vmem:[#allocation242_spill] sm:$0xff] }
 0x87f   :  { %12400 = vmatmul.mubr.bf16.gmra.mrb[112].mxu0 %v23909_v10  ;;  %13944 = vmatmul.mubr.bf16.gmra.mrb[112].mxu1 %v23909_v10  ;;  %v23935_v10 = vld [vmem:[#allocation24_spill] sm:$0xff] }
 0x880   :  { %12409 = vmatprep.mubr.bf16.mxu0 %v23910_v44  ;;  %13953 = vmatprep.mubr.bf16.mxu1 %v23910_v44  ;;  %v23936_v44 = vld [vmem:[#allocation25_spill] sm:$0xff] }
 0x887   :  { %12410 = vmatmul.mubr.bf16.gmra.mrb[116].mxu0 %v23911_v13  ;;  %13954 = vmatmul.mubr.bf16.gmra.mrb[116].mxu1 %v23911_v13  ;;  %v23937_v13 = vld [vmem:[#allocation243_spill] sm:$0xff] }
 0x888   :  { %12419 = vmatprep.mubr.bf16.mxu0 %v23912_v17  ;;  %13963 = vmatprep.mubr.bf16.mxu1 %v23912_v17  ;;  %v23938_v17 = vld [vmem:[#allocation244_spill] sm:$0xff] }
 0x88f   :  { %12420 = vmatmul.mubr.bf16.gmra.mrb[120].mxu0 %v23913_v5  ;;  %13964 = vmatmul.mubr.bf16.gmra.mrb[120].mxu1 %v23913_v5  ;;  %v23939_v5 = vld [vmem:[#allocation231_spill] sm:$0xff] }
 0x890   :  { %12429 = vmatprep.mubr.bf16.mxu0 %v23914_v31  ;;  %13973 = vmatprep.mubr.bf16.mxu1 %v23914_v31  ;;  %v1386_v31 = vsub.s32 4, %v23939_v5 }
 0x897   :  { %12430 = vmatmul.mubr.bf16.gmra.mrb[124].mxu0 %v23915_v14  ;;  %13974 = vmatmul.mubr.bf16.gmra.mrb[124].mxu1 %v23915_v14  ;;  %v1394_v14 = vsub.s32 6, %v23939_v5 }
 0x898   :  { %14919 = vmatprep.mubr.bf16.mxu0 %v21396_v36  ;;  %15080 = vmatprep.mubr.bf16.mxu1 %v21398_v50  ;;  %v19700_v36 = vld [vmem:[#allocation8 + $0x150] sm:$0xff]  }
 0x899   :  { %v19702_v50 = vld [vmem:[#allocation8 + $0x1d0] sm:$0xff]  }
 0x89f   :  { %14920 = vmatmul.mubr.bf16.vlgmr.msra.gmra.mrb[128].mxu0 %v21391_v29  ;;  %15081 = vmatmul.mubr.bf16.vlgmr.msra.gmra.mrb[128].mxu1 %v21394_v32  ;;  %v19703_v29 = vld [vmem:[#allocation8 + $0x190] sm:$0xff]   ;;  %v19706_v32 = vld [vmem:[#allocation8 + $0x1d8] sm:$0xff]  }
 0x8a0   :  { %14927 = vmatprep.mubr.bf16.mxu0 %v21416_v20  ;;  %15088 = vmatprep.mubr.bf16.mxu1 %v21418_v49  ;;  %v19705_v20 = vld [vmem:[#allocation8 + $0x118] sm:$0xff]  }
 0x8a1   :  { %17376 = vmatpush3.bf16.msra.mxu0 %v19693_v38  ;;  %17488 = vmatpush3.bf16.msra.mxu1 %v19695_v52  ;;  %v19707_v49 = vld [vmem:[#allocation8 + $0x198] sm:$0xff]   ;;  %v1390_v38 = vsub.s32 5, %v23939_v5  ;;  %v1398_v52 = vsub.s32 7, %v23939_v5 }
 0x8a2   :  { %17377 = vmatprep.subr.bf16.mxu0 %v19696_v47  ;;  %17489 = vmatprep.subr.bf16.mxu1 %v19698_v55  ;;  %v23940_v47 = vld [vmem:[#allocation26_spill] sm:$0xff] }
 0x8a3   :  { %v19852_v55 = vld [vmem:[#allocation7] sm:$0xff] }
 0x8a5   :  { %17378 = vmatpush3.bf16.msra.mxu0 %v19697_v4  ;;  %17490 = vmatpush3.bf16.msra.mxu1 %v19699_v22  ;;  %v22493_v4 = vrot.slane %v19852_v55, %v1386_v31  ;;  %v23941_v22 = vld [vmem:[#allocation27_spill] sm:$0xff] }
 0x8a6   :  { %17379 = vmatprep.subr.bf16.mxu0 %v19700_v36  ;;  %17491 = vmatprep.subr.bf16.mxu1 %v19702_v50  ;;  %v23942_v36 = vld [vmem:[#allocation245_spill] sm:$0xff]  ;;  %v22497_v50 = vrot.slane %v19852_v55, %v1394_v14 }
 0x8a7   :  { %14928 = vmatmul.mubr.bf16.gmra.mrb[132].mxu0 %v21411_v37  ;;  %15089 = vmatmul.mubr.bf16.gmra.mrb[132].mxu1 %v21414_v53  ;;  %v19711_v37 = vld [vmem:[#allocation8 + $0x1a0] sm:$0xff]   ;;  %v19714_v53 = vld [vmem:[#allocation8 + $0x1e8] sm:$0xff]  }
 0x8a8   :  { %14935 = vmatprep.mubr.bf16.mxu0 %v21436_v30  ;;  %15096 = vmatprep.mubr.bf16.mxu1 %v21438_v24  ;;  %v19713_v30 = vld [vmem:[#allocation8 + $0x128] sm:$0xff]  }
 0x8a9   :  { %17380 = vmatpush3.bf16.msra.mxu0 %v19701_v63  ;;  %17492 = vmatpush3.bf16.msra.mxu1 %v19703_v29  ;;  %v19715_v24 = vld [vmem:[#allocation8 + $0x1a8] sm:$0xff]   ;;  %v22499_v63 = vrot.slane %v19852_v55, %v1390_v38  ;;  %v23943_v29 = vld [vmem:[#allocation246_spill] sm:$0xff] }
 0x8aa   :  { %17381 = vmatprep.subr.bf16.mxu0 %v19704_v2  ;;  %17493 = vmatprep.subr.bf16.mxu1 %v19706_v32  ;;  %v22502_v2 = vrot.slane %v19852_v55, %v1398_v52 }
 0x8ad   :  { %17382 = vmatpush3.bf16.msra.mxu0 %v19705_v20  ;;  %17494 = vmatpush3.bf16.msra.mxu1 %v19707_v49 }
 0x8ae   :  { %17383 = vmatprep.subr.bf16.mxu0 %v19708_v59  ;;  %17495 = vmatprep.subr.bf16.mxu1 %v19710_v56 }
 0x8af   :  { %14936 = vmatmul.mubr.bf16.gmra.mrb[136].mxu0 %v21431_v21  ;;  %15097 = vmatmul.mubr.bf16.gmra.mrb[136].mxu1 %v21434_v9  ;;  %v19719_v21 = vld [vmem:[#allocation8 + $0x1b0] sm:$0xff]   ;;  %v19722_v9 = vld [vmem:[#allocation8 + $0x1f8] sm:$0xff]  }
 0x8b0   :  { %14943 = vmatprep.mubr.bf16.mxu0 %v21456_v19  ;;  %15104 = vmatprep.mubr.bf16.mxu1 %v21458_v6  ;;  %v19721_v19 = vld [vmem:[#allocation8 + $0x138] sm:$0xff]  }
 0x8b1   :  { %17384 = vmatpush3.bf16.msra.mxu0 %v19709_v43  ;;  %17496 = vmatpush3.bf16.msra.mxu1 %v19711_v37  ;;  %v19723_v6 = vld [vmem:[#allocation8 + $0x1b8] sm:$0xff]  }
 0x8b2   :  { %17385 = vmatprep.subr.bf16.mxu0 %v19712_v1  ;;  %17497 = vmatprep.subr.bf16.mxu1 %v19714_v53 }
 0x8b5   :  { %17386 = vmatpush3.bf16.msra.mxu0 %v19713_v30  ;;  %17498 = vmatpush3.bf16.msra.mxu1 %v19715_v24 }
 0x8b6   :  { %17387 = vmatprep.subr.bf16.mxu0 %v19716_v34  ;;  %17499 = vmatprep.subr.bf16.mxu1 %v19718_v51 }
 0x8b7   :  { %14944 = vmatmul.mubr.bf16.gmra.mrb[140].mxu0 %v21451_v16  ;;  %15105 = vmatmul.mubr.bf16.gmra.mrb[140].mxu1 %v21454_v40  ;;  %v23918_v16 = vld [vmem:[#allocation234_spill] sm:$0xff]  ;;  %v23919_v40 = vld [vmem:[#allocation16_spill] sm:$0xff] }
 0x8b8   :  { %14951 = vmatprep.mubr.bf16.mxu0 %v21480_v15  ;;  %15112 = vmatprep.mubr.bf16.mxu1 %v21486_v7  ;;  %v23920_v15 = vld [vmem:[#allocation17_spill] sm:$0xff]  ;;  %v23921_v7 = vld [vmem:[#allocation235_spill] sm:$0xff] }
 0x8b9   :  { %17388 = vmatpush3.bf16.msra.mxu0 %v19717_v41  ;;  %17500 = vmatpush3.bf16.msra.mxu1 %v19719_v21 }
 0x8ba   :  { %17389 = vmatprep.subr.bf16.mxu0 %v19720_v60  ;;  %17501 = vmatprep.subr.bf16.mxu1 %v19722_v9 }
 0x8bd   :  { %17390 = vmatpush3.bf16.msra.mxu0 %v19721_v19  ;;  %17502 = vmatpush3.bf16.msra.mxu1 %v19723_v6  ;;  %v23944_v6 = vld [vmem:[#allocation28_spill] sm:$0xff] }
 0x8bf   :  { %14952 = vmatmul.mubr.bf16.gmra.mrb[144].mxu0 %v23916_v61  ;;  %15113 = vmatmul.mubr.bf16.gmra.mrb[144].mxu1 %v23917_v18 }
 0x8c0   :  { %14959 = vmatprep.mubr.bf16.mxu0 %v21539_v48  ;;  %15120 = vmatprep.mubr.bf16.mxu1 %v23918_v16  ;;  %v23928_v48 = vld [vmem:[#allocation21_spill] sm:$0xff] }
 0x8c7   :  { %14960 = vmatmul.mubr.bf16.gmra.mrb[148].mxu0 %v23919_v40  ;;  %15121 = vmatmul.mubr.bf16.gmra.mrb[148].mxu1 %v23920_v15  ;;  %v23945_v15 = vld [vmem:[#allocation29_spill] sm:$0xff] }
 0x8c8   :  { %14967 = vmatprep.mubr.bf16.mxu0 %v23921_v7  ;;  %15128 = vmatprep.mubr.bf16.mxu1 %v23922_v45 }
 0x8cf   :  { %14968 = vmatmul.mubr.bf16.gmra.mrb[152].mxu0 %v23923_v25  ;;  %15129 = vmatmul.mubr.bf16.gmra.mrb[152].mxu1 %v23924_v28 }
 0x8d0   :  { %14975 = vmatprep.mubr.bf16.mxu0 %v23925_v57  ;;  %15136 = vmatprep.mubr.bf16.mxu1 %v23926_v26 }
 0x8d7   :  { %14976 = vmatmul.mubr.bf16.gmra.mrb[156].mxu0 %v23927_v3  ;;  %15137 = vmatmul.mubr.bf16.gmra.mrb[156].mxu1 %v23928_v48 }
 0x8d8   :  { %14983 = vmatprep.mubr.bf16.mxu0 %v23929_v0  ;;  %15144 = vmatprep.mubr.bf16.mxu1 %v23930_v42 }
 0x8df   :  { %14984 = vmatmul.mubr.bf16.gmra.mrb[160].mxu0 %v23931_v62  ;;  %15145 = vmatmul.mubr.bf16.gmra.mrb[160].mxu1 %v23932_v35 }
 0x8e0   :  { %14991 = vmatprep.mubr.bf16.mxu0 %v23933_v8  ;;  %15152 = vmatprep.mubr.bf16.mxu1 %v23934_v12 }
 0x8e7   :  { %14992 = vmatmul.mubr.bf16.gmra.mrb[164].mxu0 %v23935_v10  ;;  %15153 = vmatmul.mubr.bf16.gmra.mrb[164].mxu1 %v23936_v44 }
 0x8e8   :  { %14999 = vmatprep.mubr.bf16.mxu0 %v23937_v13  ;;  %15160 = vmatprep.mubr.bf16.mxu1 %v23938_v17 }
 0x8ef   :  { %15000 = vmatmul.mubr.bf16.gmra.mrb[168].mxu0 %v23940_v47  ;;  %15161 = vmatmul.mubr.bf16.gmra.mrb[168].mxu1 %v23941_v22 }
 0x8f0   :  { %15007 = vmatprep.mubr.bf16.mxu0 %v23942_v36  ;;  %15168 = vmatprep.mubr.bf16.mxu1 %v23943_v29 }
 0x8f2   :  { %v12281_v32 = vpop.f32.mrb[64].mxu0  ;;  %v13825_v49 = vpop.f32.mrb[64].mxu1 }
 0x8f3   :  { %v17727_v20 = vadd.f32 %v12281_v32, %v22493_v4  ;;  %v12283_v59 = vpop.f32.mrb[65].mxu0  ;;  %v17791_v56 = vadd.f32 %v13825_v49, %v22497_v50  ;;  %v13827_v37 = vpop.f32.mrb[65].mxu1 }
 0x8f4   :  { %v17728_v43 = vadd.f32 %v12283_v59, %v22499_v63  ;;  %v12285_v1 = vpop.f32.mrb[66].mxu0  ;;  %v17792_v53 = vadd.f32 %v13827_v37, %v22502_v2  ;;  %v13829_v24 = vpop.f32.mrb[66].mxu1 }
 0x8f5   :  { %v17729_v30 = vadd.f32 %v12285_v1, %v22493_v4  ;;  %v12287_v34 = vpop.f32.mrb[67].mxu0  ;;  %v17793_v51 = vadd.f32 %v13829_v24, %v22497_v50  ;;  %v13831_v21 = vpop.f32.mrb[67].mxu1  ;;  %v13988_v60 = vmax.f32 %v17727_v20, 0.0  ;;  %v13990_v61 = vmax.f32 %v17791_v56, 0.0 }
 0x8f6   :  { %v17730_v41 = vadd.f32 %v12287_v34, %v22499_v63  ;;  %v17794_v19 = vadd.f32 %v13831_v21, %v22502_v2  ;;  %v13989_v18 = vmax.f32 %v17728_v43, 0.0  ;;  %v13991_v7 = vmax.f32 %v17792_v53, 0.0 }
 0x8f7   :  { %v13996_v9 = vmax.f32 %v17729_v30, 0.0  ;;  %15008 = vmatmul.mubr.bf16.gmra.mrb[172].mxu0 %v23944_v6  ;;  %v13998_v16 = vmax.f32 %v17793_v51, 0.0  ;;  %15169 = vmatmul.mubr.bf16.gmra.mrb[172].mxu1 %v23945_v15 }
 0x8f8   :  { %v13997_v40 = vmax.f32 %v17730_v41, 0.0  ;;  %15015 = vmatprep.mubr.bf16.mxu0 %v21882_v46  ;;  %v13999_v25 = vmax.f32 %v17794_v19, 0.0  ;;  %15176 = vmatprep.mubr.bf16.mxu1 %v21886_v27 }
 0x8f9   :  { %v22515_v45 = vpack.c.bf16 %v13996_v9, %v13988_v60  ;;  %v22518_v28 = vpack.c.bf16 %v13998_v16, %v13990_v61 }
 0x8fa   :  { %v22520_v57 = vpack.c.bf16 %v13997_v40, %v13989_v18  ;;  %v12291_v26 = vpop.f32.mrb[68].mxu0  ;;  %v22522_v3 = vpack.c.bf16 %v13999_v25, %v13991_v7  ;;  %v13835_v0 = vpop.f32.mrb[68].mxu1  ;;  %v23946_v40 = vld [vmem:[#allocation32_spill] sm:$0xff] }
 0x8fb   :  { %v17731_v48 = vadd.f32 %v12291_v26, %v22493_v4  ;;  %v12293_v42 = vpop.f32.mrb[69].mxu0  ;;  %v17795_v62 = vadd.f32 %v13835_v0, %v22497_v50  ;;  %v13837_v35 = vpop.f32.mrb[69].mxu1  ;;  %v23947_v26 = vld [vmem:[#allocation33_spill] sm:$0xff] }
 0x8fc   :  { %v17732_v46 = vadd.f32 %v12293_v42, %v22499_v63  ;;  %v12295_v8 = vpop.f32.mrb[70].mxu0  ;;  %v17796_v12 = vadd.f32 %v13837_v35, %v22502_v2  ;;  %v13839_v10 = vpop.f32.mrb[70].mxu1 }
 0x8fd   :  { %v17733_v27 = vadd.f32 %v12295_v8, %v22493_v4  ;;  %v12297_v44 = vpop.f32.mrb[71].mxu0  ;;  %v17797_v13 = vadd.f32 %v13839_v10, %v22497_v50  ;;  %v13841_v5 = vpop.f32.mrb[71].mxu1  ;;  %v14004_v31 = vmax.f32 %v17731_v48, 0.0  ;;  %v14006_v52 = vmax.f32 %v17795_v62, 0.0 }
 0x8fe   :  { %v17734_v17 = vadd.f32 %v12297_v44, %v22499_v63  ;;  %v17798_v38 = vadd.f32 %v13841_v5, %v22502_v2  ;;  %v14005_v47 = vmax.f32 %v17732_v46, 0.0  ;;  %v14007_v36 = vmax.f32 %v17796_v12, 0.0 }
 0x8ff   :  { %v14012_v14 = vmax.f32 %v17733_v27, 0.0  ;;  %15016 = vmatmul.mubr.bf16.gmra.mrb[176].mxu0 %v21877_v33  ;;  %v14014_v55 = vmax.f32 %v17797_v13, 0.0  ;;  %15177 = vmatmul.mubr.bf16.gmra.mrb[176].mxu1 %v21880_v11 }
 0x900   :  { %v14013_v22 = vmax.f32 %v17734_v17, 0.0  ;;  %15023 = vmatprep.mubr.bf16.mxu0 %v21906_v54  ;;  %v14015_v32 = vmax.f32 %v17798_v38, 0.0  ;;  %15184 = vmatprep.mubr.bf16.mxu1 %v21908_v39 }
 0x901   :  { %v22535_v29 = vpack.c.bf16 %v14012_v14, %v14004_v31  ;;  %v22538_v20 = vpack.c.bf16 %v14014_v55, %v14006_v52  ;;  %v23948_v55 = vld [vmem:[#allocation30_spill] sm:$0xff] }
 0x902   :  { %v22540_v49 = vpack.c.bf16 %v14013_v22, %v14005_v47  ;;  %v12301_v59 = vpop.f32.mrb[72].mxu0  ;;  %v22542_v33 = vpack.c.bf16 %v14015_v32, %v14007_v36  ;;  %v13845_v43 = vpop.f32.mrb[72].mxu1 }
 0x903   :  { %v17735_v56 = vadd.f32 %v12301_v59, %v22493_v4  ;;  %v12303_v37 = vpop.f32.mrb[73].mxu0  ;;  %v17799_v11 = vadd.f32 %v13845_v43, %v22497_v50  ;;  %v13847_v1 = vpop.f32.mrb[73].mxu1  ;;  %v23950_v43 = vld [vmem:[#allocation36_spill] sm:$0xff] }
 0x904   :  { %v17736_v54 = vadd.f32 %v12303_v37, %v22499_v63  ;;  %v12305_v53 = vpop.f32.mrb[74].mxu0  ;;  %v17800_v30 = vadd.f32 %v13847_v1, %v22502_v2  ;;  %v13849_v24 = vpop.f32.mrb[74].mxu1  ;;  %v23951_v1 = vld [vmem:[#allocation37_spill] sm:$0xff] }
 0x905   :  { %v17737_v39 = vadd.f32 %v12305_v53, %v22493_v4  ;;  %v12307_v34 = vpop.f32.mrb[75].mxu0  ;;  %v17801_v51 = vadd.f32 %v13849_v24, %v22497_v50  ;;  %v13851_v21 = vpop.f32.mrb[75].mxu1  ;;  %v14020_v60 = vmax.f32 %v17735_v56, 0.0  ;;  %v14022_v6 = vmax.f32 %v17799_v11, 0.0  ;;  %v23949_v56 = vld [vmem:[#allocation31_spill] sm:$0xff] }
 0x906   :  { %v17738_v41 = vadd.f32 %v12307_v34, %v22499_v63  ;;  %v17802_v19 = vadd.f32 %v13851_v21, %v22502_v2  ;;  %v14021_v61 = vmax.f32 %v17736_v54, 0.0  ;;  %v14023_v15 = vmax.f32 %v17800_v30, 0.0 }
 0x907   :  { %v14028_v9 = vmax.f32 %v17737_v39, 0.0  ;;  %15024 = vmatmul.mubr.bf16.gmra.mrb[180].mxu0 %v21901_v58  ;;  %v14030_v18 = vmax.f32 %v17801_v51, 0.0  ;;  %15185 = vmatmul.mubr.bf16.gmra.mrb[180].mxu1 %v21904_v23 }
 0x908   :  { %v14029_v16 = vmax.f32 %v17738_v41, 0.0  ;;  %15031 = vmatprep.mubr.bf16.mxu0 %v23946_v40  ;;  %v14031_v25 = vmax.f32 %v17802_v19, 0.0  ;;  %15192 = vmatprep.mubr.bf16.mxu1 %v23947_v26 }
 0x909   :  { %v22555_v7 = vpack.c.bf16 %v14028_v9, %v14020_v60  ;;  %v22558_v48 = vpack.c.bf16 %v14030_v18, %v14022_v6 }
 0x90a   :  { %v22560_v0 = vpack.c.bf16 %v14029_v16, %v14021_v61  ;;  %v12311_v42 = vpop.f32.mrb[76].mxu0  ;;  %v22562_v58 = vpack.c.bf16 %v14031_v25, %v14023_v15  ;;  %v13855_v46 = vpop.f32.mrb[76].mxu1 }
 0x90b   :  { %v17739_v62 = vadd.f32 %v12311_v42, %v22493_v4  ;;  %v12313_v35 = vpop.f32.mrb[77].mxu0  ;;  %v17803_v23 = vadd.f32 %v13855_v46, %v22497_v50  ;;  %v13857_v12 = vpop.f32.mrb[77].mxu1  ;;  %v23952_v46 = vld [vmem:[#allocation34_spill] sm:$0xff] }
 0x90c   :  { %v17740_v8 = vadd.f32 %v12313_v35, %v22499_v63  ;;  %v12315_v27 = vpop.f32.mrb[78].mxu0  ;;  %v17804_v10 = vadd.f32 %v13857_v12, %v22502_v2  ;;  %v13859_v13 = vpop.f32.mrb[78].mxu1 }
 0x90d   :  { %v17741_v44 = vadd.f32 %v12315_v27, %v22493_v4  ;;  %v12317_v17 = vpop.f32.mrb[79].mxu0  ;;  %v17805_v5 = vadd.f32 %v13859_v13, %v22497_v50  ;;  %v13861_v14 = vpop.f32.mrb[79].mxu1  ;;  %v14036_v38 = vmax.f32 %v17739_v62, 0.0  ;;  %v14038_v22 = vmax.f32 %v17803_v23, 0.0  ;;  %v23953_v27 = vld [vmem:[#allocation35_spill] sm:$0xff] }
 0x90e   :  { %v17742_v31 = vadd.f32 %v12317_v17, %v22499_v63  ;;  %v17806_v47 = vadd.f32 %v13861_v14, %v22502_v2  ;;  %v14037_v36 = vmax.f32 %v17740_v8, 0.0  ;;  %v14039_v37 = vmax.f32 %v17804_v10, 0.0 }
 0x90f   :  { %v14044_v52 = vmax.f32 %v17741_v44, 0.0  ;;  %15032 = vmatmul.mubr.bf16.gmra.mrb[184].mxu0 %v23948_v55  ;;  %v14046_v32 = vmax.f32 %v17805_v5, 0.0  ;;  %15193 = vmatmul.mubr.bf16.gmra.mrb[184].mxu1 %v23949_v56 }
 0x910   :  { %v14045_v59 = vmax.f32 %v17742_v31, 0.0  ;;  %15039 = vmatprep.mubr.bf16.mxu0 %v23950_v43  ;;  %v14047_v54 = vmax.f32 %v17806_v47, 0.0  ;;  %15200 = vmatprep.mubr.bf16.mxu1 %v23951_v1 }
 0x911   :  { %v22575_v11 = vpack.c.bf16 %v14044_v52, %v14036_v38  ;;  %v22578_v53 = vpack.c.bf16 %v14046_v32, %v14038_v22 }
 0x912   :  { %v22580_v30 = vpack.c.bf16 %v14045_v59, %v14037_v36  ;;  %v12321_v39 = vpop.f32.mrb[80].mxu0  ;;  %v22582_v24 = vpack.c.bf16 %v14047_v54, %v14039_v37  ;;  %v13865_v51 = vpop.f32.mrb[80].mxu1 }
 0x913   :  { %v17743_v34 = vadd.f32 %v12321_v39, %v22493_v4  ;;  %v12323_v41 = vpop.f32.mrb[81].mxu0  ;;  %v17807_v21 = vadd.f32 %v13865_v51, %v22497_v50  ;;  %v13867_v9 = vpop.f32.mrb[81].mxu1 }
 0x914   :  { %v17744_v60 = vadd.f32 %v12323_v41, %v22499_v63  ;;  %v12325_v19 = vpop.f32.mrb[82].mxu0  ;;  %v17808_v6 = vadd.f32 %v13867_v9, %v22502_v2  ;;  %v13869_v18 = vpop.f32.mrb[82].mxu1 }
 0x915   :  { %v17745_v61 = vadd.f32 %v12325_v19, %v22493_v4  ;;  %v12327_v16 = vpop.f32.mrb[83].mxu0  ;;  %v17809_v40 = vadd.f32 %v13869_v18, %v22497_v50  ;;  %v13871_v25 = vpop.f32.mrb[83].mxu1  ;;  %v14052_v26 = vmax.f32 %v17743_v34, 0.0  ;;  %v14054_v35 = vmax.f32 %v17807_v21, 0.0 }
 0x916   :  { %v17746_v15 = vadd.f32 %v12327_v16, %v22499_v63  ;;  %v17810_v62 = vadd.f32 %v13871_v25, %v22502_v2  ;;  %v14053_v23 = vmax.f32 %v17744_v60, 0.0  ;;  %v14055_v10 = vmax.f32 %v17808_v6, 0.0 }
 0x917   :  { %v14060_v42 = vmax.f32 %v17745_v61, 0.0  ;;  %15040 = vmatmul.mubr.bf16.gmra.mrb[188].mxu0 %v23952_v46  ;;  %v14062_v8 = vmax.f32 %v17809_v40, 0.0  ;;  %15201 = vmatmul.mubr.bf16.gmra.mrb[188].mxu1 %v23953_v27 }
 0x918   :  { %v14061_v12 = vmax.f32 %v17746_v15, 0.0  ;;  %15241 = vmatprep.mubr.bf16.mxu0 %v22520_v57  ;;  %v14063_v13 = vmax.f32 %v17810_v62, 0.0  ;;  %15402 = vmatprep.mubr.bf16.mxu1 %v22522_v3 }
 0x919   :  { %v22595_v44 = vpack.c.bf16 %v14060_v42, %v14052_v26  ;;  %v22598_v17 = vpack.c.bf16 %v14062_v8, %v14054_v35 }
 0x91a   :  { %v22600_v5 = vpack.c.bf16 %v14061_v12, %v14053_v23  ;;  %v12331_v31 = vpop.f32.mrb[84].mxu0  ;;  %v22602_v14 = vpack.c.bf16 %v14063_v13, %v14055_v10  ;;  %v13875_v52 = vpop.f32.mrb[84].mxu1 }
 0x91b   :  { %v17747_v38 = vadd.f32 %v12331_v31, %v22493_v4  ;;  %v12333_v47 = vpop.f32.mrb[85].mxu0  ;;  %v17811_v55 = vadd.f32 %v13875_v52, %v22497_v50  ;;  %v13877_v22 = vpop.f32.mrb[85].mxu1 }
 0x91c   :  { %v17748_v57 = vadd.f32 %v12333_v47, %v22499_v63  ;;  %v12335_v36 = vpop.f32.mrb[86].mxu0  ;;  %v17812_v32 = vadd.f32 %v13877_v22, %v22502_v2  ;;  %v13879_v59 = vpop.f32.mrb[86].mxu1 }
 0x91d   :  { %v17749_v3 = vadd.f32 %v12335_v36, %v22493_v4  ;;  %v12337_v56 = vpop.f32.mrb[87].mxu0  ;;  %v17813_v43 = vadd.f32 %v13879_v59, %v22497_v50  ;;  %v13881_v54 = vpop.f32.mrb[87].mxu1  ;;  %v14068_v1 = vmax.f32 %v17747_v38, 0.0  ;;  %v14070_v51 = vmax.f32 %v17811_v55, 0.0 }
 0x91e   :  { %v17750_v37 = vadd.f32 %v12337_v56, %v22499_v63  ;;  %v17814_v34 = vadd.f32 %v13881_v54, %v22502_v2  ;;  %v14069_v41 = vmax.f32 %v17748_v57, 0.0  ;;  %v14071_v9 = vmax.f32 %v17812_v32, 0.0 }
 0x91f   :  { %v14076_v39 = vmax.f32 %v17749_v3, 0.0  ;;  %15242 = vmatmul.mubr.bf16.vlgmr.msra.gmra.mrb[192].mxu0 %v22515_v45  ;;  %v14078_v21 = vmax.f32 %v17813_v43, 0.0  ;;  %15403 = vmatmul.mubr.bf16.vlgmr.msra.gmra.mrb[192].mxu1 %v22518_v28 }
 0x920   :  { %v14077_v60 = vmax.f32 %v17750_v37, 0.0  ;;  %15249 = vmatprep.mubr.bf16.mxu0 %v22540_v49  ;;  %v14079_v6 = vmax.f32 %v17814_v34, 0.0  ;;  %15410 = vmatprep.mubr.bf16.mxu1 %v22542_v33 }
 0x921   :  { %v22615_v19 = vpack.c.bf16 %v14076_v39, %v14068_v1  ;;  %v22618_v61 = vpack.c.bf16 %v14078_v21, %v14070_v51 }
 0x922   :  { %v22620_v18 = vpack.c.bf16 %v14077_v60, %v14069_v41  ;;  %v12341_v16 = vpop.f32.mrb[88].mxu0  ;;  %v22622_v45 = vpack.c.bf16 %v14079_v6, %v14071_v9  ;;  %v13885_v15 = vpop.f32.mrb[88].mxu1 }
 0x923   :  { %v17751_v40 = vadd.f32 %v12341_v16, %v22493_v4  ;;  %v12343_v25 = vpop.f32.mrb[89].mxu0  ;;  %v17815_v28 = vadd.f32 %v13885_v15, %v22497_v50  ;;  %v13887_v26 = vpop.f32.mrb[89].mxu1 }
 0x924   :  { %v17752_v49 = vadd.f32 %v12343_v25, %v22499_v63  ;;  %v12345_v42 = vpop.f32.mrb[90].mxu0  ;;  %v17816_v62 = vadd.f32 %v13887_v26, %v22502_v2  ;;  %v13889_v46 = vpop.f32.mrb[90].mxu1 }
 0x925   :  { %v17753_v33 = vadd.f32 %v12345_v42, %v22493_v4  ;;  %v12347_v35 = vpop.f32.mrb[91].mxu0  ;;  %v17817_v23 = vadd.f32 %v13889_v46, %v22497_v50  ;;  %v13891_v12 = vpop.f32.mrb[91].mxu1  ;;  %v14084_v27 = vmax.f32 %v17751_v40, 0.0  ;;  %v14086_v31 = vmax.f32 %v17815_v28, 0.0 }
 0x926   :  { %v17754_v8 = vadd.f32 %v12347_v35, %v22499_v63  ;;  %v17818_v13 = vadd.f32 %v13891_v12, %v22502_v2  ;;  %v14085_v38 = vmax.f32 %v17752_v49, 0.0  ;;  %v14087_v55 = vmax.f32 %v17816_v62, 0.0 }
 0x927   :  { %v14092_v10 = vmax.f32 %v17753_v33, 0.0  ;;  %15250 = vmatmul.mubr.bf16.gmra.mrb[196].mxu0 %v22535_v29  ;;  %v14094_v52 = vmax.f32 %v17817_v23, 0.0  ;;  %15411 = vmatmul.mubr.bf16.gmra.mrb[196].mxu1 %v22538_v20 }
 0x928   :  { %v14093_v47 = vmax.f32 %v17754_v8, 0.0  ;;  %15257 = vmatprep.mubr.bf16.mxu0 %v22560_v0  ;;  %v14095_v22 = vmax.f32 %v17818_v13, 0.0  ;;  %15418 = vmatprep.mubr.bf16.mxu1 %v22562_v58 }
 0x929   :  { %v22635_v57 = vpack.c.bf16 %v14092_v10, %v14084_v27  ;;  %v22638_v36 = vpack.c.bf16 %v14094_v52, %v14086_v31 }
 0x92a   :  { %v22640_v32 = vpack.c.bf16 %v14093_v47, %v14085_v38  ;;  %v12351_v3 = vpop.f32.mrb[92].mxu0  ;;  %v22642_v29 = vpack.c.bf16 %v14095_v22, %v14087_v55  ;;  %v13895_v56 = vpop.f32.mrb[92].mxu1 }
 0x92b   :  { %v17755_v59 = vadd.f32 %v12351_v3, %v22493_v4  ;;  %v12353_v43 = vpop.f32.mrb[93].mxu0  ;;  %v17819_v20 = vadd.f32 %v13895_v56, %v22497_v50  ;;  %v13897_v37 = vpop.f32.mrb[93].mxu1 }
 0x92c   :  { %v17756_v0 = vadd.f32 %v12353_v43, %v22499_v63  ;;  %v12355_v54 = vpop.f32.mrb[94].mxu0  ;;  %v17820_v1 = vadd.f32 %v13897_v37, %v22502_v2  ;;  %v13899_v39 = vpop.f32.mrb[94].mxu1 }
 0x92d   :  { %v17757_v58 = vadd.f32 %v12355_v54, %v22493_v4  ;;  %v12357_v34 = vpop.f32.mrb[95].mxu0  ;;  %v17821_v51 = vadd.f32 %v13899_v39, %v22497_v50  ;;  %v13901_v21 = vpop.f32.mrb[95].mxu1  ;;  %v14100_v60 = vmax.f32 %v17755_v59, 0.0  ;;  %v14102_v16 = vmax.f32 %v17819_v20, 0.0 }
 0x92e   :  { %v17758_v41 = vadd.f32 %v12357_v34, %v22499_v63  ;;  %v17822_v6 = vadd.f32 %v13901_v21, %v22502_v2  ;;  %v14101_v40 = vmax.f32 %v17756_v0, 0.0  ;;  %v14103_v28 = vmax.f32 %v17820_v1, 0.0 }
 0x92f   :  { %v14108_v9 = vmax.f32 %v17757_v58, 0.0  ;;  %15258 = vmatmul.mubr.bf16.gmra.mrb[200].mxu0 %v22555_v7  ;;  %v14110_v15 = vmax.f32 %v17821_v51, 0.0  ;;  %15419 = vmatmul.mubr.bf16.gmra.mrb[200].mxu1 %v22558_v48 }
 0x930   :  { %v14109_v25 = vmax.f32 %v17758_v41, 0.0  ;;  %15265 = vmatprep.mubr.bf16.mxu0 %v22580_v30  ;;  %v14111_v26 = vmax.f32 %v17822_v6, 0.0  ;;  %15426 = vmatprep.mubr.bf16.mxu1 %v22582_v24 }
 0x931   :  { %v22655_v49 = vpack.c.bf16 %v14108_v9, %v14100_v60  ;;  %v22658_v42 = vpack.c.bf16 %v14110_v15, %v14102_v16 }
 0x932   :  { %v22660_v62 = vpack.c.bf16 %v14109_v25, %v14101_v40  ;;  %v12361_v33 = vpop.f32.mrb[96].mxu0  ;;  %v22662_v7 = vpack.c.bf16 %v14111_v26, %v14103_v28  ;;  %v13905_v35 = vpop.f32.mrb[96].mxu1 }
 0x933   :  { %v17759_v46 = vadd.f32 %v12361_v33, %v22493_v4  ;;  %v12363_v23 = vpop.f32.mrb[97].mxu0  ;;  %v17823_v48 = vadd.f32 %v13905_v35, %v22497_v50  ;;  %v13907_v8 = vpop.f32.mrb[97].mxu1 }
 0x934   :  { %v17760_v30 = vadd.f32 %v12363_v23, %v22499_v63  ;;  %v12365_v12 = vpop.f32.mrb[98].mxu0  ;;  %v17824_v27 = vadd.f32 %v13907_v8, %v22502_v2  ;;  %v13909_v10 = vpop.f32.mrb[98].mxu1 }
 0x935   :  { %v17761_v24 = vadd.f32 %v12365_v12, %v22493_v4  ;;  %v12367_v13 = vpop.f32.mrb[99].mxu0  ;;  %v17825_v31 = vadd.f32 %v13909_v10, %v22497_v50  ;;  %v13911_v52 = vpop.f32.mrb[99].mxu1  ;;  %v14116_v47 = vmax.f32 %v17759_v46, 0.0  ;;  %v14118_v3 = vmax.f32 %v17823_v48, 0.0 }
 0x936   :  { %v17762_v38 = vadd.f32 %v12367_v13, %v22499_v63  ;;  %v17826_v22 = vadd.f32 %v13911_v52, %v22502_v2  ;;  %v14117_v59 = vmax.f32 %v17760_v30, 0.0  ;;  %v14119_v20 = vmax.f32 %v17824_v27, 0.0 }
 0x937   :  { %v14124_v55 = vmax.f32 %v17761_v24, 0.0  ;;  %15266 = vmatmul.mubr.bf16.gmra.mrb[204].mxu0 %v22575_v11  ;;  %v14126_v56 = vmax.f32 %v17825_v31, 0.0  ;;  %15427 = vmatmul.mubr.bf16.gmra.mrb[204].mxu1 %v22578_v53 }
 0x938   :  { %v14125_v43 = vmax.f32 %v17762_v38, 0.0  ;;  %15273 = vmatprep.mubr.bf16.mxu0 %v22600_v5  ;;  %v14127_v37 = vmax.f32 %v17826_v22, 0.0  ;;  %15434 = vmatprep.mubr.bf16.mxu1 %v22602_v14 }
 0x939   :  { %v22675_v0 = vpack.c.bf16 %v14124_v55, %v14116_v47  ;;  %v22678_v54 = vpack.c.bf16 %v14126_v56, %v14118_v3 }
 0x93a   :  { %v22680_v1 = vpack.c.bf16 %v14125_v43, %v14117_v59  ;;  %v12371_v58 = vpop.f32.mrb[100].mxu0  ;;  %v22682_v11 = vpack.c.bf16 %v14127_v37, %v14119_v20  ;;  %v13915_v34 = vpop.f32.mrb[100].mxu1 }
 0x93b   :  { %v17763_v39 = vadd.f32 %v12371_v58, %v22493_v4  ;;  %v12373_v51 = vpop.f32.mrb[101].mxu0  ;;  %v17827_v53 = vadd.f32 %v13915_v34, %v22497_v50  ;;  %v13917_v41 = vpop.f32.mrb[101].mxu1 }
 0x93c   :  { %v17764_v5 = vadd.f32 %v12373_v51, %v22499_v63  ;;  %v12375_v21 = vpop.f32.mrb[102].mxu0  ;;  %v17828_v60 = vadd.f32 %v13917_v41, %v22502_v2  ;;  %v13919_v9 = vpop.f32.mrb[102].mxu1 }
 0x93d   :  { %v17765_v14 = vadd.f32 %v12375_v21, %v22493_v4  ;;  %v12377_v6 = vpop.f32.mrb[103].mxu0  ;;  %v17829_v16 = vadd.f32 %v13919_v9, %v22497_v50  ;;  %v13921_v15 = vpop.f32.mrb[103].mxu1  ;;  %v14132_v25 = vmax.f32 %v17763_v39, 0.0  ;;  %v14134_v33 = vmax.f32 %v17827_v53, 0.0 }
 0x93e   :  { %v17766_v40 = vadd.f32 %v12377_v6, %v22499_v63  ;;  %v17830_v26 = vadd.f32 %v13921_v15, %v22502_v2  ;;  %v14133_v46 = vmax.f32 %v17764_v5, 0.0  ;;  %v14135_v48 = vmax.f32 %v17828_v60, 0.0 }
 0x93f   :  { %v14140_v28 = vmax.f32 %v17765_v14, 0.0  ;;  %15274 = vmatmul.mubr.bf16.gmra.mrb[208].mxu0 %v22595_v44  ;;  %v14142_v35 = vmax.f32 %v17829_v16, 0.0  ;;  %15435 = vmatmul.mubr.bf16.gmra.mrb[208].mxu1 %v22598_v17 }
 0x940   :  { %v14141_v23 = vmax.f32 %v17766_v40, 0.0  ;;  %15281 = vmatprep.mubr.bf16.mxu0 %v22620_v18  ;;  %v14143_v8 = vmax.f32 %v17830_v26, 0.0  ;;  %15442 = vmatprep.mubr.bf16.mxu1 %v22622_v45 }
 0x941   :  { %v22695_v30 = vpack.c.bf16 %v14140_v28, %v14132_v25  ;;  %v22698_v12 = vpack.c.bf16 %v14142_v35, %v14134_v33 }
 0x942   :  { %v22700_v27 = vpack.c.bf16 %v14141_v23, %v14133_v46  ;;  %v12381_v24 = vpop.f32.mrb[104].mxu0  ;;  %v22702_v44 = vpack.c.bf16 %v14143_v8, %v14135_v48  ;;  %v13925_v13 = vpop.f32.mrb[104].mxu1 }
 0x943   :  { %v17767_v10 = vadd.f32 %v12381_v24, %v22493_v4  ;;  %v12383_v31 = vpop.f32.mrb[105].mxu0  ;;  %v17831_v17 = vadd.f32 %v13925_v13, %v22497_v50  ;;  %v13927_v38 = vpop.f32.mrb[105].mxu1 }
 0x944   :  { %v17768_v18 = vadd.f32 %v12383_v31, %v22499_v63  ;;  %v12385_v52 = vpop.f32.mrb[106].mxu0  ;;  %v17832_v47 = vadd.f32 %v13927_v38, %v22502_v2  ;;  %v13929_v55 = vpop.f32.mrb[106].mxu1 }
 0x945   :  { %v17769_v45 = vadd.f32 %v12385_v52, %v22493_v4  ;;  %v12387_v22 = vpop.f32.mrb[107].mxu0  ;;  %v17833_v3 = vadd.f32 %v13929_v55, %v22497_v50  ;;  %v13931_v56 = vpop.f32.mrb[107].mxu1  ;;  %v14148_v43 = vmax.f32 %v17767_v10, 0.0  ;;  %v14150_v58 = vmax.f32 %v17831_v17, 0.0 }
 0x946   :  { %v17770_v59 = vadd.f32 %v12387_v22, %v22499_v63  ;;  %v17834_v37 = vadd.f32 %v13931_v56, %v22502_v2  ;;  %v14149_v39 = vmax.f32 %v17768_v18, 0.0  ;;  %v14151_v53 = vmax.f32 %v17832_v47, 0.0 }
 0x947   :  { %v14156_v20 = vmax.f32 %v17769_v45, 0.0  ;;  %15282 = vmatmul.mubr.bf16.gmra.mrb[212].mxu0 %v22615_v19  ;;  %v14158_v34 = vmax.f32 %v17833_v3, 0.0  ;;  %15443 = vmatmul.mubr.bf16.gmra.mrb[212].mxu1 %v22618_v61 }
 0x948   :  { %v14157_v51 = vmax.f32 %v17770_v59, 0.0  ;;  %15289 = vmatprep.mubr.bf16.mxu0 %v22640_v32  ;;  %v14159_v41 = vmax.f32 %v17834_v37, 0.0  ;;  %15450 = vmatprep.mubr.bf16.mxu1 %v22642_v29 }
 0x949   :  { %v22715_v5 = vpack.c.bf16 %v14156_v20, %v14148_v43  ;;  %v22718_v21 = vpack.c.bf16 %v14158_v34, %v14150_v58 }
 0x94a   :  { %v22720_v60 = vpack.c.bf16 %v14157_v51, %v14149_v39  ;;  %v12391_v14 = vpop.f32.mrb[108].mxu0  ;;  %v22722_v19 = vpack.c.bf16 %v14159_v41, %v14151_v53  ;;  %v13935_v6 = vpop.f32.mrb[108].mxu1 }
 0x94b   :  { %v17771_v9 = vadd.f32 %v12391_v14, %v22493_v4  ;;  %v12393_v16 = vpop.f32.mrb[109].mxu0  ;;  %v17835_v61 = vadd.f32 %v13935_v6, %v22497_v50  ;;  %v13937_v40 = vpop.f32.mrb[109].mxu1 }
 0x94c   :  { %v17772_v32 = vadd.f32 %v12393_v16, %v22499_v63  ;;  %v12395_v15 = vpop.f32.mrb[110].mxu0  ;;  %v17836_v25 = vadd.f32 %v13937_v40, %v22502_v2  ;;  %v13939_v28 = vpop.f32.mrb[110].mxu1 }
 0x94d   :  { %v17773_v29 = vadd.f32 %v12395_v15, %v22493_v4  ;;  %v12397_v26 = vpop.f32.mrb[111].mxu0  ;;  %v17837_v33 = vadd.f32 %v13939_v28, %v22497_v50  ;;  %v13941_v35 = vpop.f32.mrb[111].mxu1  ;;  %v14164_v23 = vmax.f32 %v17771_v9, 0.0  ;;  %v14166_v24 = vmax.f32 %v17835_v61, 0.0 }
 0x94e   :  { %v17774_v46 = vadd.f32 %v12397_v26, %v22499_v63  ;;  %v17838_v8 = vadd.f32 %v13941_v35, %v22502_v2  ;;  %v14165_v10 = vmax.f32 %v17772_v32, 0.0  ;;  %v14167_v17 = vmax.f32 %v17836_v25, 0.0 }
 0x94f   :  { %v14172_v48 = vmax.f32 %v17773_v29, 0.0  ;;  %15290 = vmatmul.mubr.bf16.gmra.mrb[216].mxu0 %v22635_v57  ;;  %v14174_v13 = vmax.f32 %v17837_v33, 0.0  ;;  %15451 = vmatmul.mubr.bf16.gmra.mrb[216].mxu1 %v22638_v36 }
 0x950   :  { %v14173_v31 = vmax.f32 %v17774_v46, 0.0  ;;  %15297 = vmatprep.mubr.bf16.mxu0 %v22660_v62  ;;  %v14175_v38 = vmax.f32 %v17838_v8, 0.0  ;;  %15458 = vmatprep.mubr.bf16.mxu1 %v22662_v7 }
 0x951   :  { %v22735_v18 = vpack.c.bf16 %v14172_v48, %v14164_v23  ;;  %v22738_v52 = vpack.c.bf16 %v14174_v13, %v14166_v24 }
 0x952   :  { %v22740_v47 = vpack.c.bf16 %v14173_v31, %v14165_v10  ;;  %v12401_v45 = vpop.f32.mrb[112].mxu0  ;;  %v22742_v57 = vpack.c.bf16 %v14175_v38, %v14167_v17  ;;  %v13945_v22 = vpop.f32.mrb[112].mxu1 }
 0x953   :  { %v17775_v55 = vadd.f32 %v12401_v45, %v22493_v4  ;;  %v12403_v3 = vpop.f32.mrb[113].mxu0  ;;  %v17839_v36 = vadd.f32 %v13945_v22, %v22497_v50  ;;  %v13947_v59 = vpop.f32.mrb[113].mxu1 }
 0x954   :  { %v17776_v62 = vadd.f32 %v12403_v3, %v22499_v63  ;;  %v12405_v56 = vpop.f32.mrb[114].mxu0  ;;  %v17840_v43 = vadd.f32 %v13947_v59, %v22502_v2  ;;  %v13949_v20 = vpop.f32.mrb[114].mxu1 }
 0x955   :  { %v17777_v7 = vadd.f32 %v12405_v56, %v22493_v4  ;;  %v12407_v37 = vpop.f32.mrb[115].mxu0  ;;  %v17841_v58 = vadd.f32 %v13949_v20, %v22497_v50  ;;  %v13951_v34 = vpop.f32.mrb[115].mxu1  ;;  %v14180_v51 = vmax.f32 %v17775_v55, 0.0  ;;  %v14182_v14 = vmax.f32 %v17839_v36, 0.0 }
 0x956   :  { %v17778_v39 = vadd.f32 %v12407_v37, %v22499_v63  ;;  %v17842_v41 = vadd.f32 %v13951_v34, %v22502_v2  ;;  %v14181_v9 = vmax.f32 %v17776_v62, 0.0  ;;  %v14183_v61 = vmax.f32 %v17840_v43, 0.0 }
 0x957   :  { %v14188_v53 = vmax.f32 %v17777_v7, 0.0  ;;  %15298 = vmatmul.mubr.bf16.gmra.mrb[220].mxu0 %v22655_v49  ;;  %v14190_v6 = vmax.f32 %v17841_v58, 0.0  ;;  %15459 = vmatmul.mubr.bf16.gmra.mrb[220].mxu1 %v22658_v42 }
 0x958   :  { %v14189_v16 = vmax.f32 %v17778_v39, 0.0  ;;  %15305 = vmatprep.mubr.bf16.mxu0 %v22680_v1  ;;  %v14191_v40 = vmax.f32 %v17842_v41, 0.0  ;;  %15466 = vmatprep.mubr.bf16.mxu1 %v22682_v11 }
 0x959   :  { %v22755_v32 = vpack.c.bf16 %v14188_v53, %v14180_v51  ;;  %v22758_v15 = vpack.c.bf16 %v14190_v6, %v14182_v14 }
 0x95a   :  { %v22760_v25 = vpack.c.bf16 %v14189_v16, %v14181_v9  ;;  %v12411_v29 = vpop.f32.mrb[116].mxu0  ;;  %v22762_v49 = vpack.c.bf16 %v14191_v40, %v14183_v61  ;;  %v13955_v26 = vpop.f32.mrb[116].mxu1 }
 0x95b   :  { %v17779_v28 = vadd.f32 %v12411_v29, %v22493_v4  ;;  %v12413_v33 = vpop.f32.mrb[117].mxu0  ;;  %v17843_v42 = vadd.f32 %v13955_v26, %v22497_v50  ;;  %v13957_v46 = vpop.f32.mrb[117].mxu1 }
 0x95c   :  { %v17780_v1 = vadd.f32 %v12413_v33, %v22499_v63  ;;  %v12415_v35 = vpop.f32.mrb[118].mxu0  ;;  %v17844_v23 = vadd.f32 %v13957_v46, %v22502_v2  ;;  %v13959_v48 = vpop.f32.mrb[118].mxu1 }
 0x95d   :  { %v17781_v11 = vadd.f32 %v12415_v35, %v22493_v4  ;;  %v12417_v8 = vpop.f32.mrb[119].mxu0  ;;  %v17845_v24 = vadd.f32 %v13959_v48, %v22497_v50  ;;  %v13961_v13 = vpop.f32.mrb[119].mxu1  ;;  %v14196_v31 = vmax.f32 %v17779_v28, 0.0  ;;  %v14198_v45 = vmax.f32 %v17843_v42, 0.0 }
 0x95e   :  { %v17782_v10 = vadd.f32 %v12417_v8, %v22499_v63  ;;  %v17846_v38 = vadd.f32 %v13961_v13, %v22502_v2  ;;  %v14197_v55 = vmax.f32 %v17780_v1, 0.0  ;;  %v14199_v36 = vmax.f32 %v17844_v23, 0.0 }
 0x95f   :  { %v14204_v17 = vmax.f32 %v17781_v11, 0.0  ;;  %15306 = vmatmul.mubr.bf16.gmra.mrb[224].mxu0 %v22675_v0  ;;  %v14206_v22 = vmax.f32 %v17845_v24, 0.0  ;;  %15467 = vmatmul.mubr.bf16.gmra.mrb[224].mxu1 %v22678_v54 }
 0x960   :  { %v14205_v3 = vmax.f32 %v17782_v10, 0.0  ;;  %15313 = vmatprep.mubr.bf16.mxu0 %v22700_v27  ;;  %v14207_v59 = vmax.f32 %v17846_v38, 0.0  ;;  %15474 = vmatprep.mubr.bf16.mxu1 %v22702_v44 }
 0x961   :  { %v22775_v62 = vpack.c.bf16 %v14204_v17, %v14196_v31  ;;  %v22778_v56 = vpack.c.bf16 %v14206_v22, %v14198_v45 }
 0x962   :  { %v22780_v43 = vpack.c.bf16 %v14205_v3, %v14197_v55  ;;  %v12421_v7 = vpop.f32.mrb[120].mxu0  ;;  %v22782_v0 = vpack.c.bf16 %v14207_v59, %v14199_v36  ;;  %v13965_v37 = vpop.f32.mrb[120].mxu1 }
 0x963   :  { %v17783_v20 = vadd.f32 %v12421_v7, %v22493_v4  ;;  %v12423_v58 = vpop.f32.mrb[121].mxu0  ;;  %v17847_v54 = vadd.f32 %v13965_v37, %v22497_v50  ;;  %v13967_v39 = vpop.f32.mrb[121].mxu1 }
 0x964   :  { %v17784_v27 = vadd.f32 %v12423_v58, %v22499_v63  ;;  %v12425_v34 = vpop.f32.mrb[122].mxu0  ;;  %v17848_v51 = vadd.f32 %v13967_v39, %v22502_v2  ;;  %v13969_v53 = vpop.f32.mrb[122].mxu1 }
 0x965   :  { %v17785_v44 = vadd.f32 %v12425_v34, %v22493_v4  ;;  %v12427_v41 = vpop.f32.mrb[123].mxu0  ;;  %v17849_v14 = vadd.f32 %v13969_v53, %v22497_v50  ;;  %v13971_v6 = vpop.f32.mrb[123].mxu1  ;;  %v14212_v16 = vmax.f32 %v17783_v20, 0.0  ;;  %v14214_v29 = vmax.f32 %v17847_v54, 0.0  ;;  %v22824_v34 = vld [vmem:[#allocation10] ss:$0 sm:$0xff] }
 0x966   :  { %v17786_v9 = vadd.f32 %v12427_v41, %v22499_v63  ;;  %v17850_v40 = vadd.f32 %v13971_v6, %v22502_v2  ;;  %v14213_v28 = vmax.f32 %v17784_v27, 0.0  ;;  %v14215_v42 = vmax.f32 %v17848_v51, 0.0 }
 0x967   :  { %v14220_v61 = vmax.f32 %v17785_v44, 0.0  ;;  %15314 = vmatmul.mubr.bf16.gmra.mrb[228].mxu0 %v22695_v30  ;;  %v14222_v26 = vmax.f32 %v17849_v14, 0.0  ;;  %15475 = vmatmul.mubr.bf16.gmra.mrb[228].mxu1 %v22698_v12 }
 0x968   :  { %v14221_v33 = vmax.f32 %v17786_v9, 0.0  ;;  %15321 = vmatprep.mubr.bf16.mxu0 %v22720_v60  ;;  %v14223_v46 = vmax.f32 %v17850_v40, 0.0  ;;  %15482 = vmatprep.mubr.bf16.mxu1 %v22722_v19 }
 0x969   :  { %v22795_v1 = vpack.c.bf16 %v14220_v61, %v14212_v16  ;;  %v22798_v35 = vpack.c.bf16 %v14222_v26, %v14214_v29 }
 0x96a   :  { %v22800_v23 = vpack.c.bf16 %v14221_v33, %v14213_v28  ;;  %v12431_v11 = vpop.f32.mrb[124].mxu0  ;;  %v22802_v30 = vpack.c.bf16 %v14223_v46, %v14215_v42  ;;  %v13975_v8 = vpop.f32.mrb[124].mxu1 }
 0x96b   :  { %v17787_v48 = vadd.f32 %v12431_v11, %v22493_v4  ;;  %v12433_v24 = vpop.f32.mrb[125].mxu0  ;;  %v17851_v12 = vadd.f32 %v13975_v8, %v22497_v50  ;;  %v13977_v10 = vpop.f32.mrb[125].mxu1 }
 0x96c   :  { %v17788_v60 = vadd.f32 %v12433_v24, %v22499_v63  ;;  %v12435_v13 = vpop.f32.mrb[126].mxu0  ;;  %v17852_v31 = vadd.f32 %v13977_v10, %v22502_v2  ;;  %v13979_v17 = vpop.f32.mrb[126].mxu1 }
 0x96d   :  { %v17789_v19 = vadd.f32 %v12435_v13, %v22493_v4  ;;  %v12437_v38 = vpop.f32.mrb[127].mxu0  ;;  %v17853_v45 = vadd.f32 %v13979_v17, %v22497_v50  ;;  %v13981_v22 = vpop.f32.mrb[127].mxu1  ;;  %v14228_v3 = vmax.f32 %v17787_v48, 0.0  ;;  %v14230_v7 = vmax.f32 %v17851_v12, 0.0 }
 0x96e   :  { %v17790_v55 = vadd.f32 %v12437_v38, %v22499_v63  ;;  %v17854_v59 = vadd.f32 %v13981_v22, %v22502_v2  ;;  %v14229_v20 = vmax.f32 %v17788_v60, 0.0  ;;  %v14231_v4 = vmax.f32 %v17852_v31, 0.0 }
 0x96f   :  { %v14236_v36 = vmax.f32 %v17789_v19, 0.0  ;;  %15322 = vmatmul.mubr.bf16.gmra.mrb[232].mxu0 %v22715_v5  ;;  %v14238_v37 = vmax.f32 %v17853_v45, 0.0  ;;  %15483 = vmatmul.mubr.bf16.gmra.mrb[232].mxu1 %v22718_v21 }
 0x970   :  { %v14237_v58 = vmax.f32 %v17790_v55, 0.0  ;;  %15329 = vmatprep.mubr.bf16.mxu0 %v22740_v47  ;;  %v14239_v50 = vmax.f32 %v17854_v59, 0.0  ;;  %15490 = vmatprep.mubr.bf16.mxu1 %v22742_v57 }
 0x971   :  { %v22815_v54 = vpack.c.bf16 %v14236_v36, %v14228_v3  ;;  %v22818_v63 = vpack.c.bf16 %v14238_v37, %v14230_v7 }
 0x972   :  { %v22820_v27 = vpack.c.bf16 %v14237_v58, %v14229_v20  ;;  %v17167_v2 = vpop.f32.mrb[128].mxu0  ;;  %v22822_v5 = vpack.c.bf16 %v14239_v50, %v14231_v4  ;;  %v17279_v39 = vpop.f32.mrb[128].mxu1 }
 0x973   :  { %v17168_v51 = vpop.f32.mrb[129].mxu0  ;;  %v17280_v44 = vpop.f32.mrb[129].mxu1 }
 0x974   :  { %v17169_v21 = vadd.f32 %v17168_v51, %v17167_v2  ;;  %v17170_v47 = vpop.f32.mrb[130].mxu0  ;;  %v17281_v53 = vadd.f32 %v17280_v44, %v17279_v39  ;;  %v17282_v41 = vpop.f32.mrb[130].mxu1 }
 0x975   :  { %v17171_v14 = vpop.f32.mrb[131].mxu0  ;;  %v17283_v6 = vpop.f32.mrb[131].mxu1 }
 0x976   :  { %v14922_v9 = vadd.f32 %v17169_v21, %v22824_v34  ;;  %v17172_v57 = vadd.f32 %v17171_v14, %v17170_v47  ;;  %v17284_v16 = vadd.f32 %v17283_v6, %v17282_v41 }
 0x977   :  { %15330 = vmatmul.mubr.bf16.gmra.mrb[236].mxu0 %v22735_v18  ;;  %15491 = vmatmul.mubr.bf16.gmra.mrb[236].mxu1 %v22738_v52 }
 0x978   :  { %v22828_v61 = vadd.f32 %v17281_v53, %v14922_v9  ;;  %v14925_v40 = vadd.f32 %v17172_v57, %v22824_v34  ;;  %15337 = vmatprep.mubr.bf16.mxu0 %v22760_v25  ;;  %15498 = vmatprep.mubr.bf16.mxu1 %v22762_v49 }
 0x97a   :  { %v22834_v29 = vadd.f32 %v17284_v16, %v14925_v40  ;;  %v17173_v28 = vpop.f32.mrb[132].mxu0  ;;  %v17285_v26 = vpop.f32.mrb[132].mxu1 }
 0x97b   :  { %v17174_v33 = vpop.f32.mrb[133].mxu0  ;;  %v17286_v46 = vpop.f32.mrb[133].mxu1 }
 0x97c   :  { %v17175_v42 = vadd.f32 %v17174_v33, %v17173_v28  ;;  %v17176_v11 = vpop.f32.mrb[134].mxu0  ;;  %v17287_v48 = vadd.f32 %v17286_v46, %v17285_v26  ;;  %v17288_v18 = vpop.f32.mrb[134].mxu1 }
 0x97d   :  { %v17177_v8 = vpop.f32.mrb[135].mxu0  ;;  %v17289_v60 = vpop.f32.mrb[135].mxu1 }
 0x97e   :  { %v14930_v24 = vadd.f32 %v17175_v42, %v22824_v34  ;;  %v17178_v12 = vadd.f32 %v17177_v8, %v17176_v11  ;;  %v17290_v52 = vadd.f32 %v17289_v60, %v17288_v18 }
 0x97f   :  { %15338 = vmatmul.mubr.bf16.gmra.mrb[240].mxu0 %v22755_v32  ;;  %15499 = vmatmul.mubr.bf16.gmra.mrb[240].mxu1 %v22758_v15 }
 0x980   :  { %v22838_v25 = vadd.f32 %v17287_v48, %v14930_v24  ;;  %v14933_v49 = vadd.f32 %v17178_v12, %v22824_v34  ;;  %15345 = vmatprep.mubr.bf16.mxu0 %v22780_v43  ;;  %15506 = vmatprep.mubr.bf16.mxu1 %v22782_v0 }
 0x982   :  { %v22844_v10 = vadd.f32 %v17290_v52, %v14933_v49  ;;  %v17179_v13 = vpop.f32.mrb[136].mxu0  ;;  %v17291_v31 = vpop.f32.mrb[136].mxu1 }
 0x983   :  { %v17180_v19 = vpop.f32.mrb[137].mxu0  ;;  %v17292_v38 = vpop.f32.mrb[137].mxu1 }
 0x984   :  { %v17181_v17 = vadd.f32 %v17180_v19, %v17179_v13  ;;  %v17182_v45 = vpop.f32.mrb[138].mxu0  ;;  %v17293_v55 = vadd.f32 %v17292_v38, %v17291_v31  ;;  %v17294_v32 = vpop.f32.mrb[138].mxu1 }
 0x985   :  { %v17183_v22 = vpop.f32.mrb[139].mxu0  ;;  %v17295_v59 = vpop.f32.mrb[139].mxu1 }
 0x986   :  { %v14938_v3 = vadd.f32 %v17181_v17, %v22824_v34  ;;  %v17184_v36 = vadd.f32 %v17183_v22, %v17182_v45  ;;  %v17296_v15 = vadd.f32 %v17295_v59, %v17294_v32 }
 0x987   :  { %15346 = vmatmul.mubr.bf16.gmra.mrb[244].mxu0 %v22775_v62  ;;  %15507 = vmatmul.mubr.bf16.gmra.mrb[244].mxu1 %v22778_v56 }
 0x988   :  { %v22848_v43 = vadd.f32 %v17293_v55, %v14938_v3  ;;  %v14941_v0 = vadd.f32 %v17184_v36, %v22824_v34  ;;  %15353 = vmatprep.mubr.bf16.mxu0 %v22800_v23  ;;  %15514 = vmatprep.mubr.bf16.mxu1 %v22802_v30 }
 0x98a   :  { %v22854_v7 = vadd.f32 %v17296_v15, %v14941_v0  ;;  %v17185_v20 = vpop.f32.mrb[140].mxu0  ;;  %v17297_v37 = vpop.f32.mrb[140].mxu1 }
 0x98b   :  { %v17186_v58 = vpop.f32.mrb[141].mxu0  ;;  %v17298_v50 = vpop.f32.mrb[141].mxu1 }
 0x98c   :  { %v17187_v4 = vadd.f32 %v17186_v58, %v17185_v20  ;;  %v17188_v2 = vpop.f32.mrb[142].mxu0  ;;  %v17299_v39 = vadd.f32 %v17298_v50, %v17297_v37  ;;  %v17300_v62 = vpop.f32.mrb[142].mxu1 }
 0x98d   :  { %v17189_v51 = vpop.f32.mrb[143].mxu0  ;;  %v17301_v47 = vpop.f32.mrb[143].mxu1 }
 0x98e   :  { %v14946_v21 = vadd.f32 %v17187_v4, %v22824_v34  ;;  %v17190_v44 = vadd.f32 %v17189_v51, %v17188_v2  ;;  %v17302_v56 = vadd.f32 %v17301_v47, %v17300_v62 }
 0x98f   :  { %15354 = vmatmul.mubr.bf16.gmra.mrb[248].mxu0 %v22795_v1  ;;  %15515 = vmatmul.mubr.bf16.gmra.mrb[248].mxu1 %v22798_v35 }
 0x990   :  { %v22858_v23 = vadd.f32 %v17299_v39, %v14946_v21  ;;  %v14949_v30 = vadd.f32 %v17190_v44, %v22824_v34  ;;  %15361 = vmatprep.mubr.bf16.mxu0 %v22820_v27  ;;  %15522 = vmatprep.mubr.bf16.mxu1 %v22822_v5 }
 0x992   :  { %v22864_v53 = vadd.f32 %v17302_v56, %v14949_v30  ;;  %v17191_v41 = vpop.f32.mrb[144].mxu0  ;;  %v17303_v14 = vpop.f32.mrb[144].mxu1 }
 0x993   :  { %v17192_v9 = vpop.f32.mrb[145].mxu0  ;;  %v17304_v6 = vpop.f32.mrb[145].mxu1 }
 0x994   :  { %v17193_v57 = vadd.f32 %v17192_v9, %v17191_v41  ;;  %v17194_v16 = vpop.f32.mrb[146].mxu0  ;;  %v17305_v40 = vadd.f32 %v17304_v6, %v17303_v14  ;;  %v17306_v1 = vpop.f32.mrb[146].mxu1 }
 0x995   :  { %v17195_v28 = vpop.f32.mrb[147].mxu0  ;;  %v17307_v42 = vpop.f32.mrb[147].mxu1 }
 0x996   :  { %v14954_v26 = vadd.f32 %v17193_v57, %v22824_v34  ;;  %v17196_v33 = vadd.f32 %v17195_v28, %v17194_v16  ;;  %v17308_v35 = vadd.f32 %v17307_v42, %v17306_v1 }
 0x997   :  { %15362 = vmatmul.mubr.bf16.gmra.mrb[252].mxu0 %v22815_v54  ;;  %15523 = vmatmul.mubr.bf16.gmra.mrb[252].mxu1 %v22818_v63 }
 0x998   :  { %v22868_v27 = vadd.f32 %v17305_v40, %v14954_v26  ;;  %v14957_v5 = vadd.f32 %v17196_v33, %v22824_v34 }
 0x99a   :  { %v22872_v46 = vadd.f32 %v17308_v35, %v14957_v5  ;;  %v17197_v11 = vpop.f32.mrb[148].mxu0  ;;  %v17309_v48 = vpop.f32.mrb[148].mxu1 }
 0x99b   :  { %v17198_v18 = vpop.f32.mrb[149].mxu0  ;;  %v17310_v24 = vpop.f32.mrb[149].mxu1 }
 0x99c   :  { %v17199_v8 = vadd.f32 %v17198_v18, %v17197_v11  ;;  %v17200_v12 = vpop.f32.mrb[150].mxu0  ;;  %v17311_v60 = vadd.f32 %v17310_v24, %v17309_v48  ;;  %v17312_v52 = vpop.f32.mrb[150].mxu1 }
 0x99d   :  { %v17201_v49 = vpop.f32.mrb[151].mxu0  ;;  %v17313_v31 = vpop.f32.mrb[151].mxu1 }
 0x99e   :  { %v14962_v13 = vadd.f32 %v17199_v8, %v22824_v34  ;;  %v17202_v54 = vadd.f32 %v17201_v49, %v17200_v12  ;;  %v17314_v19 = vadd.f32 %v17313_v31, %v17312_v52 }
 0x9a0   :  { %v22875_v17 = vadd.f32 %v17311_v60, %v14962_v13  ;;  %v14965_v63 = vadd.f32 %v17202_v54, %v22824_v34 }
 0x9a2   :  { %v22878_v38 = vadd.f32 %v17314_v19, %v14965_v63  ;;  %v17203_v45 = vpop.f32.mrb[152].mxu0  ;;  %v17315_v55 = vpop.f32.mrb[152].mxu1 }
 0x9a3   :  { %v17204_v32 = vpop.f32.mrb[153].mxu0  ;;  %v17316_v3 = vpop.f32.mrb[153].mxu1 }
 0x9a4   :  { %v17205_v22 = vadd.f32 %v17204_v32, %v17203_v45  ;;  %v17206_v36 = vpop.f32.mrb[154].mxu0  ;;  %v17317_v59 = vadd.f32 %v17316_v3, %v17315_v55  ;;  %v17318_v15 = vpop.f32.mrb[154].mxu1 }
 0x9a5   :  { %v17207_v0 = vpop.f32.mrb[155].mxu0  ;;  %v17319_v58 = vpop.f32.mrb[155].mxu1 }
 0x9a6   :  { %v14970_v20 = vadd.f32 %v17205_v22, %v22824_v34  ;;  %v17208_v37 = vadd.f32 %v17207_v0, %v17206_v36  ;;  %v17320_v4 = vadd.f32 %v17319_v58, %v17318_v15 }
 0x9a8   :  { %v22881_v50 = vadd.f32 %v17317_v59, %v14970_v20  ;;  %v14973_v2 = vadd.f32 %v17208_v37, %v22824_v34 }
 0x9aa   :  { %v22884_v39 = vadd.f32 %v17320_v4, %v14973_v2  ;;  %v17209_v62 = vpop.f32.mrb[156].mxu0  ;;  %v17321_v51 = vpop.f32.mrb[156].mxu1 }
 0x9ab   :  { %v17210_v21 = vpop.f32.mrb[157].mxu0  ;;  %v17322_v47 = vpop.f32.mrb[157].mxu1 }
 0x9ac   :  { %v17211_v44 = vadd.f32 %v17210_v21, %v17209_v62  ;;  %v17212_v56 = vpop.f32.mrb[158].mxu0  ;;  %v17323_v30 = vadd.f32 %v17322_v47, %v17321_v51  ;;  %v17324_v41 = vpop.f32.mrb[158].mxu1 }
 0x9ad   :  { %v17213_v14 = vpop.f32.mrb[159].mxu0  ;;  %v17325_v6 = vpop.f32.mrb[159].mxu1 }
 0x9ae   :  { %v14978_v9 = vadd.f32 %v17211_v44, %v22824_v34  ;;  %v17214_v57 = vadd.f32 %v17213_v14, %v17212_v56  ;;  %v17326_v16 = vadd.f32 %v17325_v6, %v17324_v41 }
 0x9b0   :  { %v22887_v40 = vadd.f32 %v17323_v30, %v14978_v9  ;;  %v14981_v1 = vadd.f32 %v17214_v57, %v22824_v34 }
 0x9b2   :  { %v22890_v28 = vadd.f32 %v17326_v16, %v14981_v1  ;;  %v17215_v26 = vpop.f32.mrb[160].mxu0  ;;  %v17327_v33 = vpop.f32.mrb[160].mxu1 }
 0x9b3   :  { %v17216_v42 = vpop.f32.mrb[161].mxu0  ;;  %v17328_v5 = vpop.f32.mrb[161].mxu1 }
 0x9b4   :  { %v17217_v35 = vadd.f32 %v17216_v42, %v17215_v26  ;;  %v17218_v11 = vpop.f32.mrb[162].mxu0  ;;  %v17329_v48 = vadd.f32 %v17328_v5, %v17327_v33  ;;  %v17330_v18 = vpop.f32.mrb[162].mxu1 }
 0x9b5   :  { %v17219_v8 = vpop.f32.mrb[163].mxu0  ;;  %v17331_v60 = vpop.f32.mrb[163].mxu1 }
 0x9b6   :  { %v14986_v24 = vadd.f32 %v17217_v35, %v22824_v34  ;;  %v17220_v12 = vadd.f32 %v17219_v8, %v17218_v11  ;;  %v17332_v52 = vadd.f32 %v17331_v60, %v17330_v18 }
 0x9b8   :  { %v22893_v49 = vadd.f32 %v17329_v48, %v14986_v24  ;;  %v14989_v13 = vadd.f32 %v17220_v12, %v22824_v34 }
 0x9ba   :  { %v22896_v54 = vadd.f32 %v17332_v52, %v14989_v13  ;;  %v17221_v31 = vpop.f32.mrb[164].mxu0  ;;  %v17333_v19 = vpop.f32.mrb[164].mxu1 }
 0x9bb   :  { %v17222_v63 = vpop.f32.mrb[165].mxu0  ;;  %v17334_v55 = vpop.f32.mrb[165].mxu1 }
 0x9bc   :  { %v17223_v45 = vadd.f32 %v17222_v63, %v17221_v31  ;;  %v17224_v32 = vpop.f32.mrb[166].mxu0  ;;  %v17335_v22 = vadd.f32 %v17334_v55, %v17333_v19  ;;  %v17336_v3 = vpop.f32.mrb[166].mxu1 }
 0x9bd   :  { %v17225_v36 = vpop.f32.mrb[167].mxu0  ;;  %v17337_v0 = vpop.f32.mrb[167].mxu1 }
 0x9be   :  { %v14994_v59 = vadd.f32 %v17223_v45, %v22824_v34  ;;  %v17226_v15 = vadd.f32 %v17225_v36, %v17224_v32  ;;  %v17338_v20 = vadd.f32 %v17337_v0, %v17336_v3 }
 0x9c0   :  { %v22899_v37 = vadd.f32 %v17335_v22, %v14994_v59  ;;  %v14997_v58 = vadd.f32 %v17226_v15, %v22824_v34 }
 0x9c2   :  { %v22902_v4 = vadd.f32 %v17338_v20, %v14997_v58  ;;  %v17227_v2 = vpop.f32.mrb[168].mxu0  ;;  %v17339_v62 = vpop.f32.mrb[168].mxu1 }
 0x9c3   :  { %v17228_v51 = vpop.f32.mrb[169].mxu0  ;;  %v17340_v44 = vpop.f32.mrb[169].mxu1 }
 0x9c4   :  { %v17229_v21 = vadd.f32 %v17228_v51, %v17227_v2  ;;  %v17230_v47 = vpop.f32.mrb[170].mxu0  ;;  %v17341_v56 = vadd.f32 %v17340_v44, %v17339_v62  ;;  %v17342_v30 = vpop.f32.mrb[170].mxu1 }
 0x9c5   :  { %v17231_v41 = vpop.f32.mrb[171].mxu0  ;;  %v17343_v57 = vpop.f32.mrb[171].mxu1 }
 0x9c6   :  { %v15002_v14 = vadd.f32 %v17229_v21, %v22824_v34  ;;  %v17232_v9 = vadd.f32 %v17231_v41, %v17230_v47  ;;  %v17344_v6 = vadd.f32 %v17343_v57, %v17342_v30 }
 0x9c8   :  { %v22905_v16 = vadd.f32 %v17341_v56, %v15002_v14  ;;  %v15005_v1 = vadd.f32 %v17232_v9, %v22824_v34 }
 0x9ca   :  { %v22908_v26 = vadd.f32 %v17344_v6, %v15005_v1  ;;  %v17233_v33 = vpop.f32.mrb[172].mxu0  ;;  %v17345_v42 = vpop.f32.mrb[172].mxu1 }
 0x9cb   :  { %v17234_v35 = vpop.f32.mrb[173].mxu0  ;;  %v17346_v11 = vpop.f32.mrb[173].mxu1 }
 0x9cc   :  { %v17235_v5 = vadd.f32 %v17234_v35, %v17233_v33  ;;  %v17236_v48 = vpop.f32.mrb[174].mxu0  ;;  %v17347_v18 = vadd.f32 %v17346_v11, %v17345_v42  ;;  %v17348_v8 = vpop.f32.mrb[174].mxu1 }
 0x9cd   :  { %v17237_v24 = vpop.f32.mrb[175].mxu0  ;;  %v17349_v52 = vpop.f32.mrb[175].mxu1 }
 0x9ce   :  { %v15010_v12 = vadd.f32 %v17235_v5, %v22824_v34  ;;  %v17238_v60 = vadd.f32 %v17237_v24, %v17236_v48  ;;  %v17350_v13 = vadd.f32 %v17349_v52, %v17348_v8 }
 0x9d0   :  { %v22911_v31 = vadd.f32 %v17347_v18, %v15010_v12  ;;  %v15013_v19 = vadd.f32 %v17238_v60, %v22824_v34 }
 0x9d2   :  { %v22914_v63 = vadd.f32 %v17350_v13, %v15013_v19  ;;  %v17239_v45 = vpop.f32.mrb[176].mxu0  ;;  %v17351_v55 = vpop.f32.mrb[176].mxu1 }
 0x9d3   :  { %v17240_v32 = vpop.f32.mrb[177].mxu0  ;;  %v17352_v3 = vpop.f32.mrb[177].mxu1 }
 0x9d4   :  { %v17241_v22 = vadd.f32 %v17240_v32, %v17239_v45  ;;  %v17242_v36 = vpop.f32.mrb[178].mxu0  ;;  %v17353_v59 = vadd.f32 %v17352_v3, %v17351_v55  ;;  %v17354_v15 = vpop.f32.mrb[178].mxu1 }
 0x9d5   :  { %v17243_v0 = vpop.f32.mrb[179].mxu0  ;;  %v17355_v2 = vpop.f32.mrb[179].mxu1 }
 0x9d6   :  { %v15018_v20 = vadd.f32 %v17241_v22, %v22824_v34  ;;  %v17244_v58 = vadd.f32 %v17243_v0, %v17242_v36  ;;  %v17356_v62 = vadd.f32 %v17355_v2, %v17354_v15 }
 0x9d8   :  { %v22917_v51 = vadd.f32 %v17353_v59, %v15018_v20  ;;  %v15021_v21 = vadd.f32 %v17244_v58, %v22824_v34 }
 0x9da   :  { %v22920_v44 = vadd.f32 %v17356_v62, %v15021_v21  ;;  %v17245_v47 = vpop.f32.mrb[180].mxu0  ;;  %v17357_v56 = vpop.f32.mrb[180].mxu1 }
 0x9db   :  { %v17246_v30 = vpop.f32.mrb[181].mxu0  ;;  %v17358_v14 = vpop.f32.mrb[181].mxu1 }
 0x9dc   :  { %v17247_v41 = vadd.f32 %v17246_v30, %v17245_v47  ;;  %v17248_v9 = vpop.f32.mrb[182].mxu0  ;;  %v17359_v57 = vadd.f32 %v17358_v14, %v17357_v56  ;;  %v17360_v6 = vpop.f32.mrb[182].mxu1 }
 0x9dd   :  { %v17249_v1 = vpop.f32.mrb[183].mxu0  ;;  %v17361_v35 = vpop.f32.mrb[183].mxu1 }
 0x9de   :  { %v15026_v33 = vadd.f32 %v17247_v41, %v22824_v34  ;;  %v17250_v42 = vadd.f32 %v17249_v1, %v17248_v9  ;;  %v17362_v5 = vadd.f32 %v17361_v35, %v17360_v6 }
 0x9e0   :  { %v22923_v11 = vadd.f32 %v17359_v57, %v15026_v33  ;;  %v15029_v48 = vadd.f32 %v17250_v42, %v22824_v34 }
 0x9e2   :  { %v22926_v18 = vadd.f32 %v17362_v5, %v15029_v48  ;;  %v17251_v8 = vpop.f32.mrb[184].mxu0  ;;  %v17363_v24 = vpop.f32.mrb[184].mxu1 }
 0x9e3   :  { %v17252_v12 = vpop.f32.mrb[185].mxu0  ;;  %v17364_v52 = vpop.f32.mrb[185].mxu1 }
 0x9e4   :  { %v17253_v60 = vadd.f32 %v17252_v12, %v17251_v8  ;;  %v17254_v13 = vpop.f32.mrb[186].mxu0  ;;  %v17365_v19 = vadd.f32 %v17364_v52, %v17363_v24  ;;  %v17366_v45 = vpop.f32.mrb[186].mxu1 }
 0x9e5   :  { %v17255_v55 = vpop.f32.mrb[187].mxu0  ;;  %v17367_v3 = vpop.f32.mrb[187].mxu1 }
 0x9e6   :  { %v15034_v32 = vadd.f32 %v17253_v60, %v22824_v34  ;;  %v17256_v22 = vadd.f32 %v17255_v55, %v17254_v13  ;;  %v17368_v36 = vadd.f32 %v17367_v3, %v17366_v45 }
 0x9e8   :  { %v22929_v59 = vadd.f32 %v17365_v19, %v15034_v32  ;;  %v15037_v15 = vadd.f32 %v17256_v22, %v22824_v34 }
 0x9ea   :  { %v22932_v0 = vadd.f32 %v17368_v36, %v15037_v15  ;;  %v17257_v20 = vpop.f32.mrb[188].mxu0  ;;  %v17369_v58 = vpop.f32.mrb[188].mxu1 }
 0x9eb   :  { %v17258_v2 = vpop.f32.mrb[189].mxu0  ;;  %v17370_v21 = vpop.f32.mrb[189].mxu1 }
 0x9ec   :  { %v17259_v62 = vadd.f32 %v17258_v2, %v17257_v20  ;;  %v17260_v47 = vpop.f32.mrb[190].mxu0  ;;  %v17371_v56 = vadd.f32 %v17370_v21, %v17369_v58  ;;  %v17372_v30 = vpop.f32.mrb[190].mxu1 }
 0x9ed   :  { %v17261_v41 = vpop.f32.mrb[191].mxu0  ;;  %v17373_v57 = vpop.f32.mrb[191].mxu1 }
 0x9ee   :  { %v15042_v14 = vadd.f32 %v17259_v62, %v22824_v34  ;;  %v17262_v9 = vadd.f32 %v17261_v41, %v17260_v47  ;;  %v17374_v6 = vadd.f32 %v17373_v57, %v17372_v30 }
 0x9f0   :  { %v22935_v1 = vadd.f32 %v17371_v56, %v15042_v14  ;;  %v15045_v33 = vadd.f32 %v17262_v9, %v22824_v34 }
 0x9f2   :  { %v22938_v42 = vadd.f32 %v17374_v6, %v15045_v33  ;;  %v17391_v35 = vpop.f32.mrb[192].mxu0  ;;  %v17503_v5 = vpop.f32.mrb[192].mxu1 }
 0x9f3   :  { %v17392_v48 = vpop.f32.mrb[193].mxu0  ;;  %v17504_v24 = vpop.f32.mrb[193].mxu1 }
 0x9f4   :  { %v17393_v8 = vadd.f32 %v17392_v48, %v17391_v35  ;;  %v17394_v12 = vpop.f32.mrb[194].mxu0  ;;  %v17505_v60 = vadd.f32 %v17504_v24, %v17503_v5  ;;  %v17506_v52 = vpop.f32.mrb[194].mxu1 }
 0x9f5   :  { %v17395_v13 = vpop.f32.mrb[195].mxu0  ;;  %v17507_v55 = vpop.f32.mrb[195].mxu1 }
 0x9f6   :  { %v15244_v19 = vadd.f32 %v17393_v8, %v22828_v61  ;;  %v17396_v45 = vadd.f32 %v17395_v13, %v17394_v12  ;;  %v17508_v32 = vadd.f32 %v17507_v55, %v17506_v52 }
 0x9f8   :  { %v15405_v22 = vadd.f32 %v17505_v60, %v15244_v19  ;;  %v15247_v3 = vadd.f32 %v17396_v45, %v22834_v29 }
 0x9fa   :  { %v17119_v34 = vmul.f32 -1.442695, %v15405_v22  ;;  %v15408_v36 = vadd.f32 %v17508_v32, %v15247_v3  ;;  %v17397_v15 = vpop.f32.mrb[196].mxu0  ;;  %v17509_v20 = vpop.f32.mrb[196].mxu1 }
 0x9fb   :  { %v17398_v58 = vpop.f32.mrb[197].mxu0  ;;  %v17510_v21 = vpop.f32.mrb[197].mxu1 }
 0x9fc   :  { %19724 = vpow2.f32 %v17119_v34  ;;  %v17120_v2 = vmul.f32 -1.442695, %v15408_v36  ;;  %v17399_v62 = vadd.f32 %v17398_v58, %v17397_v15  ;;  %v17400_v47 = vpop.f32.mrb[198].mxu0  ;;  %v17511_v56 = vadd.f32 %v17510_v21, %v17509_v20  ;;  %v17512_v30 = vpop.f32.mrb[198].mxu1 }
 0x9fd   :  { %v17401_v41 = vpop.f32.mrb[199].mxu0  ;;  %v17513_v9 = vpop.f32.mrb[199].mxu1 }
 0x9fe   :  { %19726 = vpow2.f32 %v17120_v2  ;;  %v15252_v61 = vadd.f32 %v17399_v62, %v22838_v25  ;;  %v17402_v14 = vadd.f32 %v17401_v41, %v17400_v47  ;;  %v17514_v57 = vadd.f32 %v17513_v9, %v17512_v30 }
 0xa00   :  { %v15413_v29 = vadd.f32 %v17511_v56, %v15252_v61  ;;  %v15255_v6 = vadd.f32 %v17402_v14, %v22844_v10 }
 0xa02   :  { %v17121_v33 = vmul.f32 -1.442695, %v15413_v29  ;;  %v15416_v35 = vadd.f32 %v17514_v57, %v15255_v6  ;;  %v17403_v5 = vpop.f32.mrb[200].mxu0  ;;  %v17515_v48 = vpop.f32.mrb[200].mxu1 }
 0xa03   :  { %v17404_v8 = vpop.f32.mrb[201].mxu0  ;;  %v17516_v60 = vpop.f32.mrb[201].mxu1 }
 0xa04   :  { %19728 = vpow2.f32 %v17121_v33  ;;  %v17122_v24 = vmul.f32 -1.442695, %v15416_v35  ;;  %v17405_v12 = vadd.f32 %v17404_v8, %v17403_v5  ;;  %v17406_v52 = vpop.f32.mrb[202].mxu0  ;;  %v17517_v13 = vadd.f32 %v17516_v60, %v17515_v48  ;;  %v17518_v19 = vpop.f32.mrb[202].mxu1 }
 0xa05   :  { %v17407_v45 = vpop.f32.mrb[203].mxu0  ;;  %v17519_v22 = vpop.f32.mrb[203].mxu1 }
 0xa06   :  { %v19725_v25 = vpop.eup %19724  ;;  %19730 = vpow2.f32 %v17122_v24  ;;  %v15260_v55 = vadd.f32 %v17405_v12, %v22848_v43  ;;  %v17408_v32 = vadd.f32 %v17407_v45, %v17406_v52  ;;  %v17520_v3 = vadd.f32 %v17519_v22, %v17518_v19 }
 0xa07   :  { %v15627_v10 = vadd.f32 1.0, %v19725_v25 }
 0xa08   :  { %v19727_v34 = vpop.eup %19726  ;;  %v15421_v36 = vadd.f32 %v17517_v13, %v15260_v55  ;;  %v15263_v15 = vadd.f32 %v17408_v32, %v22854_v7 }
 0xa09   :  { %19732 = vrcp.f32 %v15627_v10  ;;  %v15628_v20 = vadd.f32 1.0, %v19727_v34 }
 0xa0a   :  { %v17123_v58 = vmul.f32 -1.442695, %v15421_v36  ;;  %v15424_v2 = vadd.f32 %v17520_v3, %v15263_v15  ;;  %v17409_v62 = vpop.f32.mrb[204].mxu0  ;;  %v17521_v21 = vpop.f32.mrb[204].mxu1 }
 0xa0b   :  { %19734 = vrcp.f32 %v15628_v20  ;;  %v17410_v47 = vpop.f32.mrb[205].mxu0  ;;  %v17522_v43 = vpop.f32.mrb[205].mxu1 }
 0xa0c   :  { %19736 = vpow2.f32 %v17123_v58  ;;  %v17124_v56 = vmul.f32 -1.442695, %v15424_v2  ;;  %v17411_v30 = vadd.f32 %v17410_v47, %v17409_v62  ;;  %v17412_v41 = vpop.f32.mrb[206].mxu0  ;;  %v17523_v61 = vadd.f32 %v17522_v43, %v17521_v21  ;;  %v17524_v14 = vpop.f32.mrb[206].mxu1 }
 0xa0d   :  { %v17413_v9 = vpop.f32.mrb[207].mxu0  ;;  %v17525_v6 = vpop.f32.mrb[207].mxu1 }
 0xa0e   :  { %v19729_v57 = vpop.eup %19728  ;;  %19738 = vpow2.f32 %v17124_v56  ;;  %v15268_v7 = vadd.f32 %v17411_v30, %v22858_v23  ;;  %v17414_v29 = vadd.f32 %v17413_v9, %v17412_v41  ;;  %v17526_v35 = vadd.f32 %v17525_v6, %v17524_v14 }
 0xa0f   :  { %v15629_v33 = vadd.f32 1.0, %v19729_v57 }
 0xa10   :  { %v19731_v5 = vpop.eup %19730  ;;  %v15429_v48 = vadd.f32 %v17523_v61, %v15268_v7  ;;  %v15271_v8 = vadd.f32 %v17414_v29, %v22864_v53 }
 0xa11   :  { %19740 = vrcp.f32 %v15629_v33  ;;  %v15630_v24 = vadd.f32 1.0, %v19731_v5 }
 0xa12   :  { %v17125_v12 = vmul.f32 -1.442695, %v15429_v48  ;;  %v15432_v60 = vadd.f32 %v17526_v35, %v15271_v8  ;;  %v17415_v52 = vpop.f32.mrb[208].mxu0  ;;  %v17527_v19 = vpop.f32.mrb[208].mxu1 }
 0xa13   :  { %v19733_v13 = vpop.eup %19732  ;;  %19742 = vrcp.f32 %v15630_v24  ;;  %v17416_v45 = vpop.f32.mrb[209].mxu0 }
 0xa14   :  { %15723 = vst [vmem:[#allocation11] sm:$0xff] %v19733_v13  ;;  %19744 = vpow2.f32 %v17125_v12  ;;  %v17126_v23 = vmul.f32 -1.442695, %v15432_v60  ;;  %v17417_v25 = vadd.f32 %v17416_v45, %v17415_v52  ;;  %v17528_v55 = vpop.f32.mrb[209].mxu1  ;;  %v17418_v32 = vpop.f32.mrb[210].mxu0 }
 0xa15   :  { %v19735_v22 = vpop.eup %19734  ;;  %v17529_v10 = vadd.f32 %v17528_v55, %v17527_v19  ;;  %v17530_v3 = vpop.f32.mrb[210].mxu1 }
 0xa16   :  { %v17419_v34 = vpop.f32.mrb[211].mxu0  ;;  %v19737_v53 = vpop.eup %19736  ;;  %15724 = vst [vmem:[#allocation11 + $0x8] sm:$0xff] %v19735_v22  ;;  %19746 = vpow2.f32 %v17126_v23  ;;  %v15276_v36 = vadd.f32 %v17417_v25, %v22868_v27 }
 0xa17   :  { %v17420_v15 = vadd.f32 %v17419_v34, %v17418_v32  ;;  %v17531_v20 = vpop.f32.mrb[211].mxu1  ;;  %v15631_v58 = vadd.f32 1.0, %v19737_v53 }
 0xa18   :  { %v17532_v2 = vadd.f32 %v17531_v20, %v17530_v3  ;;  %v19739_v62 = vpop.eup %19738  ;;  %v15437_v21 = vadd.f32 %v17529_v10, %v15276_v36 }
 0xa19   :  { %v15279_v47 = vadd.f32 %v17420_v15, %v22872_v46  ;;  %19748 = vrcp.f32 %v15631_v58  ;;  %v15632_v56 = vadd.f32 1.0, %v19739_v62 }
 0xa1a   :  { %v17127_v30 = vmul.f32 -1.442695, %v15437_v21  ;;  %v17421_v41 = vpop.f32.mrb[212].mxu0  ;;  %v17533_v14 = vpop.f32.mrb[212].mxu1 }
 0xa1b   :  { %v15440_v43 = vadd.f32 %v17532_v2, %v15279_v47  ;;  %v19741_v61 = vpop.eup %19740  ;;  %19750 = vrcp.f32 %v15632_v56  ;;  %v17422_v9 = vpop.f32.mrb[213].mxu0 }
 0xa1c   :  { %15725 = vst [vmem:[#allocation11 + $0x10] sm:$0xff] %v19741_v61  ;;  %19752 = vpow2.f32 %v17127_v30  ;;  %v17423_v57 = vadd.f32 %v17422_v9, %v17421_v41  ;;  %v17534_v7 = vpop.f32.mrb[213].mxu1  ;;  %v17424_v29 = vpop.f32.mrb[214].mxu0 }
 0xa1d   :  { %v17128_v27 = vmul.f32 -1.442695, %v15440_v43  ;;  %v19743_v6 = vpop.eup %19742  ;;  %v17535_v33 = vadd.f32 %v17534_v7, %v17533_v14  ;;  %v17536_v35 = vpop.f32.mrb[214].mxu1 }
 0xa1e   :  { %v17425_v5 = vpop.f32.mrb[215].mxu0  ;;  %v19745_v46 = vpop.eup %19744  ;;  %15726 = vst [vmem:[#allocation11 + $0x18] sm:$0xff] %v19743_v6  ;;  %v15284_v48 = vadd.f32 %v17423_v57, %v22875_v17 }
 0xa1f   :  { %19754 = vpow2.f32 %v17128_v27  ;;  %v17426_v8 = vadd.f32 %v17425_v5, %v17424_v29  ;;  %v17537_v24 = vpop.f32.mrb[215].mxu1  ;;  %v15633_v12 = vadd.f32 1.0, %v19745_v46 }
 0xa20   :  { %v17538_v60 = vadd.f32 %v17537_v24, %v17536_v35  ;;  %v19747_v52 = vpop.eup %19746  ;;  %v15445_v13 = vadd.f32 %v17535_v33, %v15284_v48 }
 0xa21   :  { %v15287_v19 = vadd.f32 %v17426_v8, %v22878_v38  ;;  %19756 = vrcp.f32 %v15633_v12  ;;  %v15634_v45 = vadd.f32 1.0, %v19747_v52 }
 0xa22   :  { %v17129_v23 = vmul.f32 -1.442695, %v15445_v13  ;;  %v17427_v55 = vpop.f32.mrb[216].mxu0  ;;  %v17539_v22 = vpop.f32.mrb[216].mxu1 }
 0xa23   :  { %v15448_v25 = vadd.f32 %v17538_v60, %v15287_v19  ;;  %v19749_v32 = vpop.eup %19748  ;;  %19758 = vrcp.f32 %v15634_v45  ;;  %v17428_v10 = vpop.f32.mrb[217].mxu0 }
 0xa24   :  { %15727 = vst [vmem:[#allocation11 + $0x20] sm:$0xff] %v19749_v32  ;;  %19760 = vpow2.f32 %v17129_v23  ;;  %v17429_v3 = vadd.f32 %v17428_v10, %v17427_v55  ;;  %v17540_v34 = vpop.f32.mrb[217].mxu1  ;;  %v17430_v53 = vpop.f32.mrb[218].mxu0 }
 0xa25   :  { %v17130_v17 = vmul.f32 -1.442695, %v15448_v25  ;;  %v19751_v36 = vpop.eup %19750  ;;  %v17541_v15 = vadd.f32 %v17540_v34, %v17539_v22  ;;  %v17542_v20 = vpop.f32.mrb[218].mxu1 }
 0xa26   :  { %v17431_v58 = vpop.f32.mrb[219].mxu0  ;;  %v19753_v38 = vpop.eup %19752  ;;  %15728 = vst [vmem:[#allocation11 + $0x28] sm:$0xff] %v19751_v36  ;;  %v15292_v2 = vadd.f32 %v17429_v3, %v22881_v50 }
 0xa27   :  { %19762 = vpow2.f32 %v17130_v17  ;;  %v17432_v62 = vadd.f32 %v17431_v58, %v17430_v53  ;;  %v17543_v21 = vpop.f32.mrb[219].mxu1  ;;  %v15635_v47 = vadd.f32 1.0, %v19753_v38 }
 0xa28   :  { %v17544_v56 = vadd.f32 %v17543_v21, %v17542_v20  ;;  %v15453_v43 = vadd.f32 %v17541_v15, %v15292_v2 }
 0xa29   :  { %v19755_v30 = vpop.eup %19754  ;;  %v15295_v41 = vadd.f32 %v17432_v62, %v22884_v39  ;;  %19764 = vrcp.f32 %v15635_v47 }
 0xa2a   :  { %v15636_v61 = vadd.f32 1.0, %v19755_v30  ;;  %v17131_v14 = vmul.f32 -1.442695, %v15453_v43  ;;  %v17433_v27 = vpop.f32.mrb[220].mxu0  ;;  %v17545_v7 = vpop.f32.mrb[220].mxu1 }
 0xa2b   :  { %v15456_v9 = vadd.f32 %v17544_v56, %v15295_v41  ;;  %v19757_v57 = vpop.eup %19756  ;;  %v17434_v29 = vpop.f32.mrb[221].mxu0 }
 0xa2c   :  { %19766 = vrcp.f32 %v15636_v61  ;;  %15729 = vst [vmem:[#allocation11 + $0x30] sm:$0xff] %v19757_v57  ;;  %v17435_v6 = vadd.f32 %v17434_v29, %v17433_v27  ;;  %v17546_v33 = vpop.f32.mrb[221].mxu1  ;;  %v17436_v35 = vpop.f32.mrb[222].mxu0 }
 0xa2d   :  { %19768 = vpow2.f32 %v17131_v14  ;;  %v17132_v50 = vmul.f32 -1.442695, %v15456_v9  ;;  %v19759_v5 = vpop.eup %19758  ;;  %v17547_v46 = vadd.f32 %v17546_v33, %v17545_v7  ;;  %v17548_v48 = vpop.f32.mrb[222].mxu1 }
 0xa2e   :  { %v17437_v8 = vpop.f32.mrb[223].mxu0  ;;  %v19761_v39 = vpop.eup %19760  ;;  %15730 = vst [vmem:[#allocation11 + $0x38] sm:$0xff] %v19759_v5  ;;  %v15300_v24 = vadd.f32 %v17435_v6, %v22887_v40 }
 0xa2f   :  { %19770 = vpow2.f32 %v17132_v50  ;;  %v17438_v12 = vadd.f32 %v17437_v8, %v17436_v35  ;;  %v17549_v60 = vpop.f32.mrb[223].mxu1  ;;  %v15637_v52 = vadd.f32 1.0, %v19761_v39 }
 0xa30   :  { %v17550_v13 = vadd.f32 %v17549_v60, %v17548_v48  ;;  %v15461_v45 = vadd.f32 %v17547_v46, %v15300_v24 }
 0xa31   :  { %v19763_v19 = vpop.eup %19762  ;;  %v15303_v23 = vadd.f32 %v17438_v12, %v22890_v28  ;;  %19772 = vrcp.f32 %v15637_v52 }
 0xa32   :  { %v15638_v25 = vadd.f32 1.0, %v19763_v19  ;;  %v17133_v55 = vmul.f32 -1.442695, %v15461_v45  ;;  %v17439_v22 = vpop.f32.mrb[224].mxu0  ;;  %v17551_v17 = vpop.f32.mrb[224].mxu1 }
 0xa33   :  { %v15464_v32 = vadd.f32 %v17550_v13, %v15303_v23  ;;  %v19765_v10 = vpop.eup %19764  ;;  %v17440_v3 = vpop.f32.mrb[225].mxu0 }
 0xa34   :  { %19774 = vrcp.f32 %v15638_v25  ;;  %15731 = vst [vmem:[#allocation11 + $0x40] sm:$0xff] %v19765_v10  ;;  %v17441_v34 = vadd.f32 %v17440_v3, %v17439_v22  ;;  %v17552_v53 = vpop.f32.mrb[225].mxu1  ;;  %v17442_v36 = vpop.f32.mrb[226].mxu0 }
 0xa35   :  { %19776 = vpow2.f32 %v17133_v55  ;;  %v17134_v40 = vmul.f32 -1.442695, %v15464_v32  ;;  %v17553_v20 = vadd.f32 %v17552_v53, %v17551_v17  ;;  %v17554_v58 = vpop.f32.mrb[226].mxu1  ;;  %v17443_v38 = vpop.f32.mrb[227].mxu0 }
 0xa36   :  { %v19767_v15 = vpop.eup %19766  ;;  %v15308_v2 = vadd.f32 %v17441_v34, %v22893_v49  ;;  %v17444_v62 = vadd.f32 %v17443_v38, %v17442_v36  ;;  %v17555_v21 = vpop.f32.mrb[227].mxu1 }
 0xa37   :  { %v19769_v28 = vpop.eup %19768  ;;  %15732 = vst [vmem:[#allocation11 + $0x48] sm:$0xff] %v19767_v15  ;;  %19778 = vpow2.f32 %v17134_v40  ;;  %v17556_v56 = vadd.f32 %v17555_v21, %v17554_v58 }
 0xa38   :  { %v15639_v47 = vadd.f32 1.0, %v19769_v28  ;;  %v15469_v43 = vadd.f32 %v17553_v20, %v15308_v2  ;;  %v15311_v41 = vadd.f32 %v17444_v62, %v22896_v54 }
 0xa39   :  { %v19771_v30 = vpop.eup %19770 }
 0xa3a   :  { %19780 = vrcp.f32 %v15639_v47  ;;  %v15640_v61 = vadd.f32 1.0, %v19771_v30  ;;  %v17135_v14 = vmul.f32 -1.442695, %v15469_v43  ;;  %v15472_v9 = vadd.f32 %v17556_v56, %v15311_v41  ;;  %v17445_v27 = vpop.f32.mrb[228].mxu0  ;;  %v17557_v7 = vpop.f32.mrb[228].mxu1 }
 0xa3b   :  { %v19773_v57 = vpop.eup %19772  ;;  %v17446_v29 = vpop.f32.mrb[229].mxu0 }
 0xa3c   :  { %19782 = vrcp.f32 %v15640_v61  ;;  %15733 = vst [vmem:[#allocation11 + $0x50] sm:$0xff] %v19773_v57  ;;  %v17136_v49 = vmul.f32 -1.442695, %v15472_v9  ;;  %v17447_v50 = vadd.f32 %v17446_v29, %v17445_v27  ;;  %v17558_v6 = vpop.f32.mrb[229].mxu1  ;;  %v17448_v33 = vpop.f32.mrb[230].mxu0 }
 0xa3d   :  { %19784 = vpow2.f32 %v17135_v14  ;;  %v17559_v5 = vadd.f32 %v17558_v6, %v17557_v7  ;;  %v17560_v46 = vpop.f32.mrb[230].mxu1  ;;  %v17449_v48 = vpop.f32.mrb[231].mxu0 }
 0xa3e   :  { %v19775_v35 = vpop.eup %19774  ;;  %19786 = vpow2.f32 %v17136_v49  ;;  %v15316_v8 = vadd.f32 %v17447_v50, %v22899_v37  ;;  %v17450_v39 = vadd.f32 %v17449_v48, %v17448_v33  ;;  %v17561_v24 = vpop.f32.mrb[231].mxu1 }
 0xa3f   :  { %v19777_v54 = vpop.eup %19776  ;;  %15734 = vst [vmem:[#allocation11 + $0x58] sm:$0xff] %v19775_v35  ;;  %v17562_v60 = vadd.f32 %v17561_v24, %v17560_v46 }
 0xa40   :  { %v15641_v12 = vadd.f32 1.0, %v19777_v54  ;;  %v15477_v13 = vadd.f32 %v17559_v5, %v15316_v8  ;;  %v15319_v19 = vadd.f32 %v17450_v39, %v22902_v4 }
 0xa41   :  { %v19779_v52 = vpop.eup %19778 }
 0xa42   :  { %19788 = vrcp.f32 %v15641_v12  ;;  %v15642_v45 = vadd.f32 1.0, %v19779_v52  ;;  %v17137_v23 = vmul.f32 -1.442695, %v15477_v13  ;;  %v15480_v25 = vadd.f32 %v17562_v60, %v15319_v19  ;;  %v17451_v55 = vpop.f32.mrb[232].mxu0  ;;  %v17563_v22 = vpop.f32.mrb[232].mxu1 }
 0xa43   :  { %v17452_v10 = vpop.f32.mrb[233].mxu0  ;;  %v17564_v3 = vpop.f32.mrb[233].mxu1 }
 0xa44   :  { %v19781_v32 = vpop.eup %19780  ;;  %19790 = vrcp.f32 %v15642_v45  ;;  %v17138_v37 = vmul.f32 -1.442695, %v15480_v25  ;;  %v17453_v17 = vadd.f32 %v17452_v10, %v17451_v55  ;;  %v17454_v40 = vpop.f32.mrb[234].mxu0  ;;  %v17565_v53 = vadd.f32 %v17564_v3, %v17563_v22 }
 0xa45   :  { %15735 = vst [vmem:[#allocation11 + $0x60] sm:$0xff] %v19781_v32  ;;  %19792 = vpow2.f32 %v17137_v23  ;;  %v17566_v36 = vpop.f32.mrb[234].mxu1  ;;  %v17455_v15 = vpop.f32.mrb[235].mxu0 }
 0xa46   :  { %v19783_v34 = vpop.eup %19782  ;;  %19794 = vpow2.f32 %v17138_v37  ;;  %v15324_v20 = vadd.f32 %v17453_v17, %v22905_v16  ;;  %v17456_v58 = vadd.f32 %v17455_v15, %v17454_v40  ;;  %v17567_v38 = vpop.f32.mrb[235].mxu1 }
 0xa47   :  { %v19785_v4 = vpop.eup %19784  ;;  %15736 = vst [vmem:[#allocation11 + $0x68] sm:$0xff] %v19783_v34  ;;  %v17568_v2 = vadd.f32 %v17567_v38, %v17566_v36 }
 0xa48   :  { %v15643_v28 = vadd.f32 1.0, %v19785_v4  ;;  %v19787_v62 = vpop.eup %19786  ;;  %v15485_v21 = vadd.f32 %v17565_v53, %v15324_v20  ;;  %v15327_v47 = vadd.f32 %v17456_v58, %v22908_v26 }
 0xa49   :  { %v15644_v56 = vadd.f32 1.0, %v19787_v62 }
 0xa4a   :  { %19796 = vrcp.f32 %v15643_v28  ;;  %v17139_v30 = vmul.f32 -1.442695, %v15485_v21  ;;  %v15488_v43 = vadd.f32 %v17568_v2, %v15327_v47  ;;  %v17457_v41 = vpop.f32.mrb[236].mxu0  ;;  %v17569_v14 = vpop.f32.mrb[236].mxu1 }
 0xa4b   :  { %19798 = vrcp.f32 %v15644_v56  ;;  %v17458_v9 = vpop.f32.mrb[237].mxu0  ;;  %v17570_v57 = vpop.f32.mrb[237].mxu1 }
 0xa4c   :  { %v19789_v61 = vpop.eup %19788  ;;  %19800 = vpow2.f32 %v17139_v30  ;;  %v17140_v16 = vmul.f32 -1.442695, %v15488_v43  ;;  %v17459_v27 = vadd.f32 %v17458_v9, %v17457_v41  ;;  %v17460_v7 = vpop.f32.mrb[238].mxu0  ;;  %v17571_v49 = vadd.f32 %v17570_v57, %v17569_v14 }
 0xa4d   :  { %15737 = vst [vmem:[#allocation11 + $0x70] sm:$0xff] %v19789_v61  ;;  %v17572_v50 = vpop.f32.mrb[238].mxu1  ;;  %v17461_v6 = vpop.f32.mrb[239].mxu0 }
 0xa4e   :  { %v19791_v29 = vpop.eup %19790  ;;  %19802 = vpow2.f32 %v17140_v16  ;;  %v15332_v33 = vadd.f32 %v17459_v27, %v22911_v31  ;;  %v17462_v35 = vadd.f32 %v17461_v6, %v17460_v7  ;;  %v17573_v5 = vpop.f32.mrb[239].mxu1 }
 0xa4f   :  { %v19793_v26 = vpop.eup %19792  ;;  %15738 = vst [vmem:[#allocation11 + $0x78] sm:$0xff] %v19791_v29  ;;  %v17574_v48 = vadd.f32 %v17573_v5, %v17572_v50 }
 0xa50   :  { %v15645_v46 = vadd.f32 1.0, %v19793_v26  ;;  %v19795_v54 = vpop.eup %19794  ;;  %v15493_v8 = vadd.f32 %v17571_v49, %v15332_v33  ;;  %v15335_v39 = vadd.f32 %v17462_v35, %v22914_v63 }
 0xa51   :  { %v15646_v24 = vadd.f32 1.0, %v19795_v54 }
 0xa52   :  { %19804 = vrcp.f32 %v15645_v46  ;;  %v17141_v12 = vmul.f32 -1.442695, %v15493_v8  ;;  %v15496_v60 = vadd.f32 %v17574_v48, %v15335_v39  ;;  %v17463_v52 = vpop.f32.mrb[240].mxu0  ;;  %v17575_v19 = vpop.f32.mrb[240].mxu1 }
 0xa53   :  { %19806 = vrcp.f32 %v15646_v24  ;;  %v17464_v45 = vpop.f32.mrb[241].mxu0  ;;  %v17576_v25 = vpop.f32.mrb[241].mxu1 }
 0xa54   :  { %v19797_v13 = vpop.eup %19796  ;;  %19808 = vpow2.f32 %v17141_v12  ;;  %v17142_v31 = vmul.f32 -1.442695, %v15496_v60  ;;  %v17465_v23 = vadd.f32 %v17464_v45, %v17463_v52  ;;  %v17466_v55 = vpop.f32.mrb[242].mxu0  ;;  %v17577_v22 = vadd.f32 %v17576_v25, %v17575_v19 }
 0xa55   :  { %15739 = vst [vmem:[#allocation11 + $0x80] sm:$0xff] %v19797_v13  ;;  %v19799_v32 = vpop.eup %19798  ;;  %v17578_v10 = vpop.f32.mrb[242].mxu1 }
 0xa56   :  { %v17467_v37 = vpop.f32.mrb[243].mxu0  ;;  %v19801_v63 = vpop.eup %19800  ;;  %15740 = vst [vmem:[#allocation11 + $0x88] sm:$0xff] %v19799_v32  ;;  %19810 = vpow2.f32 %v17142_v31  ;;  %v15340_v17 = vadd.f32 %v17465_v23, %v22917_v51 }
 0xa57   :  { %v17468_v3 = vadd.f32 %v17467_v37, %v17466_v55  ;;  %v17579_v40 = vpop.f32.mrb[243].mxu1  ;;  %v15647_v34 = vadd.f32 1.0, %v19801_v63 }
 0xa58   :  { %v17580_v53 = vadd.f32 %v17579_v40, %v17578_v10  ;;  %v19803_v36 = vpop.eup %19802  ;;  %v15501_v15 = vadd.f32 %v17577_v22, %v15340_v17 }
 0xa59   :  { %v15343_v4 = vadd.f32 %v17468_v3, %v22920_v44  ;;  %19812 = vrcp.f32 %v15647_v34  ;;  %v15648_v20 = vadd.f32 1.0, %v19803_v36 }
 0xa5a   :  { %v17143_v58 = vmul.f32 -1.442695, %v15501_v15  ;;  %v17469_v28 = vpop.f32.mrb[244].mxu0  ;;  %v17581_v62 = vpop.f32.mrb[244].mxu1 }
 0xa5b   :  { %v15504_v38 = vadd.f32 %v17580_v53, %v15343_v4  ;;  %19814 = vrcp.f32 %v15648_v20  ;;  %v17470_v21 = vpop.f32.mrb[245].mxu0  ;;  %v17582_v56 = vpop.f32.mrb[245].mxu1 }
 0xa5c   :  { %v19805_v2 = vpop.eup %19804  ;;  %19816 = vpow2.f32 %v17143_v58  ;;  %v17471_v47 = vadd.f32 %v17470_v21, %v17469_v28  ;;  %v17472_v30 = vpop.f32.mrb[246].mxu0  ;;  %v17583_v41 = vadd.f32 %v17582_v56, %v17581_v62 }
 0xa5d   :  { %15741 = vst [vmem:[#allocation11 + $0x90] sm:$0xff] %v19805_v2  ;;  %v17144_v51 = vmul.f32 -1.442695, %v15504_v38  ;;  %v19807_v43 = vpop.eup %19806  ;;  %v17584_v61 = vpop.f32.mrb[246].mxu1 }
 0xa5e   :  { %v17473_v14 = vpop.f32.mrb[247].mxu0  ;;  %v19809_v44 = vpop.eup %19808  ;;  %15742 = vst [vmem:[#allocation11 + $0x98] sm:$0xff] %v19807_v43  ;;  %v15348_v9 = vadd.f32 %v17471_v47, %v22923_v11 }
 0xa5f   :  { %19818 = vpow2.f32 %v17144_v51  ;;  %v17474_v16 = vadd.f32 %v17473_v14, %v17472_v30  ;;  %v17585_v27 = vpop.f32.mrb[247].mxu1  ;;  %v15649_v57 = vadd.f32 1.0, %v19809_v44 }
 0xa60   :  { %v17586_v7 = vadd.f32 %v17585_v27, %v17584_v61  ;;  %v19811_v29 = vpop.eup %19810  ;;  %v15509_v49 = vadd.f32 %v17583_v41, %v15348_v9 }
 0xa61   :  { %v15351_v50 = vadd.f32 %v17474_v16, %v22926_v18  ;;  %19820 = vrcp.f32 %v15649_v57  ;;  %v15650_v6 = vadd.f32 1.0, %v19811_v29 }
 0xa62   :  { %v17145_v26 = vmul.f32 -1.442695, %v15509_v49  ;;  %v17475_v35 = vpop.f32.mrb[248].mxu0  ;;  %v17587_v46 = vpop.f32.mrb[248].mxu1 }
 0xa63   :  { %v15512_v33 = vadd.f32 %v17586_v7, %v15351_v50  ;;  %v19813_v5 = vpop.eup %19812  ;;  %19822 = vrcp.f32 %v15650_v6  ;;  %v17476_v48 = vpop.f32.mrb[249].mxu0 }
 0xa64   :  { %15743 = vst [vmem:[#allocation11 + $0xa0] sm:$0xff] %v19813_v5  ;;  %19824 = vpow2.f32 %v17145_v26  ;;  %v17477_v54 = vadd.f32 %v17476_v48, %v17475_v35  ;;  %v17588_v8 = vpop.f32.mrb[249].mxu1  ;;  %v17478_v39 = vpop.f32.mrb[250].mxu0 }
 0xa65   :  { %v17146_v11 = vmul.f32 -1.442695, %v15512_v33  ;;  %v19815_v24 = vpop.eup %19814  ;;  %v17589_v12 = vadd.f32 %v17588_v8, %v17587_v46  ;;  %v17590_v60 = vpop.f32.mrb[250].mxu1 }
 0xa66   :  { %v17479_v52 = vpop.f32.mrb[251].mxu0  ;;  %v19817_v18 = vpop.eup %19816  ;;  %15744 = vst [vmem:[#allocation11 + $0xa8] sm:$0xff] %v19815_v24  ;;  %v15356_v13 = vadd.f32 %v17477_v54, %v22929_v59 }
 0xa67   :  { %19826 = vpow2.f32 %v17146_v11  ;;  %v17480_v19 = vadd.f32 %v17479_v52, %v17478_v39  ;;  %v17591_v45 = vpop.f32.mrb[251].mxu1  ;;  %v15651_v31 = vadd.f32 1.0, %v19817_v18 }
 0xa68   :  { %v17592_v23 = vadd.f32 %v17591_v45, %v17590_v60  ;;  %v15517_v55 = vadd.f32 %v17589_v12, %v15356_v13 }
 0xa69   :  { %v19819_v25 = vpop.eup %19818  ;;  %v15359_v32 = vadd.f32 %v17480_v19, %v22932_v0  ;;  %19828 = vrcp.f32 %v15651_v31 }
 0xa6a   :  { %v15652_v22 = vadd.f32 1.0, %v19819_v25  ;;  %v17147_v10 = vmul.f32 -1.442695, %v15517_v55  ;;  %v17481_v63 = vpop.f32.mrb[252].mxu0  ;;  %v17593_v3 = vpop.f32.mrb[252].mxu1 }
 0xa6b   :  { %v15520_v37 = vadd.f32 %v17592_v23, %v15359_v32  ;;  %v19821_v17 = vpop.eup %19820  ;;  %v17482_v40 = vpop.f32.mrb[253].mxu0 }
 0xa6c   :  { %19830 = vrcp.f32 %v15652_v22  ;;  %15745 = vst [vmem:[#allocation11 + $0xb0] sm:$0xff] %v19821_v17  ;;  %v17483_v34 = vadd.f32 %v17482_v40, %v17481_v63  ;;  %v17594_v53 = vpop.f32.mrb[253].mxu1  ;;  %v17484_v36 = vpop.f32.mrb[254].mxu0 }
 0xa6d   :  { %19832 = vpow2.f32 %v17147_v10  ;;  %v17148_v59 = vmul.f32 -1.442695, %v15520_v37  ;;  %v19823_v15 = vpop.eup %19822  ;;  %v17595_v4 = vadd.f32 %v17594_v53, %v17593_v3  ;;  %v17596_v20 = vpop.f32.mrb[254].mxu1 }
 0xa6e   :  { %v17485_v58 = vpop.f32.mrb[255].mxu0  ;;  %v19825_v0 = vpop.eup %19824  ;;  %15746 = vst [vmem:[#allocation11 + $0xb8] sm:$0xff] %v19823_v15  ;;  %v15364_v38 = vadd.f32 %v17483_v34, %v22935_v1 }
 0xa6f   :  { %19834 = vpow2.f32 %v17148_v59  ;;  %v17486_v28 = vadd.f32 %v17485_v58, %v17484_v36  ;;  %v17597_v2 = vpop.f32.mrb[255].mxu1  ;;  %v15653_v62 = vadd.f32 1.0, %v19825_v0 }
 0xa70   :  { %v17598_v21 = vadd.f32 %v17597_v2, %v17596_v20  ;;  %v15525_v47 = vadd.f32 %v17595_v4, %v15364_v38 }
 0xa71   :  { %v19827_v51 = vpop.eup %19826  ;;  %v15367_v56 = vadd.f32 %v17486_v28, %v22938_v42  ;;  %19836 = vrcp.f32 %v15653_v62 }
 0xa72   :  { %v15654_v30 = vadd.f32 1.0, %v19827_v51  ;;  %v17149_v43 = vmul.f32 -1.442695, %v15525_v47 }
 0xa73   :  { %v15528_v41 = vadd.f32 %v17598_v21, %v15367_v56  ;;  %v19829_v61 = vpop.eup %19828 }
 0xa74   :  { %19838 = vrcp.f32 %v15654_v30  ;;  %15747 = vst [vmem:[#allocation11 + $0xc0] sm:$0xff] %v19829_v61 }
 0xa75   :  { %19840 = vpow2.f32 %v17149_v43  ;;  %v17150_v14 = vmul.f32 -1.442695, %v15528_v41 }
 0xa76   :  { %v19831_v44 = vpop.eup %19830 }
 0xa77   :  { %v19833_v9 = vpop.eup %19832  ;;  %15748 = vst [vmem:[#allocation11 + $0xc8] sm:$0xff] %v19831_v44  ;;  %19842 = vpow2.f32 %v17150_v14 }
 0xa78   :  { %v15655_v1 = vadd.f32 1.0, %v19833_v9 }
 0xa79   :  { %v19835_v16 = vpop.eup %19834 }
 0xa7a   :  { %19844 = vrcp.f32 %v15655_v1  ;;  %v15656_v27 = vadd.f32 1.0, %v19835_v16 }
 0xa7b   :  { %v19837_v57 = vpop.eup %19836 }
 0xa7c   :  { %19846 = vrcp.f32 %v15656_v27  ;;  %15749 = vst [vmem:[#allocation11 + $0xd0] sm:$0xff] %v19837_v57 }
 0xa7e   :  { %v19839_v42 = vpop.eup %19838 }
 0xa7f   :  { %v19841_v7 = vpop.eup %19840  ;;  %15750 = vst [vmem:[#allocation11 + $0xd8] sm:$0xff] %v19839_v42 }
 0xa80   :  { %v15657_v29 = vadd.f32 1.0, %v19841_v7 }
 0xa81   :  { %v19843_v49 = vpop.eup %19842 }
 0xa82   :  { %19848 = vrcp.f32 %v15657_v29  ;;  %v15658_v50 = vadd.f32 1.0, %v19843_v49 }
 0xa84   :  { %v19845_v6 = vpop.eup %19844  ;;  %19850 = vrcp.f32 %v15658_v50 }
 0xa85   :  { %15751 = vst [vmem:[#allocation11 + $0xe0] sm:$0xff] %v19845_v6 }
 0xa86   :  { %v19847_v26 = vpop.eup %19846 }
 0xa87   :  { %15752 = vst [vmem:[#allocation11 + $0xe8] sm:$0xff] %v19847_v26 }
 0xa8c   :  { %v19849_v33 = vpop.eup %19848 }
 0xa8d   :  { %15753 = vst [vmem:[#allocation11 + $0xf0] sm:$0xff] %v19849_v33 }
 0xa8e   :  { %v19851_v35 = vpop.eup %19850 }
 0xa8f   :  { %15754 = vst [vmem:[#allocation11 + $0xf8] sm:$0xff] %v19851_v35 }
 0xa90   :  { %19974 = shalt.err (!%p19971_p2)
}
 0xa91   :  { %s19975_s7 = scalar_lea.hbm %s22989_s5, 4096 }
 0xa92   :  { %p19976_p3 = scmp.ne.s32.totalorder %s22989_s5, %s19975_s7  ;;  %p19979_p4 = scmp.lt.u32.totalorder %s19975_s7, %s22989_s5 }
 0xa94   :  { %p19981_p5 = pnand %p19979_p4, %p19976_p3 }
 0xa96   :  { %19984 = shalt.err (!%p19981_p5)
}
 0xa97   :  { %s20004_s13 = smov 128   ;;  %s20005_s14 = smov 8  }
 0xa98   :  { %15766 = dma.vmem_to_hbm [thread:$0]  %s15761_s29, 4096, %s22989_s5, [#allocation4], %s20004_s13, %s20004_s13, %s20005_s14  }
 0xa99   :  { %19991 = dma.done.wait [#allocation4], 4096  }
 0xa9a   :  { %19992 = vsyncadd [#allocation4], 4294963200 }
 0xa9b   :  { %15770 = vsyncpa [#allocation3], 1 }
 0xa9c   :  { %15771 = vsyncpa [#allocation6], 1 }
 0xa9d   :  { %15772 = vsyncpa [#allocation9], 1 }
 0xa9e   :  { %15773 = vsyncpa [#allocation4], 1 }

</bundles_post_ra>
